<compile_context>
chip_gen: v7x
topology: tpu7x:2x2x1
jax: 0.10.0
libtpu: 0.0.40
codegen_flags: <defaults>
</compile_context>

<pallas_src>
import numpy as np
import jax
import jax.numpy as jnp
from jax.experimental import pallas as pl
from jax.experimental.pallas import tpu as pltpu


# ---------------------------------------------------------------- in-kernel helpers
def _dw_same(x, w, dilation):
    """Depthwise 'same' conv (stride 1) of x (C, L) with per-channel taps w (C, K).

    Shifted windows use pltpu.roll + iota edge masks so L stays an exact
    128-lane multiple (no padded loads / lane-boundary-crossing slices).
    """
    C, L = x.shape
    K = w.shape[1]
    total = dilation * (K - 1)          # PyTorch padding='same' (extra pad right)
    left = total // 2
    lane = jax.lax.broadcasted_iota(jnp.int32, (C, L), 1)
    acc = None
    for t in range(K):                  # K small & static -> unrolled taps
        o = t * dilation - left
        if o == 0:
            tap = x
        else:
            tap = pltpu.roll(x, (-o) % L, axis=1)
            valid = jnp.logical_and(lane + o >= 0, lane + o < L)
            tap = jnp.where(valid, tap, 0.0)
        term = w[:, t:t + 1] * tap
        acc = term if acc is None else acc + term   # tap 0 initializes acc
    return acc


def _maxpool_same(x, pool_ks):
    """MaxPool1d(pool_ks, stride=1, padding=pool_ks//2) on x (C, L) (odd pool_ks)."""
    C, L = x.shape
    p = pool_ks // 2
    lane = jax.lax.broadcasted_iota(jnp.int32, (C, L), 1)
    out = None
    for t in range(pool_ks):
        o = t - p
        if o == 0:
            tap = x
        else:
            tap = pltpu.roll(x, (-o) % L, axis=1)
            valid = jnp.logical_and(lane + o >= 0, lane + o < L)
            tap = jnp.where(valid, tap, -jnp.inf)
        out = tap if out is None else jnp.maximum(out, tap)
    return out


# ---------------------------------------------------------------- fused LKI block
def _make_lki_kernel(ks1, pool_ks, with_shortcut):
    nb = len(ks1)
    dils = tuple((k + 1) // 2 for k in ks1)

    def kernel(*refs):
        i = 0
        x_ref = refs[i]; i += 1                       # (Cin, L)
        res_ref = None
        if with_shortcut:
            res_ref = refs[i]; i += 1                 # (Cres, L)
        wb_ref = refs[i]; i += 1                      # (nf, Cin)
        branch = []
        for _ in range(nb):                           # (nf,k1), (nf,ks2), (Cout,nf)
            branch.append((refs[i], refs[i + 1], refs[i + 2])); i += 3
        wmcp_ref = refs[i]; i += 1                    # (Cout, Cin) row-padded
        wsc_ref = None
        if with_shortcut:
            wsc_ref = refs[i]; i += 1                 # (Cout, Cres)
        o_ref = refs[i]; i += 1                       # (Cout, L)
        s_ref = refs[i] if with_shortcut else None    # (Cout, L)

        x = x_ref[...]
        # bottleneck 1x1 conv (MXU), shared by the LKC branches
        b = jnp.dot(wb_ref[...], x, preferred_element_type=jnp.float32)

        # Branch pointwise weights are zero-padded (in the wrapper) to the full
        # concatenated output height, so the branch matmuls accumulate directly
        # into the dense output tile -> no in-kernel concat, one dense store.
        out = None
        for j in range(nb):
            wdw_ref, wdd_ref, wpw_ref = branch[j]
            h = _dw_same(b, wdw_ref[...], 1)
            h = _dw_same(h, wdd_ref[...], dils[j])
            part = jnp.dot(wpw_ref[...], h, preferred_element_type=jnp.float32)
            out = part if out is None else out + part
        mp = _maxpool_same(x, pool_ks)
        out = out + jnp.dot(wmcp_ref[...], mp, preferred_element_type=jnp.float32)
        o_ref[...] = out.astype(o_ref.dtype)

        if with_shortcut:
            # fused shortcut 1x1 conv; its BatchNorm is applied by the caller
            s_ref[...] = jnp.dot(wsc_ref[...], res_ref[...],
                                 preferred_element_type=jnp.float32
                                 ).astype(s_ref.dtype)

    return kernel


def lki_block(x, p, ks1, pool_ks, res=None, w_sc=None):
    """One fused LKI block: x (N,Cin,L) -> (N, 4*nf, L).
    If res/w_sc given, also returns the shortcut conv w_sc @ res."""
    N, Cin, L = x.shape
    nf = p['bottleneck'].shape[0]
    nb = len(ks1)
    Cout = (nb + 1) * nf
    with_shortcut = res is not None

    # zero-pad branch pointwise / mcp weights to the concat height (host/XLA side)
    wpw_pad = [jnp.zeros((Cout, nf), x.dtype)
               .at[j * nf:(j + 1) * nf, :].set(p['convs'][j]['pw'])
               for j in range(nb)]
    wmcp_pad = jnp.zeros((Cout, Cin), x.dtype).at[nb * nf:, :].set(p['mcp'])

    def act_spec(C):   # per-batch block, batch dim squeezed out of the kernel ref
        return pl.BlockSpec((None, C, L), lambda n: (n, 0, 0))

    def w_spec(shape):
        return pl.BlockSpec(shape, lambda n: (0, 0))

    inputs, in_specs = [x], [act_spec(Cin)]
    if with_shortcut:
        inputs.append(res); in_specs.append(act_spec(res.shape[1]))
    inputs.append(p['bottleneck']); in_specs.append(w_spec(p['bottleneck'].shape))
    for j in range(nb):
        for w in (p['convs'][j]['dw'], p['convs'][j]['dd'], wpw_pad[j]):
            inputs.append(w); in_specs.append(w_spec(w.shape))
    inputs.append(wmcp_pad); in_specs.append(w_spec(wmcp_pad.shape))
    if with_shortcut:
        inputs.append(w_sc); in_specs.append(w_spec(w_sc.shape))

    if with_shortcut:
        out_shapes = (jax.ShapeDtypeStruct((N, Cout, L), x.dtype),
                      jax.ShapeDtypeStruct((N, Cout, L), x.dtype))
        out_specs = [act_spec(Cout), act_spec(Cout)]
    else:
        out_shapes = jax.ShapeDtypeStruct((N, Cout, L), x.dtype)
        out_specs = act_spec(Cout)

    return pl.pallas_call(
        _make_lki_kernel(ks1, pool_ks, with_shortcut),
        out_shape=out_shapes,
        grid_spec=pltpu.PrefetchScalarGridSpec(
            num_scalar_prefetch=0,
            grid=(N,),                       # one batch per grid step / TensorCore
            in_specs=in_specs,
            out_specs=out_specs),
        compiler_params=pltpu.CompilerParams(dimension_semantics=("parallel",)),
    )(*inputs)


# ---------------------------------------------------------------- fused BN-affine + add + relu
def _bn_add_relu_kernel(x_ref, s_ref, scale_ref, bias_ref, o_ref):
    o_ref[...] = jnp.maximum(
        x_ref[...] + s_ref[...] * scale_ref[...] + bias_ref[...], 0.0)


def bn_add_relu(x, s, scale, bias):
    """relu(x + scale*s + bias) with per-channel scale/bias (C,)."""
    N, C, L = x.shape
    return pl.pallas_call(
        _bn_add_relu_kernel,
        out_shape=jax.ShapeDtypeStruct((N, C, L), x.dtype),
        grid_spec=pltpu.PrefetchScalarGridSpec(
            num_scalar_prefetch=0,
            grid=(N,),
            in_specs=[pl.BlockSpec((None, C, L), lambda n: (n, 0, 0)),
                      pl.BlockSpec((None, C, L), lambda n: (n, 0, 0)),
                      pl.BlockSpec((C, 1), lambda n: (0, 0)),
                      pl.BlockSpec((C, 1), lambda n: (0, 0))],
            out_specs=pl.BlockSpec((None, C, L), lambda n: (n, 0, 0))),
        compiler_params=pltpu.CompilerParams(dimension_semantics=("parallel",)),
    )(x, s, scale.reshape(C, 1), bias.reshape(C, 1))


# ---------------------------------------------------------------- parameters
def _uniform(key, shape, fan_in):
    bound = 1.0 / np.sqrt(fan_in)
    return jax.random.uniform(key, shape, minval=-bound, maxval=bound,
                              dtype=jnp.float32)


def init_lkc(key, dim, k1, k2):
    ks = jax.random.split(key, 3)
    return {'dw': _uniform(ks[0], (dim, k1), k1),      # groups=dim -> fan_in = k
            'dd': _uniform(ks[1], (dim, k2), k2),
            'pw': _uniform(ks[2], (dim, dim), dim)}


def init_lki(key, ni, nf, ks1, ks2):
    ks = jax.random.split(key, 2 + len(ks1))
    return {'bottleneck': _uniform(ks[0], (nf, ni), ni),
            'mcp': _uniform(ks[1], (nf, ni), ni),
            'convs': [init_lkc(ks[2 + j], nf, k, ks2) for j, k in enumerate(ks1)]}


def init_shortcut(key, ni, nf):
    return {'w': _uniform(key, (nf, ni), ni),
            'gamma': jnp.ones((nf,), jnp.float32),
            'beta': jnp.zeros((nf,), jnp.float32)}


def init_lki_s(key, ni, nf, ks1, ks2):
    assert len(ks1) == 3, "LKI concat width requires len(ks1)+1 == 4 branches"
    hidden = [nf * 2 ** i for i in range(4)]
    out_ch = [h * 4 for h in hidden]
    in_ch = [ni] + out_ch[:-1]
    keys = jax.random.split(key, 8)
    lki, shortcuts = [], []
    for i in range(4):
        if (i + 1) % 2 == 0:
            shortcuts.append(init_shortcut(keys[4 + i // 2],
                                           in_ch[i - 1], out_ch[i]))
        lki.append(init_lki(keys[i], in_ch[i], hidden[i], ks1, ks2))
    return {'lki': lki, 'shortcuts': shortcuts}


# ---------------------------------------------------------------- forward
def lki_s_forward(params, x, ks1, pool_ks=3, eps=1e-5):
    res = x
    for i in range(4):
        p = params['lki'][i]
        if (i + 1) % 2 == 0:
            sp = params['shortcuts'][i // 2]
            x, s = lki_block(x, p, ks1, pool_ks, res=res, w_sc=sp['w'])
            # PyTorch BatchNorm1d in default (training) mode uses batch statistics.
            # TODO(synk): cross-(N,L) mean/var reduction kept in plain JAX (tiny);
            # running-stats tracking is not modeled.
            mean = jnp.mean(s, axis=(0, 2))
            var = jnp.mean(jnp.square(s - mean.reshape(1, -1, 1)), axis=(0, 2))
            scale = sp['gamma'] * jax.lax.rsqrt(var + eps)
            bias = sp['beta'] - mean * scale
            x = bn_add_relu(x, s, scale, bias)
            res = x
        else:
            x = lki_block(x, p, ks1, pool_ks)
    return x


# ---------------------------------------------------------------- main
if __name__ == "__main__":
    ni, nf = 4, 4
    ks1 = (9, 5, 3)
    ks2 = 3
    N, L = 2, 128

    kparam, kx = jax.random.split(jax.random.PRNGKey(0))
    params = init_lki_s(kparam, ni, nf, ks1, ks2)
    x = jax.random.normal(kx, (N, ni, L), dtype=jnp.float32)

    fwd = jax.jit(lambda p, xx: lki_s_forward(p, xx, ks1, pool_ks=3))
    y = jax.block_until_ready(fwd(params, x))

    assert y.shape == (N, nf * 8 * 4, L), y.shape      # (2, 128, 128)
    assert bool(jnp.all(jnp.isfinite(y)))
    print("KERNEL_OK")
</pallas_src>

<mosaic_0001>
module attributes {stable_mosaic.version = 11 : i64} {
  func.func @_bn_add_relu_kernel(%arg0: i32, %arg1: memref<1x32x128xf32, #tpu.memory_space<vmem>>, %arg2: memref<1x32x128xf32, #tpu.memory_space<vmem>>, %arg3: memref<32x1xf32, #tpu.memory_space<vmem>>, %arg4: memref<32x1xf32, #tpu.memory_space<vmem>>, %arg5: memref<1x32x128xf32, #tpu.memory_space<vmem>>) attributes {dimension_semantics = [#tpu.dimension_semantics<parallel>], iteration_bounds = array<i64: 2>, scalar_prefetch = 0 : i64, scratch_operands = 0 : i64, tpu.core_type = #tpu.core_type<tc>, window_params = [{transform_indices = @transform_0, window_bounds = array<i64: 1, 32, 128>}, {transform_indices = @transform_1, window_bounds = array<i64: 1, 32, 128>}, {pipeline_mode = #tpu.pipeline_mode<synchronous>, transform_indices = @transform_2, window_bounds = array<i64: 32, 1>}, {pipeline_mode = #tpu.pipeline_mode<synchronous>, transform_indices = @transform_3, window_bounds = array<i64: 32, 1>}, {transform_indices = @transform_4, window_bounds = array<i64: 1, 32, 128>}]} {
    %c0 = arith.constant 0 : index
    %c0_0 = arith.constant 0 : index
    %c0_1 = arith.constant 0 : index
    %0 = vector.load %arg1[%c0, %c0_0, %c0_1] : memref<1x32x128xf32, #tpu.memory_space<vmem>>, vector<1x32x128xf32>
    %1 = vector.shape_cast %0 : vector<1x32x128xf32> to vector<32x128xf32>
    %c0_2 = arith.constant 0 : index
    %c0_3 = arith.constant 0 : index
    %c0_4 = arith.constant 0 : index
    %2 = vector.load %arg2[%c0_2, %c0_3, %c0_4] : memref<1x32x128xf32, #tpu.memory_space<vmem>>, vector<1x32x128xf32>
    %3 = vector.shape_cast %2 : vector<1x32x128xf32> to vector<32x128xf32>
    %c0_5 = arith.constant 0 : index
    %c0_6 = arith.constant 0 : index
    %4 = vector.load %arg3[%c0_5, %c0_6] : memref<32x1xf32, #tpu.memory_space<vmem>>, vector<32x1xf32>
    %5 = vector.broadcast %4 : vector<32x1xf32> to vector<32x128xf32>
    %6 = arith.mulf %3, %5 : vector<32x128xf32>
    %7 = arith.addf %1, %6 : vector<32x128xf32>
    %c0_7 = arith.constant 0 : index
    %c0_8 = arith.constant 0 : index
    %8 = vector.load %arg4[%c0_7, %c0_8] : memref<32x1xf32, #tpu.memory_space<vmem>>, vector<32x1xf32>
    %9 = vector.broadcast %8 : vector<32x1xf32> to vector<32x128xf32>
    %10 = arith.addf %7, %9 : vector<32x128xf32>
    %cst = arith.constant 0.000000e+00 : f32
    %11 = vector.broadcast %cst : f32 to vector<32x128xf32>
    %12 = arith.maximumf %10, %11 : vector<32x128xf32>
    %c0_9 = arith.constant 0 : index
    %c0_10 = arith.constant 0 : index
    %c0_11 = arith.constant 0 : index
    %13 = vector.load %arg5[%c0_9, %c0_10, %c0_11] : memref<1x32x128xf32, #tpu.memory_space<vmem>>, vector<1x32x128xf32>
    %14 = vector.shape_cast %13 : vector<1x32x128xf32> to vector<32x128xf32>
    %15 = vector.shape_cast %12 : vector<32x128xf32> to vector<1x32x128xf32>
    tpu.vector_store %arg5[%c0_9, %c0_10, %c0_11], %15 {strides = array<i32>} : memref<1x32x128xf32, #tpu.memory_space<vmem>>, vector<1x32x128xf32>,
    return
  }
  func.func @transform_0(%arg0: i32) -> (i32, i32, i32) {
    %c0_i32 = arith.constant 0 : i32
    %c0_i32_0 = arith.constant 0 : i32
    %c0_i32_1 = arith.constant 0 : i32
    return %arg0, %c0_i32, %c0_i32_0 : i32, i32, i32
  }
  func.func @transform_1(%arg0: i32) -> (i32, i32, i32) {
    %c0_i32 = arith.constant 0 : i32
    %c0_i32_0 = arith.constant 0 : i32
    %c0_i32_1 = arith.constant 0 : i32
    return %arg0, %c0_i32, %c0_i32_0 : i32, i32, i32
  }
  func.func @transform_2(%arg0: i32) -> (i32, i32) {
    %c0_i32 = arith.constant 0 : i32
    %c0_i32_0 = arith.constant 0 : i32
    %c0_i32_1 = arith.constant 0 : i32
    return %c0_i32, %c0_i32_0 : i32, i32
  }
  func.func @transform_3(%arg0: i32) -> (i32, i32) {
    %c0_i32 = arith.constant 0 : i32
    %c0_i32_0 = arith.constant 0 : i32
    %c0_i32_1 = arith.constant 0 : i32
    return %c0_i32, %c0_i32_0 : i32, i32
  }
  func.func @transform_4(%arg0: i32) -> (i32, i32, i32) {
    %c0_i32 = arith.constant 0 : i32
    %c0_i32_0 = arith.constant 0 : i32
    %c0_i32_1 = arith.constant 0 : i32
    return %arg0, %c0_i32, %c0_i32_0 : i32, i32, i32
  }
}

module attributes {stable_mosaic.version = 11 : i64} {
  func.func @kernel(%arg0: i32, %arg1: memref<1x4x128xf32, #tpu.memory_space<vmem>>, %arg2: memref<4x4xf32, #tpu.memory_space<vmem>>, %arg3: memref<4x9xf32, #tpu.memory_space<vmem>>, %arg4: memref<4x3xf32, #tpu.memory_space<vmem>>, %arg5: memref<16x4xf32, #tpu.memory_space<vmem>>, %arg6: memref<4x5xf32, #tpu.memory_space<vmem>>, %arg7: memref<4x3xf32, #tpu.memory_space<vmem>>, %arg8: memref<16x4xf32, #tpu.memory_space<vmem>>, %arg9: memref<4x3xf32, #tpu.memory_space<vmem>>, %arg10: memref<4x3xf32, #tpu.memory_space<vmem>>, %arg11: memref<16x4xf32, #tpu.memory_space<vmem>>, %arg12: memref<16x4xf32, #tpu.memory_space<vmem>>, %arg13: memref<1x16x128xf32, #tpu.memory_space<vmem>>) attributes {dimension_semantics = [#tpu.dimension_semantics<parallel>], iteration_bounds = array<i64: 2>, scalar_prefetch = 0 : i64, scratch_operands = 0 : i64, tpu.core_type = #tpu.core_type<tc>, window_params = [{transform_indices = @transform_0, window_bounds = array<i64: 1, 4, 128>}, {pipeline_mode = #tpu.pipeline_mode<synchronous>, transform_indices = @transform_1, window_bounds = array<i64: 4, 4>}, {pipeline_mode = #tpu.pipeline_mode<synchronous>, transform_indices = @transform_2, window_bounds = array<i64: 4, 9>}, {pipeline_mode = #tpu.pipeline_mode<synchronous>, transform_indices = @transform_3, window_bounds = array<i64: 4, 3>}, {pipeline_mode = #tpu.pipeline_mode<synchronous>, transform_indices = @transform_4, window_bounds = array<i64: 16, 4>}, {pipeline_mode = #tpu.pipeline_mode<synchronous>, transform_indices = @transform_5, window_bounds = array<i64: 4, 5>}, {pipeline_mode = #tpu.pipeline_mode<synchronous>, transform_indices = @transform_6, window_bounds = array<i64: 4, 3>}, {pipeline_mode = #tpu.pipeline_mode<synchronous>, transform_indices = @transform_7, window_bounds = array<i64: 16, 4>}, {pipeline_mode = #tpu.pipeline_mode<synchronous>, transform_indices = @transform_8, window_bounds = array<i64: 4, 3>}, {pipeline_mode = #tpu.pipeline_mode<synchronous>, transform_indices = @transform_9, window_bounds = array<i64: 4, 3>}, {pipeline_mode = #tpu.pipeline_mode<synchronous>, transform_indices = @transform_10, window_bounds = array<i64: 16, 4>}, {pipeline_mode = #tpu.pipeline_mode<synchronous>, transform_indices = @transform_11, window_bounds = array<i64: 16, 4>}, {transform_indices = @transform_12, window_bounds = array<i64: 1, 16, 128>}]} {
    %c0 = arith.constant 0 : index
    %c0_0 = arith.constant 0 : index
    %c0_1 = arith.constant 0 : index
    %0 = vector.load %arg1[%c0, %c0_0, %c0_1] : memref<1x4x128xf32, #tpu.memory_space<vmem>>, vector<1x4x128xf32>
    %1 = vector.shape_cast %0 : vector<1x4x128xf32> to vector<4x128xf32>
    %c0_2 = arith.constant 0 : index
    %c0_3 = arith.constant 0 : index
    %2 = vector.load %arg2[%c0_2, %c0_3] : memref<4x4xf32, #tpu.memory_space<vmem>>, vector<4x4xf32>
    %cst = arith.constant dense<0.000000e+00> : vector<4x128xf32>
    %3 = tpu.matmul %2, %1, %cst {dimension_numbers = #tpu.dot_dimension_numbers<[1], [0], [0], [1], [0, 0, 1, 1], [], []>} : vector<4x4xf32>, vector<4x128xf32>, vector<4x128xf32> -> vector<4x128xf32>
    %c0_4 = arith.constant 0 : index
    %c0_5 = arith.constant 0 : index
    %4 = vector.load %arg3[%c0_4, %c0_5] : memref<4x9xf32, #tpu.memory_space<vmem>>, vector<4x9xf32>
    %5 = tpu.iota {dimensions = array<i32: 1>} : vector<4x128xi32>
    %c4_i32 = arith.constant 4 : i32
    %6 = tpu.dynamic_rotate %3 by %c4_i32 dim 1 : vector<4x128xf32>, i32 -> vector<4x128xf32>
    %c-4_i32 = arith.constant -4 : i32
    %7 = vector.broadcast %c-4_i32 : i32 to vector<4x128xi32>
    %8 = arith.addi %5, %7 : vector<4x128xi32>
    %c0_i32 = arith.constant 0 : i32
    %9 = vector.broadcast %c0_i32 : i32 to vector<4x128xi32>
    %10 = arith.cmpi sge, %8, %9 : vector<4x128xi32>
    %c-4_i32_6 = arith.constant -4 : i32
    %11 = vector.broadcast %c-4_i32_6 : i32 to vector<4x128xi32>
    %12 = arith.addi %5, %11 : vector<4x128xi32>
    %c128_i32 = arith.constant 128 : i32
    %13 = vector.broadcast %c128_i32 : i32 to vector<4x128xi32>
    %14 = arith.cmpi slt, %12, %13 : vector<4x128xi32>
    %15 = arith.andi %10, %14 : vector<4x128xi1>
    %cst_7 = arith.constant 0.000000e+00 : f32
    %16 = vector.broadcast %cst_7 : f32 to vector<4x128xf32>
    %17 = arith.select %15, %6, %16 : vector<4x128xi1>, vector<4x128xf32>
    %18 = vector.extract_strided_slice %4 {offsets = [0, 0], sizes = [4, 1], strides = [1, 1]} : vector<4x9xf32> to vector<4x1xf32>
    %19 = vector.broadcast %18 : vector<4x1xf32> to vector<4x128xf32>
    %20 = arith.mulf %19, %17 : vector<4x128xf32>
    %c3_i32 = arith.constant 3 : i32
    %21 = tpu.dynamic_rotate %3 by %c3_i32 dim 1 : vector<4x128xf32>, i32 -> vector<4x128xf32>
    %c-3_i32 = arith.constant -3 : i32
    %22 = vector.broadcast %c-3_i32 : i32 to vector<4x128xi32>
    %23 = arith.addi %5, %22 : vector<4x128xi32>
    %c0_i32_8 = arith.constant 0 : i32
    %24 = vector.broadcast %c0_i32_8 : i32 to vector<4x128xi32>
    %25 = arith.cmpi sge, %23, %24 : vector<4x128xi32>
    %c-3_i32_9 = arith.constant -3 : i32
    %26 = vector.broadcast %c-3_i32_9 : i32 to vector<4x128xi32>
    %27 = arith.addi %5, %26 : vector<4x128xi32>
    %c128_i32_10 = arith.constant 128 : i32
    %28 = vector.broadcast %c128_i32_10 : i32 to vector<4x128xi32>
    %29 = arith.cmpi slt, %27, %28 : vector<4x128xi32>
    %30 = arith.andi %25, %29 : vector<4x128xi1>
    %cst_11 = arith.constant 0.000000e+00 : f32
    %31 = vector.broadcast %cst_11 : f32 to vector<4x128xf32>
    %32 = arith.select %30, %21, %31 : vector<4x128xi1>, vector<4x128xf32>
    %33 = vector.extract_strided_slice %4 {offsets = [0, 1], sizes = [4, 1], strides = [1, 1]} : vector<4x9xf32> to vector<4x1xf32>
    %34 = vector.broadcast %33 : vector<4x1xf32> to vector<4x128xf32>
    %35 = arith.mulf %34, %32 : vector<4x128xf32>
    %36 = arith.addf %20, %35 : vector<4x128xf32>
    %c2_i32 = arith.constant 2 : i32
    %37 = tpu.dynamic_rotate %3 by %c2_i32 dim 1 : vector<4x128xf32>, i32 -> vector<4x128xf32>
    %c-2_i32 = arith.constant -2 : i32
    %38 = vector.broadcast %c-2_i32 : i32 to vector<4x128xi32>
    %39 = arith.addi %5, %38 : vector<4x128xi32>
    %c0_i32_12 = arith.constant 0 : i32
    %40 = vector.broadcast %c0_i32_12 : i32 to vector<4x128xi32>
    %41 = arith.cmpi sge, %39, %40 : vector<4x128xi32>
    %c-2_i32_13 = arith.constant -2 : i32
    %42 = vector.broadcast %c-2_i32_13 : i32 to vector<4x128xi32>
    %43 = arith.addi %5, %42 : vector<4x128xi32>
    %c128_i32_14 = arith.constant 128 : i32
    %44 = vector.broadcast %c128_i32_14 : i32 to vector<4x128xi32>
    %45 = arith.cmpi slt, %43, %44 : vector<4x128xi32>
    %46 = arith.andi %41, %45 : vector<4x128xi1>
    %cst_15 = arith.constant 0.000000e+00 : f32
    %47 = vector.broadcast %cst_15 : f32 to vector<4x128xf32>
    %48 = arith.select %46, %37, %47 : vector<4x128xi1>, vector<4x128xf32>
    %49 = vector.extract_strided_slice %4 {offsets = [0, 2], sizes = [4, 1], strides = [1, 1]} : vector<4x9xf32> to vector<4x1xf32>
    %50 = vector.broadcast %49 : vector<4x1xf32> to vector<4x128xf32>
    %51 = arith.mulf %50, %48 : vector<4x128xf32>
    %52 = arith.addf %36, %51 : vector<4x128xf32>
    %c1_i32 = arith.constant 1 : i32
    %53 = tpu.dynamic_rotate %3 by %c1_i32 dim 1 : vector<4x128xf32>, i32 -> vector<4x128xf32>
    %c-1_i32 = arith.constant -1 : i32
    %54 = vector.broadcast %c-1_i32 : i32 to vector<4x128xi32>
    %55 = arith.addi %5, %54 : vector<4x128xi32>
    %c0_i32_16 = arith.constant 0 : i32
    %56 = vector.broadcast %c0_i32_16 : i32 to vector<4x128xi32>
    %57 = arith.cmpi sge, %55, %56 : vector<4x128xi32>
    %c-1_i32_17 = arith.constant -1 : i32
    %58 = vector.broadcast %c-1_i32_17 : i32 to vector<4x128xi32>
    %59 = arith.addi %5, %58 : vector<4x128xi32>
    %c128_i32_18 = arith.constant 128 : i32
    %60 = vector.broadcast %c128_i32_18 : i32 to vector<4x128xi32>
    %61 = arith.cmpi slt, %59, %60 : vector<4x128xi32>
    %62 = arith.andi %57, %61 : vector<4x128xi1>
    %cst_19 = arith.constant 0.000000e+00 : f32
    %63 = vector.broadcast %cst_19 : f32 to vector<4x128xf32>
    %64 = arith.select %62, %53, %63 : vector<4x128xi1>, vector<4x128xf32>
    %65 = vector.extract_strided_slice %4 {offsets = [0, 3], sizes = [4, 1], strides = [1, 1]} : vector<4x9xf32> to vector<4x1xf32>
    %66 = vector.broadcast %65 : vector<4x1xf32> to vector<4x128xf32>
    %67 = arith.mulf %66, %64 : vector<4x128xf32>
    %68 = arith.addf %52, %67 : vector<4x128xf32>
    %69 = vector.extract_strided_slice %4 {offsets = [0, 4], sizes = [4, 1], strides = [1, 1]} : vector<4x9xf32> to vector<4x1xf32>
    %70 = vector.broadcast %69 : vector<4x1xf32> to vector<4x128xf32>
    %71 = arith.mulf %70, %3 : vector<4x128xf32>
    %72 = arith.addf %68, %71 : vector<4x128xf32>
    %c127_i32 = arith.constant 127 : i32
    %73 = tpu.dynamic_rotate %3 by %c127_i32 dim 1 : vector<4x128xf32>, i32 -> vector<4x128xf32>
    %c1_i32_20 = arith.constant 1 : i32
    %74 = vector.broadcast %c1_i32_20 : i32 to vector<4x128xi32>
    %75 = arith.addi %5, %74 : vector<4x128xi32>
    %c0_i32_21 = arith.constant 0 : i32
    %76 = vector.broadcast %c0_i32_21 : i32 to vector<4x128xi32>
    %77 = arith.cmpi sge, %75, %76 : vector<4x128xi32>
    %c1_i32_22 = arith.constant 1 : i32
    %78 = vector.broadcast %c1_i32_22 : i32 to vector<4x128xi32>
    %79 = arith.addi %5, %78 : vector<4x128xi32>
    %c128_i32_23 = arith.constant 128 : i32
    %80 = vector.broadcast %c128_i32_23 : i32 to vector<4x128xi32>
    %81 = arith.cmpi slt, %79, %80 : vector<4x128xi32>
    %82 = arith.andi %77, %81 : vector<4x128xi1>
    %cst_24 = arith.constant 0.000000e+00 : f32
    %83 = vector.broadcast %cst_24 : f32 to vector<4x128xf32>
    %84 = arith.select %82, %73, %83 : vector<4x128xi1>, vector<4x128xf32>
    %85 = vector.extract_strided_slice %4 {offsets = [0, 5], sizes = [4, 1], strides = [1, 1]} : vector<4x9xf32> to vector<4x1xf32>
    %86 = vector.broadcast %85 : vector<4x1xf32> to vector<4x128xf32>
    %87 = arith.mulf %86, %84 : vector<4x128xf32>
    %88 = arith.addf %72, %87 : vector<4x128xf32>
    %c126_i32 = arith.constant 126 : i32
    %89 = tpu.dynamic_rotate %3 by %c126_i32 dim 1 : vector<4x128xf32>, i32 -> vector<4x128xf32>
    %c2_i32_25 = arith.constant 2 : i32
    %90 = vector.broadcast %c2_i32_25 : i32 to vector<4x128xi32>
    %91 = arith.addi %5, %90 : vector<4x128xi32>
    %c0_i32_26 = arith.constant 0 : i32
    %92 = vector.broadcast %c0_i32_26 : i32 to vector<4x128xi32>
    %93 = arith.cmpi sge, %91, %92 : vector<4x128xi32>
    %c2_i32_27 = arith.constant 2 : i32
    %94 = vector.broadcast %c2_i32_27 : i32 to vector<4x128xi32>
    %95 = arith.addi %5, %94 : vector<4x128xi32>
    %c128_i32_28 = arith.constant 128 : i32
    %96 = vector.broadcast %c128_i32_28 : i32 to vector<4x128xi32>
    %97 = arith.cmpi slt, %95, %96 : vector<4x128xi32>
    %98 = arith.andi %93, %97 : vector<4x128xi1>
    %cst_29 = arith.constant 0.000000e+00 : f32
    %99 = vector.broadcast %cst_29 : f32 to vector<4x128xf32>
    %100 = arith.select %98, %89, %99 : vector<4x128xi1>, vector<4x128xf32>
    %101 = vector.extract_strided_slice %4 {offsets = [0, 6], sizes = [4, 1], strides = [1, 1]} : vector<4x9xf32> to vector<4x1xf32>
    %102 = vector.broadcast %101 : vector<4x1xf32> to vector<4x128xf32>
    %103 = arith.mulf %102, %100 : vector<4x128xf32>
    %104 = arith.addf %88, %103 : vector<4x128xf32>
    %c125_i32 = arith.constant 125 : i32
    %105 = tpu.dynamic_rotate %3 by %c125_i32 dim 1 : vector<4x128xf32>, i32 -> vector<4x128xf32>
    %c3_i32_30 = arith.constant 3 : i32
    %106 = vector.broadcast %c3_i32_30 : i32 to vector<4x128xi32>
    %107 = arith.addi %5, %106 : vector<4x128xi32>
    %c0_i32_31 = arith.constant 0 : i32
    %108 = vector.broadcast %c0_i32_31 : i32 to vector<4x128xi32>
    %109 = arith.cmpi sge, %107, %108 : vector<4x128xi32>
    %c3_i32_32 = arith.constant 3 : i32
    %110 = vector.broadcast %c3_i32_32 : i32 to vector<4x128xi32>
    %111 = arith.addi %5, %110 : vector<4x128xi32>
    %c128_i32_33 = arith.constant 128 : i32
    %112 = vector.broadcast %c128_i32_33 : i32 to vector<4x128xi32>
    %113 = arith.cmpi slt, %111, %112 : vector<4x128xi32>
    %114 = arith.andi %109, %113 : vector<4x128xi1>
    %cst_34 = arith.constant 0.000000e+00 : f32
    %115 = vector.broadcast %cst_34 : f32 to vector<4x128xf32>
    %116 = arith.select %114, %105, %115 : vector<4x128xi1>, vector<4x128xf32>
    %117 = vector.extract_strided_slice %4 {offsets = [0, 7], sizes = [4, 1], strides = [1, 1]} : vector<4x9xf32> to vector<4x1xf32>
    %118 = vector.broadcast %117 : vector<4x1xf32> to vector<4x128xf32>
    %119 = arith.mulf %118, %116 : vector<4x128xf32>
    %120 = arith.addf %104, %119 : vector<4x128xf32>
    %c124_i32 = arith.constant 124 : i32
    %121 = tpu.dynamic_rotate %3 by %c124_i32 dim 1 : vector<4x128xf32>, i32 -> vector<4x128xf32>
    %c4_i32_35 = arith.constant 4 : i32
    %122 = vector.broadcast %c4_i32_35 : i32 to vector<4x128xi32>
    %123 = arith.addi %5, %122 : vector<4x128xi32>
    %c0_i32_36 = arith.constant 0 : i32
    %124 = vector.broadcast %c0_i32_36 : i32 to vector<4x128xi32>
    %125 = arith.cmpi sge, %123, %124 : vector<4x128xi32>
    %c4_i32_37 = arith.constant 4 : i32
    %126 = vector.broadcast %c4_i32_37 : i32 to vector<4x128xi32>
    %127 = arith.addi %5, %126 : vector<4x128xi32>
    %c128_i32_38 = arith.constant 128 : i32
    %128 = vector.broadcast %c128_i32_38 : i32 to vector<4x128xi32>
    %129 = arith.cmpi slt, %127, %128 : vector<4x128xi32>
    %130 = arith.andi %125, %129 : vector<4x128xi1>
    %cst_39 = arith.constant 0.000000e+00 : f32
    %131 = vector.broadcast %cst_39 : f32 to vector<4x128xf32>
    %132 = arith.select %130, %121, %131 : vector<4x128xi1>, vector<4x128xf32>
    %133 = vector.extract_strided_slice %4 {offsets = [0, 8], sizes = [4, 1], strides = [1, 1]} : vector<4x9xf32> to vector<4x1xf32>
    %134 = vector.broadcast %133 : vector<4x1xf32> to vector<4x128xf32>
    %135 = arith.mulf %134, %132 : vector<4x128xf32>
    %136 = arith.addf %120, %135 : vector<4x128xf32>
    %c0_40 = arith.constant 0 : index
    %c0_41 = arith.constant 0 : index
    %137 = vector.load %arg4[%c0_40, %c0_41] : memref<4x3xf32, #tpu.memory_space<vmem>>, vector<4x3xf32>
    %138 = tpu.iota {dimensions = array<i32: 1>} : vector<4x128xi32>
    %c5_i32 = arith.constant 5 : i32
    %139 = tpu.dynamic_rotate %136 by %c5_i32 dim 1 : vector<4x128xf32>, i32 -> vector<4x128xf32>
    %c-5_i32 = arith.constant -5 : i32
    %140 = vector.broadcast %c-5_i32 : i32 to vector<4x128xi32>
    %141 = arith.addi %138, %140 : vector<4x128xi32>
    %c0_i32_42 = arith.constant 0 : i32
    %142 = vector.broadcast %c0_i32_42 : i32 to vector<4x128xi32>
    %143 = arith.cmpi sge, %141, %142 : vector<4x128xi32>
    %c-5_i32_43 = arith.constant -5 : i32
    %144 = vector.broadcast %c-5_i32_43 : i32 to vector<4x128xi32>
    %145 = arith.addi %138, %144 : vector<4x128xi32>
    %c128_i32_44 = arith.constant 128 : i32
    %146 = vector.broadcast %c128_i32_44 : i32 to vector<4x128xi32>
    %147 = arith.cmpi slt, %145, %146 : vector<4x128xi32>
    %148 = arith.andi %143, %147 : vector<4x128xi1>
    %cst_45 = arith.constant 0.000000e+00 : f32
    %149 = vector.broadcast %cst_45 : f32 to vector<4x128xf32>
    %150 = arith.select %148, %139, %149 : vector<4x128xi1>, vector<4x128xf32>
    %151 = vector.extract_strided_slice %137 {offsets = [0, 0], sizes = [4, 1], strides = [1, 1]} : vector<4x3xf32> to vector<4x1xf32>
    %152 = vector.broadcast %151 : vector<4x1xf32> to vector<4x128xf32>
    %153 = arith.mulf %152, %150 : vector<4x128xf32>
    %154 = vector.extract_strided_slice %137 {offsets = [0, 1], sizes = [4, 1], strides = [1, 1]} : vector<4x3xf32> to vector<4x1xf32>
    %155 = vector.broadcast %154 : vector<4x1xf32> to vector<4x128xf32>
    %156 = arith.mulf %155, %136 : vector<4x128xf32>
    %157 = arith.addf %153, %156 : vector<4x128xf32>
    %c123_i32 = arith.constant 123 : i32
    %158 = tpu.dynamic_rotate %136 by %c123_i32 dim 1 : vector<4x128xf32>, i32 -> vector<4x128xf32>
    %c5_i32_46 = arith.constant 5 : i32
    %159 = vector.broadcast %c5_i32_46 : i32 to vector<4x128xi32>
    %160 = arith.addi %138, %159 : vector<4x128xi32>
    %c0_i32_47 = arith.constant 0 : i32
    %161 = vector.broadcast %c0_i32_47 : i32 to vector<4x128xi32>
    %162 = arith.cmpi sge, %160, %161 : vector<4x128xi32>
    %c5_i32_48 = arith.constant 5 : i32
    %163 = vector.broadcast %c5_i32_48 : i32 to vector<4x128xi32>
    %164 = arith.addi %138, %163 : vector<4x128xi32>
    %c128_i32_49 = arith.constant 128 : i32
    %165 = vector.broadcast %c128_i32_49 : i32 to vector<4x128xi32>
    %166 = arith.cmpi slt, %164, %165 : vector<4x128xi32>
    %167 = arith.andi %162, %166 : vector<4x128xi1>
    %cst_50 = arith.constant 0.000000e+00 : f32
    %168 = vector.broadcast %cst_50 : f32 to vector<4x128xf32>
    %169 = arith.select %167, %158, %168 : vector<4x128xi1>, vector<4x128xf32>
    %170 = vector.extract_strided_slice %137 {offsets = [0, 2], sizes = [4, 1], strides = [1, 1]} : vector<4x3xf32> to vector<4x1xf32>
    %171 = vector.broadcast %170 : vector<4x1xf32> to vector<4x128xf32>
    %172 = arith.mulf %171, %169 : vector<4x128xf32>
    %173 = arith.addf %157, %172 : vector<4x128xf32>
    %c0_51 = arith.constant 0 : index
    %c0_52 = arith.constant 0 : index
    %174 = vector.load %arg5[%c0_51, %c0_52] : memref<16x4xf32, #tpu.memory_space<vmem>>, vector<16x4xf32>
    %cst_53 = arith.constant dense<0.000000e+00> : vector<16x128xf32>
    %175 = tpu.matmul %174, %173, %cst_53 {dimension_numbers = #tpu.dot_dimension_numbers<[1], [0], [0], [1], [0, 0, 1, 1], [], []>} : vector<16x4xf32>, vector<4x128xf32>, vector<16x128xf32> -> vector<16x128xf32>
    %c0_54 = arith.constant 0 : index
    %c0_55 = arith.constant 0 : index
    %176 = vector.load %arg6[%c0_54, %c0_55] : memref<4x5xf32, #tpu.memory_space<vmem>>, vector<4x5xf32>
    %177 = tpu.iota {dimensions = array<i32: 1>} : vector<4x128xi32>
    %c2_i32_56 = arith.constant 2 : i32
    %178 = tpu.dynamic_rotate %3 by %c2_i32_56 dim 1 : vector<4x128xf32>, i32 -> vector<4x128xf32>
    %c-2_i32_57 = arith.constant -2 : i32
    %179 = vector.broadcast %c-2_i32_57 : i32 to vector<4x128xi32>
    %180 = arith.addi %177, %179 : vector<4x128xi32>
    %c0_i32_58 = arith.constant 0 : i32
    %181 = vector.broadcast %c0_i32_58 : i32 to vector<4x128xi32>
    %182 = arith.cmpi sge, %180, %181 : vector<4x128xi32>
    %c-2_i32_59 = arith.constant -2 : i32
    %183 = vector.broadcast %c-2_i32_59 : i32 to vector<4x128xi32>
    %184 = arith.addi %177, %183 : vector<4x128xi32>
    %c128_i32_60 = arith.constant 128 : i32
    %185 = vector.broadcast %c128_i32_60 : i32 to vector<4x128xi32>
    %186 = arith.cmpi slt, %184, %185 : vector<4x128xi32>
    %187 = arith.andi %182, %186 : vector<4x128xi1>
    %cst_61 = arith.constant 0.000000e+00 : f32
    %188 = vector.broadcast %cst_61 : f32 to vector<4x128xf32>
    %189 = arith.select %187, %178, %188 : vector<4x128xi1>, vector<4x128xf32>
    %190 = vector.extract_strided_slice %176 {offsets = [0, 0], sizes = [4, 1], strides = [1, 1]} : vector<4x5xf32> to vector<4x1xf32>
    %191 = vector.broadcast %190 : vector<4x1xf32> to vector<4x128xf32>
    %192 = arith.mulf %191, %189 : vector<4x128xf32>
    %c1_i32_62 = arith.constant 1 : i32
    %193 = tpu.dynamic_rotate %3 by %c1_i32_62 dim 1 : vector<4x128xf32>, i32 -> vector<4x128xf32>
    %c-1_i32_63 = arith.constant -1 : i32
    %194 = vector.broadcast %c-1_i32_63 : i32 to vector<4x128xi32>
    %195 = arith.addi %177, %194 : vector<4x128xi32>
    %c0_i32_64 = arith.constant 0 : i32
    %196 = vector.broadcast %c0_i32_64 : i32 to vector<4x128xi32>
    %197 = arith.cmpi sge, %195, %196 : vector<4x128xi32>
    %c-1_i32_65 = arith.constant -1 : i32
    %198 = vector.broadcast %c-1_i32_65 : i32 to vector<4x128xi32>
    %199 = arith.addi %177, %198 : vector<4x128xi32>
    %c128_i32_66 = arith.constant 128 : i32
    %200 = vector.broadcast %c128_i32_66 : i32 to vector<4x128xi32>
    %201 = arith.cmpi slt, %199, %200 : vector<4x128xi32>
    %202 = arith.andi %197, %201 : vector<4x128xi1>
    %cst_67 = arith.constant 0.000000e+00 : f32
    %203 = vector.broadcast %cst_67 : f32 to vector<4x128xf32>
    %204 = arith.select %202, %193, %203 : vector<4x128xi1>, vector<4x128xf32>
    %205 = vector.extract_strided_slice %176 {offsets = [0, 1], sizes = [4, 1], strides = [1, 1]} : vector<4x5xf32> to vector<4x1xf32>
    %206 = vector.broadcast %205 : vector<4x1xf32> to vector<4x128xf32>
    %207 = arith.mulf %206, %204 : vector<4x128xf32>
    %208 = arith.addf %192, %207 : vector<4x128xf32>
    %209 = vector.extract_strided_slice %176 {offsets = [0, 2], sizes = [4, 1], strides = [1, 1]} : vector<4x5xf32> to vector<4x1xf32>
    %210 = vector.broadcast %209 : vector<4x1xf32> to vector<4x128xf32>
    %211 = arith.mulf %210, %3 : vector<4x128xf32>
    %212 = arith.addf %208, %211 : vector<4x128xf32>
    %c127_i32_68 = arith.constant 127 : i32
    %213 = tpu.dynamic_rotate %3 by %c127_i32_68 dim 1 : vector<4x128xf32>, i32 -> vector<4x128xf32>
    %c1_i32_69 = arith.constant 1 : i32
    %214 = vector.broadcast %c1_i32_69 : i32 to vector<4x128xi32>
    %215 = arith.addi %177, %214 : vector<4x128xi32>
    %c0_i32_70 = arith.constant 0 : i32
    %216 = vector.broadcast %c0_i32_70 : i32 to vector<4x128xi32>
    %217 = arith.cmpi sge, %215, %216 : vector<4x128xi32>
    %c1_i32_71 = arith.constant 1 : i32
    %218 = vector.broadcast %c1_i32_71 : i32 to vector<4x128xi32>
    %219 = arith.addi %177, %218 : vector<4x128xi32>
    %c128_i32_72 = arith.constant 128 : i32
    %220 = vector.broadcast %c128_i32_72 : i32 to vector<4x128xi32>
    %221 = arith.cmpi slt, %219, %220 : vector<4x128xi32>
    %222 = arith.andi %217, %221 : vector<4x128xi1>
    %cst_73 = arith.constant 0.000000e+00 : f32
    %223 = vector.broadcast %cst_73 : f32 to vector<4x128xf32>
    %224 = arith.select %222, %213, %223 : vector<4x128xi1>, vector<4x128xf32>
    %225 = vector.extract_strided_slice %176 {offsets = [0, 3], sizes = [4, 1], strides = [1, 1]} : vector<4x5xf32> to vector<4x1xf32>
    %226 = vector.broadcast %225 : vector<4x1xf32> to vector<4x128xf32>
    %227 = arith.mulf %226, %224 : vector<4x128xf32>
    %228 = arith.addf %212, %227 : vector<4x128xf32>
    %c126_i32_74 = arith.constant 126 : i32
    %229 = tpu.dynamic_rotate %3 by %c126_i32_74 dim 1 : vector<4x128xf32>, i32 -> vector<4x128xf32>
    %c2_i32_75 = arith.constant 2 : i32
    %230 = vector.broadcast %c2_i32_75 : i32 to vector<4x128xi32>
    %231 = arith.addi %177, %230 : vector<4x128xi32>
    %c0_i32_76 = arith.constant 0 : i32
    %232 = vector.broadcast %c0_i32_76 : i32 to vector<4x128xi32>
    %233 = arith.cmpi sge, %231, %232 : vector<4x128xi32>
    %c2_i32_77 = arith.constant 2 : i32
    %234 = vector.broadcast %c2_i32_77 : i32 to vector<4x128xi32>
    %235 = arith.addi %177, %234 : vector<4x128xi32>
    %c128_i32_78 = arith.constant 128 : i32
    %236 = vector.broadcast %c128_i32_78 : i32 to vector<4x128xi32>
    %237 = arith.cmpi slt, %235, %236 : vector<4x128xi32>
    %238 = arith.andi %233, %237 : vector<4x128xi1>
    %cst_79 = arith.constant 0.000000e+00 : f32
    %239 = vector.broadcast %cst_79 : f32 to vector<4x128xf32>
    %240 = arith.select %238, %229, %239 : vector<4x128xi1>, vector<4x128xf32>
    %241 = vector.extract_strided_slice %176 {offsets = [0, 4], sizes = [4, 1], strides = [1, 1]} : vector<4x5xf32> to vector<4x1xf32>
    %242 = vector.broadcast %241 : vector<4x1xf32> to vector<4x128xf32>
    %243 = arith.mulf %242, %240 : vector<4x128xf32>
    %244 = arith.addf %228, %243 : vector<4x128xf32>
    %c0_80 = arith.constant 0 : index
    %c0_81 = arith.constant 0 : index
    %245 = vector.load %arg7[%c0_80, %c0_81] : memref<4x3xf32, #tpu.memory_space<vmem>>, vector<4x3xf32>
    %246 = tpu.iota {dimensions = array<i32: 1>} : vector<4x128xi32>
    %c3_i32_82 = arith.constant 3 : i32
    %247 = tpu.dynamic_rotate %244 by %c3_i32_82 dim 1 : vector<4x128xf32>, i32 -> vector<4x128xf32>
    %c-3_i32_83 = arith.constant -3 : i32
    %248 = vector.broadcast %c-3_i32_83 : i32 to vector<4x128xi32>
    %249 = arith.addi %246, %248 : vector<4x128xi32>
    %c0_i32_84 = arith.constant 0 : i32
    %250 = vector.broadcast %c0_i32_84 : i32 to vector<4x128xi32>
    %251 = arith.cmpi sge, %249, %250 : vector<4x128xi32>
    %c-3_i32_85 = arith.constant -3 : i32
    %252 = vector.broadcast %c-3_i32_85 : i32 to vector<4x128xi32>
    %253 = arith.addi %246, %252 : vector<4x128xi32>
    %c128_i32_86 = arith.constant 128 : i32
    %254 = vector.broadcast %c128_i32_86 : i32 to vector<4x128xi32>
    %255 = arith.cmpi slt, %253, %254 : vector<4x128xi32>
    %256 = arith.andi %251, %255 : vector<4x128xi1>
    %cst_87 = arith.constant 0.000000e+00 : f32
    %257 = vector.broadcast %cst_87 : f32 to vector<4x128xf32>
    %258 = arith.select %256, %247, %257 : vector<4x128xi1>, vector<4x128xf32>
    %259 = vector.extract_strided_slice %245 {offsets = [0, 0], sizes = [4, 1], strides = [1, 1]} : vector<4x3xf32> to vector<4x1xf32>
    %260 = vector.broadcast %259 : vector<4x1xf32> to vector<4x128xf32>
    %261 = arith.mulf %260, %258 : vector<4x128xf32>
    %262 = vector.extract_strided_slice %245 {offsets = [0, 1], sizes = [4, 1], strides = [1, 1]} : vector<4x3xf32> to vector<4x1xf32>
    %263 = vector.broadcast %262 : vector<4x1xf32> to vector<4x128xf32>
    %264 = arith.mulf %263, %244 : vector<4x128xf32>
    %265 = arith.addf %261, %264 : vector<4x128xf32>
    %c125_i32_88 = arith.constant 125 : i32
    %266 = tpu.dynamic_rotate %244 by %c125_i32_88 dim 1 : vector<4x128xf32>, i32 -> vector<4x128xf32>
    %c3_i32_89 = arith.constant 3 : i32
    %267 = vector.broadcast %c3_i32_89 : i32 to vector<4x128xi32>
    %268 = arith.addi %246, %267 : vector<4x128xi32>
    %c0_i32_90 = arith.constant 0 : i32
    %269 = vector.broadcast %c0_i32_90 : i32 to vector<4x128xi32>
    %270 = arith.cmpi sge, %268, %269 : vector<4x128xi32>
    %c3_i32_91 = arith.constant 3 : i32
    %271 = vector.broadcast %c3_i32_91 : i32 to vector<4x128xi32>
    %272 = arith.addi %246, %271 : vector<4x128xi32>
    %c128_i32_92 = arith.constant 128 : i32
    %273 = vector.broadcast %c128_i32_92 : i32 to vector<4x128xi32>
    %274 = arith.cmpi slt, %272, %273 : vector<4x128xi32>
    %275 = arith.andi %270, %274 : vector<4x128xi1>
    %cst_93 = arith.constant 0.000000e+00 : f32
    %276 = vector.broadcast %cst_93 : f32 to vector<4x128xf32>
    %277 = arith.select %275, %266, %276 : vector<4x128xi1>, vector<4x128xf32>
    %278 = vector.extract_strided_slice %245 {offsets = [0, 2], sizes = [4, 1], strides = [1, 1]} : vector<4x3xf32> to vector<4x1xf32>
    %279 = vector.broadcast %278 : vector<4x1xf32> to vector<4x128xf32>
    %280 = arith.mulf %279, %277 : vector<4x128xf32>
    %281 = arith.addf %265, %280 : vector<4x128xf32>
    %c0_94 = arith.constant 0 : index
    %c0_95 = arith.constant 0 : index
    %282 = vector.load %arg8[%c0_94, %c0_95] : memref<16x4xf32, #tpu.memory_space<vmem>>, vector<16x4xf32>
    %cst_96 = arith.constant dense<0.000000e+00> : vector<16x128xf32>
    %283 = tpu.matmul %282, %281, %cst_96 {dimension_numbers = #tpu.dot_dimension_numbers<[1], [0], [0], [1], [0, 0, 1, 1], [], []>} : vector<16x4xf32>, vector<4x128xf32>, vector<16x128xf32> -> vector<16x128xf32>
    %284 = arith.addf %175, %283 : vector<16x128xf32>
    %c0_97 = arith.constant 0 : index
    %c0_98 = arith.constant 0 : index
    %285 = vector.load %arg9[%c0_97, %c0_98] : memref<4x3xf32, #tpu.memory_space<vmem>>, vector<4x3xf32>
    %286 = tpu.iota {dimensions = array<i32: 1>} : vector<4x128xi32>
    %c1_i32_99 = arith.constant 1 : i32
    %287 = tpu.dynamic_rotate %3 by %c1_i32_99 dim 1 : vector<4x128xf32>, i32 -> vector<4x128xf32>
    %c-1_i32_100 = arith.constant -1 : i32
    %288 = vector.broadcast %c-1_i32_100 : i32 to vector<4x128xi32>
    %289 = arith.addi %286, %288 : vector<4x128xi32>
    %c0_i32_101 = arith.constant 0 : i32
    %290 = vector.broadcast %c0_i32_101 : i32 to vector<4x128xi32>
    %291 = arith.cmpi sge, %289, %290 : vector<4x128xi32>
    %c-1_i32_102 = arith.constant -1 : i32
    %292 = vector.broadcast %c-1_i32_102 : i32 to vector<4x128xi32>
    %293 = arith.addi %286, %292 : vector<4x128xi32>
    %c128_i32_103 = arith.constant 128 : i32
    %294 = vector.broadcast %c128_i32_103 : i32 to vector<4x128xi32>
    %295 = arith.cmpi slt, %293, %294 : vector<4x128xi32>
    %296 = arith.andi %291, %295 : vector<4x128xi1>
    %cst_104 = arith.constant 0.000000e+00 : f32
    %297 = vector.broadcast %cst_104 : f32 to vector<4x128xf32>
    %298 = arith.select %296, %287, %297 : vector<4x128xi1>, vector<4x128xf32>
    %299 = vector.extract_strided_slice %285 {offsets = [0, 0], sizes = [4, 1], strides = [1, 1]} : vector<4x3xf32> to vector<4x1xf32>
    %300 = vector.broadcast %299 : vector<4x1xf32> to vector<4x128xf32>
    %301 = arith.mulf %300, %298 : vector<4x128xf32>
    %302 = vector.extract_strided_slice %285 {offsets = [0, 1], sizes = [4, 1], strides = [1, 1]} : vector<4x3xf32> to vector<4x1xf32>
    %303 = vector.broadcast %302 : vector<4x1xf32> to vector<4x128xf32>
    %304 = arith.mulf %303, %3 : vector<4x128xf32>
    %305 = arith.addf %301, %304 : vector<4x128xf32>
    %c127_i32_105 = arith.constant 127 : i32
    %306 = tpu.dynamic_rotate %3 by %c127_i32_105 dim 1 : vector<4x128xf32>, i32 -> vector<4x128xf32>
    %c1_i32_106 = arith.constant 1 : i32
    %307 = vector.broadcast %c1_i32_106 : i32 to vector<4x128xi32>
    %308 = arith.addi %286, %307 : vector<4x128xi32>
    %c0_i32_107 = arith.constant 0 : i32
    %309 = vector.broadcast %c0_i32_107 : i32 to vector<4x128xi32>
    %310 = arith.cmpi sge, %308, %309 : vector<4x128xi32>
    %c1_i32_108 = arith.constant 1 : i32
    %311 = vector.broadcast %c1_i32_108 : i32 to vector<4x128xi32>
    %312 = arith.addi %286, %311 : vector<4x128xi32>
    %c128_i32_109 = arith.constant 128 : i32
    %313 = vector.broadcast %c128_i32_109 : i32 to vector<4x128xi32>
    %314 = arith.cmpi slt, %312, %313 : vector<4x128xi32>
    %315 = arith.andi %310, %314 : vector<4x128xi1>
    %cst_110 = arith.constant 0.000000e+00 : f32
    %316 = vector.broadcast %cst_110 : f32 to vector<4x128xf32>
    %317 = arith.select %315, %306, %316 : vector<4x128xi1>, vector<4x128xf32>
    %318 = vector.extract_strided_slice %285 {offsets = [0, 2], sizes = [4, 1], strides = [1, 1]} : vector<4x3xf32> to vector<4x1xf32>
    %319 = vector.broadcast %318 : vector<4x1xf32> to vector<4x128xf32>
    %320 = arith.mulf %319, %317 : vector<4x128xf32>
    %321 = arith.addf %305, %320 : vector<4x128xf32>
    %c0_111 = arith.constant 0 : index
    %c0_112 = arith.constant 0 : index
    %322 = vector.load %arg10[%c0_111, %c0_112] : memref<4x3xf32, #tpu.memory_space<vmem>>, vector<4x3xf32>
    %323 = tpu.iota {dimensions = array<i32: 1>} : vector<4x128xi32>
    %c2_i32_113 = arith.constant 2 : i32
    %324 = tpu.dynamic_rotate %321 by %c2_i32_113 dim 1 : vector<4x128xf32>, i32 -> vector<4x128xf32>
    %c-2_i32_114 = arith.constant -2 : i32
    %325 = vector.broadcast %c-2_i32_114 : i32 to vector<4x128xi32>
    %326 = arith.addi %323, %325 : vector<4x128xi32>
    %c0_i32_115 = arith.constant 0 : i32
    %327 = vector.broadcast %c0_i32_115 : i32 to vector<4x128xi32>
    %328 = arith.cmpi sge, %326, %327 : vector<4x128xi32>
    %c-2_i32_116 = arith.constant -2 : i32
    %329 = vector.broadcast %c-2_i32_116 : i32 to vector<4x128xi32>
    %330 = arith.addi %323, %329 : vector<4x128xi32>
    %c128_i32_117 = arith.constant 128 : i32
    %331 = vector.broadcast %c128_i32_117 : i32 to vector<4x128xi32>
    %332 = arith.cmpi slt, %330, %331 : vector<4x128xi32>
    %333 = arith.andi %328, %332 : vector<4x128xi1>
    %cst_118 = arith.constant 0.000000e+00 : f32
    %334 = vector.broadcast %cst_118 : f32 to vector<4x128xf32>
    %335 = arith.select %333, %324, %334 : vector<4x128xi1>, vector<4x128xf32>
    %336 = vector.extract_strided_slice %322 {offsets = [0, 0], sizes = [4, 1], strides = [1, 1]} : vector<4x3xf32> to vector<4x1xf32>
    %337 = vector.broadcast %336 : vector<4x1xf32> to vector<4x128xf32>
    %338 = arith.mulf %337, %335 : vector<4x128xf32>
    %339 = vector.extract_strided_slice %322 {offsets = [0, 1], sizes = [4, 1], strides = [1, 1]} : vector<4x3xf32> to vector<4x1xf32>
    %340 = vector.broadcast %339 : vector<4x1xf32> to vector<4x128xf32>
    %341 = arith.mulf %340, %321 : vector<4x128xf32>
    %342 = arith.addf %338, %341 : vector<4x128xf32>
    %c126_i32_119 = arith.constant 126 : i32
    %343 = tpu.dynamic_rotate %321 by %c126_i32_119 dim 1 : vector<4x128xf32>, i32 -> vector<4x128xf32>
    %c2_i32_120 = arith.constant 2 : i32
    %344 = vector.broadcast %c2_i32_120 : i32 to vector<4x128xi32>
    %345 = arith.addi %323, %344 : vector<4x128xi32>
    %c0_i32_121 = arith.constant 0 : i32
    %346 = vector.broadcast %c0_i32_121 : i32 to vector<4x128xi32>
    %347 = arith.cmpi sge, %345, %346 : vector<4x128xi32>
    %c2_i32_122 = arith.constant 2 : i32
    %348 = vector.broadcast %c2_i32_122 : i32 to vector<4x128xi32>
    %349 = arith.addi %323, %348 : vector<4x128xi32>
    %c128_i32_123 = arith.constant 128 : i32
    %350 = vector.broadcast %c128_i32_123 : i32 to vector<4x128xi32>
    %351 = arith.cmpi slt, %349, %350 : vector<4x128xi32>
    %352 = arith.andi %347, %351 : vector<4x128xi1>
    %cst_124 = arith.constant 0.000000e+00 : f32
    %353 = vector.broadcast %cst_124 : f32 to vector<4x128xf32>
    %354 = arith.select %352, %343, %353 : vector<4x128xi1>, vector<4x128xf32>
    %355 = vector.extract_strided_slice %322 {offsets = [0, 2], sizes = [4, 1], strides = [1, 1]} : vector<4x3xf32> to vector<4x1xf32>
    %356 = vector.broadcast %355 : vector<4x1xf32> to vector<4x128xf32>
    %357 = arith.mulf %356, %354 : vector<4x128xf32>
    %358 = arith.addf %342, %357 : vector<4x128xf32>
    %c0_125 = arith.constant 0 : index
    %c0_126 = arith.constant 0 : index
    %359 = vector.load %arg11[%c0_125, %c0_126] : memref<16x4xf32, #tpu.memory_space<vmem>>, vector<16x4xf32>
    %cst_127 = arith.constant dense<0.000000e+00> : vector<16x128xf32>
    %360 = tpu.matmul %359, %358, %cst_127 {dimension_numbers = #tpu.dot_dimension_numbers<[1], [0], [0], [1], [0, 0, 1, 1], [], []>} : vector<16x4xf32>, vector<4x128xf32>, vector<16x128xf32> -> vector<16x128xf32>
    %361 = arith.addf %284, %360 : vector<16x128xf32>
    %362 = tpu.iota {dimensions = array<i32: 1>} : vector<4x128xi32>
    %c1_i32_128 = arith.constant 1 : i32
    %363 = tpu.dynamic_rotate %1 by %c1_i32_128 dim 1 : vector<4x128xf32>, i32 -> vector<4x128xf32>
    %c-1_i32_129 = arith.constant -1 : i32
    %364 = vector.broadcast %c-1_i32_129 : i32 to vector<4x128xi32>
    %365 = arith.addi %362, %364 : vector<4x128xi32>
    %c0_i32_130 = arith.constant 0 : i32
    %366 = vector.broadcast %c0_i32_130 : i32 to vector<4x128xi32>
    %367 = arith.cmpi sge, %365, %366 : vector<4x128xi32>
    %c-1_i32_131 = arith.constant -1 : i32
    %368 = vector.broadcast %c-1_i32_131 : i32 to vector<4x128xi32>
    %369 = arith.addi %362, %368 : vector<4x128xi32>
    %c128_i32_132 = arith.constant 128 : i32
    %370 = vector.broadcast %c128_i32_132 : i32 to vector<4x128xi32>
    %371 = arith.cmpi slt, %369, %370 : vector<4x128xi32>
    %372 = arith.andi %367, %371 : vector<4x128xi1>
    %cst_133 = arith.constant 0xFF800000 : f32
    %373 = vector.broadcast %cst_133 : f32 to vector<4x128xf32>
    %374 = arith.select %372, %363, %373 : vector<4x128xi1>, vector<4x128xf32>
    %375 = arith.maximumf %374, %1 : vector<4x128xf32>
    %c127_i32_134 = arith.constant 127 : i32
    %376 = tpu.dynamic_rotate %1 by %c127_i32_134 dim 1 : vector<4x128xf32>, i32 -> vector<4x128xf32>
    %c1_i32_135 = arith.constant 1 : i32
    %377 = vector.broadcast %c1_i32_135 : i32 to vector<4x128xi32>
    %378 = arith.addi %362, %377 : vector<4x128xi32>
    %c0_i32_136 = arith.constant 0 : i32
    %379 = vector.broadcast %c0_i32_136 : i32 to vector<4x128xi32>
    %380 = arith.cmpi sge, %378, %379 : vector<4x128xi32>
    %c1_i32_137 = arith.constant 1 : i32
    %381 = vector.broadcast %c1_i32_137 : i32 to vector<4x128xi32>
    %382 = arith.addi %362, %381 : vector<4x128xi32>
    %c128_i32_138 = arith.constant 128 : i32
    %383 = vector.broadcast %c128_i32_138 : i32 to vector<4x128xi32>
    %384 = arith.cmpi slt, %382, %383 : vector<4x128xi32>
    %385 = arith.andi %380, %384 : vector<4x128xi1>
    %cst_139 = arith.constant 0xFF800000 : f32
    %386 = vector.broadcast %cst_139 : f32 to vector<4x128xf32>
    %387 = arith.select %385, %376, %386 : vector<4x128xi1>, vector<4x128xf32>
    %388 = arith.maximumf %375, %387 : vector<4x128xf32>
    %c0_140 = arith.constant 0 : index
    %c0_141 = arith.constant 0 : index
    %389 = vector.load %arg12[%c0_140, %c0_141] : memref<16x4xf32, #tpu.memory_space<vmem>>, vector<16x4xf32>
    %cst_142 = arith.constant dense<0.000000e+00> : vector<16x128xf32>
    %390 = tpu.matmul %389, %388, %cst_142 {dimension_numbers = #tpu.dot_dimension_numbers<[1], [0], [0], [1], [0, 0, 1, 1], [], []>} : vector<16x4xf32>, vector<4x128xf32>, vector<16x128xf32> -> vector<16x128xf32>
    %391 = arith.addf %361, %390 : vector<16x128xf32>
    %c0_143 = arith.constant 0 : index
    %c0_144 = arith.constant 0 : index
    %c0_145 = arith.constant 0 : index
    %392 = vector.load %arg13[%c0_143, %c0_144, %c0_145] : memref<1x16x128xf32, #tpu.memory_space<vmem>>, vector<1x16x128xf32>
    %393 = vector.shape_cast %392 : vector<1x16x128xf32> to vector<16x128xf32>
    %394 = vector.shape_cast %391 : vector<16x128xf32> to vector<1x16x128xf32>
    tpu.vector_store %arg13[%c0_143, %c0_144, %c0_145], %394 {strides = array<i32>} : memref<1x16x128xf32, #tpu.memory_space<vmem>>, vector<1x16x128xf32>,
    return
  }
  func.func @transform_0(%arg0: i32) -> (i32, i32, i32) {
    %c0_i32 = arith.constant 0 : i32
    %c0_i32_0 = arith.constant 0 : i32
    %c0_i32_1 = arith.constant 0 : i32
    return %arg0, %c0_i32, %c0_i32_0 : i32, i32, i32
  }
  func.func @transform_1(%arg0: i32) -> (i32, i32) {
    %c0_i32 = arith.constant 0 : i32
    %c0_i32_0 = arith.constant 0 : i32
    %c0_i32_1 = arith.constant 0 : i32
    return %c0_i32, %c0_i32_0 : i32, i32
  }
  func.func @transform_2(%arg0: i32) -> (i32, i32) {
    %c0_i32 = arith.constant 0 : i32
    %c0_i32_0 = arith.constant 0 : i32
    %c0_i32_1 = arith.constant 0 : i32
    return %c0_i32, %c0_i32_0 : i32, i32
  }
  func.func @transform_3(%arg0: i32) -> (i32, i32) {
    %c0_i32 = arith.constant 0 : i32
    %c0_i32_0 = arith.constant 0 : i32
    %c0_i32_1 = arith.constant 0 : i32
    return %c0_i32, %c0_i32_0 : i32, i32
  }
  func.func @transform_4(%arg0: i32) -> (i32, i32) {
    %c0_i32 = arith.constant 0 : i32
    %c0_i32_0 = arith.constant 0 : i32
    %c0_i32_1 = arith.constant 0 : i32
    return %c0_i32, %c0_i32_0 : i32, i32
  }
  func.func @transform_5(%arg0: i32) -> (i32, i32) {
    %c0_i32 = arith.constant 0 : i32
    %c0_i32_0 = arith.constant 0 : i32
    %c0_i32_1 = arith.constant 0 : i32
    return %c0_i32, %c0_i32_0 : i32, i32
  }
  func.func @transform_6(%arg0: i32) -> (i32, i32) {
    %c0_i32 = arith.constant 0 : i32
    %c0_i32_0 = arith.constant 0 : i32
    %c0_i32_1 = arith.constant 0 : i32
    return %c0_i32, %c0_i32_0 : i32, i32
  }
  func.func @transform_7(%arg0: i32) -> (i32, i32) {
    %c0_i32 = arith.constant 0 : i32
    %c0_i32_0 = arith.constant 0 : i32
    %c0_i32_1 = arith.constant 0 : i32
    return %c0_i32, %c0_i32_0 : i32, i32
  }
  func.func @transform_8(%arg0: i32) -> (i32, i32) {
    %c0_i32 = arith.constant 0 : i32
    %c0_i32_0 = arith.constant 0 : i32
    %c0_i32_1 = arith.constant 0 : i32
    return %c0_i32, %c0_i32_0 : i32, i32
  }
  func.func @transform_9(%arg0: i32) -> (i32, i32) {
    %c0_i32 = arith.constant 0 : i32
    %c0_i32_0 = arith.constant 0 : i32
    %c0_i32_1 = arith.constant 0 : i32
    return %c0_i32, %c0_i32_0 : i32, i32
  }
  func.func @transform_10(%arg0: i32) -> (i32, i32) {
    %c0_i32 = arith.constant 0 : i32
    %c0_i32_0 = arith.constant 0 : i32
    %c0_i32_1 = arith.constant 0 : i32
    return %c0_i32, %c0_i32_0 : i32, i32
  }
  func.func @transform_11(%arg0: i32) -> (i32, i32) {
    %c0_i32 = arith.constant 0 : i32
    %c0_i32_0 = arith.constant 0 : i32
    %c0_i32_1 = arith.constant 0 : i32
    return %c0_i32, %c0_i32_0 : i32, i32
  }
  func.func @transform_12(%arg0: i32) -> (i32, i32, i32) {
    %c0_i32 = arith.constant 0 : i32
    %c0_i32_0 = arith.constant 0 : i32
    %c0_i32_1 = arith.constant 0 : i32
    return %arg0, %c0_i32, %c0_i32_0 : i32, i32, i32
  }
}

module attributes {stable_mosaic.version = 11 : i64} {
  func.func @kernel(%arg0: i32, %arg1: memref<1x16x128xf32, #tpu.memory_space<vmem>>, %arg2: memref<1x4x128xf32, #tpu.memory_space<vmem>>, %arg3: memref<8x16xf32, #tpu.memory_space<vmem>>, %arg4: memref<8x9xf32, #tpu.memory_space<vmem>>, %arg5: memref<8x3xf32, #tpu.memory_space<vmem>>, %arg6: memref<32x8xf32, #tpu.memory_space<vmem>>, %arg7: memref<8x5xf32, #tpu.memory_space<vmem>>, %arg8: memref<8x3xf32, #tpu.memory_space<vmem>>, %arg9: memref<32x8xf32, #tpu.memory_space<vmem>>, %arg10: memref<8x3xf32, #tpu.memory_space<vmem>>, %arg11: memref<8x3xf32, #tpu.memory_space<vmem>>, %arg12: memref<32x8xf32, #tpu.memory_space<vmem>>, %arg13: memref<32x16xf32, #tpu.memory_space<vmem>>, %arg14: memref<32x4xf32, #tpu.memory_space<vmem>>, %arg15: memref<1x32x128xf32, #tpu.memory_space<vmem>>, %arg16: memref<1x32x128xf32, #tpu.memory_space<vmem>>) attributes {dimension_semantics = [#tpu.dimension_semantics<parallel>], iteration_bounds = array<i64: 2>, scalar_prefetch = 0 : i64, scratch_operands = 0 : i64, tpu.core_type = #tpu.core_type<tc>, window_params = [{transform_indices = @transform_0, window_bounds = array<i64: 1, 16, 128>}, {transform_indices = @transform_1, window_bounds = array<i64: 1, 4, 128>}, {pipeline_mode = #tpu.pipeline_mode<synchronous>, transform_indices = @transform_2, window_bounds = array<i64: 8, 16>}, {pipeline_mode = #tpu.pipeline_mode<synchronous>, transform_indices = @transform_3, window_bounds = array<i64: 8, 9>}, {pipeline_mode = #tpu.pipeline_mode<synchronous>, transform_indices = @transform_4, window_bounds = array<i64: 8, 3>}, {pipeline_mode = #tpu.pipeline_mode<synchronous>, transform_indices = @transform_5, window_bounds = array<i64: 32, 8>}, {pipeline_mode = #tpu.pipeline_mode<synchronous>, transform_indices = @transform_6, window_bounds = array<i64: 8, 5>}, {pipeline_mode = #tpu.pipeline_mode<synchronous>, transform_indices = @transform_7, window_bounds = array<i64: 8, 3>}, {pipeline_mode = #tpu.pipeline_mode<synchronous>, transform_indices = @transform_8, window_bounds = array<i64: 32, 8>}, {pipeline_mode = #tpu.pipeline_mode<synchronous>, transform_indices = @transform_9, window_bounds = array<i64: 8, 3>}, {pipeline_mode = #tpu.pipeline_mode<synchronous>, transform_indices = @transform_10, window_bounds = array<i64: 8, 3>}, {pipeline_mode = #tpu.pipeline_mode<synchronous>, transform_indices = @transform_11, window_bounds = array<i64: 32, 8>}, {pipeline_mode = #tpu.pipeline_mode<synchronous>, transform_indices = @transform_12, window_bounds = array<i64: 32, 16>}, {pipeline_mode = #tpu.pipeline_mode<synchronous>, transform_indices = @transform_13, window_bounds = array<i64: 32, 4>}, {transform_indices = @transform_14, window_bounds = array<i64: 1, 32, 128>}, {transform_indices = @transform_15, window_bounds = array<i64: 1, 32, 128>}]} {
    %c0 = arith.constant 0 : index
    %c0_0 = arith.constant 0 : index
    %c0_1 = arith.constant 0 : index
    %0 = vector.load %arg1[%c0, %c0_0, %c0_1] : memref<1x16x128xf32, #tpu.memory_space<vmem>>, vector<1x16x128xf32>
    %1 = vector.shape_cast %0 : vector<1x16x128xf32> to vector<16x128xf32>
    %c0_2 = arith.constant 0 : index
    %c0_3 = arith.constant 0 : index
    %2 = vector.load %arg3[%c0_2, %c0_3] : memref<8x16xf32, #tpu.memory_space<vmem>>, vector<8x16xf32>
    %cst = arith.constant dense<0.000000e+00> : vector<8x128xf32>
    %3 = tpu.matmul %2, %1, %cst {dimension_numbers = #tpu.dot_dimension_numbers<[1], [0], [0], [1], [0, 0, 1, 1], [], []>} : vector<8x16xf32>, vector<16x128xf32>, vector<8x128xf32> -> vector<8x128xf32>
    %c0_4 = arith.constant 0 : index
    %c0_5 = arith.constant 0 : index
    %4 = vector.load %arg4[%c0_4, %c0_5] : memref<8x9xf32, #tpu.memory_space<vmem>>, vector<8x9xf32>
    %5 = tpu.iota {dimensions = array<i32: 1>} : vector<8x128xi32>
    %c4_i32 = arith.constant 4 : i32
    %6 = tpu.dynamic_rotate %3 by %c4_i32 dim 1 : vector<8x128xf32>, i32 -> vector<8x128xf32>
    %c-4_i32 = arith.constant -4 : i32
    %7 = vector.broadcast %c-4_i32 : i32 to vector<8x128xi32>
    %8 = arith.addi %5, %7 : vector<8x128xi32>
    %c0_i32 = arith.constant 0 : i32
    %9 = vector.broadcast %c0_i32 : i32 to vector<8x128xi32>
    %10 = arith.cmpi sge, %8, %9 : vector<8x128xi32>
    %c-4_i32_6 = arith.constant -4 : i32
    %11 = vector.broadcast %c-4_i32_6 : i32 to vector<8x128xi32>
    %12 = arith.addi %5, %11 : vector<8x128xi32>
    %c128_i32 = arith.constant 128 : i32
    %13 = vector.broadcast %c128_i32 : i32 to vector<8x128xi32>
    %14 = arith.cmpi slt, %12, %13 : vector<8x128xi32>
    %15 = arith.andi %10, %14 : vector<8x128xi1>
    %cst_7 = arith.constant 0.000000e+00 : f32
    %16 = vector.broadcast %cst_7 : f32 to vector<8x128xf32>
    %17 = arith.select %15, %6, %16 : vector<8x128xi1>, vector<8x128xf32>
    %18 = vector.extract_strided_slice %4 {offsets = [0, 0], sizes = [8, 1], strides = [1, 1]} : vector<8x9xf32> to vector<8x1xf32>
    %19 = vector.broadcast %18 : vector<8x1xf32> to vector<8x128xf32>
    %20 = arith.mulf %19, %17 : vector<8x128xf32>
    %c3_i32 = arith.constant 3 : i32
    %21 = tpu.dynamic_rotate %3 by %c3_i32 dim 1 : vector<8x128xf32>, i32 -> vector<8x128xf32>
    %c-3_i32 = arith.constant -3 : i32
    %22 = vector.broadcast %c-3_i32 : i32 to vector<8x128xi32>
    %23 = arith.addi %5, %22 : vector<8x128xi32>
    %c0_i32_8 = arith.constant 0 : i32
    %24 = vector.broadcast %c0_i32_8 : i32 to vector<8x128xi32>
    %25 = arith.cmpi sge, %23, %24 : vector<8x128xi32>
    %c-3_i32_9 = arith.constant -3 : i32
    %26 = vector.broadcast %c-3_i32_9 : i32 to vector<8x128xi32>
    %27 = arith.addi %5, %26 : vector<8x128xi32>
    %c128_i32_10 = arith.constant 128 : i32
    %28 = vector.broadcast %c128_i32_10 : i32 to vector<8x128xi32>
    %29 = arith.cmpi slt, %27, %28 : vector<8x128xi32>
    %30 = arith.andi %25, %29 : vector<8x128xi1>
    %cst_11 = arith.constant 0.000000e+00 : f32
    %31 = vector.broadcast %cst_11 : f32 to vector<8x128xf32>
    %32 = arith.select %30, %21, %31 : vector<8x128xi1>, vector<8x128xf32>
    %33 = vector.extract_strided_slice %4 {offsets = [0, 1], sizes = [8, 1], strides = [1, 1]} : vector<8x9xf32> to vector<8x1xf32>
    %34 = vector.broadcast %33 : vector<8x1xf32> to vector<8x128xf32>
    %35 = arith.mulf %34, %32 : vector<8x128xf32>
    %36 = arith.addf %20, %35 : vector<8x128xf32>
    %c2_i32 = arith.constant 2 : i32
    %37 = tpu.dynamic_rotate %3 by %c2_i32 dim 1 : vector<8x128xf32>, i32 -> vector<8x128xf32>
    %c-2_i32 = arith.constant -2 : i32
    %38 = vector.broadcast %c-2_i32 : i32 to vector<8x128xi32>
    %39 = arith.addi %5, %38 : vector<8x128xi32>
    %c0_i32_12 = arith.constant 0 : i32
    %40 = vector.broadcast %c0_i32_12 : i32 to vector<8x128xi32>
    %41 = arith.cmpi sge, %39, %40 : vector<8x128xi32>
    %c-2_i32_13 = arith.constant -2 : i32
    %42 = vector.broadcast %c-2_i32_13 : i32 to vector<8x128xi32>
    %43 = arith.addi %5, %42 : vector<8x128xi32>
    %c128_i32_14 = arith.constant 128 : i32
    %44 = vector.broadcast %c128_i32_14 : i32 to vector<8x128xi32>
    %45 = arith.cmpi slt, %43, %44 : vector<8x128xi32>
    %46 = arith.andi %41, %45 : vector<8x128xi1>
    %cst_15 = arith.constant 0.000000e+00 : f32
    %47 = vector.broadcast %cst_15 : f32 to vector<8x128xf32>
    %48 = arith.select %46, %37, %47 : vector<8x128xi1>, vector<8x128xf32>
    %49 = vector.extract_strided_slice %4 {offsets = [0, 2], sizes = [8, 1], strides = [1, 1]} : vector<8x9xf32> to vector<8x1xf32>
    %50 = vector.broadcast %49 : vector<8x1xf32> to vector<8x128xf32>
    %51 = arith.mulf %50, %48 : vector<8x128xf32>
    %52 = arith.addf %36, %51 : vector<8x128xf32>
    %c1_i32 = arith.constant 1 : i32
    %53 = tpu.dynamic_rotate %3 by %c1_i32 dim 1 : vector<8x128xf32>, i32 -> vector<8x128xf32>
    %c-1_i32 = arith.constant -1 : i32
    %54 = vector.broadcast %c-1_i32 : i32 to vector<8x128xi32>
    %55 = arith.addi %5, %54 : vector<8x128xi32>
    %c0_i32_16 = arith.constant 0 : i32
    %56 = vector.broadcast %c0_i32_16 : i32 to vector<8x128xi32>
    %57 = arith.cmpi sge, %55, %56 : vector<8x128xi32>
    %c-1_i32_17 = arith.constant -1 : i32
    %58 = vector.broadcast %c-1_i32_17 : i32 to vector<8x128xi32>
    %59 = arith.addi %5, %58 : vector<8x128xi32>
    %c128_i32_18 = arith.constant 128 : i32
    %60 = vector.broadcast %c128_i32_18 : i32 to vector<8x128xi32>
    %61 = arith.cmpi slt, %59, %60 : vector<8x128xi32>
    %62 = arith.andi %57, %61 : vector<8x128xi1>
    %cst_19 = arith.constant 0.000000e+00 : f32
    %63 = vector.broadcast %cst_19 : f32 to vector<8x128xf32>
    %64 = arith.select %62, %53, %63 : vector<8x128xi1>, vector<8x128xf32>
    %65 = vector.extract_strided_slice %4 {offsets = [0, 3], sizes = [8, 1], strides = [1, 1]} : vector<8x9xf32> to vector<8x1xf32>
    %66 = vector.broadcast %65 : vector<8x1xf32> to vector<8x128xf32>
    %67 = arith.mulf %66, %64 : vector<8x128xf32>
    %68 = arith.addf %52, %67 : vector<8x128xf32>
    %69 = vector.extract_strided_slice %4 {offsets = [0, 4], sizes = [8, 1], strides = [1, 1]} : vector<8x9xf32> to vector<8x1xf32>
    %70 = vector.broadcast %69 : vector<8x1xf32> to vector<8x128xf32>
    %71 = arith.mulf %70, %3 : vector<8x128xf32>
    %72 = arith.addf %68, %71 : vector<8x128xf32>
    %c127_i32 = arith.constant 127 : i32
    %73 = tpu.dynamic_rotate %3 by %c127_i32 dim 1 : vector<8x128xf32>, i32 -> vector<8x128xf32>
    %c1_i32_20 = arith.constant 1 : i32
    %74 = vector.broadcast %c1_i32_20 : i32 to vector<8x128xi32>
    %75 = arith.addi %5, %74 : vector<8x128xi32>
    %c0_i32_21 = arith.constant 0 : i32
    %76 = vector.broadcast %c0_i32_21 : i32 to vector<8x128xi32>
    %77 = arith.cmpi sge, %75, %76 : vector<8x128xi32>
    %c1_i32_22 = arith.constant 1 : i32
    %78 = vector.broadcast %c1_i32_22 : i32 to vector<8x128xi32>
    %79 = arith.addi %5, %78 : vector<8x128xi32>
    %c128_i32_23 = arith.constant 128 : i32
    %80 = vector.broadcast %c128_i32_23 : i32 to vector<8x128xi32>
    %81 = arith.cmpi slt, %79, %80 : vector<8x128xi32>
    %82 = arith.andi %77, %81 : vector<8x128xi1>
    %cst_24 = arith.constant 0.000000e+00 : f32
    %83 = vector.broadcast %cst_24 : f32 to vector<8x128xf32>
    %84 = arith.select %82, %73, %83 : vector<8x128xi1>, vector<8x128xf32>
    %85 = vector.extract_strided_slice %4 {offsets = [0, 5], sizes = [8, 1], strides = [1, 1]} : vector<8x9xf32> to vector<8x1xf32>
    %86 = vector.broadcast %85 : vector<8x1xf32> to vector<8x128xf32>
    %87 = arith.mulf %86, %84 : vector<8x128xf32>
    %88 = arith.addf %72, %87 : vector<8x128xf32>
    %c126_i32 = arith.constant 126 : i32
    %89 = tpu.dynamic_rotate %3 by %c126_i32 dim 1 : vector<8x128xf32>, i32 -> vector<8x128xf32>
    %c2_i32_25 = arith.constant 2 : i32
    %90 = vector.broadcast %c2_i32_25 : i32 to vector<8x128xi32>
    %91 = arith.addi %5, %90 : vector<8x128xi32>
    %c0_i32_26 = arith.constant 0 : i32
    %92 = vector.broadcast %c0_i32_26 : i32 to vector<8x128xi32>
    %93 = arith.cmpi sge, %91, %92 : vector<8x128xi32>
    %c2_i32_27 = arith.constant 2 : i32
    %94 = vector.broadcast %c2_i32_27 : i32 to vector<8x128xi32>
    %95 = arith.addi %5, %94 : vector<8x128xi32>
    %c128_i32_28 = arith.constant 128 : i32
    %96 = vector.broadcast %c128_i32_28 : i32 to vector<8x128xi32>
    %97 = arith.cmpi slt, %95, %96 : vector<8x128xi32>
    %98 = arith.andi %93, %97 : vector<8x128xi1>
    %cst_29 = arith.constant 0.000000e+00 : f32
    %99 = vector.broadcast %cst_29 : f32 to vector<8x128xf32>
    %100 = arith.select %98, %89, %99 : vector<8x128xi1>, vector<8x128xf32>
    %101 = vector.extract_strided_slice %4 {offsets = [0, 6], sizes = [8, 1], strides = [1, 1]} : vector<8x9xf32> to vector<8x1xf32>
    %102 = vector.broadcast %101 : vector<8x1xf32> to vector<8x128xf32>
    %103 = arith.mulf %102, %100 : vector<8x128xf32>
    %104 = arith.addf %88, %103 : vector<8x128xf32>
    %c125_i32 = arith.constant 125 : i32
    %105 = tpu.dynamic_rotate %3 by %c125_i32 dim 1 : vector<8x128xf32>, i32 -> vector<8x128xf32>
    %c3_i32_30 = arith.constant 3 : i32
    %106 = vector.broadcast %c3_i32_30 : i32 to vector<8x128xi32>
    %107 = arith.addi %5, %106 : vector<8x128xi32>
    %c0_i32_31 = arith.constant 0 : i32
    %108 = vector.broadcast %c0_i32_31 : i32 to vector<8x128xi32>
    %109 = arith.cmpi sge, %107, %108 : vector<8x128xi32>
    %c3_i32_32 = arith.constant 3 : i32
    %110 = vector.broadcast %c3_i32_32 : i32 to vector<8x128xi32>
    %111 = arith.addi %5, %110 : vector<8x128xi32>
    %c128_i32_33 = arith.constant 128 : i32
    %112 = vector.broadcast %c128_i32_33 : i32 to vector<8x128xi32>
    %113 = arith.cmpi slt, %111, %112 : vector<8x128xi32>
    %114 = arith.andi %109, %113 : vector<8x128xi1>
    %cst_34 = arith.constant 0.000000e+00 : f32
    %115 = vector.broadcast %cst_34 : f32 to vector<8x128xf32>
    %116 = arith.select %114, %105, %115 : vector<8x128xi1>, vector<8x128xf32>
    %117 = vector.extract_strided_slice %4 {offsets = [0, 7], sizes = [8, 1], strides = [1, 1]} : vector<8x9xf32> to vector<8x1xf32>
    %118 = vector.broadcast %117 : vector<8x1xf32> to vector<8x128xf32>
    %119 = arith.mulf %118, %116 : vector<8x128xf32>
    %120 = arith.addf %104, %119 : vector<8x128xf32>
    %c124_i32 = arith.constant 124 : i32
    %121 = tpu.dynamic_rotate %3 by %c124_i32 dim 1 : vector<8x128xf32>, i32 -> vector<8x128xf32>
    %c4_i32_35 = arith.constant 4 : i32
    %122 = vector.broadcast %c4_i32_35 : i32 to vector<8x128xi32>
    %123 = arith.addi %5, %122 : vector<8x128xi32>
    %c0_i32_36 = arith.constant 0 : i32
    %124 = vector.broadcast %c0_i32_36 : i32 to vector<8x128xi32>
    %125 = arith.cmpi sge, %123, %124 : vector<8x128xi32>
    %c4_i32_37 = arith.constant 4 : i32
    %126 = vector.broadcast %c4_i32_37 : i32 to vector<8x128xi32>
    %127 = arith.addi %5, %126 : vector<8x128xi32>
    %c128_i32_38 = arith.constant 128 : i32
    %128 = vector.broadcast %c128_i32_38 : i32 to vector<8x128xi32>
    %129 = arith.cmpi slt, %127, %128 : vector<8x128xi32>
    %130 = arith.andi %125, %129 : vector<8x128xi1>
    %cst_39 = arith.constant 0.000000e+00 : f32
    %131 = vector.broadcast %cst_39 : f32 to vector<8x128xf32>
    %132 = arith.select %130, %121, %131 : vector<8x128xi1>, vector<8x128xf32>
    %133 = vector.extract_strided_slice %4 {offsets = [0, 8], sizes = [8, 1], strides = [1, 1]} : vector<8x9xf32> to vector<8x1xf32>
    %134 = vector.broadcast %133 : vector<8x1xf32> to vector<8x128xf32>
    %135 = arith.mulf %134, %132 : vector<8x128xf32>
    %136 = arith.addf %120, %135 : vector<8x128xf32>
    %c0_40 = arith.constant 0 : index
    %c0_41 = arith.constant 0 : index
    %137 = vector.load %arg5[%c0_40, %c0_41] : memref<8x3xf32, #tpu.memory_space<vmem>>, vector<8x3xf32>
    %138 = tpu.iota {dimensions = array<i32: 1>} : vector<8x128xi32>
    %c5_i32 = arith.constant 5 : i32
    %139 = tpu.dynamic_rotate %136 by %c5_i32 dim 1 : vector<8x128xf32>, i32 -> vector<8x128xf32>
    %c-5_i32 = arith.constant -5 : i32
    %140 = vector.broadcast %c-5_i32 : i32 to vector<8x128xi32>
    %141 = arith.addi %138, %140 : vector<8x128xi32>
    %c0_i32_42 = arith.constant 0 : i32
    %142 = vector.broadcast %c0_i32_42 : i32 to vector<8x128xi32>
    %143 = arith.cmpi sge, %141, %142 : vector<8x128xi32>
    %c-5_i32_43 = arith.constant -5 : i32
    %144 = vector.broadcast %c-5_i32_43 : i32 to vector<8x128xi32>
    %145 = arith.addi %138, %144 : vector<8x128xi32>
    %c128_i32_44 = arith.constant 128 : i32
    %146 = vector.broadcast %c128_i32_44 : i32 to vector<8x128xi32>
    %147 = arith.cmpi slt, %145, %146 : vector<8x128xi32>
    %148 = arith.andi %143, %147 : vector<8x128xi1>
    %cst_45 = arith.constant 0.000000e+00 : f32
    %149 = vector.broadcast %cst_45 : f32 to vector<8x128xf32>
    %150 = arith.select %148, %139, %149 : vector<8x128xi1>, vector<8x128xf32>
    %151 = vector.extract_strided_slice %137 {offsets = [0, 0], sizes = [8, 1], strides = [1, 1]} : vector<8x3xf32> to vector<8x1xf32>
    %152 = vector.broadcast %151 : vector<8x1xf32> to vector<8x128xf32>
    %153 = arith.mulf %152, %150 : vector<8x128xf32>
    %154 = vector.extract_strided_slice %137 {offsets = [0, 1], sizes = [8, 1], strides = [1, 1]} : vector<8x3xf32> to vector<8x1xf32>
    %155 = vector.broadcast %154 : vector<8x1xf32> to vector<8x128xf32>
    %156 = arith.mulf %155, %136 : vector<8x128xf32>
    %157 = arith.addf %153, %156 : vector<8x128xf32>
    %c123_i32 = arith.constant 123 : i32
    %158 = tpu.dynamic_rotate %136 by %c123_i32 dim 1 : vector<8x128xf32>, i32 -> vector<8x128xf32>
    %c5_i32_46 = arith.constant 5 : i32
    %159 = vector.broadcast %c5_i32_46 : i32 to vector<8x128xi32>
    %160 = arith.addi %138, %159 : vector<8x128xi32>
    %c0_i32_47 = arith.constant 0 : i32
    %161 = vector.broadcast %c0_i32_47 : i32 to vector<8x128xi32>
    %162 = arith.cmpi sge, %160, %161 : vector<8x128xi32>
    %c5_i32_48 = arith.constant 5 : i32
    %163 = vector.broadcast %c5_i32_48 : i32 to vector<8x128xi32>
    %164 = arith.addi %138, %163 : vector<8x128xi32>
    %c128_i32_49 = arith.constant 128 : i32
    %165 = vector.broadcast %c128_i32_49 : i32 to vector<8x128xi32>
    %166 = arith.cmpi slt, %164, %165 : vector<8x128xi32>
    %167 = arith.andi %162, %166 : vector<8x128xi1>
    %cst_50 = arith.constant 0.000000e+00 : f32
    %168 = vector.broadcast %cst_50 : f32 to vector<8x128xf32>
    %169 = arith.select %167, %158, %168 : vector<8x128xi1>, vector<8x128xf32>
    %170 = vector.extract_strided_slice %137 {offsets = [0, 2], sizes = [8, 1], strides = [1, 1]} : vector<8x3xf32> to vector<8x1xf32>
    %171 = vector.broadcast %170 : vector<8x1xf32> to vector<8x128xf32>
    %172 = arith.mulf %171, %169 : vector<8x128xf32>
    %173 = arith.addf %157, %172 : vector<8x128xf32>
    %c0_51 = arith.constant 0 : index
    %c0_52 = arith.constant 0 : index
    %174 = vector.load %arg6[%c0_51, %c0_52] : memref<32x8xf32, #tpu.memory_space<vmem>>, vector<32x8xf32>
    %cst_53 = arith.constant dense<0.000000e+00> : vector<32x128xf32>
    %175 = tpu.matmul %174, %173, %cst_53 {dimension_numbers = #tpu.dot_dimension_numbers<[1], [0], [0], [1], [0, 0, 1, 1], [], []>} : vector<32x8xf32>, vector<8x128xf32>, vector<32x128xf32> -> vector<32x128xf32>
    %c0_54 = arith.constant 0 : index
    %c0_55 = arith.constant 0 : index
    %176 = vector.load %arg7[%c0_54, %c0_55] : memref<8x5xf32, #tpu.memory_space<vmem>>, vector<8x5xf32>
    %177 = tpu.iota {dimensions = array<i32: 1>} : vector<8x128xi32>
    %c2_i32_56 = arith.constant 2 : i32
    %178 = tpu.dynamic_rotate %3 by %c2_i32_56 dim 1 : vector<8x128xf32>, i32 -> vector<8x128xf32>
    %c-2_i32_57 = arith.constant -2 : i32
    %179 = vector.broadcast %c-2_i32_57 : i32 to vector<8x128xi32>
    %180 = arith.addi %177, %179 : vector<8x128xi32>
    %c0_i32_58 = arith.constant 0 : i32
    %181 = vector.broadcast %c0_i32_58 : i32 to vector<8x128xi32>
    %182 = arith.cmpi sge, %180, %181 : vector<8x128xi32>
    %c-2_i32_59 = arith.constant -2 : i32
    %183 = vector.broadcast %c-2_i32_59 : i32 to vector<8x128xi32>
    %184 = arith.addi %177, %183 : vector<8x128xi32>
    %c128_i32_60 = arith.constant 128 : i32
    %185 = vector.broadcast %c128_i32_60 : i32 to vector<8x128xi32>
    %186 = arith.cmpi slt, %184, %185 : vector<8x128xi32>
    %187 = arith.andi %182, %186 : vector<8x128xi1>
    %cst_61 = arith.constant 0.000000e+00 : f32
    %188 = vector.broadcast %cst_61 : f32 to vector<8x128xf32>
    %189 = arith.select %187, %178, %188 : vector<8x128xi1>, vector<8x128xf32>
    %190 = vector.extract_strided_slice %176 {offsets = [0, 0], sizes = [8, 1], strides = [1, 1]} : vector<8x5xf32> to vector<8x1xf32>
    %191 = vector.broadcast %190 : vector<8x1xf32> to vector<8x128xf32>
    %192 = arith.mulf %191, %189 : vector<8x128xf32>
    %c1_i32_62 = arith.constant 1 : i32
    %193 = tpu.dynamic_rotate %3 by %c1_i32_62 dim 1 : vector<8x128xf32>, i32 -> vector<8x128xf32>
    %c-1_i32_63 = arith.constant -1 : i32
    %194 = vector.broadcast %c-1_i32_63 : i32 to vector<8x128xi32>
    %195 = arith.addi %177, %194 : vector<8x128xi32>
    %c0_i32_64 = arith.constant 0 : i32
    %196 = vector.broadcast %c0_i32_64 : i32 to vector<8x128xi32>
    %197 = arith.cmpi sge, %195, %196 : vector<8x128xi32>
    %c-1_i32_65 = arith.constant -1 : i32
    %198 = vector.broadcast %c-1_i32_65 : i32 to vector<8x128xi32>
    %199 = arith.addi %177, %198 : vector<8x128xi32>
    %c128_i32_66 = arith.constant 128 : i32
    %200 = vector.broadcast %c128_i32_66 : i32 to vector<8x128xi32>
    %201 = arith.cmpi slt, %199, %200 : vector<8x128xi32>
    %202 = arith.andi %197, %201 : vector<8x128xi1>
    %cst_67 = arith.constant 0.000000e+00 : f32
    %203 = vector.broadcast %cst_67 : f32 to vector<8x128xf32>
    %204 = arith.select %202, %193, %203 : vector<8x128xi1>, vector<8x128xf32>
    %205 = vector.extract_strided_slice %176 {offsets = [0, 1], sizes = [8, 1], strides = [1, 1]} : vector<8x5xf32> to vector<8x1xf32>
    %206 = vector.broadcast %205 : vector<8x1xf32> to vector<8x128xf32>
    %207 = arith.mulf %206, %204 : vector<8x128xf32>
    %208 = arith.addf %192, %207 : vector<8x128xf32>
    %209 = vector.extract_strided_slice %176 {offsets = [0, 2], sizes = [8, 1], strides = [1, 1]} : vector<8x5xf32> to vector<8x1xf32>
    %210 = vector.broadcast %209 : vector<8x1xf32> to vector<8x128xf32>
    %211 = arith.mulf %210, %3 : vector<8x128xf32>
    %212 = arith.addf %208, %211 : vector<8x128xf32>
    %c127_i32_68 = arith.constant 127 : i32
    %213 = tpu.dynamic_rotate %3 by %c127_i32_68 dim 1 : vector<8x128xf32>, i32 -> vector<8x128xf32>
    %c1_i32_69 = arith.constant 1 : i32
    %214 = vector.broadcast %c1_i32_69 : i32 to vector<8x128xi32>
    %215 = arith.addi %177, %214 : vector<8x128xi32>
    %c0_i32_70 = arith.constant 0 : i32
    %216 = vector.broadcast %c0_i32_70 : i32 to vector<8x128xi32>
    %217 = arith.cmpi sge, %215, %216 : vector<8x128xi32>
    %c1_i32_71 = arith.constant 1 : i32
    %218 = vector.broadcast %c1_i32_71 : i32 to vector<8x128xi32>
    %219 = arith.addi %177, %218 : vector<8x128xi32>
    %c128_i32_72 = arith.constant 128 : i32
    %220 = vector.broadcast %c128_i32_72 : i32 to vector<8x128xi32>
    %221 = arith.cmpi slt, %219, %220 : vector<8x128xi32>
    %222 = arith.andi %217, %221 : vector<8x128xi1>
    %cst_73 = arith.constant 0.000000e+00 : f32
    %223 = vector.broadcast %cst_73 : f32 to vector<8x128xf32>
    %224 = arith.select %222, %213, %223 : vector<8x128xi1>, vector<8x128xf32>
    %225 = vector.extract_strided_slice %176 {offsets = [0, 3], sizes = [8, 1], strides = [1, 1]} : vector<8x5xf32> to vector<8x1xf32>
    %226 = vector.broadcast %225 : vector<8x1xf32> to vector<8x128xf32>
    %227 = arith.mulf %226, %224 : vector<8x128xf32>
    %228 = arith.addf %212, %227 : vector<8x128xf32>
    %c126_i32_74 = arith.constant 126 : i32
    %229 = tpu.dynamic_rotate %3 by %c126_i32_74 dim 1 : vector<8x128xf32>, i32 -> vector<8x128xf32>
    %c2_i32_75 = arith.constant 2 : i32
    %230 = vector.broadcast %c2_i32_75 : i32 to vector<8x128xi32>
    %231 = arith.addi %177, %230 : vector<8x128xi32>
    %c0_i32_76 = arith.constant 0 : i32
    %232 = vector.broadcast %c0_i32_76 : i32 to vector<8x128xi32>
    %233 = arith.cmpi sge, %231, %232 : vector<8x128xi32>
    %c2_i32_77 = arith.constant 2 : i32
    %234 = vector.broadcast %c2_i32_77 : i32 to vector<8x128xi32>
    %235 = arith.addi %177, %234 : vector<8x128xi32>
    %c128_i32_78 = arith.constant 128 : i32
    %236 = vector.broadcast %c128_i32_78 : i32 to vector<8x128xi32>
    %237 = arith.cmpi slt, %235, %236 : vector<8x128xi32>
    %238 = arith.andi %233, %237 : vector<8x128xi1>
    %cst_79 = arith.constant 0.000000e+00 : f32
    %239 = vector.broadcast %cst_79 : f32 to vector<8x128xf32>
    %240 = arith.select %238, %229, %239 : vector<8x128xi1>, vector<8x128xf32>
    %241 = vector.extract_strided_slice %176 {offsets = [0, 4], sizes = [8, 1], strides = [1, 1]} : vector<8x5xf32> to vector<8x1xf32>
    %242 = vector.broadcast %241 : vector<8x1xf32> to vector<8x128xf32>
    %243 = arith.mulf %242, %240 : vector<8x128xf32>
    %244 = arith.addf %228, %243 : vector<8x128xf32>
    %c0_80 = arith.constant 0 : index
    %c0_81 = arith.constant 0 : index
    %245 = vector.load %arg8[%c0_80, %c0_81] : memref<8x3xf32, #tpu.memory_space<vmem>>, vector<8x3xf32>
    %246 = tpu.iota {dimensions = array<i32: 1>} : vector<8x128xi32>
    %c3_i32_82 = arith.constant 3 : i32
    %247 = tpu.dynamic_rotate %244 by %c3_i32_82 dim 1 : vector<8x128xf32>, i32 -> vector<8x128xf32>
    %c-3_i32_83 = arith.constant -3 : i32
    %248 = vector.broadcast %c-3_i32_83 : i32 to vector<8x128xi32>
    %249 = arith.addi %246, %248 : vector<8x128xi32>
    %c0_i32_84 = arith.constant 0 : i32
    %250 = vector.broadcast %c0_i32_84 : i32 to vector<8x128xi32>
    %251 = arith.cmpi sge, %249, %250 : vector<8x128xi32>
    %c-3_i32_85 = arith.constant -3 : i32
    %252 = vector.broadcast %c-3_i32_85 : i32 to vector<8x128xi32>
    %253 = arith.addi %246, %252 : vector<8x128xi32>
    %c128_i32_86 = arith.constant 128 : i32
    %254 = vector.broadcast %c128_i32_86 : i32 to vector<8x128xi32>
    %255 = arith.cmpi slt, %253, %254 : vector<8x128xi32>
    %256 = arith.andi %251, %255 : vector<8x128xi1>
    %cst_87 = arith.constant 0.000000e+00 : f32
    %257 = vector.broadcast %cst_87 : f32 to vector<8x128xf32>
    %258 = arith.select %256, %247, %257 : vector<8x128xi1>, vector<8x128xf32>
    %259 = vector.extract_strided_slice %245 {offsets = [0, 0], sizes = [8, 1], strides = [1, 1]} : vector<8x3xf32> to vector<8x1xf32>
    %260 = vector.broadcast %259 : vector<8x1xf32> to vector<8x128xf32>
    %261 = arith.mulf %260, %258 : vector<8x128xf32>
    %262 = vector.extract_strided_slice %245 {offsets = [0, 1], sizes = [8, 1], strides = [1, 1]} : vector<8x3xf32> to vector<8x1xf32>
    %263 = vector.broadcast %262 : vector<8x1xf32> to vector<8x128xf32>
    %264 = arith.mulf %263, %244 : vector<8x128xf32>
    %265 = arith.addf %261, %264 : vector<8x128xf32>
    %c125_i32_88 = arith.constant 125 : i32
    %266 = tpu.dynamic_rotate %244 by %c125_i32_88 dim 1 : vector<8x128xf32>, i32 -> vector<8x128xf32>
    %c3_i32_89 = arith.constant 3 : i32
    %267 = vector.broadcast %c3_i32_89 : i32 to vector<8x128xi32>
    %268 = arith.addi %246, %267 : vector<8x128xi32>
    %c0_i32_90 = arith.constant 0 : i32
    %269 = vector.broadcast %c0_i32_90 : i32 to vector<8x128xi32>
    %270 = arith.cmpi sge, %268, %269 : vector<8x128xi32>
    %c3_i32_91 = arith.constant 3 : i32
    %271 = vector.broadcast %c3_i32_91 : i32 to vector<8x128xi32>
    %272 = arith.addi %246, %271 : vector<8x128xi32>
    %c128_i32_92 = arith.constant 128 : i32
    %273 = vector.broadcast %c128_i32_92 : i32 to vector<8x128xi32>
    %274 = arith.cmpi slt, %272, %273 : vector<8x128xi32>
    %275 = arith.andi %270, %274 : vector<8x128xi1>
    %cst_93 = arith.constant 0.000000e+00 : f32
    %276 = vector.broadcast %cst_93 : f32 to vector<8x128xf32>
    %277 = arith.select %275, %266, %276 : vector<8x128xi1>, vector<8x128xf32>
    %278 = vector.extract_strided_slice %245 {offsets = [0, 2], sizes = [8, 1], strides = [1, 1]} : vector<8x3xf32> to vector<8x1xf32>
    %279 = vector.broadcast %278 : vector<8x1xf32> to vector<8x128xf32>
    %280 = arith.mulf %279, %277 : vector<8x128xf32>
    %281 = arith.addf %265, %280 : vector<8x128xf32>
    %c0_94 = arith.constant 0 : index
    %c0_95 = arith.constant 0 : index
    %282 = vector.load %arg9[%c0_94, %c0_95] : memref<32x8xf32, #tpu.memory_space<vmem>>, vector<32x8xf32>
    %cst_96 = arith.constant dense<0.000000e+00> : vector<32x128xf32>
    %283 = tpu.matmul %282, %281, %cst_96 {dimension_numbers = #tpu.dot_dimension_numbers<[1], [0], [0], [1], [0, 0, 1, 1], [], []>} : vector<32x8xf32>, vector<8x128xf32>, vector<32x128xf32> -> vector<32x128xf32>
    %284 = arith.addf %175, %283 : vector<32x128xf32>
    %c0_97 = arith.constant 0 : index
    %c0_98 = arith.constant 0 : index
    %285 = vector.load %arg10[%c0_97, %c0_98] : memref<8x3xf32, #tpu.memory_space<vmem>>, vector<8x3xf32>
    %286 = tpu.iota {dimensions = array<i32: 1>} : vector<8x128xi32>
    %c1_i32_99 = arith.constant 1 : i32
    %287 = tpu.dynamic_rotate %3 by %c1_i32_99 dim 1 : vector<8x128xf32>, i32 -> vector<8x128xf32>
    %c-1_i32_100 = arith.constant -1 : i32
    %288 = vector.broadcast %c-1_i32_100 : i32 to vector<8x128xi32>
    %289 = arith.addi %286, %288 : vector<8x128xi32>
    %c0_i32_101 = arith.constant 0 : i32
    %290 = vector.broadcast %c0_i32_101 : i32 to vector<8x128xi32>
    %291 = arith.cmpi sge, %289, %290 : vector<8x128xi32>
    %c-1_i32_102 = arith.constant -1 : i32
    %292 = vector.broadcast %c-1_i32_102 : i32 to vector<8x128xi32>
    %293 = arith.addi %286, %292 : vector<8x128xi32>
    %c128_i32_103 = arith.constant 128 : i32
    %294 = vector.broadcast %c128_i32_103 : i32 to vector<8x128xi32>
    %295 = arith.cmpi slt, %293, %294 : vector<8x128xi32>
    %296 = arith.andi %291, %295 : vector<8x128xi1>
    %cst_104 = arith.constant 0.000000e+00 : f32
    %297 = vector.broadcast %cst_104 : f32 to vector<8x128xf32>
    %298 = arith.select %296, %287, %297 : vector<8x128xi1>, vector<8x128xf32>
    %299 = vector.extract_strided_slice %285 {offsets = [0, 0], sizes = [8, 1], strides = [1, 1]} : vector<8x3xf32> to vector<8x1xf32>
    %300 = vector.broadcast %299 : vector<8x1xf32> to vector<8x128xf32>
    %301 = arith.mulf %300, %298 : vector<8x128xf32>
    %302 = vector.extract_strided_slice %285 {offsets = [0, 1], sizes = [8, 1], strides = [1, 1]} : vector<8x3xf32> to vector<8x1xf32>
    %303 = vector.broadcast %302 : vector<8x1xf32> to vector<8x128xf32>
    %304 = arith.mulf %303, %3 : vector<8x128xf32>
    %305 = arith.addf %301, %304 : vector<8x128xf32>
    %c127_i32_105 = arith.constant 127 : i32
    %306 = tpu.dynamic_rotate %3 by %c127_i32_105 dim 1 : vector<8x128xf32>, i32 -> vector<8x128xf32>
    %c1_i32_106 = arith.constant 1 : i32
    %307 = vector.broadcast %c1_i32_106 : i32 to vector<8x128xi32>
    %308 = arith.addi %286, %307 : vector<8x128xi32>
    %c0_i32_107 = arith.constant 0 : i32
    %309 = vector.broadcast %c0_i32_107 : i32 to vector<8x128xi32>
    %310 = arith.cmpi sge, %308, %309 : vector<8x128xi32>
    %c1_i32_108 = arith.constant 1 : i32
    %311 = vector.broadcast %c1_i32_108 : i32 to vector<8x128xi32>
    %312 = arith.addi %286, %311 : vector<8x128xi32>
    %c128_i32_109 = arith.constant 128 : i32
    %313 = vector.broadcast %c128_i32_109 : i32 to vector<8x128xi32>
    %314 = arith.cmpi slt, %312, %313 : vector<8x128xi32>
    %315 = arith.andi %310, %314 : vector<8x128xi1>
    %cst_110 = arith.constant 0.000000e+00 : f32
    %316 = vector.broadcast %cst_110 : f32 to vector<8x128xf32>
    %317 = arith.select %315, %306, %316 : vector<8x128xi1>, vector<8x128xf32>
    %318 = vector.extract_strided_slice %285 {offsets = [0, 2], sizes = [8, 1], strides = [1, 1]} : vector<8x3xf32> to vector<8x1xf32>
    %319 = vector.broadcast %318 : vector<8x1xf32> to vector<8x128xf32>
    %320 = arith.mulf %319, %317 : vector<8x128xf32>
    %321 = arith.addf %305, %320 : vector<8x128xf32>
    %c0_111 = arith.constant 0 : index
    %c0_112 = arith.constant 0 : index
    %322 = vector.load %arg11[%c0_111, %c0_112] : memref<8x3xf32, #tpu.memory_space<vmem>>, vector<8x3xf32>
    %323 = tpu.iota {dimensions = array<i32: 1>} : vector<8x128xi32>
    %c2_i32_113 = arith.constant 2 : i32
    %324 = tpu.dynamic_rotate %321 by %c2_i32_113 dim 1 : vector<8x128xf32>, i32 -> vector<8x128xf32>
    %c-2_i32_114 = arith.constant -2 : i32
    %325 = vector.broadcast %c-2_i32_114 : i32 to vector<8x128xi32>
    %326 = arith.addi %323, %325 : vector<8x128xi32>
    %c0_i32_115 = arith.constant 0 : i32
    %327 = vector.broadcast %c0_i32_115 : i32 to vector<8x128xi32>
    %328 = arith.cmpi sge, %326, %327 : vector<8x128xi32>
    %c-2_i32_116 = arith.constant -2 : i32
    %329 = vector.broadcast %c-2_i32_116 : i32 to vector<8x128xi32>
    %330 = arith.addi %323, %329 : vector<8x128xi32>
    %c128_i32_117 = arith.constant 128 : i32
    %331 = vector.broadcast %c128_i32_117 : i32 to vector<8x128xi32>
    %332 = arith.cmpi slt, %330, %331 : vector<8x128xi32>
    %333 = arith.andi %328, %332 : vector<8x128xi1>
    %cst_118 = arith.constant 0.000000e+00 : f32
    %334 = vector.broadcast %cst_118 : f32 to vector<8x128xf32>
    %335 = arith.select %333, %324, %334 : vector<8x128xi1>, vector<8x128xf32>
    %336 = vector.extract_strided_slice %322 {offsets = [0, 0], sizes = [8, 1], strides = [1, 1]} : vector<8x3xf32> to vector<8x1xf32>
    %337 = vector.broadcast %336 : vector<8x1xf32> to vector<8x128xf32>
    %338 = arith.mulf %337, %335 : vector<8x128xf32>
    %339 = vector.extract_strided_slice %322 {offsets = [0, 1], sizes = [8, 1], strides = [1, 1]} : vector<8x3xf32> to vector<8x1xf32>
    %340 = vector.broadcast %339 : vector<8x1xf32> to vector<8x128xf32>
    %341 = arith.mulf %340, %321 : vector<8x128xf32>
    %342 = arith.addf %338, %341 : vector<8x128xf32>
    %c126_i32_119 = arith.constant 126 : i32
    %343 = tpu.dynamic_rotate %321 by %c126_i32_119 dim 1 : vector<8x128xf32>, i32 -> vector<8x128xf32>
    %c2_i32_120 = arith.constant 2 : i32
    %344 = vector.broadcast %c2_i32_120 : i32 to vector<8x128xi32>
    %345 = arith.addi %323, %344 : vector<8x128xi32>
    %c0_i32_121 = arith.constant 0 : i32
    %346 = vector.broadcast %c0_i32_121 : i32 to vector<8x128xi32>
    %347 = arith.cmpi sge, %345, %346 : vector<8x128xi32>
    %c2_i32_122 = arith.constant 2 : i32
    %348 = vector.broadcast %c2_i32_122 : i32 to vector<8x128xi32>
    %349 = arith.addi %323, %348 : vector<8x128xi32>
    %c128_i32_123 = arith.constant 128 : i32
    %350 = vector.broadcast %c128_i32_123 : i32 to vector<8x128xi32>
    %351 = arith.cmpi slt, %349, %350 : vector<8x128xi32>
    %352 = arith.andi %347, %351 : vector<8x128xi1>
    %cst_124 = arith.constant 0.000000e+00 : f32
    %353 = vector.broadcast %cst_124 : f32 to vector<8x128xf32>
    %354 = arith.select %352, %343, %353 : vector<8x128xi1>, vector<8x128xf32>
    %355 = vector.extract_strided_slice %322 {offsets = [0, 2], sizes = [8, 1], strides = [1, 1]} : vector<8x3xf32> to vector<8x1xf32>
    %356 = vector.broadcast %355 : vector<8x1xf32> to vector<8x128xf32>
    %357 = arith.mulf %356, %354 : vector<8x128xf32>
    %358 = arith.addf %342, %357 : vector<8x128xf32>
    %c0_125 = arith.constant 0 : index
    %c0_126 = arith.constant 0 : index
    %359 = vector.load %arg12[%c0_125, %c0_126] : memref<32x8xf32, #tpu.memory_space<vmem>>, vector<32x8xf32>
    %cst_127 = arith.constant dense<0.000000e+00> : vector<32x128xf32>
    %360 = tpu.matmul %359, %358, %cst_127 {dimension_numbers = #tpu.dot_dimension_numbers<[1], [0], [0], [1], [0, 0, 1, 1], [], []>} : vector<32x8xf32>, vector<8x128xf32>, vector<32x128xf32> -> vector<32x128xf32>
    %361 = arith.addf %284, %360 : vector<32x128xf32>
    %362 = tpu.iota {dimensions = array<i32: 1>} : vector<16x128xi32>
    %c1_i32_128 = arith.constant 1 : i32
    %363 = tpu.dynamic_rotate %1 by %c1_i32_128 dim 1 : vector<16x128xf32>, i32 -> vector<16x128xf32>
    %c-1_i32_129 = arith.constant -1 : i32
    %364 = vector.broadcast %c-1_i32_129 : i32 to vector<16x128xi32>
    %365 = arith.addi %362, %364 : vector<16x128xi32>
    %c0_i32_130 = arith.constant 0 : i32
    %366 = vector.broadcast %c0_i32_130 : i32 to vector<16x128xi32>
    %367 = arith.cmpi sge, %365, %366 : vector<16x128xi32>
    %c-1_i32_131 = arith.constant -1 : i32
    %368 = vector.broadcast %c-1_i32_131 : i32 to vector<16x128xi32>
    %369 = arith.addi %362, %368 : vector<16x128xi32>
    %c128_i32_132 = arith.constant 128 : i32
    %370 = vector.broadcast %c128_i32_132 : i32 to vector<16x128xi32>
    %371 = arith.cmpi slt, %369, %370 : vector<16x128xi32>
    %372 = arith.andi %367, %371 : vector<16x128xi1>
    %cst_133 = arith.constant 0xFF800000 : f32
    %373 = vector.broadcast %cst_133 : f32 to vector<16x128xf32>
    %374 = arith.select %372, %363, %373 : vector<16x128xi1>, vector<16x128xf32>
    %375 = arith.maximumf %374, %1 : vector<16x128xf32>
    %c127_i32_134 = arith.constant 127 : i32
    %376 = tpu.dynamic_rotate %1 by %c127_i32_134 dim 1 : vector<16x128xf32>, i32 -> vector<16x128xf32>
    %c1_i32_135 = arith.constant 1 : i32
    %377 = vector.broadcast %c1_i32_135 : i32 to vector<16x128xi32>
    %378 = arith.addi %362, %377 : vector<16x128xi32>
    %c0_i32_136 = arith.constant 0 : i32
    %379 = vector.broadcast %c0_i32_136 : i32 to vector<16x128xi32>
    %380 = arith.cmpi sge, %378, %379 : vector<16x128xi32>
    %c1_i32_137 = arith.constant 1 : i32
    %381 = vector.broadcast %c1_i32_137 : i32 to vector<16x128xi32>
    %382 = arith.addi %362, %381 : vector<16x128xi32>
    %c128_i32_138 = arith.constant 128 : i32
    %383 = vector.broadcast %c128_i32_138 : i32 to vector<16x128xi32>
    %384 = arith.cmpi slt, %382, %383 : vector<16x128xi32>
    %385 = arith.andi %380, %384 : vector<16x128xi1>
    %cst_139 = arith.constant 0xFF800000 : f32
    %386 = vector.broadcast %cst_139 : f32 to vector<16x128xf32>
    %387 = arith.select %385, %376, %386 : vector<16x128xi1>, vector<16x128xf32>
    %388 = arith.maximumf %375, %387 : vector<16x128xf32>
    %c0_140 = arith.constant 0 : index
    %c0_141 = arith.constant 0 : index
    %389 = vector.load %arg13[%c0_140, %c0_141] : memref<32x16xf32, #tpu.memory_space<vmem>>, vector<32x16xf32>
    %cst_142 = arith.constant dense<0.000000e+00> : vector<32x128xf32>
    %390 = tpu.matmul %389, %388, %cst_142 {dimension_numbers = #tpu.dot_dimension_numbers<[1], [0], [0], [1], [0, 0, 1, 1], [], []>} : vector<32x16xf32>, vector<16x128xf32>, vector<32x128xf32> -> vector<32x128xf32>
    %391 = arith.addf %361, %390 : vector<32x128xf32>
    %c0_143 = arith.constant 0 : index
    %c0_144 = arith.constant 0 : index
    %c0_145 = arith.constant 0 : index
    %392 = vector.load %arg15[%c0_143, %c0_144, %c0_145] : memref<1x32x128xf32, #tpu.memory_space<vmem>>, vector<1x32x128xf32>
    %393 = vector.shape_cast %392 : vector<1x32x128xf32> to vector<32x128xf32>
    %394 = vector.shape_cast %391 : vector<32x128xf32> to vector<1x32x128xf32>
    tpu.vector_store %arg15[%c0_143, %c0_144, %c0_145], %394 {strides = array<i32>} : memref<1x32x128xf32, #tpu.memory_space<vmem>>, vector<1x32x128xf32>,
    %c0_146 = arith.constant 0 : index
    %c0_147 = arith.constant 0 : index
    %395 = vector.load %arg14[%c0_146, %c0_147] : memref<32x4xf32, #tpu.memory_space<vmem>>, vector<32x4xf32>
    %c0_148 = arith.constant 0 : index
    %c0_149 = arith.constant 0 : index
    %c0_150 = arith.constant 0 : index
    %396 = vector.load %arg2[%c0_148, %c0_149, %c0_150] : memref<1x4x128xf32, #tpu.memory_space<vmem>>, vector<1x4x128xf32>
    %397 = vector.shape_cast %396 : vector<1x4x128xf32> to vector<4x128xf32>
    %cst_151 = arith.constant dense<0.000000e+00> : vector<32x128xf32>
    %398 = tpu.matmul %395, %397, %cst_151 {dimension_numbers = #tpu.dot_dimension_numbers<[1], [0], [0], [1], [0, 0, 1, 1], [], []>} : vector<32x4xf32>, vector<4x128xf32>, vector<32x128xf32> -> vector<32x128xf32>
    %c0_152 = arith.constant 0 : index
    %c0_153 = arith.constant 0 : index
    %c0_154 = arith.constant 0 : index
    %399 = vector.load %arg16[%c0_152, %c0_153, %c0_154] : memref<1x32x128xf32, #tpu.memory_space<vmem>>, vector<1x32x128xf32>
    %400 = vector.shape_cast %399 : vector<1x32x128xf32> to vector<32x128xf32>
    %401 = vector.shape_cast %398 : vector<32x128xf32> to vector<1x32x128xf32>
    tpu.vector_store %arg16[%c0_152, %c0_153, %c0_154], %401 {strides = array<i32>} : memref<1x32x128xf32, #tpu.memory_space<vmem>>, vector<1x32x128xf32>,
    return
  }
  func.func @transform_0(%arg0: i32) -> (i32, i32, i32) {
    %c0_i32 = arith.constant 0 : i32
    %c0_i32_0 = arith.constant 0 : i32
    %c0_i32_1 = arith.constant 0 : i32
    return %arg0, %c0_i32, %c0_i32_0 : i32, i32, i32
  }
  func.func @transform_1(%arg0: i32) -> (i32, i32, i32) {
    %c0_i32 = arith.constant 0 : i32
    %c0_i32_0 = arith.constant 0 : i32
    %c0_i32_1 = arith.constant 0 : i32
    return %arg0, %c0_i32, %c0_i32_0 : i32, i32, i32
  }
  func.func @transform_2(%arg0: i32) -> (i32, i32) {
    %c0_i32 = arith.constant 0 : i32
    %c0_i32_0 = arith.constant 0 : i32
    %c0_i32_1 = arith.constant 0 : i32
    return %c0_i32, %c0_i32_0 : i32, i32
  }
  func.func @transform_3(%arg0: i32) -> (i32, i32) {
    %c0_i32 = arith.constant 0 : i32
    %c0_i32_0 = arith.constant 0 : i32
    %c0_i32_1 = arith.constant 0 : i32
    return %c0_i32, %c0_i32_0 : i32, i32
  }
  func.func @transform_4(%arg0: i32) -> (i32, i32) {
    %c0_i32 = arith.constant 0 : i32
    %c0_i32_0 = arith.constant 0 : i32
    %c0_i32_1 = arith.constant 0 : i32
    return %c0_i32, %c0_i32_0 : i32, i32
  }
  func.func @transform_5(%arg0: i32) -> (i32, i32) {
    %c0_i32 = arith.constant 0 : i32
    %c0_i32_0 = arith.constant 0 : i32
    %c0_i32_1 = arith.constant 0 : i32
    return %c0_i32, %c0_i32_0 : i32, i32
  }
  func.func @transform_6(%arg0: i32) -> (i32, i32) {
    %c0_i32 = arith.constant 0 : i32
    %c0_i32_0 = arith.constant 0 : i32
    %c0_i32_1 = arith.constant 0 : i32
    return %c0_i32, %c0_i32_0 : i32, i32
  }
  func.func @transform_7(%arg0: i32) -> (i32, i32) {
    %c0_i32 = arith.constant 0 : i32
    %c0_i32_0 = arith.constant 0 : i32
    %c0_i32_1 = arith.constant 0 : i32
    return %c0_i32, %c0_i32_0 : i32, i32
  }
  func.func @transform_8(%arg0: i32) -> (i32, i32) {
    %c0_i32 = arith.constant 0 : i32
    %c0_i32_0 = arith.constant 0 : i32
    %c0_i32_1 = arith.constant 0 : i32
    return %c0_i32, %c0_i32_0 : i32, i32
  }
  func.func @transform_9(%arg0: i32) -> (i32, i32) {
    %c0_i32 = arith.constant 0 : i32
    %c0_i32_0 = arith.constant 0 : i32
    %c0_i32_1 = arith.constant 0 : i32
    return %c0_i32, %c0_i32_0 : i32, i32
  }
  func.func @transform_10(%arg0: i32) -> (i32, i32) {
    %c0_i32 = arith.constant 0 : i32
    %c0_i32_0 = arith.constant 0 : i32
    %c0_i32_1 = arith.constant 0 : i32
    return %c0_i32, %c0_i32_0 : i32, i32
  }
  func.func @transform_11(%arg0: i32) -> (i32, i32) {
    %c0_i32 = arith.constant 0 : i32
    %c0_i32_0 = arith.constant 0 : i32
    %c0_i32_1 = arith.constant 0 : i32
    return %c0_i32, %c0_i32_0 : i32, i32
  }
  func.func @transform_12(%arg0: i32) -> (i32, i32) {
    %c0_i32 = arith.constant 0 : i32
    %c0_i32_0 = arith.constant 0 : i32
    %c0_i32_1 = arith.constant 0 : i32
    return %c0_i32, %c0_i32_0 : i32, i32
  }
  func.func @transform_13(%arg0: i32) -> (i32, i32) {
    %c0_i32 = arith.constant 0 : i32
    %c0_i32_0 = arith.constant 0 : i32
    %c0_i32_1 = arith.constant 0 : i32
    return %c0_i32, %c0_i32_0 : i32, i32
  }
  func.func @transform_14(%arg0: i32) -> (i32, i32, i32) {
    %c0_i32 = arith.constant 0 : i32
    %c0_i32_0 = arith.constant 0 : i32
    %c0_i32_1 = arith.constant 0 : i32
    return %arg0, %c0_i32, %c0_i32_0 : i32, i32, i32
  }
  func.func @transform_15(%arg0: i32) -> (i32, i32, i32) {
    %c0_i32 = arith.constant 0 : i32
    %c0_i32_0 = arith.constant 0 : i32
    %c0_i32_1 = arith.constant 0 : i32
    return %arg0, %c0_i32, %c0_i32_0 : i32, i32, i32
  }
}

module attributes {stable_mosaic.version = 11 : i64} {
  func.func @kernel(%arg0: i32, %arg1: memref<1x32x128xf32, #tpu.memory_space<vmem>>, %arg2: memref<16x32xf32, #tpu.memory_space<vmem>>, %arg3: memref<16x9xf32, #tpu.memory_space<vmem>>, %arg4: memref<16x3xf32, #tpu.memory_space<vmem>>, %arg5: memref<64x16xf32, #tpu.memory_space<vmem>>, %arg6: memref<16x5xf32, #tpu.memory_space<vmem>>, %arg7: memref<16x3xf32, #tpu.memory_space<vmem>>, %arg8: memref<64x16xf32, #tpu.memory_space<vmem>>, %arg9: memref<16x3xf32, #tpu.memory_space<vmem>>, %arg10: memref<16x3xf32, #tpu.memory_space<vmem>>, %arg11: memref<64x16xf32, #tpu.memory_space<vmem>>, %arg12: memref<64x32xf32, #tpu.memory_space<vmem>>, %arg13: memref<1x64x128xf32, #tpu.memory_space<vmem>>) attributes {dimension_semantics = [#tpu.dimension_semantics<parallel>], iteration_bounds = array<i64: 2>, scalar_prefetch = 0 : i64, scratch_operands = 0 : i64, tpu.core_type = #tpu.core_type<tc>, window_params = [{transform_indices = @transform_0, window_bounds = array<i64: 1, 32, 128>}, {pipeline_mode = #tpu.pipeline_mode<synchronous>, transform_indices = @transform_1, window_bounds = array<i64: 16, 32>}, {pipeline_mode = #tpu.pipeline_mode<synchronous>, transform_indices = @transform_2, window_bounds = array<i64: 16, 9>}, {pipeline_mode = #tpu.pipeline_mode<synchronous>, transform_indices = @transform_3, window_bounds = array<i64: 16, 3>}, {pipeline_mode = #tpu.pipeline_mode<synchronous>, transform_indices = @transform_4, window_bounds = array<i64: 64, 16>}, {pipeline_mode = #tpu.pipeline_mode<synchronous>, transform_indices = @transform_5, window_bounds = array<i64: 16, 5>}, {pipeline_mode = #tpu.pipeline_mode<synchronous>, transform_indices = @transform_6, window_bounds = array<i64: 16, 3>}, {pipeline_mode = #tpu.pipeline_mode<synchronous>, transform_indices = @transform_7, window_bounds = array<i64: 64, 16>}, {pipeline_mode = #tpu.pipeline_mode<synchronous>, transform_indices = @transform_8, window_bounds = array<i64: 16, 3>}, {pipeline_mode = #tpu.pipeline_mode<synchronous>, transform_indices = @transform_9, window_bounds = array<i64: 16, 3>}, {pipeline_mode = #tpu.pipeline_mode<synchronous>, transform_indices = @transform_10, window_bounds = array<i64: 64, 16>}, {pipeline_mode = #tpu.pipeline_mode<synchronous>, transform_indices = @transform_11, window_bounds = array<i64: 64, 32>}, {transform_indices = @transform_12, window_bounds = array<i64: 1, 64, 128>}]} {
    %c0 = arith.constant 0 : index
    %c0_0 = arith.constant 0 : index
    %c0_1 = arith.constant 0 : index
    %0 = vector.load %arg1[%c0, %c0_0, %c0_1] : memref<1x32x128xf32, #tpu.memory_space<vmem>>, vector<1x32x128xf32>
    %1 = vector.shape_cast %0 : vector<1x32x128xf32> to vector<32x128xf32>
    %c0_2 = arith.constant 0 : index
    %c0_3 = arith.constant 0 : index
    %2 = vector.load %arg2[%c0_2, %c0_3] : memref<16x32xf32, #tpu.memory_space<vmem>>, vector<16x32xf32>
    %cst = arith.constant dense<0.000000e+00> : vector<16x128xf32>
    %3 = tpu.matmul %2, %1, %cst {dimension_numbers = #tpu.dot_dimension_numbers<[1], [0], [0], [1], [0, 0, 1, 1], [], []>} : vector<16x32xf32>, vector<32x128xf32>, vector<16x128xf32> -> vector<16x128xf32>
    %c0_4 = arith.constant 0 : index
    %c0_5 = arith.constant 0 : index
    %4 = vector.load %arg3[%c0_4, %c0_5] : memref<16x9xf32, #tpu.memory_space<vmem>>, vector<16x9xf32>
    %5 = tpu.iota {dimensions = array<i32: 1>} : vector<16x128xi32>
    %c4_i32 = arith.constant 4 : i32
    %6 = tpu.dynamic_rotate %3 by %c4_i32 dim 1 : vector<16x128xf32>, i32 -> vector<16x128xf32>
    %c-4_i32 = arith.constant -4 : i32
    %7 = vector.broadcast %c-4_i32 : i32 to vector<16x128xi32>
    %8 = arith.addi %5, %7 : vector<16x128xi32>
    %c0_i32 = arith.constant 0 : i32
    %9 = vector.broadcast %c0_i32 : i32 to vector<16x128xi32>
    %10 = arith.cmpi sge, %8, %9 : vector<16x128xi32>
    %c-4_i32_6 = arith.constant -4 : i32
    %11 = vector.broadcast %c-4_i32_6 : i32 to vector<16x128xi32>
    %12 = arith.addi %5, %11 : vector<16x128xi32>
    %c128_i32 = arith.constant 128 : i32
    %13 = vector.broadcast %c128_i32 : i32 to vector<16x128xi32>
    %14 = arith.cmpi slt, %12, %13 : vector<16x128xi32>
    %15 = arith.andi %10, %14 : vector<16x128xi1>
    %cst_7 = arith.constant 0.000000e+00 : f32
    %16 = vector.broadcast %cst_7 : f32 to vector<16x128xf32>
    %17 = arith.select %15, %6, %16 : vector<16x128xi1>, vector<16x128xf32>
    %18 = vector.extract_strided_slice %4 {offsets = [0, 0], sizes = [16, 1], strides = [1, 1]} : vector<16x9xf32> to vector<16x1xf32>
    %19 = vector.broadcast %18 : vector<16x1xf32> to vector<16x128xf32>
    %20 = arith.mulf %19, %17 : vector<16x128xf32>
    %c3_i32 = arith.constant 3 : i32
    %21 = tpu.dynamic_rotate %3 by %c3_i32 dim 1 : vector<16x128xf32>, i32 -> vector<16x128xf32>
    %c-3_i32 = arith.constant -3 : i32
    %22 = vector.broadcast %c-3_i32 : i32 to vector<16x128xi32>
    %23 = arith.addi %5, %22 : vector<16x128xi32>
    %c0_i32_8 = arith.constant 0 : i32
    %24 = vector.broadcast %c0_i32_8 : i32 to vector<16x128xi32>
    %25 = arith.cmpi sge, %23, %24 : vector<16x128xi32>
    %c-3_i32_9 = arith.constant -3 : i32
    %26 = vector.broadcast %c-3_i32_9 : i32 to vector<16x128xi32>
    %27 = arith.addi %5, %26 : vector<16x128xi32>
    %c128_i32_10 = arith.constant 128 : i32
    %28 = vector.broadcast %c128_i32_10 : i32 to vector<16x128xi32>
    %29 = arith.cmpi slt, %27, %28 : vector<16x128xi32>
    %30 = arith.andi %25, %29 : vector<16x128xi1>
    %cst_11 = arith.constant 0.000000e+00 : f32
    %31 = vector.broadcast %cst_11 : f32 to vector<16x128xf32>
    %32 = arith.select %30, %21, %31 : vector<16x128xi1>, vector<16x128xf32>
    %33 = vector.extract_strided_slice %4 {offsets = [0, 1], sizes = [16, 1], strides = [1, 1]} : vector<16x9xf32> to vector<16x1xf32>
    %34 = vector.broadcast %33 : vector<16x1xf32> to vector<16x128xf32>
    %35 = arith.mulf %34, %32 : vector<16x128xf32>
    %36 = arith.addf %20, %35 : vector<16x128xf32>
    %c2_i32 = arith.constant 2 : i32
    %37 = tpu.dynamic_rotate %3 by %c2_i32 dim 1 : vector<16x128xf32>, i32 -> vector<16x128xf32>
    %c-2_i32 = arith.constant -2 : i32
    %38 = vector.broadcast %c-2_i32 : i32 to vector<16x128xi32>
    %39 = arith.addi %5, %38 : vector<16x128xi32>
    %c0_i32_12 = arith.constant 0 : i32
    %40 = vector.broadcast %c0_i32_12 : i32 to vector<16x128xi32>
    %41 = arith.cmpi sge, %39, %40 : vector<16x128xi32>
    %c-2_i32_13 = arith.constant -2 : i32
    %42 = vector.broadcast %c-2_i32_13 : i32 to vector<16x128xi32>
    %43 = arith.addi %5, %42 : vector<16x128xi32>
    %c128_i32_14 = arith.constant 128 : i32
    %44 = vector.broadcast %c128_i32_14 : i32 to vector<16x128xi32>
    %45 = arith.cmpi slt, %43, %44 : vector<16x128xi32>
    %46 = arith.andi %41, %45 : vector<16x128xi1>
    %cst_15 = arith.constant 0.000000e+00 : f32
    %47 = vector.broadcast %cst_15 : f32 to vector<16x128xf32>
    %48 = arith.select %46, %37, %47 : vector<16x128xi1>, vector<16x128xf32>
    %49 = vector.extract_strided_slice %4 {offsets = [0, 2], sizes = [16, 1], strides = [1, 1]} : vector<16x9xf32> to vector<16x1xf32>
    %50 = vector.broadcast %49 : vector<16x1xf32> to vector<16x128xf32>
    %51 = arith.mulf %50, %48 : vector<16x128xf32>
    %52 = arith.addf %36, %51 : vector<16x128xf32>
    %c1_i32 = arith.constant 1 : i32
    %53 = tpu.dynamic_rotate %3 by %c1_i32 dim 1 : vector<16x128xf32>, i32 -> vector<16x128xf32>
    %c-1_i32 = arith.constant -1 : i32
    %54 = vector.broadcast %c-1_i32 : i32 to vector<16x128xi32>
    %55 = arith.addi %5, %54 : vector<16x128xi32>
    %c0_i32_16 = arith.constant 0 : i32
    %56 = vector.broadcast %c0_i32_16 : i32 to vector<16x128xi32>
    %57 = arith.cmpi sge, %55, %56 : vector<16x128xi32>
    %c-1_i32_17 = arith.constant -1 : i32
    %58 = vector.broadcast %c-1_i32_17 : i32 to vector<16x128xi32>
    %59 = arith.addi %5, %58 : vector<16x128xi32>
    %c128_i32_18 = arith.constant 128 : i32
    %60 = vector.broadcast %c128_i32_18 : i32 to vector<16x128xi32>
    %61 = arith.cmpi slt, %59, %60 : vector<16x128xi32>
    %62 = arith.andi %57, %61 : vector<16x128xi1>
    %cst_19 = arith.constant 0.000000e+00 : f32
    %63 = vector.broadcast %cst_19 : f32 to vector<16x128xf32>
    %64 = arith.select %62, %53, %63 : vector<16x128xi1>, vector<16x128xf32>
    %65 = vector.extract_strided_slice %4 {offsets = [0, 3], sizes = [16, 1], strides = [1, 1]} : vector<16x9xf32> to vector<16x1xf32>
    %66 = vector.broadcast %65 : vector<16x1xf32> to vector<16x128xf32>
    %67 = arith.mulf %66, %64 : vector<16x128xf32>
    %68 = arith.addf %52, %67 : vector<16x128xf32>
    %69 = vector.extract_strided_slice %4 {offsets = [0, 4], sizes = [16, 1], strides = [1, 1]} : vector<16x9xf32> to vector<16x1xf32>
    %70 = vector.broadcast %69 : vector<16x1xf32> to vector<16x128xf32>
    %71 = arith.mulf %70, %3 : vector<16x128xf32>
    %72 = arith.addf %68, %71 : vector<16x128xf32>
    %c127_i32 = arith.constant 127 : i32
    %73 = tpu.dynamic_rotate %3 by %c127_i32 dim 1 : vector<16x128xf32>, i32 -> vector<16x128xf32>
    %c1_i32_20 = arith.constant 1 : i32
    %74 = vector.broadcast %c1_i32_20 : i32 to vector<16x128xi32>
    %75 = arith.addi %5, %74 : vector<16x128xi32>
    %c0_i32_21 = arith.constant 0 : i32
    %76 = vector.broadcast %c0_i32_21 : i32 to vector<16x128xi32>
    %77 = arith.cmpi sge, %75, %76 : vector<16x128xi32>
    %c1_i32_22 = arith.constant 1 : i32
    %78 = vector.broadcast %c1_i32_22 : i32 to vector<16x128xi32>
    %79 = arith.addi %5, %78 : vector<16x128xi32>
    %c128_i32_23 = arith.constant 128 : i32
    %80 = vector.broadcast %c128_i32_23 : i32 to vector<16x128xi32>
    %81 = arith.cmpi slt, %79, %80 : vector<16x128xi32>
    %82 = arith.andi %77, %81 : vector<16x128xi1>
    %cst_24 = arith.constant 0.000000e+00 : f32
    %83 = vector.broadcast %cst_24 : f32 to vector<16x128xf32>
    %84 = arith.select %82, %73, %83 : vector<16x128xi1>, vector<16x128xf32>
    %85 = vector.extract_strided_slice %4 {offsets = [0, 5], sizes = [16, 1], strides = [1, 1]} : vector<16x9xf32> to vector<16x1xf32>
    %86 = vector.broadcast %85 : vector<16x1xf32> to vector<16x128xf32>
    %87 = arith.mulf %86, %84 : vector<16x128xf32>
    %88 = arith.addf %72, %87 : vector<16x128xf32>
    %c126_i32 = arith.constant 126 : i32
    %89 = tpu.dynamic_rotate %3 by %c126_i32 dim 1 : vector<16x128xf32>, i32 -> vector<16x128xf32>
    %c2_i32_25 = arith.constant 2 : i32
    %90 = vector.broadcast %c2_i32_25 : i32 to vector<16x128xi32>
    %91 = arith.addi %5, %90 : vector<16x128xi32>
    %c0_i32_26 = arith.constant 0 : i32
    %92 = vector.broadcast %c0_i32_26 : i32 to vector<16x128xi32>
    %93 = arith.cmpi sge, %91, %92 : vector<16x128xi32>
    %c2_i32_27 = arith.constant 2 : i32
    %94 = vector.broadcast %c2_i32_27 : i32 to vector<16x128xi32>
    %95 = arith.addi %5, %94 : vector<16x128xi32>
    %c128_i32_28 = arith.constant 128 : i32
    %96 = vector.broadcast %c128_i32_28 : i32 to vector<16x128xi32>
    %97 = arith.cmpi slt, %95, %96 : vector<16x128xi32>
    %98 = arith.andi %93, %97 : vector<16x128xi1>
    %cst_29 = arith.constant 0.000000e+00 : f32
    %99 = vector.broadcast %cst_29 : f32 to vector<16x128xf32>
    %100 = arith.select %98, %89, %99 : vector<16x128xi1>, vector<16x128xf32>
    %101 = vector.extract_strided_slice %4 {offsets = [0, 6], sizes = [16, 1], strides = [1, 1]} : vector<16x9xf32> to vector<16x1xf32>
    %102 = vector.broadcast %101 : vector<16x1xf32> to vector<16x128xf32>
    %103 = arith.mulf %102, %100 : vector<16x128xf32>
    %104 = arith.addf %88, %103 : vector<16x128xf32>
    %c125_i32 = arith.constant 125 : i32
    %105 = tpu.dynamic_rotate %3 by %c125_i32 dim 1 : vector<16x128xf32>, i32 -> vector<16x128xf32>
    %c3_i32_30 = arith.constant 3 : i32
    %106 = vector.broadcast %c3_i32_30 : i32 to vector<16x128xi32>
    %107 = arith.addi %5, %106 : vector<16x128xi32>
    %c0_i32_31 = arith.constant 0 : i32
    %108 = vector.broadcast %c0_i32_31 : i32 to vector<16x128xi32>
    %109 = arith.cmpi sge, %107, %108 : vector<16x128xi32>
    %c3_i32_32 = arith.constant 3 : i32
    %110 = vector.broadcast %c3_i32_32 : i32 to vector<16x128xi32>
    %111 = arith.addi %5, %110 : vector<16x128xi32>
    %c128_i32_33 = arith.constant 128 : i32
    %112 = vector.broadcast %c128_i32_33 : i32 to vector<16x128xi32>
    %113 = arith.cmpi slt, %111, %112 : vector<16x128xi32>
    %114 = arith.andi %109, %113 : vector<16x128xi1>
    %cst_34 = arith.constant 0.000000e+00 : f32
    %115 = vector.broadcast %cst_34 : f32 to vector<16x128xf32>
    %116 = arith.select %114, %105, %115 : vector<16x128xi1>, vector<16x128xf32>
    %117 = vector.extract_strided_slice %4 {offsets = [0, 7], sizes = [16, 1], strides = [1, 1]} : vector<16x9xf32> to vector<16x1xf32>
    %118 = vector.broadcast %117 : vector<16x1xf32> to vector<16x128xf32>
    %119 = arith.mulf %118, %116 : vector<16x128xf32>
    %120 = arith.addf %104, %119 : vector<16x128xf32>
    %c124_i32 = arith.constant 124 : i32
    %121 = tpu.dynamic_rotate %3 by %c124_i32 dim 1 : vector<16x128xf32>, i32 -> vector<16x128xf32>
    %c4_i32_35 = arith.constant 4 : i32
    %122 = vector.broadcast %c4_i32_35 : i32 to vector<16x128xi32>
    %123 = arith.addi %5, %122 : vector<16x128xi32>
    %c0_i32_36 = arith.constant 0 : i32
    %124 = vector.broadcast %c0_i32_36 : i32 to vector<16x128xi32>
    %125 = arith.cmpi sge, %123, %124 : vector<16x128xi32>
    %c4_i32_37 = arith.constant 4 : i32
    %126 = vector.broadcast %c4_i32_37 : i32 to vector<16x128xi32>
    %127 = arith.addi %5, %126 : vector<16x128xi32>
    %c128_i32_38 = arith.constant 128 : i32
    %128 = vector.broadcast %c128_i32_38 : i32 to vector<16x128xi32>
    %129 = arith.cmpi slt, %127, %128 : vector<16x128xi32>
    %130 = arith.andi %125, %129 : vector<16x128xi1>
    %cst_39 = arith.constant 0.000000e+00 : f32
    %131 = vector.broadcast %cst_39 : f32 to vector<16x128xf32>
    %132 = arith.select %130, %121, %131 : vector<16x128xi1>, vector<16x128xf32>
    %133 = vector.extract_strided_slice %4 {offsets = [0, 8], sizes = [16, 1], strides = [1, 1]} : vector<16x9xf32> to vector<16x1xf32>
    %134 = vector.broadcast %133 : vector<16x1xf32> to vector<16x128xf32>
    %135 = arith.mulf %134, %132 : vector<16x128xf32>
    %136 = arith.addf %120, %135 : vector<16x128xf32>
    %c0_40 = arith.constant 0 : index
    %c0_41 = arith.constant 0 : index
    %137 = vector.load %arg4[%c0_40, %c0_41] : memref<16x3xf32, #tpu.memory_space<vmem>>, vector<16x3xf32>
    %138 = tpu.iota {dimensions = array<i32: 1>} : vector<16x128xi32>
    %c5_i32 = arith.constant 5 : i32
    %139 = tpu.dynamic_rotate %136 by %c5_i32 dim 1 : vector<16x128xf32>, i32 -> vector<16x128xf32>
    %c-5_i32 = arith.constant -5 : i32
    %140 = vector.broadcast %c-5_i32 : i32 to vector<16x128xi32>
    %141 = arith.addi %138, %140 : vector<16x128xi32>
    %c0_i32_42 = arith.constant 0 : i32
    %142 = vector.broadcast %c0_i32_42 : i32 to vector<16x128xi32>
    %143 = arith.cmpi sge, %141, %142 : vector<16x128xi32>
    %c-5_i32_43 = arith.constant -5 : i32
    %144 = vector.broadcast %c-5_i32_43 : i32 to vector<16x128xi32>
    %145 = arith.addi %138, %144 : vector<16x128xi32>
    %c128_i32_44 = arith.constant 128 : i32
    %146 = vector.broadcast %c128_i32_44 : i32 to vector<16x128xi32>
    %147 = arith.cmpi slt, %145, %146 : vector<16x128xi32>
    %148 = arith.andi %143, %147 : vector<16x128xi1>
    %cst_45 = arith.constant 0.000000e+00 : f32
    %149 = vector.broadcast %cst_45 : f32 to vector<16x128xf32>
    %150 = arith.select %148, %139, %149 : vector<16x128xi1>, vector<16x128xf32>
    %151 = vector.extract_strided_slice %137 {offsets = [0, 0], sizes = [16, 1], strides = [1, 1]} : vector<16x3xf32> to vector<16x1xf32>
    %152 = vector.broadcast %151 : vector<16x1xf32> to vector<16x128xf32>
    %153 = arith.mulf %152, %150 : vector<16x128xf32>
    %154 = vector.extract_strided_slice %137 {offsets = [0, 1], sizes = [16, 1], strides = [1, 1]} : vector<16x3xf32> to vector<16x1xf32>
    %155 = vector.broadcast %154 : vector<16x1xf32> to vector<16x128xf32>
    %156 = arith.mulf %155, %136 : vector<16x128xf32>
    %157 = arith.addf %153, %156 : vector<16x128xf32>
    %c123_i32 = arith.constant 123 : i32
    %158 = tpu.dynamic_rotate %136 by %c123_i32 dim 1 : vector<16x128xf32>, i32 -> vector<16x128xf32>
    %c5_i32_46 = arith.constant 5 : i32
    %159 = vector.broadcast %c5_i32_46 : i32 to vector<16x128xi32>
    %160 = arith.addi %138, %159 : vector<16x128xi32>
    %c0_i32_47 = arith.constant 0 : i32
    %161 = vector.broadcast %c0_i32_47 : i32 to vector<16x128xi32>
    %162 = arith.cmpi sge, %160, %161 : vector<16x128xi32>
    %c5_i32_48 = arith.constant 5 : i32
    %163 = vector.broadcast %c5_i32_48 : i32 to vector<16x128xi32>
    %164 = arith.addi %138, %163 : vector<16x128xi32>
    %c128_i32_49 = arith.constant 128 : i32
    %165 = vector.broadcast %c128_i32_49 : i32 to vector<16x128xi32>
    %166 = arith.cmpi slt, %164, %165 : vector<16x128xi32>
    %167 = arith.andi %162, %166 : vector<16x128xi1>
    %cst_50 = arith.constant 0.000000e+00 : f32
    %168 = vector.broadcast %cst_50 : f32 to vector<16x128xf32>
    %169 = arith.select %167, %158, %168 : vector<16x128xi1>, vector<16x128xf32>
    %170 = vector.extract_strided_slice %137 {offsets = [0, 2], sizes = [16, 1], strides = [1, 1]} : vector<16x3xf32> to vector<16x1xf32>
    %171 = vector.broadcast %170 : vector<16x1xf32> to vector<16x128xf32>
    %172 = arith.mulf %171, %169 : vector<16x128xf32>
    %173 = arith.addf %157, %172 : vector<16x128xf32>
    %c0_51 = arith.constant 0 : index
    %c0_52 = arith.constant 0 : index
    %174 = vector.load %arg5[%c0_51, %c0_52] : memref<64x16xf32, #tpu.memory_space<vmem>>, vector<64x16xf32>
    %cst_53 = arith.constant dense<0.000000e+00> : vector<64x128xf32>
    %175 = tpu.matmul %174, %173, %cst_53 {dimension_numbers = #tpu.dot_dimension_numbers<[1], [0], [0], [1], [0, 0, 1, 1], [], []>} : vector<64x16xf32>, vector<16x128xf32>, vector<64x128xf32> -> vector<64x128xf32>
    %c0_54 = arith.constant 0 : index
    %c0_55 = arith.constant 0 : index
    %176 = vector.load %arg6[%c0_54, %c0_55] : memref<16x5xf32, #tpu.memory_space<vmem>>, vector<16x5xf32>
    %177 = tpu.iota {dimensions = array<i32: 1>} : vector<16x128xi32>
    %c2_i32_56 = arith.constant 2 : i32
    %178 = tpu.dynamic_rotate %3 by %c2_i32_56 dim 1 : vector<16x128xf32>, i32 -> vector<16x128xf32>
    %c-2_i32_57 = arith.constant -2 : i32
    %179 = vector.broadcast %c-2_i32_57 : i32 to vector<16x128xi32>
    %180 = arith.addi %177, %179 : vector<16x128xi32>
    %c0_i32_58 = arith.constant 0 : i32
    %181 = vector.broadcast %c0_i32_58 : i32 to vector<16x128xi32>
    %182 = arith.cmpi sge, %180, %181 : vector<16x128xi32>
    %c-2_i32_59 = arith.constant -2 : i32
    %183 = vector.broadcast %c-2_i32_59 : i32 to vector<16x128xi32>
    %184 = arith.addi %177, %183 : vector<16x128xi32>
    %c128_i32_60 = arith.constant 128 : i32
    %185 = vector.broadcast %c128_i32_60 : i32 to vector<16x128xi32>
    %186 = arith.cmpi slt, %184, %185 : vector<16x128xi32>
    %187 = arith.andi %182, %186 : vector<16x128xi1>
    %cst_61 = arith.constant 0.000000e+00 : f32
    %188 = vector.broadcast %cst_61 : f32 to vector<16x128xf32>
    %189 = arith.select %187, %178, %188 : vector<16x128xi1>, vector<16x128xf32>
    %190 = vector.extract_strided_slice %176 {offsets = [0, 0], sizes = [16, 1], strides = [1, 1]} : vector<16x5xf32> to vector<16x1xf32>
    %191 = vector.broadcast %190 : vector<16x1xf32> to vector<16x128xf32>
    %192 = arith.mulf %191, %189 : vector<16x128xf32>
    %c1_i32_62 = arith.constant 1 : i32
    %193 = tpu.dynamic_rotate %3 by %c1_i32_62 dim 1 : vector<16x128xf32>, i32 -> vector<16x128xf32>
    %c-1_i32_63 = arith.constant -1 : i32
    %194 = vector.broadcast %c-1_i32_63 : i32 to vector<16x128xi32>
    %195 = arith.addi %177, %194 : vector<16x128xi32>
    %c0_i32_64 = arith.constant 0 : i32
    %196 = vector.broadcast %c0_i32_64 : i32 to vector<16x128xi32>
    %197 = arith.cmpi sge, %195, %196 : vector<16x128xi32>
    %c-1_i32_65 = arith.constant -1 : i32
    %198 = vector.broadcast %c-1_i32_65 : i32 to vector<16x128xi32>
    %199 = arith.addi %177, %198 : vector<16x128xi32>
    %c128_i32_66 = arith.constant 128 : i32
    %200 = vector.broadcast %c128_i32_66 : i32 to vector<16x128xi32>
    %201 = arith.cmpi slt, %199, %200 : vector<16x128xi32>
    %202 = arith.andi %197, %201 : vector<16x128xi1>
    %cst_67 = arith.constant 0.000000e+00 : f32
    %203 = vector.broadcast %cst_67 : f32 to vector<16x128xf32>
    %204 = arith.select %202, %193, %203 : vector<16x128xi1>, vector<16x128xf32>
    %205 = vector.extract_strided_slice %176 {offsets = [0, 1], sizes = [16, 1], strides = [1, 1]} : vector<16x5xf32> to vector<16x1xf32>
    %206 = vector.broadcast %205 : vector<16x1xf32> to vector<16x128xf32>
    %207 = arith.mulf %206, %204 : vector<16x128xf32>
    %208 = arith.addf %192, %207 : vector<16x128xf32>
    %209 = vector.extract_strided_slice %176 {offsets = [0, 2], sizes = [16, 1], strides = [1, 1]} : vector<16x5xf32> to vector<16x1xf32>
    %210 = vector.broadcast %209 : vector<16x1xf32> to vector<16x128xf32>
    %211 = arith.mulf %210, %3 : vector<16x128xf32>
    %212 = arith.addf %208, %211 : vector<16x128xf32>
    %c127_i32_68 = arith.constant 127 : i32
    %213 = tpu.dynamic_rotate %3 by %c127_i32_68 dim 1 : vector<16x128xf32>, i32 -> vector<16x128xf32>
    %c1_i32_69 = arith.constant 1 : i32
    %214 = vector.broadcast %c1_i32_69 : i32 to vector<16x128xi32>
    %215 = arith.addi %177, %214 : vector<16x128xi32>
    %c0_i32_70 = arith.constant 0 : i32
    %216 = vector.broadcast %c0_i32_70 : i32 to vector<16x128xi32>
    %217 = arith.cmpi sge, %215, %216 : vector<16x128xi32>
    %c1_i32_71 = arith.constant 1 : i32
    %218 = vector.broadcast %c1_i32_71 : i32 to vector<16x128xi32>
    %219 = arith.addi %177, %218 : vector<16x128xi32>
    %c128_i32_72 = arith.constant 128 : i32
    %220 = vector.broadcast %c128_i32_72 : i32 to vector<16x128xi32>
    %221 = arith.cmpi slt, %219, %220 : vector<16x128xi32>
    %222 = arith.andi %217, %221 : vector<16x128xi1>
    %cst_73 = arith.constant 0.000000e+00 : f32
    %223 = vector.broadcast %cst_73 : f32 to vector<16x128xf32>
    %224 = arith.select %222, %213, %223 : vector<16x128xi1>, vector<16x128xf32>
    %225 = vector.extract_strided_slice %176 {offsets = [0, 3], sizes = [16, 1], strides = [1, 1]} : vector<16x5xf32> to vector<16x1xf32>
    %226 = vector.broadcast %225 : vector<16x1xf32> to vector<16x128xf32>
    %227 = arith.mulf %226, %224 : vector<16x128xf32>
    %228 = arith.addf %212, %227 : vector<16x128xf32>
    %c126_i32_74 = arith.constant 126 : i32
    %229 = tpu.dynamic_rotate %3 by %c126_i32_74 dim 1 : vector<16x128xf32>, i32 -> vector<16x128xf32>
    %c2_i32_75 = arith.constant 2 : i32
    %230 = vector.broadcast %c2_i32_75 : i32 to vector<16x128xi32>
    %231 = arith.addi %177, %230 : vector<16x128xi32>
    %c0_i32_76 = arith.constant 0 : i32
    %232 = vector.broadcast %c0_i32_76 : i32 to vector<16x128xi32>
    %233 = arith.cmpi sge, %231, %232 : vector<16x128xi32>
    %c2_i32_77 = arith.constant 2 : i32
    %234 = vector.broadcast %c2_i32_77 : i32 to vector<16x128xi32>
    %235 = arith.addi %177, %234 : vector<16x128xi32>
    %c128_i32_78 = arith.constant 128 : i32
    %236 = vector.broadcast %c128_i32_78 : i32 to vector<16x128xi32>
    %237 = arith.cmpi slt, %235, %236 : vector<16x128xi32>
    %238 = arith.andi %233, %237 : vector<16x128xi1>
    %cst_79 = arith.constant 0.000000e+00 : f32
    %239 = vector.broadcast %cst_79 : f32 to vector<16x128xf32>
    %240 = arith.select %238, %229, %239 : vector<16x128xi1>, vector<16x128xf32>
    %241 = vector.extract_strided_slice %176 {offsets = [0, 4], sizes = [16, 1], strides = [1, 1]} : vector<16x5xf32> to vector<16x1xf32>
    %242 = vector.broadcast %241 : vector<16x1xf32> to vector<16x128xf32>
    %243 = arith.mulf %242, %240 : vector<16x128xf32>
    %244 = arith.addf %228, %243 : vector<16x128xf32>
    %c0_80 = arith.constant 0 : index
    %c0_81 = arith.constant 0 : index
    %245 = vector.load %arg7[%c0_80, %c0_81] : memref<16x3xf32, #tpu.memory_space<vmem>>, vector<16x3xf32>
    %246 = tpu.iota {dimensions = array<i32: 1>} : vector<16x128xi32>
    %c3_i32_82 = arith.constant 3 : i32
    %247 = tpu.dynamic_rotate %244 by %c3_i32_82 dim 1 : vector<16x128xf32>, i32 -> vector<16x128xf32>
    %c-3_i32_83 = arith.constant -3 : i32
    %248 = vector.broadcast %c-3_i32_83 : i32 to vector<16x128xi32>
    %249 = arith.addi %246, %248 : vector<16x128xi32>
    %c0_i32_84 = arith.constant 0 : i32
    %250 = vector.broadcast %c0_i32_84 : i32 to vector<16x128xi32>
    %251 = arith.cmpi sge, %249, %250 : vector<16x128xi32>
    %c-3_i32_85 = arith.constant -3 : i32
    %252 = vector.broadcast %c-3_i32_85 : i32 to vector<16x128xi32>
    %253 = arith.addi %246, %252 : vector<16x128xi32>
    %c128_i32_86 = arith.constant 128 : i32
    %254 = vector.broadcast %c128_i32_86 : i32 to vector<16x128xi32>
    %255 = arith.cmpi slt, %253, %254 : vector<16x128xi32>
    %256 = arith.andi %251, %255 : vector<16x128xi1>
    %cst_87 = arith.constant 0.000000e+00 : f32
    %257 = vector.broadcast %cst_87 : f32 to vector<16x128xf32>
    %258 = arith.select %256, %247, %257 : vector<16x128xi1>, vector<16x128xf32>
    %259 = vector.extract_strided_slice %245 {offsets = [0, 0], sizes = [16, 1], strides = [1, 1]} : vector<16x3xf32> to vector<16x1xf32>
    %260 = vector.broadcast %259 : vector<16x1xf32> to vector<16x128xf32>
    %261 = arith.mulf %260, %258 : vector<16x128xf32>
    %262 = vector.extract_strided_slice %245 {offsets = [0, 1], sizes = [16, 1], strides = [1, 1]} : vector<16x3xf32> to vector<16x1xf32>
    %263 = vector.broadcast %262 : vector<16x1xf32> to vector<16x128xf32>
    %264 = arith.mulf %263, %244 : vector<16x128xf32>
    %265 = arith.addf %261, %264 : vector<16x128xf32>
    %c125_i32_88 = arith.constant 125 : i32
    %266 = tpu.dynamic_rotate %244 by %c125_i32_88 dim 1 : vector<16x128xf32>, i32 -> vector<16x128xf32>
    %c3_i32_89 = arith.constant 3 : i32
    %267 = vector.broadcast %c3_i32_89 : i32 to vector<16x128xi32>
    %268 = arith.addi %246, %267 : vector<16x128xi32>
    %c0_i32_90 = arith.constant 0 : i32
    %269 = vector.broadcast %c0_i32_90 : i32 to vector<16x128xi32>
    %270 = arith.cmpi sge, %268, %269 : vector<16x128xi32>
    %c3_i32_91 = arith.constant 3 : i32
    %271 = vector.broadcast %c3_i32_91 : i32 to vector<16x128xi32>
    %272 = arith.addi %246, %271 : vector<16x128xi32>
    %c128_i32_92 = arith.constant 128 : i32
    %273 = vector.broadcast %c128_i32_92 : i32 to vector<16x128xi32>
    %274 = arith.cmpi slt, %272, %273 : vector<16x128xi32>
    %275 = arith.andi %270, %274 : vector<16x128xi1>
    %cst_93 = arith.constant 0.000000e+00 : f32
    %276 = vector.broadcast %cst_93 : f32 to vector<16x128xf32>
    %277 = arith.select %275, %266, %276 : vector<16x128xi1>, vector<16x128xf32>
    %278 = vector.extract_strided_slice %245 {offsets = [0, 2], sizes = [16, 1], strides = [1, 1]} : vector<16x3xf32> to vector<16x1xf32>
    %279 = vector.broadcast %278 : vector<16x1xf32> to vector<16x128xf32>
    %280 = arith.mulf %279, %277 : vector<16x128xf32>
    %281 = arith.addf %265, %280 : vector<16x128xf32>
    %c0_94 = arith.constant 0 : index
    %c0_95 = arith.constant 0 : index
    %282 = vector.load %arg8[%c0_94, %c0_95] : memref<64x16xf32, #tpu.memory_space<vmem>>, vector<64x16xf32>
    %cst_96 = arith.constant dense<0.000000e+00> : vector<64x128xf32>
    %283 = tpu.matmul %282, %281, %cst_96 {dimension_numbers = #tpu.dot_dimension_numbers<[1], [0], [0], [1], [0, 0, 1, 1], [], []>} : vector<64x16xf32>, vector<16x128xf32>, vector<64x128xf32> -> vector<64x128xf32>
    %284 = arith.addf %175, %283 : vector<64x128xf32>
    %c0_97 = arith.constant 0 : index
    %c0_98 = arith.constant 0 : index
    %285 = vector.load %arg9[%c0_97, %c0_98] : memref<16x3xf32, #tpu.memory_space<vmem>>, vector<16x3xf32>
    %286 = tpu.iota {dimensions = array<i32: 1>} : vector<16x128xi32>
    %c1_i32_99 = arith.constant 1 : i32
    %287 = tpu.dynamic_rotate %3 by %c1_i32_99 dim 1 : vector<16x128xf32>, i32 -> vector<16x128xf32>
    %c-1_i32_100 = arith.constant -1 : i32
    %288 = vector.broadcast %c-1_i32_100 : i32 to vector<16x128xi32>
    %289 = arith.addi %286, %288 : vector<16x128xi32>
    %c0_i32_101 = arith.constant 0 : i32
    %290 = vector.broadcast %c0_i32_101 : i32 to vector<16x128xi32>
    %291 = arith.cmpi sge, %289, %290 : vector<16x128xi32>
    %c-1_i32_102 = arith.constant -1 : i32
    %292 = vector.broadcast %c-1_i32_102 : i32 to vector<16x128xi32>
    %293 = arith.addi %286, %292 : vector<16x128xi32>
    %c128_i32_103 = arith.constant 128 : i32
    %294 = vector.broadcast %c128_i32_103 : i32 to vector<16x128xi32>
    %295 = arith.cmpi slt, %293, %294 : vector<16x128xi32>
    %296 = arith.andi %291, %295 : vector<16x128xi1>
    %cst_104 = arith.constant 0.000000e+00 : f32
    %297 = vector.broadcast %cst_104 : f32 to vector<16x128xf32>
    %298 = arith.select %296, %287, %297 : vector<16x128xi1>, vector<16x128xf32>
    %299 = vector.extract_strided_slice %285 {offsets = [0, 0], sizes = [16, 1], strides = [1, 1]} : vector<16x3xf32> to vector<16x1xf32>
    %300 = vector.broadcast %299 : vector<16x1xf32> to vector<16x128xf32>
    %301 = arith.mulf %300, %298 : vector<16x128xf32>
    %302 = vector.extract_strided_slice %285 {offsets = [0, 1], sizes = [16, 1], strides = [1, 1]} : vector<16x3xf32> to vector<16x1xf32>
    %303 = vector.broadcast %302 : vector<16x1xf32> to vector<16x128xf32>
    %304 = arith.mulf %303, %3 : vector<16x128xf32>
    %305 = arith.addf %301, %304 : vector<16x128xf32>
    %c127_i32_105 = arith.constant 127 : i32
    %306 = tpu.dynamic_rotate %3 by %c127_i32_105 dim 1 : vector<16x128xf32>, i32 -> vector<16x128xf32>
    %c1_i32_106 = arith.constant 1 : i32
    %307 = vector.broadcast %c1_i32_106 : i32 to vector<16x128xi32>
    %308 = arith.addi %286, %307 : vector<16x128xi32>
    %c0_i32_107 = arith.constant 0 : i32
    %309 = vector.broadcast %c0_i32_107 : i32 to vector<16x128xi32>
    %310 = arith.cmpi sge, %308, %309 : vector<16x128xi32>
    %c1_i32_108 = arith.constant 1 : i32
    %311 = vector.broadcast %c1_i32_108 : i32 to vector<16x128xi32>
    %312 = arith.addi %286, %311 : vector<16x128xi32>
    %c128_i32_109 = arith.constant 128 : i32
    %313 = vector.broadcast %c128_i32_109 : i32 to vector<16x128xi32>
    %314 = arith.cmpi slt, %312, %313 : vector<16x128xi32>
    %315 = arith.andi %310, %314 : vector<16x128xi1>
    %cst_110 = arith.constant 0.000000e+00 : f32
    %316 = vector.broadcast %cst_110 : f32 to vector<16x128xf32>
    %317 = arith.select %315, %306, %316 : vector<16x128xi1>, vector<16x128xf32>
    %318 = vector.extract_strided_slice %285 {offsets = [0, 2], sizes = [16, 1], strides = [1, 1]} : vector<16x3xf32> to vector<16x1xf32>
    %319 = vector.broadcast %318 : vector<16x1xf32> to vector<16x128xf32>
    %320 = arith.mulf %319, %317 : vector<16x128xf32>
    %321 = arith.addf %305, %320 : vector<16x128xf32>
    %c0_111 = arith.constant 0 : index
    %c0_112 = arith.constant 0 : index
    %322 = vector.load %arg10[%c0_111, %c0_112] : memref<16x3xf32, #tpu.memory_space<vmem>>, vector<16x3xf32>
    %323 = tpu.iota {dimensions = array<i32: 1>} : vector<16x128xi32>
    %c2_i32_113 = arith.constant 2 : i32
    %324 = tpu.dynamic_rotate %321 by %c2_i32_113 dim 1 : vector<16x128xf32>, i32 -> vector<16x128xf32>
    %c-2_i32_114 = arith.constant -2 : i32
    %325 = vector.broadcast %c-2_i32_114 : i32 to vector<16x128xi32>
    %326 = arith.addi %323, %325 : vector<16x128xi32>
    %c0_i32_115 = arith.constant 0 : i32
    %327 = vector.broadcast %c0_i32_115 : i32 to vector<16x128xi32>
    %328 = arith.cmpi sge, %326, %327 : vector<16x128xi32>
    %c-2_i32_116 = arith.constant -2 : i32
    %329 = vector.broadcast %c-2_i32_116 : i32 to vector<16x128xi32>
    %330 = arith.addi %323, %329 : vector<16x128xi32>
    %c128_i32_117 = arith.constant 128 : i32
    %331 = vector.broadcast %c128_i32_117 : i32 to vector<16x128xi32>
    %332 = arith.cmpi slt, %330, %331 : vector<16x128xi32>
    %333 = arith.andi %328, %332 : vector<16x128xi1>
    %cst_118 = arith.constant 0.000000e+00 : f32
    %334 = vector.broadcast %cst_118 : f32 to vector<16x128xf32>
    %335 = arith.select %333, %324, %334 : vector<16x128xi1>, vector<16x128xf32>
    %336 = vector.extract_strided_slice %322 {offsets = [0, 0], sizes = [16, 1], strides = [1, 1]} : vector<16x3xf32> to vector<16x1xf32>
    %337 = vector.broadcast %336 : vector<16x1xf32> to vector<16x128xf32>
    %338 = arith.mulf %337, %335 : vector<16x128xf32>
    %339 = vector.extract_strided_slice %322 {offsets = [0, 1], sizes = [16, 1], strides = [1, 1]} : vector<16x3xf32> to vector<16x1xf32>
    %340 = vector.broadcast %339 : vector<16x1xf32> to vector<16x128xf32>
    %341 = arith.mulf %340, %321 : vector<16x128xf32>
    %342 = arith.addf %338, %341 : vector<16x128xf32>
    %c126_i32_119 = arith.constant 126 : i32
    %343 = tpu.dynamic_rotate %321 by %c126_i32_119 dim 1 : vector<16x128xf32>, i32 -> vector<16x128xf32>
    %c2_i32_120 = arith.constant 2 : i32
    %344 = vector.broadcast %c2_i32_120 : i32 to vector<16x128xi32>
    %345 = arith.addi %323, %344 : vector<16x128xi32>
    %c0_i32_121 = arith.constant 0 : i32
    %346 = vector.broadcast %c0_i32_121 : i32 to vector<16x128xi32>
    %347 = arith.cmpi sge, %345, %346 : vector<16x128xi32>
    %c2_i32_122 = arith.constant 2 : i32
    %348 = vector.broadcast %c2_i32_122 : i32 to vector<16x128xi32>
    %349 = arith.addi %323, %348 : vector<16x128xi32>
    %c128_i32_123 = arith.constant 128 : i32
    %350 = vector.broadcast %c128_i32_123 : i32 to vector<16x128xi32>
    %351 = arith.cmpi slt, %349, %350 : vector<16x128xi32>
    %352 = arith.andi %347, %351 : vector<16x128xi1>
    %cst_124 = arith.constant 0.000000e+00 : f32
    %353 = vector.broadcast %cst_124 : f32 to vector<16x128xf32>
    %354 = arith.select %352, %343, %353 : vector<16x128xi1>, vector<16x128xf32>
    %355 = vector.extract_strided_slice %322 {offsets = [0, 2], sizes = [16, 1], strides = [1, 1]} : vector<16x3xf32> to vector<16x1xf32>
    %356 = vector.broadcast %355 : vector<16x1xf32> to vector<16x128xf32>
    %357 = arith.mulf %356, %354 : vector<16x128xf32>
    %358 = arith.addf %342, %357 : vector<16x128xf32>
    %c0_125 = arith.constant 0 : index
    %c0_126 = arith.constant 0 : index
    %359 = vector.load %arg11[%c0_125, %c0_126] : memref<64x16xf32, #tpu.memory_space<vmem>>, vector<64x16xf32>
    %cst_127 = arith.constant dense<0.000000e+00> : vector<64x128xf32>
    %360 = tpu.matmul %359, %358, %cst_127 {dimension_numbers = #tpu.dot_dimension_numbers<[1], [0], [0], [1], [0, 0, 1, 1], [], []>} : vector<64x16xf32>, vector<16x128xf32>, vector<64x128xf32> -> vector<64x128xf32>
    %361 = arith.addf %284, %360 : vector<64x128xf32>
    %362 = tpu.iota {dimensions = array<i32: 1>} : vector<32x128xi32>
    %c1_i32_128 = arith.constant 1 : i32
    %363 = tpu.dynamic_rotate %1 by %c1_i32_128 dim 1 : vector<32x128xf32>, i32 -> vector<32x128xf32>
    %c-1_i32_129 = arith.constant -1 : i32
    %364 = vector.broadcast %c-1_i32_129 : i32 to vector<32x128xi32>
    %365 = arith.addi %362, %364 : vector<32x128xi32>
    %c0_i32_130 = arith.constant 0 : i32
    %366 = vector.broadcast %c0_i32_130 : i32 to vector<32x128xi32>
    %367 = arith.cmpi sge, %365, %366 : vector<32x128xi32>
    %c-1_i32_131 = arith.constant -1 : i32
    %368 = vector.broadcast %c-1_i32_131 : i32 to vector<32x128xi32>
    %369 = arith.addi %362, %368 : vector<32x128xi32>
    %c128_i32_132 = arith.constant 128 : i32
    %370 = vector.broadcast %c128_i32_132 : i32 to vector<32x128xi32>
    %371 = arith.cmpi slt, %369, %370 : vector<32x128xi32>
    %372 = arith.andi %367, %371 : vector<32x128xi1>
    %cst_133 = arith.constant 0xFF800000 : f32
    %373 = vector.broadcast %cst_133 : f32 to vector<32x128xf32>
    %374 = arith.select %372, %363, %373 : vector<32x128xi1>, vector<32x128xf32>
    %375 = arith.maximumf %374, %1 : vector<32x128xf32>
    %c127_i32_134 = arith.constant 127 : i32
    %376 = tpu.dynamic_rotate %1 by %c127_i32_134 dim 1 : vector<32x128xf32>, i32 -> vector<32x128xf32>
    %c1_i32_135 = arith.constant 1 : i32
    %377 = vector.broadcast %c1_i32_135 : i32 to vector<32x128xi32>
    %378 = arith.addi %362, %377 : vector<32x128xi32>
    %c0_i32_136 = arith.constant 0 : i32
    %379 = vector.broadcast %c0_i32_136 : i32 to vector<32x128xi32>
    %380 = arith.cmpi sge, %378, %379 : vector<32x128xi32>
    %c1_i32_137 = arith.constant 1 : i32
    %381 = vector.broadcast %c1_i32_137 : i32 to vector<32x128xi32>
    %382 = arith.addi %362, %381 : vector<32x128xi32>
    %c128_i32_138 = arith.constant 128 : i32
    %383 = vector.broadcast %c128_i32_138 : i32 to vector<32x128xi32>
    %384 = arith.cmpi slt, %382, %383 : vector<32x128xi32>
    %385 = arith.andi %380, %384 : vector<32x128xi1>
    %cst_139 = arith.constant 0xFF800000 : f32
    %386 = vector.broadcast %cst_139 : f32 to vector<32x128xf32>
    %387 = arith.select %385, %376, %386 : vector<32x128xi1>, vector<32x128xf32>
    %388 = arith.maximumf %375, %387 : vector<32x128xf32>
    %c0_140 = arith.constant 0 : index
    %c0_141 = arith.constant 0 : index
    %389 = vector.load %arg12[%c0_140, %c0_141] : memref<64x32xf32, #tpu.memory_space<vmem>>, vector<64x32xf32>
    %cst_142 = arith.constant dense<0.000000e+00> : vector<64x128xf32>
    %390 = tpu.matmul %389, %388, %cst_142 {dimension_numbers = #tpu.dot_dimension_numbers<[1], [0], [0], [1], [0, 0, 1, 1], [], []>} : vector<64x32xf32>, vector<32x128xf32>, vector<64x128xf32> -> vector<64x128xf32>
    %391 = arith.addf %361, %390 : vector<64x128xf32>
    %c0_143 = arith.constant 0 : index
    %c0_144 = arith.constant 0 : index
    %c0_145 = arith.constant 0 : index
    %392 = vector.load %arg13[%c0_143, %c0_144, %c0_145] : memref<1x64x128xf32, #tpu.memory_space<vmem>>, vector<1x64x128xf32>
    %393 = vector.shape_cast %392 : vector<1x64x128xf32> to vector<64x128xf32>
    %394 = vector.shape_cast %391 : vector<64x128xf32> to vector<1x64x128xf32>
    tpu.vector_store %arg13[%c0_143, %c0_144, %c0_145], %394 {strides = array<i32>} : memref<1x64x128xf32, #tpu.memory_space<vmem>>, vector<1x64x128xf32>,
    return
  }
  func.func @transform_0(%arg0: i32) -> (i32, i32, i32) {
    %c0_i32 = arith.constant 0 : i32
    %c0_i32_0 = arith.constant 0 : i32
    %c0_i32_1 = arith.constant 0 : i32
    return %arg0, %c0_i32, %c0_i32_0 : i32, i32, i32
  }
  func.func @transform_1(%arg0: i32) -> (i32, i32) {
    %c0_i32 = arith.constant 0 : i32
    %c0_i32_0 = arith.constant 0 : i32
    %c0_i32_1 = arith.constant 0 : i32
    return %c0_i32, %c0_i32_0 : i32, i32
  }
  func.func @transform_2(%arg0: i32) -> (i32, i32) {
    %c0_i32 = arith.constant 0 : i32
    %c0_i32_0 = arith.constant 0 : i32
    %c0_i32_1 = arith.constant 0 : i32
    return %c0_i32, %c0_i32_0 : i32, i32
  }
  func.func @transform_3(%arg0: i32) -> (i32, i32) {
    %c0_i32 = arith.constant 0 : i32
    %c0_i32_0 = arith.constant 0 : i32
    %c0_i32_1 = arith.constant 0 : i32
    return %c0_i32, %c0_i32_0 : i32, i32
  }
  func.func @transform_4(%arg0: i32) -> (i32, i32) {
    %c0_i32 = arith.constant 0 : i32
    %c0_i32_0 = arith.constant 0 : i32
    %c0_i32_1 = arith.constant 0 : i32
    return %c0_i32, %c0_i32_0 : i32, i32
  }
  func.func @transform_5(%arg0: i32) -> (i32, i32) {
    %c0_i32 = arith.constant 0 : i32
    %c0_i32_0 = arith.constant 0 : i32
    %c0_i32_1 = arith.constant 0 : i32
    return %c0_i32, %c0_i32_0 : i32, i32
  }
  func.func @transform_6(%arg0: i32) -> (i32, i32) {
    %c0_i32 = arith.constant 0 : i32
    %c0_i32_0 = arith.constant 0 : i32
    %c0_i32_1 = arith.constant 0 : i32
    return %c0_i32, %c0_i32_0 : i32, i32
  }
  func.func @transform_7(%arg0: i32) -> (i32, i32) {
    %c0_i32 = arith.constant 0 : i32
    %c0_i32_0 = arith.constant 0 : i32
    %c0_i32_1 = arith.constant 0 : i32
    return %c0_i32, %c0_i32_0 : i32, i32
  }
  func.func @transform_8(%arg0: i32) -> (i32, i32) {
    %c0_i32 = arith.constant 0 : i32
    %c0_i32_0 = arith.constant 0 : i32
    %c0_i32_1 = arith.constant 0 : i32
    return %c0_i32, %c0_i32_0 : i32, i32
  }
  func.func @transform_9(%arg0: i32) -> (i32, i32) {
    %c0_i32 = arith.constant 0 : i32
    %c0_i32_0 = arith.constant 0 : i32
    %c0_i32_1 = arith.constant 0 : i32
    return %c0_i32, %c0_i32_0 : i32, i32
  }
  func.func @transform_10(%arg0: i32) -> (i32, i32) {
    %c0_i32 = arith.constant 0 : i32
    %c0_i32_0 = arith.constant 0 : i32
    %c0_i32_1 = arith.constant 0 : i32
    return %c0_i32, %c0_i32_0 : i32, i32
  }
  func.func @transform_11(%arg0: i32) -> (i32, i32) {
    %c0_i32 = arith.constant 0 : i32
    %c0_i32_0 = arith.constant 0 : i32
    %c0_i32_1 = arith.constant 0 : i32
    return %c0_i32, %c0_i32_0 : i32, i32
  }
  func.func @transform_12(%arg0: i32) -> (i32, i32, i32) {
    %c0_i32 = arith.constant 0 : i32
    %c0_i32_0 = arith.constant 0 : i32
    %c0_i32_1 = arith.constant 0 : i32
    return %arg0, %c0_i32, %c0_i32_0 : i32, i32, i32
  }
}

module attributes {stable_mosaic.version = 11 : i64} {
  func.func @kernel(%arg0: i32, %arg1: memref<1x64x128xf32, #tpu.memory_space<vmem>>, %arg2: memref<1x32x128xf32, #tpu.memory_space<vmem>>, %arg3: memref<32x64xf32, #tpu.memory_space<vmem>>, %arg4: memref<32x9xf32, #tpu.memory_space<vmem>>, %arg5: memref<32x3xf32, #tpu.memory_space<vmem>>, %arg6: memref<128x32xf32, #tpu.memory_space<vmem>>, %arg7: memref<32x5xf32, #tpu.memory_space<vmem>>, %arg8: memref<32x3xf32, #tpu.memory_space<vmem>>, %arg9: memref<128x32xf32, #tpu.memory_space<vmem>>, %arg10: memref<32x3xf32, #tpu.memory_space<vmem>>, %arg11: memref<32x3xf32, #tpu.memory_space<vmem>>, %arg12: memref<128x32xf32, #tpu.memory_space<vmem>>, %arg13: memref<128x64xf32, #tpu.memory_space<vmem>>, %arg14: memref<128x32xf32, #tpu.memory_space<vmem>>, %arg15: memref<1x128x128xf32, #tpu.memory_space<vmem>>, %arg16: memref<1x128x128xf32, #tpu.memory_space<vmem>>) attributes {dimension_semantics = [#tpu.dimension_semantics<parallel>], iteration_bounds = array<i64: 2>, scalar_prefetch = 0 : i64, scratch_operands = 0 : i64, tpu.core_type = #tpu.core_type<tc>, window_params = [{transform_indices = @transform_0, window_bounds = array<i64: 1, 64, 128>}, {transform_indices = @transform_1, window_bounds = array<i64: 1, 32, 128>}, {pipeline_mode = #tpu.pipeline_mode<synchronous>, transform_indices = @transform_2, window_bounds = array<i64: 32, 64>}, {pipeline_mode = #tpu.pipeline_mode<synchronous>, transform_indices = @transform_3, window_bounds = array<i64: 32, 9>}, {pipeline_mode = #tpu.pipeline_mode<synchronous>, transform_indices = @transform_4, window_bounds = array<i64: 32, 3>}, {pipeline_mode = #tpu.pipeline_mode<synchronous>, transform_indices = @transform_5, window_bounds = array<i64: 128, 32>}, {pipeline_mode = #tpu.pipeline_mode<synchronous>, transform_indices = @transform_6, window_bounds = array<i64: 32, 5>}, {pipeline_mode = #tpu.pipeline_mode<synchronous>, transform_indices = @transform_7, window_bounds = array<i64: 32, 3>}, {pipeline_mode = #tpu.pipeline_mode<synchronous>, transform_indices = @transform_8, window_bounds = array<i64: 128, 32>}, {pipeline_mode = #tpu.pipeline_mode<synchronous>, transform_indices = @transform_9, window_bounds = array<i64: 32, 3>}, {pipeline_mode = #tpu.pipeline_mode<synchronous>, transform_indices = @transform_10, window_bounds = array<i64: 32, 3>}, {pipeline_mode = #tpu.pipeline_mode<synchronous>, transform_indices = @transform_11, window_bounds = array<i64: 128, 32>}, {pipeline_mode = #tpu.pipeline_mode<synchronous>, transform_indices = @transform_12, window_bounds = array<i64: 128, 64>}, {pipeline_mode = #tpu.pipeline_mode<synchronous>, transform_indices = @transform_13, window_bounds = array<i64: 128, 32>}, {transform_indices = @transform_14, window_bounds = array<i64: 1, 128, 128>}, {transform_indices = @transform_15, window_bounds = array<i64: 1, 128, 128>}]} {
    %c0 = arith.constant 0 : index
    %c0_0 = arith.constant 0 : index
    %c0_1 = arith.constant 0 : index
    %0 = vector.load %arg1[%c0, %c0_0, %c0_1] : memref<1x64x128xf32, #tpu.memory_space<vmem>>, vector<1x64x128xf32>
    %1 = vector.shape_cast %0 : vector<1x64x128xf32> to vector<64x128xf32>
    %c0_2 = arith.constant 0 : index
    %c0_3 = arith.constant 0 : index
    %2 = vector.load %arg3[%c0_2, %c0_3] : memref<32x64xf32, #tpu.memory_space<vmem>>, vector<32x64xf32>
    %cst = arith.constant dense<0.000000e+00> : vector<32x128xf32>
    %3 = tpu.matmul %2, %1, %cst {dimension_numbers = #tpu.dot_dimension_numbers<[1], [0], [0], [1], [0, 0, 1, 1], [], []>} : vector<32x64xf32>, vector<64x128xf32>, vector<32x128xf32> -> vector<32x128xf32>
    %c0_4 = arith.constant 0 : index
    %c0_5 = arith.constant 0 : index
    %4 = vector.load %arg4[%c0_4, %c0_5] : memref<32x9xf32, #tpu.memory_space<vmem>>, vector<32x9xf32>
    %5 = tpu.iota {dimensions = array<i32: 1>} : vector<32x128xi32>
    %c4_i32 = arith.constant 4 : i32
    %6 = tpu.dynamic_rotate %3 by %c4_i32 dim 1 : vector<32x128xf32>, i32 -> vector<32x128xf32>
    %c-4_i32 = arith.constant -4 : i32
    %7 = vector.broadcast %c-4_i32 : i32 to vector<32x128xi32>
    %8 = arith.addi %5, %7 : vector<32x128xi32>
    %c0_i32 = arith.constant 0 : i32
    %9 = vector.broadcast %c0_i32 : i32 to vector<32x128xi32>
    %10 = arith.cmpi sge, %8, %9 : vector<32x128xi32>
    %c-4_i32_6 = arith.constant -4 : i32
    %11 = vector.broadcast %c-4_i32_6 : i32 to vector<32x128xi32>
    %12 = arith.addi %5, %11 : vector<32x128xi32>
    %c128_i32 = arith.constant 128 : i32
    %13 = vector.broadcast %c128_i32 : i32 to vector<32x128xi32>
    %14 = arith.cmpi slt, %12, %13 : vector<32x128xi32>
    %15 = arith.andi %10, %14 : vector<32x128xi1>
    %cst_7 = arith.constant 0.000000e+00 : f32
    %16 = vector.broadcast %cst_7 : f32 to vector<32x128xf32>
    %17 = arith.select %15, %6, %16 : vector<32x128xi1>, vector<32x128xf32>
    %18 = vector.extract_strided_slice %4 {offsets = [0, 0], sizes = [32, 1], strides = [1, 1]} : vector<32x9xf32> to vector<32x1xf32>
    %19 = vector.broadcast %18 : vector<32x1xf32> to vector<32x128xf32>
    %20 = arith.mulf %19, %17 : vector<32x128xf32>
    %c3_i32 = arith.constant 3 : i32
    %21 = tpu.dynamic_rotate %3 by %c3_i32 dim 1 : vector<32x128xf32>, i32 -> vector<32x128xf32>
    %c-3_i32 = arith.constant -3 : i32
    %22 = vector.broadcast %c-3_i32 : i32 to vector<32x128xi32>
    %23 = arith.addi %5, %22 : vector<32x128xi32>
    %c0_i32_8 = arith.constant 0 : i32
    %24 = vector.broadcast %c0_i32_8 : i32 to vector<32x128xi32>
    %25 = arith.cmpi sge, %23, %24 : vector<32x128xi32>
    %c-3_i32_9 = arith.constant -3 : i32
    %26 = vector.broadcast %c-3_i32_9 : i32 to vector<32x128xi32>
    %27 = arith.addi %5, %26 : vector<32x128xi32>
    %c128_i32_10 = arith.constant 128 : i32
    %28 = vector.broadcast %c128_i32_10 : i32 to vector<32x128xi32>
    %29 = arith.cmpi slt, %27, %28 : vector<32x128xi32>
    %30 = arith.andi %25, %29 : vector<32x128xi1>
    %cst_11 = arith.constant 0.000000e+00 : f32
    %31 = vector.broadcast %cst_11 : f32 to vector<32x128xf32>
    %32 = arith.select %30, %21, %31 : vector<32x128xi1>, vector<32x128xf32>
    %33 = vector.extract_strided_slice %4 {offsets = [0, 1], sizes = [32, 1], strides = [1, 1]} : vector<32x9xf32> to vector<32x1xf32>
    %34 = vector.broadcast %33 : vector<32x1xf32> to vector<32x128xf32>
    %35 = arith.mulf %34, %32 : vector<32x128xf32>
    %36 = arith.addf %20, %35 : vector<32x128xf32>
    %c2_i32 = arith.constant 2 : i32
    %37 = tpu.dynamic_rotate %3 by %c2_i32 dim 1 : vector<32x128xf32>, i32 -> vector<32x128xf32>
    %c-2_i32 = arith.constant -2 : i32
    %38 = vector.broadcast %c-2_i32 : i32 to vector<32x128xi32>
    %39 = arith.addi %5, %38 : vector<32x128xi32>
    %c0_i32_12 = arith.constant 0 : i32
    %40 = vector.broadcast %c0_i32_12 : i32 to vector<32x128xi32>
    %41 = arith.cmpi sge, %39, %40 : vector<32x128xi32>
    %c-2_i32_13 = arith.constant -2 : i32
    %42 = vector.broadcast %c-2_i32_13 : i32 to vector<32x128xi32>
    %43 = arith.addi %5, %42 : vector<32x128xi32>
    %c128_i32_14 = arith.constant 128 : i32
    %44 = vector.broadcast %c128_i32_14 : i32 to vector<32x128xi32>
    %45 = arith.cmpi slt, %43, %44 : vector<32x128xi32>
    %46 = arith.andi %41, %45 : vector<32x128xi1>
    %cst_15 = arith.constant 0.000000e+00 : f32
    %47 = vector.broadcast %cst_15 : f32 to vector<32x128xf32>
    %48 = arith.select %46, %37, %47 : vector<32x128xi1>, vector<32x128xf32>
    %49 = vector.extract_strided_slice %4 {offsets = [0, 2], sizes = [32, 1], strides = [1, 1]} : vector<32x9xf32> to vector<32x1xf32>
    %50 = vector.broadcast %49 : vector<32x1xf32> to vector<32x128xf32>
    %51 = arith.mulf %50, %48 : vector<32x128xf32>
    %52 = arith.addf %36, %51 : vector<32x128xf32>
    %c1_i32 = arith.constant 1 : i32
    %53 = tpu.dynamic_rotate %3 by %c1_i32 dim 1 : vector<32x128xf32>, i32 -> vector<32x128xf32>
    %c-1_i32 = arith.constant -1 : i32
    %54 = vector.broadcast %c-1_i32 : i32 to vector<32x128xi32>
    %55 = arith.addi %5, %54 : vector<32x128xi32>
    %c0_i32_16 = arith.constant 0 : i32
    %56 = vector.broadcast %c0_i32_16 : i32 to vector<32x128xi32>
    %57 = arith.cmpi sge, %55, %56 : vector<32x128xi32>
    %c-1_i32_17 = arith.constant -1 : i32
    %58 = vector.broadcast %c-1_i32_17 : i32 to vector<32x128xi32>
    %59 = arith.addi %5, %58 : vector<32x128xi32>
    %c128_i32_18 = arith.constant 128 : i32
    %60 = vector.broadcast %c128_i32_18 : i32 to vector<32x128xi32>
    %61 = arith.cmpi slt, %59, %60 : vector<32x128xi32>
    %62 = arith.andi %57, %61 : vector<32x128xi1>
    %cst_19 = arith.constant 0.000000e+00 : f32
    %63 = vector.broadcast %cst_19 : f32 to vector<32x128xf32>
    %64 = arith.select %62, %53, %63 : vector<32x128xi1>, vector<32x128xf32>
    %65 = vector.extract_strided_slice %4 {offsets = [0, 3], sizes = [32, 1], strides = [1, 1]} : vector<32x9xf32> to vector<32x1xf32>
    %66 = vector.broadcast %65 : vector<32x1xf32> to vector<32x128xf32>
    %67 = arith.mulf %66, %64 : vector<32x128xf32>
    %68 = arith.addf %52, %67 : vector<32x128xf32>
    %69 = vector.extract_strided_slice %4 {offsets = [0, 4], sizes = [32, 1], strides = [1, 1]} : vector<32x9xf32> to vector<32x1xf32>
    %70 = vector.broadcast %69 : vector<32x1xf32> to vector<32x128xf32>
    %71 = arith.mulf %70, %3 : vector<32x128xf32>
    %72 = arith.addf %68, %71 : vector<32x128xf32>
    %c127_i32 = arith.constant 127 : i32
    %73 = tpu.dynamic_rotate %3 by %c127_i32 dim 1 : vector<32x128xf32>, i32 -> vector<32x128xf32>
    %c1_i32_20 = arith.constant 1 : i32
    %74 = vector.broadcast %c1_i32_20 : i32 to vector<32x128xi32>
    %75 = arith.addi %5, %74 : vector<32x128xi32>
    %c0_i32_21 = arith.constant 0 : i32
    %76 = vector.broadcast %c0_i32_21 : i32 to vector<32x128xi32>
    %77 = arith.cmpi sge, %75, %76 : vector<32x128xi32>
    %c1_i32_22 = arith.constant 1 : i32
    %78 = vector.broadcast %c1_i32_22 : i32 to vector<32x128xi32>
    %79 = arith.addi %5, %78 : vector<32x128xi32>
    %c128_i32_23 = arith.constant 128 : i32
    %80 = vector.broadcast %c128_i32_23 : i32 to vector<32x128xi32>
    %81 = arith.cmpi slt, %79, %80 : vector<32x128xi32>
    %82 = arith.andi %77, %81 : vector<32x128xi1>
    %cst_24 = arith.constant 0.000000e+00 : f32
    %83 = vector.broadcast %cst_24 : f32 to vector<32x128xf32>
    %84 = arith.select %82, %73, %83 : vector<32x128xi1>, vector<32x128xf32>
    %85 = vector.extract_strided_slice %4 {offsets = [0, 5], sizes = [32, 1], strides = [1, 1]} : vector<32x9xf32> to vector<32x1xf32>
    %86 = vector.broadcast %85 : vector<32x1xf32> to vector<32x128xf32>
    %87 = arith.mulf %86, %84 : vector<32x128xf32>
    %88 = arith.addf %72, %87 : vector<32x128xf32>
    %c126_i32 = arith.constant 126 : i32
    %89 = tpu.dynamic_rotate %3 by %c126_i32 dim 1 : vector<32x128xf32>, i32 -> vector<32x128xf32>
    %c2_i32_25 = arith.constant 2 : i32
    %90 = vector.broadcast %c2_i32_25 : i32 to vector<32x128xi32>
    %91 = arith.addi %5, %90 : vector<32x128xi32>
    %c0_i32_26 = arith.constant 0 : i32
    %92 = vector.broadcast %c0_i32_26 : i32 to vector<32x128xi32>
    %93 = arith.cmpi sge, %91, %92 : vector<32x128xi32>
    %c2_i32_27 = arith.constant 2 : i32
    %94 = vector.broadcast %c2_i32_27 : i32 to vector<32x128xi32>
    %95 = arith.addi %5, %94 : vector<32x128xi32>
    %c128_i32_28 = arith.constant 128 : i32
    %96 = vector.broadcast %c128_i32_28 : i32 to vector<32x128xi32>
    %97 = arith.cmpi slt, %95, %96 : vector<32x128xi32>
    %98 = arith.andi %93, %97 : vector<32x128xi1>
    %cst_29 = arith.constant 0.000000e+00 : f32
    %99 = vector.broadcast %cst_29 : f32 to vector<32x128xf32>
    %100 = arith.select %98, %89, %99 : vector<32x128xi1>, vector<32x128xf32>
    %101 = vector.extract_strided_slice %4 {offsets = [0, 6], sizes = [32, 1], strides = [1, 1]} : vector<32x9xf32> to vector<32x1xf32>
    %102 = vector.broadcast %101 : vector<32x1xf32> to vector<32x128xf32>
    %103 = arith.mulf %102, %100 : vector<32x128xf32>
    %104 = arith.addf %88, %103 : vector<32x128xf32>
    %c125_i32 = arith.constant 125 : i32
    %105 = tpu.dynamic_rotate %3 by %c125_i32 dim 1 : vector<32x128xf32>, i32 -> vector<32x128xf32>
    %c3_i32_30 = arith.constant 3 : i32
    %106 = vector.broadcast %c3_i32_30 : i32 to vector<32x128xi32>
    %107 = arith.addi %5, %106 : vector<32x128xi32>
    %c0_i32_31 = arith.constant 0 : i32
    %108 = vector.broadcast %c0_i32_31 : i32 to vector<32x128xi32>
    %109 = arith.cmpi sge, %107, %108 : vector<32x128xi32>
    %c3_i32_32 = arith.constant 3 : i32
    %110 = vector.broadcast %c3_i32_32 : i32 to vector<32x128xi32>
    %111 = arith.addi %5, %110 : vector<32x128xi32>
    %c128_i32_33 = arith.constant 128 : i32
    %112 = vector.broadcast %c128_i32_33 : i32 to vector<32x128xi32>
    %113 = arith.cmpi slt, %111, %112 : vector<32x128xi32>
    %114 = arith.andi %109, %113 : vector<32x128xi1>
    %cst_34 = arith.constant 0.000000e+00 : f32
    %115 = vector.broadcast %cst_34 : f32 to vector<32x128xf32>
    %116 = arith.select %114, %105, %115 : vector<32x128xi1>, vector<32x128xf32>
    %117 = vector.extract_strided_slice %4 {offsets = [0, 7], sizes = [32, 1], strides = [1, 1]} : vector<32x9xf32> to vector<32x1xf32>
    %118 = vector.broadcast %117 : vector<32x1xf32> to vector<32x128xf32>
    %119 = arith.mulf %118, %116 : vector<32x128xf32>
    %120 = arith.addf %104, %119 : vector<32x128xf32>
    %c124_i32 = arith.constant 124 : i32
    %121 = tpu.dynamic_rotate %3 by %c124_i32 dim 1 : vector<32x128xf32>, i32 -> vector<32x128xf32>
    %c4_i32_35 = arith.constant 4 : i32
    %122 = vector.broadcast %c4_i32_35 : i32 to vector<32x128xi32>
    %123 = arith.addi %5, %122 : vector<32x128xi32>
    %c0_i32_36 = arith.constant 0 : i32
    %124 = vector.broadcast %c0_i32_36 : i32 to vector<32x128xi32>
    %125 = arith.cmpi sge, %123, %124 : vector<32x128xi32>
    %c4_i32_37 = arith.constant 4 : i32
    %126 = vector.broadcast %c4_i32_37 : i32 to vector<32x128xi32>
    %127 = arith.addi %5, %126 : vector<32x128xi32>
    %c128_i32_38 = arith.constant 128 : i32
    %128 = vector.broadcast %c128_i32_38 : i32 to vector<32x128xi32>
    %129 = arith.cmpi slt, %127, %128 : vector<32x128xi32>
    %130 = arith.andi %125, %129 : vector<32x128xi1>
    %cst_39 = arith.constant 0.000000e+00 : f32
    %131 = vector.broadcast %cst_39 : f32 to vector<32x128xf32>
    %132 = arith.select %130, %121, %131 : vector<32x128xi1>, vector<32x128xf32>
    %133 = vector.extract_strided_slice %4 {offsets = [0, 8], sizes = [32, 1], strides = [1, 1]} : vector<32x9xf32> to vector<32x1xf32>
    %134 = vector.broadcast %133 : vector<32x1xf32> to vector<32x128xf32>
    %135 = arith.mulf %134, %132 : vector<32x128xf32>
    %136 = arith.addf %120, %135 : vector<32x128xf32>
    %c0_40 = arith.constant 0 : index
    %c0_41 = arith.constant 0 : index
    %137 = vector.load %arg5[%c0_40, %c0_41] : memref<32x3xf32, #tpu.memory_space<vmem>>, vector<32x3xf32>
    %138 = tpu.iota {dimensions = array<i32: 1>} : vector<32x128xi32>
    %c5_i32 = arith.constant 5 : i32
    %139 = tpu.dynamic_rotate %136 by %c5_i32 dim 1 : vector<32x128xf32>, i32 -> vector<32x128xf32>
    %c-5_i32 = arith.constant -5 : i32
    %140 = vector.broadcast %c-5_i32 : i32 to vector<32x128xi32>
    %141 = arith.addi %138, %140 : vector<32x128xi32>
    %c0_i32_42 = arith.constant 0 : i32
    %142 = vector.broadcast %c0_i32_42 : i32 to vector<32x128xi32>
    %143 = arith.cmpi sge, %141, %142 : vector<32x128xi32>
    %c-5_i32_43 = arith.constant -5 : i32
    %144 = vector.broadcast %c-5_i32_43 : i32 to vector<32x128xi32>
    %145 = arith.addi %138, %144 : vector<32x128xi32>
    %c128_i32_44 = arith.constant 128 : i32
    %146 = vector.broadcast %c128_i32_44 : i32 to vector<32x128xi32>
    %147 = arith.cmpi slt, %145, %146 : vector<32x128xi32>
    %148 = arith.andi %143, %147 : vector<32x128xi1>
    %cst_45 = arith.constant 0.000000e+00 : f32
    %149 = vector.broadcast %cst_45 : f32 to vector<32x128xf32>
    %150 = arith.select %148, %139, %149 : vector<32x128xi1>, vector<32x128xf32>
    %151 = vector.extract_strided_slice %137 {offsets = [0, 0], sizes = [32, 1], strides = [1, 1]} : vector<32x3xf32> to vector<32x1xf32>
    %152 = vector.broadcast %151 : vector<32x1xf32> to vector<32x128xf32>
    %153 = arith.mulf %152, %150 : vector<32x128xf32>
    %154 = vector.extract_strided_slice %137 {offsets = [0, 1], sizes = [32, 1], strides = [1, 1]} : vector<32x3xf32> to vector<32x1xf32>
    %155 = vector.broadcast %154 : vector<32x1xf32> to vector<32x128xf32>
    %156 = arith.mulf %155, %136 : vector<32x128xf32>
    %157 = arith.addf %153, %156 : vector<32x128xf32>
    %c123_i32 = arith.constant 123 : i32
    %158 = tpu.dynamic_rotate %136 by %c123_i32 dim 1 : vector<32x128xf32>, i32 -> vector<32x128xf32>
    %c5_i32_46 = arith.constant 5 : i32
    %159 = vector.broadcast %c5_i32_46 : i32 to vector<32x128xi32>
    %160 = arith.addi %138, %159 : vector<32x128xi32>
    %c0_i32_47 = arith.constant 0 : i32
    %161 = vector.broadcast %c0_i32_47 : i32 to vector<32x128xi32>
    %162 = arith.cmpi sge, %160, %161 : vector<32x128xi32>
    %c5_i32_48 = arith.constant 5 : i32
    %163 = vector.broadcast %c5_i32_48 : i32 to vector<32x128xi32>
    %164 = arith.addi %138, %163 : vector<32x128xi32>
    %c128_i32_49 = arith.constant 128 : i32
    %165 = vector.broadcast %c128_i32_49 : i32 to vector<32x128xi32>
    %166 = arith.cmpi slt, %164, %165 : vector<32x128xi32>
    %167 = arith.andi %162, %166 : vector<32x128xi1>
    %cst_50 = arith.constant 0.000000e+00 : f32
    %168 = vector.broadcast %cst_50 : f32 to vector<32x128xf32>
    %169 = arith.select %167, %158, %168 : vector<32x128xi1>, vector<32x128xf32>
    %170 = vector.extract_strided_slice %137 {offsets = [0, 2], sizes = [32, 1], strides = [1, 1]} : vector<32x3xf32> to vector<32x1xf32>
    %171 = vector.broadcast %170 : vector<32x1xf32> to vector<32x128xf32>
    %172 = arith.mulf %171, %169 : vector<32x128xf32>
    %173 = arith.addf %157, %172 : vector<32x128xf32>
    %c0_51 = arith.constant 0 : index
    %c0_52 = arith.constant 0 : index
    %174 = vector.load %arg6[%c0_51, %c0_52] : memref<128x32xf32, #tpu.memory_space<vmem>>, vector<128x32xf32>
    %cst_53 = arith.constant dense<0.000000e+00> : vector<128x128xf32>
    %175 = tpu.matmul %174, %173, %cst_53 {dimension_numbers = #tpu.dot_dimension_numbers<[1], [0], [0], [1], [0, 0, 1, 1], [], []>} : vector<128x32xf32>, vector<32x128xf32>, vector<128x128xf32> -> vector<128x128xf32>
    %c0_54 = arith.constant 0 : index
    %c0_55 = arith.constant 0 : index
    %176 = vector.load %arg7[%c0_54, %c0_55] : memref<32x5xf32, #tpu.memory_space<vmem>>, vector<32x5xf32>
    %177 = tpu.iota {dimensions = array<i32: 1>} : vector<32x128xi32>
    %c2_i32_56 = arith.constant 2 : i32
    %178 = tpu.dynamic_rotate %3 by %c2_i32_56 dim 1 : vector<32x128xf32>, i32 -> vector<32x128xf32>
    %c-2_i32_57 = arith.constant -2 : i32
    %179 = vector.broadcast %c-2_i32_57 : i32 to vector<32x128xi32>
    %180 = arith.addi %177, %179 : vector<32x128xi32>
    %c0_i32_58 = arith.constant 0 : i32
    %181 = vector.broadcast %c0_i32_58 : i32 to vector<32x128xi32>
    %182 = arith.cmpi sge, %180, %181 : vector<32x128xi32>
    %c-2_i32_59 = arith.constant -2 : i32
    %183 = vector.broadcast %c-2_i32_59 : i32 to vector<32x128xi32>
    %184 = arith.addi %177, %183 : vector<32x128xi32>
    %c128_i32_60 = arith.constant 128 : i32
    %185 = vector.broadcast %c128_i32_60 : i32 to vector<32x128xi32>
    %186 = arith.cmpi slt, %184, %185 : vector<32x128xi32>
    %187 = arith.andi %182, %186 : vector<32x128xi1>
    %cst_61 = arith.constant 0.000000e+00 : f32
    %188 = vector.broadcast %cst_61 : f32 to vector<32x128xf32>
    %189 = arith.select %187, %178, %188 : vector<32x128xi1>, vector<32x128xf32>
    %190 = vector.extract_strided_slice %176 {offsets = [0, 0], sizes = [32, 1], strides = [1, 1]} : vector<32x5xf32> to vector<32x1xf32>
    %191 = vector.broadcast %190 : vector<32x1xf32> to vector<32x128xf32>
    %192 = arith.mulf %191, %189 : vector<32x128xf32>
    %c1_i32_62 = arith.constant 1 : i32
    %193 = tpu.dynamic_rotate %3 by %c1_i32_62 dim 1 : vector<32x128xf32>, i32 -> vector<32x128xf32>
    %c-1_i32_63 = arith.constant -1 : i32
    %194 = vector.broadcast %c-1_i32_63 : i32 to vector<32x128xi32>
    %195 = arith.addi %177, %194 : vector<32x128xi32>
    %c0_i32_64 = arith.constant 0 : i32
    %196 = vector.broadcast %c0_i32_64 : i32 to vector<32x128xi32>
    %197 = arith.cmpi sge, %195, %196 : vector<32x128xi32>
    %c-1_i32_65 = arith.constant -1 : i32
    %198 = vector.broadcast %c-1_i32_65 : i32 to vector<32x128xi32>
    %199 = arith.addi %177, %198 : vector<32x128xi32>
    %c128_i32_66 = arith.constant 128 : i32
    %200 = vector.broadcast %c128_i32_66 : i32 to vector<32x128xi32>
    %201 = arith.cmpi slt, %199, %200 : vector<32x128xi32>
    %202 = arith.andi %197, %201 : vector<32x128xi1>
    %cst_67 = arith.constant 0.000000e+00 : f32
    %203 = vector.broadcast %cst_67 : f32 to vector<32x128xf32>
    %204 = arith.select %202, %193, %203 : vector<32x128xi1>, vector<32x128xf32>
    %205 = vector.extract_strided_slice %176 {offsets = [0, 1], sizes = [32, 1], strides = [1, 1]} : vector<32x5xf32> to vector<32x1xf32>
    %206 = vector.broadcast %205 : vector<32x1xf32> to vector<32x128xf32>
    %207 = arith.mulf %206, %204 : vector<32x128xf32>
    %208 = arith.addf %192, %207 : vector<32x128xf32>
    %209 = vector.extract_strided_slice %176 {offsets = [0, 2], sizes = [32, 1], strides = [1, 1]} : vector<32x5xf32> to vector<32x1xf32>
    %210 = vector.broadcast %209 : vector<32x1xf32> to vector<32x128xf32>
    %211 = arith.mulf %210, %3 : vector<32x128xf32>
    %212 = arith.addf %208, %211 : vector<32x128xf32>
    %c127_i32_68 = arith.constant 127 : i32
    %213 = tpu.dynamic_rotate %3 by %c127_i32_68 dim 1 : vector<32x128xf32>, i32 -> vector<32x128xf32>
    %c1_i32_69 = arith.constant 1 : i32
    %214 = vector.broadcast %c1_i32_69 : i32 to vector<32x128xi32>
    %215 = arith.addi %177, %214 : vector<32x128xi32>
    %c0_i32_70 = arith.constant 0 : i32
    %216 = vector.broadcast %c0_i32_70 : i32 to vector<32x128xi32>
    %217 = arith.cmpi sge, %215, %216 : vector<32x128xi32>
    %c1_i32_71 = arith.constant 1 : i32
    %218 = vector.broadcast %c1_i32_71 : i32 to vector<32x128xi32>
    %219 = arith.addi %177, %218 : vector<32x128xi32>
    %c128_i32_72 = arith.constant 128 : i32
    %220 = vector.broadcast %c128_i32_72 : i32 to vector<32x128xi32>
    %221 = arith.cmpi slt, %219, %220 : vector<32x128xi32>
    %222 = arith.andi %217, %221 : vector<32x128xi1>
    %cst_73 = arith.constant 0.000000e+00 : f32
    %223 = vector.broadcast %cst_73 : f32 to vector<32x128xf32>
    %224 = arith.select %222, %213, %223 : vector<32x128xi1>, vector<32x128xf32>
    %225 = vector.extract_strided_slice %176 {offsets = [0, 3], sizes = [32, 1], strides = [1, 1]} : vector<32x5xf32> to vector<32x1xf32>
    %226 = vector.broadcast %225 : vector<32x1xf32> to vector<32x128xf32>
    %227 = arith.mulf %226, %224 : vector<32x128xf32>
    %228 = arith.addf %212, %227 : vector<32x128xf32>
    %c126_i32_74 = arith.constant 126 : i32
    %229 = tpu.dynamic_rotate %3 by %c126_i32_74 dim 1 : vector<32x128xf32>, i32 -> vector<32x128xf32>
    %c2_i32_75 = arith.constant 2 : i32
    %230 = vector.broadcast %c2_i32_75 : i32 to vector<32x128xi32>
    %231 = arith.addi %177, %230 : vector<32x128xi32>
    %c0_i32_76 = arith.constant 0 : i32
    %232 = vector.broadcast %c0_i32_76 : i32 to vector<32x128xi32>
    %233 = arith.cmpi sge, %231, %232 : vector<32x128xi32>
    %c2_i32_77 = arith.constant 2 : i32
    %234 = vector.broadcast %c2_i32_77 : i32 to vector<32x128xi32>
    %235 = arith.addi %177, %234 : vector<32x128xi32>
    %c128_i32_78 = arith.constant 128 : i32
    %236 = vector.broadcast %c128_i32_78 : i32 to vector<32x128xi32>
    %237 = arith.cmpi slt, %235, %236 : vector<32x128xi32>
    %238 = arith.andi %233, %237 : vector<32x128xi1>
    %cst_79 = arith.constant 0.000000e+00 : f32
    %239 = vector.broadcast %cst_79 : f32 to vector<32x128xf32>
    %240 = arith.select %238, %229, %239 : vector<32x128xi1>, vector<32x128xf32>
    %241 = vector.extract_strided_slice %176 {offsets = [0, 4], sizes = [32, 1], strides = [1, 1]} : vector<32x5xf32> to vector<32x1xf32>
    %242 = vector.broadcast %241 : vector<32x1xf32> to vector<32x128xf32>
    %243 = arith.mulf %242, %240 : vector<32x128xf32>
    %244 = arith.addf %228, %243 : vector<32x128xf32>
    %c0_80 = arith.constant 0 : index
    %c0_81 = arith.constant 0 : index
    %245 = vector.load %arg8[%c0_80, %c0_81] : memref<32x3xf32, #tpu.memory_space<vmem>>, vector<32x3xf32>
    %246 = tpu.iota {dimensions = array<i32: 1>} : vector<32x128xi32>
    %c3_i32_82 = arith.constant 3 : i32
    %247 = tpu.dynamic_rotate %244 by %c3_i32_82 dim 1 : vector<32x128xf32>, i32 -> vector<32x128xf32>
    %c-3_i32_83 = arith.constant -3 : i32
    %248 = vector.broadcast %c-3_i32_83 : i32 to vector<32x128xi32>
    %249 = arith.addi %246, %248 : vector<32x128xi32>
    %c0_i32_84 = arith.constant 0 : i32
    %250 = vector.broadcast %c0_i32_84 : i32 to vector<32x128xi32>
    %251 = arith.cmpi sge, %249, %250 : vector<32x128xi32>
    %c-3_i32_85 = arith.constant -3 : i32
    %252 = vector.broadcast %c-3_i32_85 : i32 to vector<32x128xi32>
    %253 = arith.addi %246, %252 : vector<32x128xi32>
    %c128_i32_86 = arith.constant 128 : i32
    %254 = vector.broadcast %c128_i32_86 : i32 to vector<32x128xi32>
    %255 = arith.cmpi slt, %253, %254 : vector<32x128xi32>
    %256 = arith.andi %251, %255 : vector<32x128xi1>
    %cst_87 = arith.constant 0.000000e+00 : f32
    %257 = vector.broadcast %cst_87 : f32 to vector<32x128xf32>
    %258 = arith.select %256, %247, %257 : vector<32x128xi1>, vector<32x128xf32>
    %259 = vector.extract_strided_slice %245 {offsets = [0, 0], sizes = [32, 1], strides = [1, 1]} : vector<32x3xf32> to vector<32x1xf32>
    %260 = vector.broadcast %259 : vector<32x1xf32> to vector<32x128xf32>
    %261 = arith.mulf %260, %258 : vector<32x128xf32>
    %262 = vector.extract_strided_slice %245 {offsets = [0, 1], sizes = [32, 1], strides = [1, 1]} : vector<32x3xf32> to vector<32x1xf32>
    %263 = vector.broadcast %262 : vector<32x1xf32> to vector<32x128xf32>
    %264 = arith.mulf %263, %244 : vector<32x128xf32>
    %265 = arith.addf %261, %264 : vector<32x128xf32>
    %c125_i32_88 = arith.constant 125 : i32
    %266 = tpu.dynamic_rotate %244 by %c125_i32_88 dim 1 : vector<32x128xf32>, i32 -> vector<32x128xf32>
    %c3_i32_89 = arith.constant 3 : i32
    %267 = vector.broadcast %c3_i32_89 : i32 to vector<32x128xi32>
    %268 = arith.addi %246, %267 : vector<32x128xi32>
    %c0_i32_90 = arith.constant 0 : i32
    %269 = vector.broadcast %c0_i32_90 : i32 to vector<32x128xi32>
    %270 = arith.cmpi sge, %268, %269 : vector<32x128xi32>
    %c3_i32_91 = arith.constant 3 : i32
    %271 = vector.broadcast %c3_i32_91 : i32 to vector<32x128xi32>
    %272 = arith.addi %246, %271 : vector<32x128xi32>
    %c128_i32_92 = arith.constant 128 : i32
    %273 = vector.broadcast %c128_i32_92 : i32 to vector<32x128xi32>
    %274 = arith.cmpi slt, %272, %273 : vector<32x128xi32>
    %275 = arith.andi %270, %274 : vector<32x128xi1>
    %cst_93 = arith.constant 0.000000e+00 : f32
    %276 = vector.broadcast %cst_93 : f32 to vector<32x128xf32>
    %277 = arith.select %275, %266, %276 : vector<32x128xi1>, vector<32x128xf32>
    %278 = vector.extract_strided_slice %245 {offsets = [0, 2], sizes = [32, 1], strides = [1, 1]} : vector<32x3xf32> to vector<32x1xf32>
    %279 = vector.broadcast %278 : vector<32x1xf32> to vector<32x128xf32>
    %280 = arith.mulf %279, %277 : vector<32x128xf32>
    %281 = arith.addf %265, %280 : vector<32x128xf32>
    %c0_94 = arith.constant 0 : index
    %c0_95 = arith.constant 0 : index
    %282 = vector.load %arg9[%c0_94, %c0_95] : memref<128x32xf32, #tpu.memory_space<vmem>>, vector<128x32xf32>
    %cst_96 = arith.constant dense<0.000000e+00> : vector<128x128xf32>
    %283 = tpu.matmul %282, %281, %cst_96 {dimension_numbers = #tpu.dot_dimension_numbers<[1], [0], [0], [1], [0, 0, 1, 1], [], []>} : vector<128x32xf32>, vector<32x128xf32>, vector<128x128xf32> -> vector<128x128xf32>
    %284 = arith.addf %175, %283 : vector<128x128xf32>
    %c0_97 = arith.constant 0 : index
    %c0_98 = arith.constant 0 : index
    %285 = vector.load %arg10[%c0_97, %c0_98] : memref<32x3xf32, #tpu.memory_space<vmem>>, vector<32x3xf32>
    %286 = tpu.iota {dimensions = array<i32: 1>} : vector<32x128xi32>
    %c1_i32_99 = arith.constant 1 : i32
    %287 = tpu.dynamic_rotate %3 by %c1_i32_99 dim 1 : vector<32x128xf32>, i32 -> vector<32x128xf32>
    %c-1_i32_100 = arith.constant -1 : i32
    %288 = vector.broadcast %c-1_i32_100 : i32 to vector<32x128xi32>
    %289 = arith.addi %286, %288 : vector<32x128xi32>
    %c0_i32_101 = arith.constant 0 : i32
    %290 = vector.broadcast %c0_i32_101 : i32 to vector<32x128xi32>
    %291 = arith.cmpi sge, %289, %290 : vector<32x128xi32>
    %c-1_i32_102 = arith.constant -1 : i32
    %292 = vector.broadcast %c-1_i32_102 : i32 to vector<32x128xi32>
    %293 = arith.addi %286, %292 : vector<32x128xi32>
    %c128_i32_103 = arith.constant 128 : i32
    %294 = vector.broadcast %c128_i32_103 : i32 to vector<32x128xi32>
    %295 = arith.cmpi slt, %293, %294 : vector<32x128xi32>
    %296 = arith.andi %291, %295 : vector<32x128xi1>
    %cst_104 = arith.constant 0.000000e+00 : f32
    %297 = vector.broadcast %cst_104 : f32 to vector<32x128xf32>
    %298 = arith.select %296, %287, %297 : vector<32x128xi1>, vector<32x128xf32>
    %299 = vector.extract_strided_slice %285 {offsets = [0, 0], sizes = [32, 1], strides = [1, 1]} : vector<32x3xf32> to vector<32x1xf32>
    %300 = vector.broadcast %299 : vector<32x1xf32> to vector<32x128xf32>
    %301 = arith.mulf %300, %298 : vector<32x128xf32>
    %302 = vector.extract_strided_slice %285 {offsets = [0, 1], sizes = [32, 1], strides = [1, 1]} : vector<32x3xf32> to vector<32x1xf32>
    %303 = vector.broadcast %302 : vector<32x1xf32> to vector<32x128xf32>
    %304 = arith.mulf %303, %3 : vector<32x128xf32>
    %305 = arith.addf %301, %304 : vector<32x128xf32>
    %c127_i32_105 = arith.constant 127 : i32
    %306 = tpu.dynamic_rotate %3 by %c127_i32_105 dim 1 : vector<32x128xf32>, i32 -> vector<32x128xf32>
    %c1_i32_106 = arith.constant 1 : i32
    %307 = vector.broadcast %c1_i32_106 : i32 to vector<32x128xi32>
    %308 = arith.addi %286, %307 : vector<32x128xi32>
    %c0_i32_107 = arith.constant 0 : i32
    %309 = vector.broadcast %c0_i32_107 : i32 to vector<32x128xi32>
    %310 = arith.cmpi sge, %308, %309 : vector<32x128xi32>
    %c1_i32_108 = arith.constant 1 : i32
    %311 = vector.broadcast %c1_i32_108 : i32 to vector<32x128xi32>
    %312 = arith.addi %286, %311 : vector<32x128xi32>
    %c128_i32_109 = arith.constant 128 : i32
    %313 = vector.broadcast %c128_i32_109 : i32 to vector<32x128xi32>
    %314 = arith.cmpi slt, %312, %313 : vector<32x128xi32>
    %315 = arith.andi %310, %314 : vector<32x128xi1>
    %cst_110 = arith.constant 0.000000e+00 : f32
    %316 = vector.broadcast %cst_110 : f32 to vector<32x128xf32>
    %317 = arith.select %315, %306, %316 : vector<32x128xi1>, vector<32x128xf32>
    %318 = vector.extract_strided_slice %285 {offsets = [0, 2], sizes = [32, 1], strides = [1, 1]} : vector<32x3xf32> to vector<32x1xf32>
    %319 = vector.broadcast %318 : vector<32x1xf32> to vector<32x128xf32>
    %320 = arith.mulf %319, %317 : vector<32x128xf32>
    %321 = arith.addf %305, %320 : vector<32x128xf32>
    %c0_111 = arith.constant 0 : index
    %c0_112 = arith.constant 0 : index
    %322 = vector.load %arg11[%c0_111, %c0_112] : memref<32x3xf32, #tpu.memory_space<vmem>>, vector<32x3xf32>
    %323 = tpu.iota {dimensions = array<i32: 1>} : vector<32x128xi32>
    %c2_i32_113 = arith.constant 2 : i32
    %324 = tpu.dynamic_rotate %321 by %c2_i32_113 dim 1 : vector<32x128xf32>, i32 -> vector<32x128xf32>
    %c-2_i32_114 = arith.constant -2 : i32
    %325 = vector.broadcast %c-2_i32_114 : i32 to vector<32x128xi32>
    %326 = arith.addi %323, %325 : vector<32x128xi32>
    %c0_i32_115 = arith.constant 0 : i32
    %327 = vector.broadcast %c0_i32_115 : i32 to vector<32x128xi32>
    %328 = arith.cmpi sge, %326, %327 : vector<32x128xi32>
    %c-2_i32_116 = arith.constant -2 : i32
    %329 = vector.broadcast %c-2_i32_116 : i32 to vector<32x128xi32>
    %330 = arith.addi %323, %329 : vector<32x128xi32>
    %c128_i32_117 = arith.constant 128 : i32
    %331 = vector.broadcast %c128_i32_117 : i32 to vector<32x128xi32>
    %332 = arith.cmpi slt, %330, %331 : vector<32x128xi32>
    %333 = arith.andi %328, %332 : vector<32x128xi1>
    %cst_118 = arith.constant 0.000000e+00 : f32
    %334 = vector.broadcast %cst_118 : f32 to vector<32x128xf32>
    %335 = arith.select %333, %324, %334 : vector<32x128xi1>, vector<32x128xf32>
    %336 = vector.extract_strided_slice %322 {offsets = [0, 0], sizes = [32, 1], strides = [1, 1]} : vector<32x3xf32> to vector<32x1xf32>
    %337 = vector.broadcast %336 : vector<32x1xf32> to vector<32x128xf32>
    %338 = arith.mulf %337, %335 : vector<32x128xf32>
    %339 = vector.extract_strided_slice %322 {offsets = [0, 1], sizes = [32, 1], strides = [1, 1]} : vector<32x3xf32> to vector<32x1xf32>
    %340 = vector.broadcast %339 : vector<32x1xf32> to vector<32x128xf32>
    %341 = arith.mulf %340, %321 : vector<32x128xf32>
    %342 = arith.addf %338, %341 : vector<32x128xf32>
    %c126_i32_119 = arith.constant 126 : i32
    %343 = tpu.dynamic_rotate %321 by %c126_i32_119 dim 1 : vector<32x128xf32>, i32 -> vector<32x128xf32>
    %c2_i32_120 = arith.constant 2 : i32
    %344 = vector.broadcast %c2_i32_120 : i32 to vector<32x128xi32>
    %345 = arith.addi %323, %344 : vector<32x128xi32>
    %c0_i32_121 = arith.constant 0 : i32
    %346 = vector.broadcast %c0_i32_121 : i32 to vector<32x128xi32>
    %347 = arith.cmpi sge, %345, %346 : vector<32x128xi32>
    %c2_i32_122 = arith.constant 2 : i32
    %348 = vector.broadcast %c2_i32_122 : i32 to vector<32x128xi32>
    %349 = arith.addi %323, %348 : vector<32x128xi32>
    %c128_i32_123 = arith.constant 128 : i32
    %350 = vector.broadcast %c128_i32_123 : i32 to vector<32x128xi32>
    %351 = arith.cmpi slt, %349, %350 : vector<32x128xi32>
    %352 = arith.andi %347, %351 : vector<32x128xi1>
    %cst_124 = arith.constant 0.000000e+00 : f32
    %353 = vector.broadcast %cst_124 : f32 to vector<32x128xf32>
    %354 = arith.select %352, %343, %353 : vector<32x128xi1>, vector<32x128xf32>
    %355 = vector.extract_strided_slice %322 {offsets = [0, 2], sizes = [32, 1], strides = [1, 1]} : vector<32x3xf32> to vector<32x1xf32>
    %356 = vector.broadcast %355 : vector<32x1xf32> to vector<32x128xf32>
    %357 = arith.mulf %356, %354 : vector<32x128xf32>
    %358 = arith.addf %342, %357 : vector<32x128xf32>
    %c0_125 = arith.constant 0 : index
    %c0_126 = arith.constant 0 : index
    %359 = vector.load %arg12[%c0_125, %c0_126] : memref<128x32xf32, #tpu.memory_space<vmem>>, vector<128x32xf32>
    %cst_127 = arith.constant dense<0.000000e+00> : vector<128x128xf32>
    %360 = tpu.matmul %359, %358, %cst_127 {dimension_numbers = #tpu.dot_dimension_numbers<[1], [0], [0], [1], [0, 0, 1, 1], [], []>} : vector<128x32xf32>, vector<32x128xf32>, vector<128x128xf32> -> vector<128x128xf32>
    %361 = arith.addf %284, %360 : vector<128x128xf32>
    %362 = tpu.iota {dimensions = array<i32: 1>} : vector<64x128xi32>
    %c1_i32_128 = arith.constant 1 : i32
    %363 = tpu.dynamic_rotate %1 by %c1_i32_128 dim 1 : vector<64x128xf32>, i32 -> vector<64x128xf32>
    %c-1_i32_129 = arith.constant -1 : i32
    %364 = vector.broadcast %c-1_i32_129 : i32 to vector<64x128xi32>
    %365 = arith.addi %362, %364 : vector<64x128xi32>
    %c0_i32_130 = arith.constant 0 : i32
    %366 = vector.broadcast %c0_i32_130 : i32 to vector<64x128xi32>
    %367 = arith.cmpi sge, %365, %366 : vector<64x128xi32>
    %c-1_i32_131 = arith.constant -1 : i32
    %368 = vector.broadcast %c-1_i32_131 : i32 to vector<64x128xi32>
    %369 = arith.addi %362, %368 : vector<64x128xi32>
    %c128_i32_132 = arith.constant 128 : i32
    %370 = vector.broadcast %c128_i32_132 : i32 to vector<64x128xi32>
    %371 = arith.cmpi slt, %369, %370 : vector<64x128xi32>
    %372 = arith.andi %367, %371 : vector<64x128xi1>
    %cst_133 = arith.constant 0xFF800000 : f32
    %373 = vector.broadcast %cst_133 : f32 to vector<64x128xf32>
    %374 = arith.select %372, %363, %373 : vector<64x128xi1>, vector<64x128xf32>
    %375 = arith.maximumf %374, %1 : vector<64x128xf32>
    %c127_i32_134 = arith.constant 127 : i32
    %376 = tpu.dynamic_rotate %1 by %c127_i32_134 dim 1 : vector<64x128xf32>, i32 -> vector<64x128xf32>
    %c1_i32_135 = arith.constant 1 : i32
    %377 = vector.broadcast %c1_i32_135 : i32 to vector<64x128xi32>
    %378 = arith.addi %362, %377 : vector<64x128xi32>
    %c0_i32_136 = arith.constant 0 : i32
    %379 = vector.broadcast %c0_i32_136 : i32 to vector<64x128xi32>
    %380 = arith.cmpi sge, %378, %379 : vector<64x128xi32>
    %c1_i32_137 = arith.constant 1 : i32
    %381 = vector.broadcast %c1_i32_137 : i32 to vector<64x128xi32>
    %382 = arith.addi %362, %381 : vector<64x128xi32>
    %c128_i32_138 = arith.constant 128 : i32
    %383 = vector.broadcast %c128_i32_138 : i32 to vector<64x128xi32>
    %384 = arith.cmpi slt, %382, %383 : vector<64x128xi32>
    %385 = arith.andi %380, %384 : vector<64x128xi1>
    %cst_139 = arith.constant 0xFF800000 : f32
    %386 = vector.broadcast %cst_139 : f32 to vector<64x128xf32>
    %387 = arith.select %385, %376, %386 : vector<64x128xi1>, vector<64x128xf32>
    %388 = arith.maximumf %375, %387 : vector<64x128xf32>
    %c0_140 = arith.constant 0 : index
    %c0_141 = arith.constant 0 : index
    %389 = vector.load %arg13[%c0_140, %c0_141] : memref<128x64xf32, #tpu.memory_space<vmem>>, vector<128x64xf32>
    %cst_142 = arith.constant dense<0.000000e+00> : vector<128x128xf32>
    %390 = tpu.matmul %389, %388, %cst_142 {dimension_numbers = #tpu.dot_dimension_numbers<[1], [0], [0], [1], [0, 0, 1, 1], [], []>} : vector<128x64xf32>, vector<64x128xf32>, vector<128x128xf32> -> vector<128x128xf32>
    %391 = arith.addf %361, %390 : vector<128x128xf32>
    %c0_143 = arith.constant 0 : index
    %c0_144 = arith.constant 0 : index
    %c0_145 = arith.constant 0 : index
    %392 = vector.load %arg15[%c0_143, %c0_144, %c0_145] : memref<1x128x128xf32, #tpu.memory_space<vmem>>, vector<1x128x128xf32>
    %393 = vector.shape_cast %392 : vector<1x128x128xf32> to vector<128x128xf32>
    %394 = vector.shape_cast %391 : vector<128x128xf32> to vector<1x128x128xf32>
    tpu.vector_store %arg15[%c0_143, %c0_144, %c0_145], %394 {strides = array<i32>} : memref<1x128x128xf32, #tpu.memory_space<vmem>>, vector<1x128x128xf32>,
    %c0_146 = arith.constant 0 : index
    %c0_147 = arith.constant 0 : index
    %395 = vector.load %arg14[%c0_146, %c0_147] : memref<128x32xf32, #tpu.memory_space<vmem>>, vector<128x32xf32>
    %c0_148 = arith.constant 0 : index
    %c0_149 = arith.constant 0 : index
    %c0_150 = arith.constant 0 : index
    %396 = vector.load %arg2[%c0_148, %c0_149, %c0_150] : memref<1x32x128xf32, #tpu.memory_space<vmem>>, vector<1x32x128xf32>
    %397 = vector.shape_cast %396 : vector<1x32x128xf32> to vector<32x128xf32>
    %cst_151 = arith.constant dense<0.000000e+00> : vector<128x128xf32>
    %398 = tpu.matmul %395, %397, %cst_151 {dimension_numbers = #tpu.dot_dimension_numbers<[1], [0], [0], [1], [0, 0, 1, 1], [], []>} : vector<128x32xf32>, vector<32x128xf32>, vector<128x128xf32> -> vector<128x128xf32>
    %c0_152 = arith.constant 0 : index
    %c0_153 = arith.constant 0 : index
    %c0_154 = arith.constant 0 : index
    %399 = vector.load %arg16[%c0_152, %c0_153, %c0_154] : memref<1x128x128xf32, #tpu.memory_space<vmem>>, vector<1x128x128xf32>
    %400 = vector.shape_cast %399 : vector<1x128x128xf32> to vector<128x128xf32>
    %401 = vector.shape_cast %398 : vector<128x128xf32> to vector<1x128x128xf32>
    tpu.vector_store %arg16[%c0_152, %c0_153, %c0_154], %401 {strides = array<i32>} : memref<1x128x128xf32, #tpu.memory_space<vmem>>, vector<1x128x128xf32>,
    return
  }
  func.func @transform_0(%arg0: i32) -> (i32, i32, i32) {
    %c0_i32 = arith.constant 0 : i32
    %c0_i32_0 = arith.constant 0 : i32
    %c0_i32_1 = arith.constant 0 : i32
    return %arg0, %c0_i32, %c0_i32_0 : i32, i32, i32
  }
  func.func @transform_1(%arg0: i32) -> (i32, i32, i32) {
    %c0_i32 = arith.constant 0 : i32
    %c0_i32_0 = arith.constant 0 : i32
    %c0_i32_1 = arith.constant 0 : i32
    return %arg0, %c0_i32, %c0_i32_0 : i32, i32, i32
  }
  func.func @transform_2(%arg0: i32) -> (i32, i32) {
    %c0_i32 = arith.constant 0 : i32
    %c0_i32_0 = arith.constant 0 : i32
    %c0_i32_1 = arith.constant 0 : i32
    return %c0_i32, %c0_i32_0 : i32, i32
  }
  func.func @transform_3(%arg0: i32) -> (i32, i32) {
    %c0_i32 = arith.constant 0 : i32
    %c0_i32_0 = arith.constant 0 : i32
    %c0_i32_1 = arith.constant 0 : i32
    return %c0_i32, %c0_i32_0 : i32, i32
  }
  func.func @transform_4(%arg0: i32) -> (i32, i32) {
    %c0_i32 = arith.constant 0 : i32
    %c0_i32_0 = arith.constant 0 : i32
    %c0_i32_1 = arith.constant 0 : i32
    return %c0_i32, %c0_i32_0 : i32, i32
  }
  func.func @transform_5(%arg0: i32) -> (i32, i32) {
    %c0_i32 = arith.constant 0 : i32
    %c0_i32_0 = arith.constant 0 : i32
    %c0_i32_1 = arith.constant 0 : i32
    return %c0_i32, %c0_i32_0 : i32, i32
  }
  func.func @transform_6(%arg0: i32) -> (i32, i32) {
    %c0_i32 = arith.constant 0 : i32
    %c0_i32_0 = arith.constant 0 : i32
    %c0_i32_1 = arith.constant 0 : i32
    return %c0_i32, %c0_i32_0 : i32, i32
  }
  func.func @transform_7(%arg0: i32) -> (i32, i32) {
    %c0_i32 = arith.constant 0 : i32
    %c0_i32_0 = arith.constant 0 : i32
    %c0_i32_1 = arith.constant 0 : i32
    return %c0_i32, %c0_i32_0 : i32, i32
  }
  func.func @transform_8(%arg0: i32) -> (i32, i32) {
    %c0_i32 = arith.constant 0 : i32
    %c0_i32_0 = arith.constant 0 : i32
    %c0_i32_1 = arith.constant 0 : i32
    return %c0_i32, %c0_i32_0 : i32, i32
  }
  func.func @transform_9(%arg0: i32) -> (i32, i32) {
    %c0_i32 = arith.constant 0 : i32
    %c0_i32_0 = arith.constant 0 : i32
    %c0_i32_1 = arith.constant 0 : i32
    return %c0_i32, %c0_i32_0 : i32, i32
  }
  func.func @transform_10(%arg0: i32) -> (i32, i32) {
    %c0_i32 = arith.constant 0 : i32
    %c0_i32_0 = arith.constant 0 : i32
    %c0_i32_1 = arith.constant 0 : i32
    return %c0_i32, %c0_i32_0 : i32, i32
  }
  func.func @transform_11(%arg0: i32) -> (i32, i32) {
    %c0_i32 = arith.constant 0 : i32
    %c0_i32_0 = arith.constant 0 : i32
    %c0_i32_1 = arith.constant 0 : i32
    return %c0_i32, %c0_i32_0 : i32, i32
  }
  func.func @transform_12(%arg0: i32) -> (i32, i32) {
    %c0_i32 = arith.constant 0 : i32
    %c0_i32_0 = arith.constant 0 : i32
    %c0_i32_1 = arith.constant 0 : i32
    return %c0_i32, %c0_i32_0 : i32, i32
  }
  func.func @transform_13(%arg0: i32) -> (i32, i32) {
    %c0_i32 = arith.constant 0 : i32
    %c0_i32_0 = arith.constant 0 : i32
    %c0_i32_1 = arith.constant 0 : i32
    return %c0_i32, %c0_i32_0 : i32, i32
  }
  func.func @transform_14(%arg0: i32) -> (i32, i32, i32) {
    %c0_i32 = arith.constant 0 : i32
    %c0_i32_0 = arith.constant 0 : i32
    %c0_i32_1 = arith.constant 0 : i32
    return %arg0, %c0_i32, %c0_i32_0 : i32, i32, i32
  }
  func.func @transform_15(%arg0: i32) -> (i32, i32, i32) {
    %c0_i32 = arith.constant 0 : i32
    %c0_i32_0 = arith.constant 0 : i32
    %c0_i32_1 = arith.constant 0 : i32
    return %arg0, %c0_i32, %c0_i32_0 : i32, i32, i32
  }
}

module attributes {stable_mosaic.version = 11 : i64} {
  func.func @_bn_add_relu_kernel(%arg0: i32, %arg1: memref<1x128x128xf32, #tpu.memory_space<vmem>>, %arg2: memref<1x128x128xf32, #tpu.memory_space<vmem>>, %arg3: memref<128x1xf32, #tpu.memory_space<vmem>>, %arg4: memref<128x1xf32, #tpu.memory_space<vmem>>, %arg5: memref<1x128x128xf32, #tpu.memory_space<vmem>>) attributes {dimension_semantics = [#tpu.dimension_semantics<parallel>], iteration_bounds = array<i64: 2>, scalar_prefetch = 0 : i64, scratch_operands = 0 : i64, tpu.core_type = #tpu.core_type<tc>, window_params = [{transform_indices = @transform_0, window_bounds = array<i64: 1, 128, 128>}, {transform_indices = @transform_1, window_bounds = array<i64: 1, 128, 128>}, {pipeline_mode = #tpu.pipeline_mode<synchronous>, transform_indices = @transform_2, window_bounds = array<i64: 128, 1>}, {pipeline_mode = #tpu.pipeline_mode<synchronous>, transform_indices = @transform_3, window_bounds = array<i64: 128, 1>}, {transform_indices = @transform_4, window_bounds = array<i64: 1, 128, 128>}]} {
    %c0 = arith.constant 0 : index
    %c0_0 = arith.constant 0 : index
    %c0_1 = arith.constant 0 : index
    %0 = vector.load %arg1[%c0, %c0_0, %c0_1] : memref<1x128x128xf32, #tpu.memory_space<vmem>>, vector<1x128x128xf32>
    %1 = vector.shape_cast %0 : vector<1x128x128xf32> to vector<128x128xf32>
    %c0_2 = arith.constant 0 : index
    %c0_3 = arith.constant 0 : index
    %c0_4 = arith.constant 0 : index
    %2 = vector.load %arg2[%c0_2, %c0_3, %c0_4] : memref<1x128x128xf32, #tpu.memory_space<vmem>>, vector<1x128x128xf32>
    %3 = vector.shape_cast %2 : vector<1x128x128xf32> to vector<128x128xf32>
    %c0_5 = arith.constant 0 : index
    %c0_6 = arith.constant 0 : index
    %4 = vector.load %arg3[%c0_5, %c0_6] : memref<128x1xf32, #tpu.memory_space<vmem>>, vector<128x1xf32>
    %5 = vector.broadcast %4 : vector<128x1xf32> to vector<128x128xf32>
    %6 = arith.mulf %3, %5 : vector<128x128xf32>
    %7 = arith.addf %1, %6 : vector<128x128xf32>
    %c0_7 = arith.constant 0 : index
    %c0_8 = arith.constant 0 : index
    %8 = vector.load %arg4[%c0_7, %c0_8] : memref<128x1xf32, #tpu.memory_space<vmem>>, vector<128x1xf32>
    %9 = vector.broadcast %8 : vector<128x1xf32> to vector<128x128xf32>
    %10 = arith.addf %7, %9 : vector<128x128xf32>
    %cst = arith.constant 0.000000e+00 : f32
    %11 = vector.broadcast %cst : f32 to vector<128x128xf32>
    %12 = arith.maximumf %10, %11 : vector<128x128xf32>
    %c0_9 = arith.constant 0 : index
    %c0_10 = arith.constant 0 : index
    %c0_11 = arith.constant 0 : index
    %13 = vector.load %arg5[%c0_9, %c0_10, %c0_11] : memref<1x128x128xf32, #tpu.memory_space<vmem>>, vector<1x128x128xf32>
    %14 = vector.shape_cast %13 : vector<1x128x128xf32> to vector<128x128xf32>
    %15 = vector.shape_cast %12 : vector<128x128xf32> to vector<1x128x128xf32>
    tpu.vector_store %arg5[%c0_9, %c0_10, %c0_11], %15 {strides = array<i32>} : memref<1x128x128xf32, #tpu.memory_space<vmem>>, vector<1x128x128xf32>,
    return
  }
  func.func @transform_0(%arg0: i32) -> (i32, i32, i32) {
    %c0_i32 = arith.constant 0 : i32
    %c0_i32_0 = arith.constant 0 : i32
    %c0_i32_1 = arith.constant 0 : i32
    return %arg0, %c0_i32, %c0_i32_0 : i32, i32, i32
  }
  func.func @transform_1(%arg0: i32) -> (i32, i32, i32) {
    %c0_i32 = arith.constant 0 : i32
    %c0_i32_0 = arith.constant 0 : i32
    %c0_i32_1 = arith.constant 0 : i32
    return %arg0, %c0_i32, %c0_i32_0 : i32, i32, i32
  }
  func.func @transform_2(%arg0: i32) -> (i32, i32) {
    %c0_i32 = arith.constant 0 : i32
    %c0_i32_0 = arith.constant 0 : i32
    %c0_i32_1 = arith.constant 0 : i32
    return %c0_i32, %c0_i32_0 : i32, i32
  }
  func.func @transform_3(%arg0: i32) -> (i32, i32) {
    %c0_i32 = arith.constant 0 : i32
    %c0_i32_0 = arith.constant 0 : i32
    %c0_i32_1 = arith.constant 0 : i32
    return %c0_i32, %c0_i32_0 : i32, i32
  }
  func.func @transform_4(%arg0: i32) -> (i32, i32, i32) {
    %c0_i32 = arith.constant 0 : i32
    %c0_i32_0 = arith.constant 0 : i32
    %c0_i32_1 = arith.constant 0 : i32
    return %arg0, %c0_i32, %c0_i32_0 : i32, i32, i32
  }
}

</mosaic_0001>

<bundles_post_ra>
// kernel: _lambda_.8
= control target key start
LH: loop header
LB: loop body
LE: loop exit
PB: predicated region body
PF: predicated region fallthrough
CT: control target
= control target key end

     0   :  { %s422_s15 = smov 0   ;;  %s466_s0 = inlined_call_operand.vmem [shape: f32[2,32,128], index: 0, kind: input, shape index: {}]   ;;  %s467_s1 = inlined_call_operand.vmem [shape: f32[2,32,128], index: 1, kind: input, shape index: {}]   ;;  %s468_s2 = inlined_call_operand.vmem [shape: f32[32,1], index: 2, kind: input, shape index: {}]   ;;  %s469_s3 = inlined_call_operand.vmem [shape: f32[32,1], index: 3, kind: input, shape index: {}]   ;;  %s470_s4 = inlined_call_operand.vmem [shape: f32[2,32,128], index: 4, kind: output, shape index: {}]  }
   0x1 LB: > { %s361_s16 = sadd.s32 4294967295, %s394_s15   ;;  %p365_p0 = scmp.ge.s32.totalorder %s394_s15, 1  ;;  %s394_s15 = sphi %s422_s15, %s14_s15  }
   0x2   : > { %p172_p1 = scmp.lt.s32.totalorder %s394_s15, 3 }
   0x4   : > { %p173_p2 = pnand %p365_p0, %p172_p1 }
   0x5   : > { %v228_v0 = vld [vmem:[%s468_s2 + $0x10] sm:$0xff] (!%p173_p2)  ;;  %v226_v1 = vld [vmem:[%s468_s2] sm:$0xff] (!%p173_p2)  ;;  %v396_v2 = vmov (!%p173_p2), 0   ;;  %v229_v3 = vld [vmem:[%s468_s2 + $0x18] sm:$0xff] (!%p173_p2)  ;;  %p203_p3 = scmp.lt.s32.totalorder (!%p173_p2), %s361_s16, 1 }
   0x6   : > { %176 = sbr.rel (%p173_p2) target bundleno = 152 (0x98), region = 36  ;;  %387 = vset.pattern.permute.xlu1 (!%p173_p2), %v396_v2  ;;  %386 = vset.pattern.permute.xlu0 (!%p173_p2), %v396_v2  ;;  %v227_v4 = vld [vmem:[%s468_s2 + $0x8] sm:$0xff] (!%p173_p2)  ;;  %v258_v6 = vld [vmem:[%s469_s3] sm:$0xff] (!%p173_p2)  ;;  %v261_v7 = vld [vmem:[%s469_s3 + $0x18] sm:$0xff] (!%p173_p2) }
   0x7   : > { %242 = vperm.xlu1 (!%p173_p2), %387, %v228_v0   ;;  %232 = vperm.xlu0 (!%p173_p2), %386, %v226_v1   ;;  %v259_v5 = vld [vmem:[%s469_s3 + $0x8] sm:$0xff] (!%p173_p2)  ;;  %v260_v8 = vld [vmem:[%s469_s3 + $0x10] sm:$0xff] (!%p173_p2) }
   0xb   : > { %247 = vperm.xlu1 (!%p173_p2), %387, %v229_v3   ;;  %237 = vperm.xlu0 (!%p173_p2), %386, %v227_v4  }
   0xd   : > { %s472_s16 = smov (!%p203_p3, %s361_s16), 1 }
   0xe   : > { %s374_s7 = sshll.u32 %s472_s16, 5 }
   0xf   : > { %269 = vperm.xlu1 %387, %v259_v5   ;;  %264 = vperm.xlu0 %386, %v258_v6   ;;  %s212_s10 = scalar_lea.vmem %s467_s1, %s374_s7  ;;  %s207_s13 = scalar_lea.vmem %s466_s0, %s374_s7 }
  0x10   : > { %v222_v11 = vld [vmem:[%s212_s10] sm:$0xff]  ;;  %v223_v12 = vld [vmem:[%s212_s10 + $0x8] sm:$0xff]  ;;  %v224_v13 = vld [vmem:[%s212_s10 + $0x10] sm:$0xff]  ;;  %s217_s17 = scalar_lea.vmem %s470_s4, %s374_s7 }
  0x11   : > { %v225_v16 = vld [vmem:[%s212_s10 + $0x18] sm:$0xff]  ;;  %v219_v18 = vld [vmem:[%s207_s13 + $0x8] sm:$0xff]  ;;  %v218_v19 = vld [vmem:[%s207_s13] sm:$0xff] }
  0x12   : > { %v221_v27 = vld [vmem:[%s207_s13 + $0x18] sm:$0xff]  ;;  %v220_v28 = vld [vmem:[%s207_s13 + $0x10] sm:$0xff] }
  0x13   : > { %279 = vperm.xlu1 %387, %v261_v7   ;;  %274 = vperm.xlu0 %386, %v260_v8  }
  0x86   : > { %v243_v9 = vpop.permute.xlu1 %242  ;;  %v233_v10 = vpop.permute.xlu0 %232 }
  0x87   : > { %v250_v14 = vmul.f32 %v233_v10, %v222_v11  ;;  %v252_v21 = vmul.f32 %v243_v9, %v224_v13 }
  0x89   : > { %v254_v24 = vadd.f32 %v250_v14, %v218_v19  ;;  %v256_v34 = vadd.f32 %v252_v21, %v220_v28 }
  0x8a   : > { %v248_v15 = vpop.permute.xlu1 %247  ;;  %v238_v17 = vpop.permute.xlu0 %237 }
  0x8b   : > { %v251_v20 = vmul.f32 %v238_v17, %v223_v12  ;;  %v253_v22 = vmul.f32 %v248_v15, %v225_v16 }
  0x8d   : > { %v255_v23 = vadd.f32 %v251_v20, %v219_v18  ;;  %v257_v33 = vadd.f32 %v253_v22, %v221_v27 }
  0x8e   : > { %v270_v25 = vpop.permute.xlu1 %269  ;;  %v265_v26 = vpop.permute.xlu0 %264 }
  0x8f   : > { %v283_v29 = vadd.f32 %v270_v25, %v255_v23  ;;  %v282_v30 = vadd.f32 %v265_v26, %v254_v24 }
  0x91   : > { %v287_v31 = vmax.f32 %v283_v29, 0.0  ;;  %v286_v32 = vmax.f32 %v282_v30, 0.0 }
  0x92   : > { %v280_v35 = vpop.permute.xlu1 %279  ;;  %v275_v36 = vpop.permute.xlu0 %274 }
  0x93   : > { %291 = vst [vmem:[%s217_s17 + $0x8] sm:$0xff] %v287_v31  ;;  %290 = vst [vmem:[%s217_s17] sm:$0xff] %v286_v32  ;;  %v285_v37 = vadd.f32 %v280_v35, %v257_v33  ;;  %v284_v38 = vadd.f32 %v275_v36, %v256_v34 }
  0x95   : > { %v289_v39 = vmax.f32 %v285_v37, 0.0  ;;  %v288_v40 = vmax.f32 %v284_v38, 0.0 }
  0x97   : > { %293 = vst [vmem:[%s217_s17 + $0x18] sm:$0xff] %v289_v39  ;;  %292 = vst [vmem:[%s217_s17 + $0x10] sm:$0xff] %v288_v40 }
  0x98 PF: > { %s14_s15 = sadd.s32 1, %s394_s15  }
  0x99   : > { %p11_p4 = scmp.ge.s32.totalorder %s14_s15, 4  }
  0x9b   :  { %13 = sbr.rel (!%p11_p4) target bundleno = 1 (0x1), region = 69 }

// kernel: _lambda_.7
= control target key start
LH: loop header
LB: loop body
LE: loop exit
PB: predicated region body
PF: predicated region fallthrough
CT: control target
= control target key end

     0   :  { %s1800_s18 = smov 0   ;;  %s2044_s0 = inlined_call_operand.vmem [shape: f32[2,16,128], index: 0, kind: input, shape index: {}]   ;;  %s2045_s1 = inlined_call_operand.vmem [shape: f32[2,4,128], index: 1, kind: input, shape index: {}]   ;;  %s2046_s2 = inlined_call_operand.vmem [shape: f32[8,16], index: 2, kind: input, shape index: {}]   ;;  %s2047_s3 = inlined_call_operand.vmem [shape: f32[8,9], index: 3, kind: input, shape index: {}]   ;;  %s2048_s4 = inlined_call_operand.vmem [shape: f32[8,3], index: 4, kind: input, shape index: {}]   ;;  %s2049_s5 = inlined_call_operand.vmem [shape: f32[32,8], index: 5, kind: input, shape index: {}]   ;;  %s2050_s6 = inlined_call_operand.vmem [shape: f32[8,5], index: 6, kind: input, shape index: {}]   ;;  %s2051_s7 = inlined_call_operand.vmem [shape: f32[8,3], index: 7, kind: input, shape index: {}]   ;;  %s2052_s8 = inlined_call_operand.vmem [shape: f32[32,8], index: 8, kind: input, shape index: {}]   ;;  %s2053_s9 = inlined_call_operand.vmem [shape: f32[8,3], index: 9, kind: input, shape index: {}]   ;;  %s2054_s10 = inlined_call_operand.vmem [shape: f32[8,3], index: 10, kind: input, shape index: {}]   ;;  %s2055_s11 = inlined_call_operand.vmem [shape: f32[32,8], index: 11, kind: input, shape index: {}]   ;;  %s2056_s12 = inlined_call_operand.vmem [shape: f32[32,16], index: 12, kind: input, shape index: {}]   ;;  %s2057_s13 = inlined_call_operand.vmem [shape: f32[32,4], index: 13, kind: input, shape index: {}]   ;;  %s2058_s14 = inlined_call_operand.vmem [shape: f32[2,32,128], index: 14, kind: output, shape index: {0}]   ;;  %s2059_s15 = inlined_call_operand.vmem [shape: f32[2,32,128], index: 15, kind: output, shape index: {1}]  }
   0x1 LB: > { %s1492_s19 = sadd.s32 4294967295, %s1696_s18   ;;  %p1496_p0 = scmp.ge.s32.totalorder %s1696_s18, 1  ;;  %s1696_s18 = sphi %s1800_s18, %s26_s18  }
   0x2   : > { %p449_p1 = scmp.lt.s32.totalorder %s1696_s18, 3 }
   0x4   : > { %p450_p2 = pnand %p1496_p0, %p449_p1 }
   0x5   : > { %p506_p3 = scmp.lt.s32.totalorder (!%p450_p2), %s1492_s19, 1  ;;  %v1698_v0 = vmov (!%p450_p2), 0.0|0.0   ;;  %vm1699_vm0 = vmmov (!%p450_p2), 0   ;;  %v1700_v1 = vmov (!%p450_p2), 0.0   ;;  %v602_v2 = vld [vmem:[%s2047_s3] sm:$0xff] (!%p450_p2)  ;;  %v1701_v3 = vmov (!%p450_p2), 2  }
   0x6   : > { %453 = sbr.rel (%p450_p2) target bundleno = 768 (0x300), region = 76  ;;  %1609 = vmatprep.subr.bf16.mxu0 (!%p450_p2), %v1698_v0  ;;  %1564 = vmatprep.mubr.msk.f32.mxu0 (!%p450_p2), %vm1699_vm0, %v1700_v1  ;;  %v1702_v4 = vmov (!%p450_p2), 1   ;;  %v1703_v8 = vmov (!%p450_p2), 3   ;;  %v1704_v9 = vmov (!%p450_p2), 7   ;;  %v527_v10 = vld [vmem:[%s2046_s2] sm:$0xff] (!%p450_p2)  ;;  %vm528_vm1 = vcmask (!%p450_p2), 130048  }
   0x7   : > { %1659 = vset.pattern.permute.xlu1 (!%p450_p2), %v1701_v3  ;;  %1658 = vset.pattern.permute.xlu0 (!%p450_p2), %v1702_v4  ;;  %v1705_v11 = vmov (!%p450_p2), 4   ;;  %v1706_v12 = vmov (!%p450_p2), 0   ;;  %v752_v13 = vld [vmem:[%s2050_s6] sm:$0xff] (!%p450_p2)  ;;  %v1707_v14 = vmov (!%p450_p2), 5   ;;  %v1708_v15 = vmov (!%p450_p2), 6   ;;  %s1710_s30 = smov (!%p450_p2), 3  }
   0x8   : > { %639 = vperm.xlu1 (!%p450_p2), %1659, %v602_v2   ;;  %626 = vperm.xlu0 (!%p450_p2), %1658, %v602_v2   ;;  %v1709_v16 = vmov (!%p450_p2), 8   ;;  %s1711_s16 = smov (!%p450_p2), 4   ;;  %s1712_s17 = smov (!%p450_p2), 2   ;;  %v1007_v19 = vld [vmem:[%s2053_s9] sm:$0xff] (!%p450_p2)  ;;  %v603_v33 = vlaneseq (!%p450_p2)  ;;  %vm812_vm10 = vcmask (!%p450_p2), 64512   ;;  %vm1299_vm13 = vcmask (!%p450_p2), 1043456  }
   0x9   : > { %s1713_s20 = smov (!%p450_p2), 127   ;;  %s1714_s23 = smov (!%p450_p2), 1   ;;  %v715_v20 = vld [vmem:[%s2048_s4] sm:$0xff] (!%p450_p2)  ;;  %vm1286_vm14 = vcmask (!%p450_p2), 31744  }
   0xa   : > { %s1715_s24 = smov (!%p450_p2), 126   ;;  %s1717_s28 = smov (!%p450_p2), 124   ;;  %v1861_v21 = vld [vmem:[%s2054_s10] sm:$0xff] (!%p450_p2)  ;;  %v1873_v35 = vand.u32 (!%p450_p2), 127, %v603_v33 }
   0xb   : > { %v783_v22 = vld [vmem:[%s2051_s7] sm:$0xff] (!%p450_p2)  ;;  %s1718_s26 = smov (!%p450_p2), 123   ;;  %s1719_s27 = smov (!%p450_p2), 5  }
   0xc   : > { %1660 = vset.pattern.permute.xlu1 (!%p450_p2), %v1703_v8  ;;  %1664 = vset.pattern.permute.xlu0 (!%p450_p2), %v1704_v9  ;;  %v1876_v37 = vadd.s32 (!%p450_p2), 4294967293, %v1873_v35  ;;  %v607_v38 = vadd.s32 (!%p450_p2), 4294967292, %v1873_v35  ;;  %v1880_v40 = vadd.s32 (!%p450_p2), 4294967294, %v1873_v35  ;;  %v1884_v42 = vadd.s32 (!%p450_p2), 4294967295, %v1873_v35 }
   0xd   : > { %s2061_s19 = smov (!%p506_p3, %s1492_s19), 1  ;;  %652 = vperm.xlu1 %1660, %v602_v2   ;;  %697 = vperm.xlu0 %1664, %v602_v2   ;;  %v1895_v54 = vadd.s32 1, %v1873_v35  ;;  %v1899_v59 = vadd.s32 2, %v1873_v35  ;;  %v1903_v61 = vadd.s32 3, %v1873_v35 }
   0xe   : > { %s1528_s22 = sshll.u32 %s2061_s19, 4  ;;  %vm621_vm2 = vcmp.ge.s32.totalorder %v1876_v37, 0  ;;  %vm608_vm3 = vcmp.ge.s32.totalorder %v607_v38, 0  ;;  %vm634_vm4 = vcmp.ge.s32.totalorder %v1880_v40, 0  ;;  %vm647_vm5 = vcmp.ge.s32.totalorder %v1884_v42, 0  ;;  %v1054_v37 = vld [vmem:[%s2055_s11 + $0x18] sm:$0xff] }
   0xf   : > { %s510_s25 = scalar_lea.vmem %s2044_s0, %s1528_s22  ;;  %vm667_vm6 = vcmp.lt.s32.totalorder %v1895_v54, 128  ;;  %vm680_vm7 = vcmp.lt.s32.totalorder %v1899_v59, 128  ;;  %vm693_vm8 = vcmp.lt.s32.totalorder %v1903_v61, 128  ;;  %v1053_v59 = vld [vmem:[%s2055_s11 + $0x10] sm:$0xff]  ;;  %v1173_v54 = vld [vmem:[%s2056_s12 + $0x8] sm:$0xff] }
  0x10   : > { %v1819_v5 = vld [vmem:[%s510_s25] sm:$0xff]  ;;  %v1821_v6 = vld [vmem:[%s510_s25 + $0x8] sm:$0xff]  ;;  %s1716_s25 = smov 125  }
  0x11   : > { %v1610_v7 = vpack.c.bf16 %v1821_v6, %v1819_v5  ;;  %1661 = vset.pattern.permute.xlu1 %v1705_v11  ;;  %1665 = vset.pattern.permute.xlu0 %v1706_v12 }
  0x12   : > { %658 = vperm.xlu1 %1661, %v602_v2   ;;  %614 = vperm.xlu0 %1665, %v602_v2  }
  0x13   : > { %1611 = vmatpush3.bf16.msra.mxu0 %v1610_v7 }
  0x16   : > { %1565 = vmatmul.mubr.msk.f32.vlgmr.msra.gmra.mrb[0].mxu0 %vm528_vm1, %v527_v10  ;;  %1662 = vset.pattern.permute.xlu1 %v1707_v14 }
  0x17   : > { %671 = vperm.xlu1 %1662, %v602_v2   ;;  %755 = vperm.xlu0 %1665, %v752_v13  }
  0x1b   : > { %1663 = vset.pattern.permute.xlu1 %v1708_v15  ;;  %1668 = vset.pattern.permute.xlu0 %v1701_v3 }
  0x1c   : > { %684 = vperm.xlu1 %1663, %v602_v2  }
  0x20   : > { %1666 = vset.pattern.permute.xlu1 %v1709_v16 }
  0x21   : > { %710 = vperm.xlu1 %1666, %v602_v2  }
  0x25   : > { %1667 = vset.pattern.permute.xlu1 %v1702_v4 }
  0x26   : > { %760 = vperm.xlu1 %1667, %v752_v13  }
  0x2a   : > { %1669 = vset.pattern.permute.xlu1 %v1706_v12 }
  0x87   : > { %v640_v23 = vpop.permute.xlu1 %639  ;;  %v627_v25 = vpop.permute.xlu0 %626 }
  0x8c   : > { %v653_v24 = vpop.permute.xlu1 %652  ;;  %v698_v28 = vpop.permute.xlu0 %697 }
  0x91   : > { %v659_v26 = vpop.permute.xlu1 %658  ;;  %v615_v30 = vpop.permute.xlu0 %614 }
  0x96   : > { %v672_v27 = vpop.permute.xlu1 %671  ;;  %v756_v32 = vpop.permute.xlu0 %755 }
  0x9b   : > { %v685_v29 = vpop.permute.xlu1 %684 }
  0xa0   : > { %v711_v31 = vpop.permute.xlu1 %710 }
  0xa5   : > { %v761_v34 = vpop.permute.xlu1 %760 }
  0xe9   : > { %v1834_v17 = vpop.f32.mrb[0].mxu0 }
  0xea   : > { %618 = vrot.lane.b32.xlu0 %v1834_v17, %s1710_s30  ;;  %605 = vrot.lane.b32.xlu1 %v1834_v17, %s1711_s16  ;;  %v1566_v18 = vpop.f32.mrb[1].mxu0  ;;  %v661_v60 = vmul.f32 %v659_v26, %v1834_v17  ;;  %s1499_s16 = sshll.u32 %s2061_s19, 2 }
  0xeb   : > { %s514_s22 = scalar_lea.vmem %s2045_s1, %s1499_s16 }
  0xee   : > { %631 = vrot.lane.b32.xlu0 %v1834_v17, %s1712_s17  ;;  %663 = vrot.lane.b32.xlu1 %v1834_v17, %s1713_s20 }
  0xf2   : > { %644 = vrot.lane.b32.xlu0 %v1834_v17, %s1714_s23  ;;  %1010 = vperm.xlu1 %1669, %v1007_v19  }
  0xf6   : > { %676 = vrot.lane.b32.xlu0 %v1834_v17, %s1715_s24  ;;  %1670 = vset.pattern.permute.xlu1 %v1702_v4 }
  0xf7   : > { %1015 = vperm.xlu1 %1670, %v1007_v19  }
  0xfa   : > { %766 = vperm.xlu0 %1668, %v752_v13  }
  0xfb   : > { %1672 = vset.pattern.permute.xlu1 %v1701_v3 }
  0xfc   : > { %1021 = vperm.xlu1 %1672, %v1007_v19  }
  0xfe   : > { %1671 = vset.pattern.permute.xlu0 %v1703_v8 }
  0xff   : > { %772 = vperm.xlu0 %1671, %v752_v13  }
 0x100   : > { %689 = vrot.lane.b32.xlu1 %v1834_v17, %s1716_s25 }
 0x101   : > { %1673 = vset.pattern.permute.xlu1 %v1705_v11 }
 0x103   : > { %1674 = vset.pattern.permute.xlu0 %v1706_v12 }
 0x104   : > { %702 = vrot.lane.b32.xlu1 %v1834_v17, %s1717_s28  ;;  %725 = vperm.xlu0 %1674, %v715_v20  }
 0x108   : > { %778 = vperm.xlu1 %1673, %v752_v13   ;;  %1032 = vperm.xlu0 %1674, %v1861_v21  }
 0x10c   : > { %1675 = vset.pattern.permute.xlu1 %v1702_v4  ;;  %789 = vperm.xlu0 %1674, %v783_v22  }
 0x10d   : > { %730 = vperm.xlu1 %1675, %v715_v20  }
 0x110   : > { %1678 = vset.pattern.permute.xlu0 %v1701_v3 }
 0x111   : > { %1676 = vset.pattern.permute.xlu1 %v1701_v3 }
 0x112   : > { %743 = vperm.xlu1 %1676, %v715_v20  }
 0x116   : > { %1677 = vset.pattern.permute.xlu1 %v1702_v4 }
 0x117   : > { %1037 = vperm.xlu1 %1677, %v1861_v21  }
 0x11b   : > { %794 = vperm.xlu1 %1677, %v783_v22  }
 0x11f   : > { %1679 = vset.pattern.permute.xlu1 %v1701_v3  ;;  %v704_v3 = vadd.s32 4, %v1873_v35 }
 0x120   : > { %803 = vperm.xlu1 %1679, %v783_v22  }
 0x121   : > { %vm706_vm9 = vcmp.lt.s32.totalorder %v704_v3, 128  ;;  %v751_v3 = vld [vmem:[%s2049_s5 + $0x18] sm:$0xff] }
 0x15c   : > { %v619_v36 = vpop.permute.xlu0 %618  ;;  %v606_v39 = vpop.permute.xlu1 %605 }
 0x15d   : > { %v624_v43 = vsel %vm621_vm2, %v619_v36, 0.0  ;;  %v611_v44 = vsel %vm608_vm3, %v606_v39, 0.0 }
 0x15e   : > { %v629_v48 = vmul.f32 %v627_v25, %v624_v43  ;;  %v617_v49 = vmul.f32 %v615_v30, %v611_v44 }
 0x160   : > { %v632_v41 = vpop.permute.xlu0 %631  ;;  %v664_v45 = vpop.permute.xlu1 %663  ;;  %v630_v53 = vadd.f32 %v629_v48, %v617_v49 }
 0x161   : > { %v637_v47 = vsel %vm634_vm4, %v632_v41, 0.0  ;;  %v669_v62 = vsel %vm667_vm6, %v664_v45, 0.0 }
 0x162   : > { %v642_v51 = vmul.f32 %v640_v23, %v637_v47  ;;  %v674_v2 = vmul.f32 %v672_v27, %v669_v62  ;;  %v758_v22 = vmul.f32 %v756_v32, %v637_v47  ;;  %v1680_v32 = vpack.i.bf16 %v1821_v6, %v1819_v5 }
 0x164   : > { %v645_v46 = vpop.permute.xlu0 %644  ;;  %v643_v56 = vadd.f32 %v642_v51, %v630_v53  ;;  %v718_v51 = vadd.s32 4294967291, %v1873_v35 }
 0x165   : > { %v650_v50 = vsel %vm647_vm5, %v645_v46, 0.0 }
 0x166   : > { %v655_v55 = vmul.f32 %v653_v24, %v650_v50  ;;  %v763_v16 = vmul.f32 %v761_v34, %v650_v50  ;;  %vm719_vm12 = vcmp.ge.s32.totalorder %v718_v51, 0 }
 0x168   : > { %v656_v58 = vadd.f32 %v655_v55, %v643_v56  ;;  %v677_v0 = vpop.permute.xlu0 %676 }
 0x169   : > { %v682_v4 = vsel %vm680_vm7, %v677_v0, 0.0  ;;  %v749_v0 = vld [vmem:[%s2049_s5 + $0x8] sm:$0xff] }
 0x16a   : > { %v662_v63 = vadd.f32 %v661_v60, %v656_v58  ;;  %v687_v11 = vmul.f32 %v685_v29, %v682_v4  ;;  %v764_v29 = vadd.f32 %v763_v16, %v758_v22  ;;  %v1052_v16 = vld [vmem:[%s2055_s11 + $0x8] sm:$0xff] }
 0x16c   : > { %v675_v7 = vadd.f32 %v674_v2, %v662_v63 }
 0x16e   : > { %v688_v13 = vadd.f32 %v687_v11, %v675_v7 }
 0x171   : > { %v1011_v52 = vpop.permute.xlu1 %1010 }
 0x172   : > { %v1013_v24 = vmul.f32 %v1011_v52, %v650_v50  ;;  %v737_v50 = vadd.s32 5, %v1873_v35  ;;  %v750_v35 = vld [vmem:[%s2049_s5 + $0x10] sm:$0xff] }
 0x174   : > { %vm739_vm11 = vcmp.lt.s32.totalorder %v737_v50, 128 }
 0x176   : > { %v1016_v57 = vpop.permute.xlu1 %1015 }
 0x177   : > { %v1018_v18 = vmul.f32 %v1016_v57, %v1834_v17 }
 0x179   : > { %v767_v9 = vpop.permute.xlu0 %766  ;;  %v1019_v33 = vadd.f32 %v1018_v18, %v1013_v24 }
 0x17a   : > { %v769_v25 = vmul.f32 %v767_v9, %v1834_v17  ;;  %v748_v17 = vld [vmem:[%s2049_s5] sm:$0xff] }
 0x17b   : > { %v1022_v1 = vpop.permute.xlu1 %1021  ;;  %1577 = vmatprep.mubr.msk.f32.mxu1 %vm812_vm10, %v748_v17  ;;  %v810_v17 = vld [vmem:[%s2052_s8 + $0x10] sm:$0xff] }
 0x17c   : > { %v1024_v26 = vmul.f32 %v1022_v1, %v669_v62  ;;  %v770_v34 = vadd.f32 %v769_v25, %v764_v29 }
 0x17e   : > { %v773_v23 = vpop.permute.xlu0 %772  ;;  %v1025_v36 = vadd.f32 %v1024_v26, %v1019_v33 }
 0x17f   : > { %v690_v8 = vpop.permute.xlu1 %689 }
 0x180   : > { %v695_v10 = vsel %vm693_vm8, %v690_v8, 0.0 }
 0x181   : > { %v700_v12 = vmul.f32 %v698_v28, %v695_v10  ;;  %v775_v28 = vmul.f32 %v773_v23, %v669_v62 }
 0x183   : > { %v703_v14 = vpop.permute.xlu1 %702  ;;  %v701_v19 = vadd.f32 %v700_v12, %v688_v13  ;;  %v776_v39 = vadd.f32 %v775_v28, %v770_v34  ;;  %v726_v44 = vpop.permute.xlu0 %725 }
 0x184   : > { %v708_v15 = vsel %vm706_vm9, %v703_v14, 0.0 }
 0x185   : > { %v713_v20 = vmul.f32 %v711_v31, %v708_v15 }
 0x187   : > { %v714_v27 = vadd.f32 %v713_v20, %v701_v19  ;;  %v779_v30 = vpop.permute.xlu1 %778  ;;  %v1033_v46 = vpop.permute.xlu0 %1032 }
 0x188   : > { %v781_v38 = vmul.f32 %v779_v30, %v682_v4  ;;  %v1051_v4 = vld [vmem:[%s2055_s11] sm:$0xff] }
 0x189   : > { %735 = vrot.lane.b32.xlu1 %v714_v27, %s1718_s26  ;;  %716 = vrot.lane.b32.xlu0 %v714_v27, %s1719_s27  ;;  %v1172_v30 = vld [vmem:[%s2056_s12] sm:$0xff] }
 0x18a   : > { %v1918_v31 = vadd.f32 %v781_v38, %v776_v39  ;;  %v809_v39 = vld [vmem:[%s2052_s8 + $0x8] sm:$0xff] }
 0x18b   : > { %v790_v48 = vpop.permute.xlu0 %789 }
 0x18c   : > { %v731_v41 = vpop.permute.xlu1 %730 }
 0x18d   : > { %1027 = vrot.lane.b32.xlu1 %v1025_v36, %s1712_s17  ;;  %1046 = vperm.xlu0 %1678, %v1861_v21   ;;  %v808_v21 = vld [vmem:[%s2052_s8] sm:$0xff]  ;;  %v733_v57 = vmul.f32 %v731_v41, %v714_v27  ;;  %v811_v41 = vld [vmem:[%s2052_s8 + $0x18] sm:$0xff] }
 0x18e   : > { %1569 = vmatprep.mubr.msk.f32.mxu0 %vm812_vm10, %v808_v21 }
 0x191   : > { %1042 = vrot.lane.b32.xlu1 %v1025_v36, %s1715_s24  ;;  %784 = vrot.lane.b32.xlu0 %v1918_v31, %s1710_s30  ;;  %v744_v43 = vpop.permute.xlu1 %743 }
 0x195   : > { %799 = vrot.lane.b32.xlu0 %v1918_v31, %s1716_s25  ;;  %1681 = vrot.lane.b32.xlu1 %v1680_v32, %s1714_s23 }
 0x196   : > { %v1038_v45 = vpop.permute.xlu1 %1037 }
 0x197   : > { %v1040_v9 = vmul.f32 %v1038_v45, %v1025_v36  ;;  %v1282_v45 = vld [vmem:[%s2057_s13 + $0x8] sm:$0xff] }
 0x199   : > { %1686 = vrot.lane.b32.xlu0 %v1680_v32, %s1713_s20  ;;  %s1529_s20 = sshll.u32 %s2061_s19, 5 }
 0x19a   : > { %v795_v47 = vpop.permute.xlu1 %794  ;;  %s524_s25 = scalar_lea.vmem %s2059_s15, %s1529_s20  ;;  %s519_s26 = scalar_lea.vmem %s2058_s14, %s1529_s20 }
 0x19b   : > { %v797_v23 = vmul.f32 %v795_v47, %v1918_v31  ;;  %v1285_v31 = vld [vmem:[%s514_s22] sm:$0xf]  ;;  %v1283_v47 = vld [vmem:[%s2057_s13 + $0x10] sm:$0xff] }
 0x19f   : > { %v804_v49 = vpop.permute.xlu1 %803 }
 0x1fb   : > { %v736_v52 = vpop.permute.xlu1 %735  ;;  %v717_v53 = vpop.permute.xlu0 %716 }
 0x1fc   : > { %v741_v55 = vsel %vm739_vm11, %v736_v52, 0.0  ;;  %v722_v56 = vsel %vm719_vm12, %v717_v53, 0.0 }
 0x1fd   : > { %v728_v58 = vmul.f32 %v726_v44, %v722_v56  ;;  %v746_v60 = vmul.f32 %v744_v43, %v741_v55  ;;  %v1281_v44 = vld [vmem:[%s2057_s13] sm:$0xff] }
 0x1ff   : > { %v734_v62 = vadd.f32 %v733_v57, %v728_v58  ;;  %v1028_v1 = vpop.permute.xlu1 %1027 }
 0x200   : > { %v1029_v2 = vsel %vm634_vm4, %v1028_v1, 0.0 }
 0x201   : > { %v747_v63 = vadd.f32 %v746_v60, %v734_v62  ;;  %v1035_v7 = vmul.f32 %v1033_v46, %v1029_v2  ;;  %v1174_v46 = vld [vmem:[%s2056_s12 + $0x10] sm:$0xff] }
 0x203   : > { %1575 = vmatprep.subr.mxu1 %v747_v63  ;;  %v1043_v8 = vpop.permute.xlu1 %1042  ;;  %v1041_v11 = vadd.f32 %v1040_v9, %v1035_v7 }
 0x204   : > { %1576 = vmatpush3.msra.mxu1 %v747_v63  ;;  %v1044_v40 = vsel %vm680_vm7, %v1043_v8, 0.0 }
 0x205   : > { %1578 = vmatmul.mubr.msk.f32.vlgmr.msra.gmra.mrb[0].mxu1 %vm812_vm10, %v749_v0 }
 0x206   : > { %1580 = vmatprep.mubr.msk.f32.mxu1 %vm812_vm10, %v750_v35 }
 0x207   : > { %v1682_v13 = vpop.permute.xlu1 %1681 }
 0x208   : > { %v1684_v19 = vunpack.i.h.bf16 %v1682_v13  ;;  %v1683_v20 = vunpack.i.l.bf16 %v1682_v13 }
 0x209   : > { %1581 = vmatmul.mubr.msk.f32.gmra.mrb[2].mxu1 %vm812_vm10, %v751_v3 }
 0x20a   : > { %1585 = vmatprep.mubr.msk.f32.mxu1 %vm812_vm10, %v1051_v4  ;;  %v1161_v26 = vsel %vm647_vm5, %v1684_v19, -inf  ;;  %v1160_v27 = vsel %vm647_vm5, %v1683_v20, -inf }
 0x20b   : > { %v1163_v28 = vmax.f32 %v1161_v26, %v1821_v6  ;;  %v1162_v34 = vmax.f32 %v1160_v27, %v1819_v5 }
 0x20c   : > { %v1047_v10 = vpop.permute.xlu0 %1046 }
 0x20d   : > { %v1049_v12 = vmul.f32 %v1047_v10, %v1044_v40 }
 0x20f   : > { %v1050_v14 = vadd.f32 %v1049_v12, %v1041_v11 }
 0x210   : > { %v785_v15 = vpop.permute.xlu0 %784 }
 0x211   : > { %v786_v18 = vsel %vm621_vm2, %v785_v15, 0.0  ;;  %1583 = vmatprep.subr.mxu1 %v1050_v14 }
 0x212   : > { %v792_v22 = vmul.f32 %v790_v48, %v786_v18  ;;  %1584 = vmatpush3.msra.mxu1 %v1050_v14  ;;  %v1175_v48 = vld [vmem:[%s2056_s12 + $0x18] sm:$0xff] }
 0x213   : > { %1586 = vmatmul.mubr.msk.f32.vlgmr.msra.gmra.mrb[0].mxu1 %vm812_vm10, %v1052_v16 }
 0x214   : > { %v800_v24 = vpop.permute.xlu0 %799  ;;  %1588 = vmatprep.mubr.msk.f32.mxu1 %vm812_vm10, %v1053_v59  ;;  %v798_v33 = vadd.f32 %v797_v23, %v792_v22 }
 0x215   : > { %v801_v25 = vsel %vm693_vm8, %v800_v24, 0.0 }
 0x216   : > { %v806_v29 = vmul.f32 %v804_v49, %v801_v25  ;;  %v1284_v49 = vld [vmem:[%s2057_s13 + $0x18] sm:$0xff] }
 0x217   : > { %1589 = vmatmul.mubr.msk.f32.gmra.mrb[2].mxu1 %vm812_vm10, %v1054_v37 }
 0x218   : > { %v807_v61 = vadd.f32 %v806_v29, %v798_v33  ;;  %v1687_v36 = vpop.permute.xlu0 %1686  ;;  %1595 = vmatprep.mubr.msk.f32.mxu1 %vm528_vm1, %v1172_v30 }
 0x219   : > { %v1689_v42 = vunpack.i.h.bf16 %v1687_v36  ;;  %v1688_v38 = vunpack.i.l.bf16 %v1687_v36 }
 0x21a   : > { %1567 = vmatprep.subr.mxu0 %v807_v61 }
 0x21b   : > { %v1169_v6 = vsel %vm667_vm6, %v1689_v42, -inf  ;;  %v1168_v5 = vsel %vm667_vm6, %v1688_v38, -inf  ;;  %1568 = vmatpush3.msra.mxu0 %v807_v61 }
 0x21c   : > { %v1171_v32 = vmax.f32 %v1163_v28, %v1169_v6  ;;  %v1170_v21 = vmax.f32 %v1162_v34, %v1168_v5  ;;  %1570 = vmatmul.mubr.msk.f32.vlgmr.msra.gmra.mrb[2].mxu0 %vm812_vm10, %v809_v39  ;;  %1601 = vmatprep.subr.msk.mxu0 %vm1299_vm13, %v1285_v31 }
 0x21d   : > { %1602 = vmatpush3.msk.msra.mxu0 %vm1299_vm13, %v1285_v31  ;;  %1572 = vmatprep.mubr.msk.f32.mxu0 %vm812_vm10, %v810_v17 }
 0x21e   : > { %v1612_v43 = vpack.c.bf16 %v1171_v32, %v1170_v21 }
 0x220   : > { %1613 = vmatprep.subr.bf16.mxu1 %v1612_v43  ;;  %1573 = vmatmul.mubr.msk.f32.gmra.mrb[4].mxu0 %vm812_vm10, %v811_v41 }
 0x221   : > { %1615 = vmatpush3.bf16.msra.mxu1 %v1612_v43  ;;  %1603 = vmatprep.mubr.msk.f32.mxu0 %vm1286_vm14, %v1281_v44 }
 0x224   : > { %1596 = vmatmul.mubr.msk.f32.vlgmr.msra.gmra.mrb[0].mxu1 %vm528_vm1, %v1173_v54  ;;  %1604 = vmatmul.mubr.msk.f32.vlgmr.msra.gmra.mrb[6].mxu0 %vm1286_vm14, %v1282_v45 }
 0x225   : > { %1598 = vmatprep.mubr.msk.f32.mxu1 %vm528_vm1, %v1174_v46  ;;  %1606 = vmatprep.mubr.msk.f32.mxu0 %vm1286_vm14, %v1283_v47 }
 0x228   : > { %1599 = vmatmul.mubr.msk.f32.gmra.mrb[2].mxu1 %vm528_vm1, %v1175_v48  ;;  %1607 = vmatmul.mubr.msk.f32.gmra.mrb[8].mxu0 %vm1286_vm14, %v1284_v49 }
 0x2ef   : > { %v1571_v50 = vpop.f32.mrb[2].mxu0 }
 0x2f0   : > { %v891_v51 = vpop.f32.mrb[3].mxu0 }
 0x2f3   : > { %v1574_v52 = vpop.f32.mrb[4].mxu0 }
 0x2f4   : > { %v901_v53 = vpop.f32.mrb[5].mxu0 }
 0x2f7   : > { %v1597_v55 = vpop.f32.mrb[0].mxu1  ;;  %v1605_v56 = vpop.f32.mrb[6].mxu0 }
 0x2f8   : > { %v1616_v57 = vadd.f32 %v1597_v55, %v1571_v50  ;;  %v1254_v58 = vpop.f32.mrb[1].mxu1  ;;  %1389 = vst [vmem:[%s524_s25 + $0x8] sm:$0xff] %v1605_v56  ;;  %v1369_v60 = vpop.f32.mrb[7].mxu0 }
 0x2f9   : > { %v1617_v62 = vadd.f32 %v1254_v58, %v891_v51  ;;  %1388 = vst [vmem:[%s524_s25] sm:$0xff] %v1369_v60 }
 0x2fa   : > { %1278 = vst [vmem:[%s519_s26 + $0x8] sm:$0xff] %v1616_v57 }
 0x2fb   : > { %1277 = vst [vmem:[%s519_s26] sm:$0xff] %v1617_v62  ;;  %v1600_v63 = vpop.f32.mrb[2].mxu1  ;;  %v1608_v0 = vpop.f32.mrb[8].mxu0 }
 0x2fc   : > { %v1618_v1 = vadd.f32 %v1600_v63, %v1574_v52  ;;  %v1264_v35 = vpop.f32.mrb[3].mxu1  ;;  %1391 = vst [vmem:[%s524_s25 + $0x18] sm:$0xff] %v1608_v0  ;;  %v1379_v2 = vpop.f32.mrb[9].mxu0 }
 0x2fd   : > { %v1619_v3 = vadd.f32 %v1264_v35, %v901_v53  ;;  %1390 = vst [vmem:[%s524_s25 + $0x10] sm:$0xff] %v1379_v2 }
 0x2fe   : > { %1280 = vst [vmem:[%s519_s26 + $0x18] sm:$0xff] %v1618_v1 }
 0x2ff   : > { %1279 = vst [vmem:[%s519_s26 + $0x10] sm:$0xff] %v1619_v3 }
 0x300 PF: > { %s26_s18 = sadd.s32 1, %s1696_s18  }
 0x301   : > { %p23_p4 = scmp.ge.s32.totalorder %s26_s18, 4  }
 0x303   :  { %25 = sbr.rel (!%p23_p4) target bundleno = 1 (0x1), region = 121 }

// kernel: _lambda_.6
= control target key start
LH: loop header
LB: loop body
LE: loop exit
PB: predicated region body
PF: predicated region fallthrough
CT: control target
= control target key end

     0   :  { %s1365_s21 = smov 0   ;;  %s1551_s0 = inlined_call_operand.vmem [shape: f32[2,4,128], index: 0, kind: input, shape index: {}]   ;;  %s1552_s1 = inlined_call_operand.vmem [shape: f32[4,4], index: 1, kind: input, shape index: {}]   ;;  %s1553_s2 = inlined_call_operand.vmem [shape: f32[4,9], index: 2, kind: input, shape index: {}]   ;;  %s1554_s3 = inlined_call_operand.vmem [shape: f32[4,3], index: 3, kind: input, shape index: {}]   ;;  %s1555_s4 = inlined_call_operand.vmem [shape: f32[16,4], index: 4, kind: input, shape index: {}]   ;;  %s1556_s5 = inlined_call_operand.vmem [shape: f32[4,5], index: 5, kind: input, shape index: {}]   ;;  %s1557_s6 = inlined_call_operand.vmem [shape: f32[4,3], index: 6, kind: input, shape index: {}]   ;;  %s1558_s7 = inlined_call_operand.vmem [shape: f32[16,4], index: 7, kind: input, shape index: {}]   ;;  %s1559_s8 = inlined_call_operand.vmem [shape: f32[4,3], index: 8, kind: input, shape index: {}]   ;;  %s1560_s9 = inlined_call_operand.vmem [shape: f32[4,3], index: 9, kind: input, shape index: {}]   ;;  %s1561_s10 = inlined_call_operand.vmem [shape: f32[16,4], index: 10, kind: input, shape index: {}]   ;;  %s1562_s11 = inlined_call_operand.vmem [shape: f32[16,4], index: 11, kind: input, shape index: {}]   ;;  %s1563_s12 = inlined_call_operand.vmem [shape: f32[2,16,128], index: 12, kind: output, shape index: {}]  }
   0x1 LB: > { %s1150_s22 = sadd.s32 4294967295, %s1277_s21   ;;  %p1154_p0 = scmp.ge.s32.totalorder %s1277_s21, 1  ;;  %s1277_s21 = sphi %s1365_s21, %s22_s21  }
   0x2   : > { %p361_p1 = scmp.lt.s32.totalorder %s1277_s21, 3 }
   0x4   : > { %p362_p2 = pnand %p1154_p0, %p361_p1 }
   0x5   : > { %p402_p3 = scmp.lt.s32.totalorder (!%p362_p2), %s1150_s22, 1  ;;  %v1279_v0 = vmov (!%p362_p2), 0.0   ;;  %vm1280_vm0 = vmmov (!%p362_p2), 0   ;;  %v491_v1 = vld [vmem:[%s1553_s2] sm:$0xf] (!%p362_p2)  ;;  %v1281_v2 = vmov (!%p362_p2), 0   ;;  %v492_v28 = vlaneseq (!%p362_p2) }
   0x6   : > { %365 = sbr.rel (%p362_p2) target bundleno = 746 (0x2ea), region = 68  ;;  %1189 = vmatprep.subr.mxu0 (!%p362_p2), %v1279_v0  ;;  %1191 = vmatprep.mubr.msk.f32.mxu0 (!%p362_p2), %vm1280_vm0, %v1279_v0  ;;  %v1282_v3 = vmov (!%p362_p2), 2   ;;  %vm417_vm1 = vcmask (!%p362_p2), 1043456   ;;  %v412_v4 = vld [vmem:[%s1552_s1] sm:$0xf] (!%p362_p2)  ;;  %vm413_vm2 = vcmask (!%p362_p2), 31744  }
   0x7   : > { %1249 = vset.pattern.permute.xlu0 (!%p362_p2), %v1281_v2  ;;  %1250 = vset.pattern.permute.xlu1 (!%p362_p2), %v1282_v3  ;;  %v1283_v6 = vmov (!%p362_p2), 7   ;;  %v1284_v7 = vmov (!%p362_p2), 3   ;;  %v1285_v8 = vmov (!%p362_p2), 1   ;;  %v1286_v9 = vmov (!%p362_p2), 4   ;;  %v865_v10 = vld [vmem:[%s1559_s8] sm:$0xf] (!%p362_p2) }
   0x8   : > { %503 = vperm.xlu0 (!%p362_p2), %1249, %v491_v1   ;;  %528 = vperm.xlu1 (!%p362_p2), %1250, %v491_v1   ;;  %v1287_v11 = vmov (!%p362_p2), 5   ;;  %v1288_v12 = vmov (!%p362_p2), 6   ;;  %v1289_v13 = vmov (!%p362_p2), 8   ;;  %s1290_s15 = smov (!%p362_p2), 3   ;;  %s1291_s16 = smov (!%p362_p2), 4   ;;  %v1429_v30 = vand.u32 (!%p362_p2), 127, %v492_v28 }
   0x9   : > { %s1292_s17 = smov (!%p362_p2), 2   ;;  %s1293_s18 = smov (!%p362_p2), 1   ;;  %v639_v16 = vld [vmem:[%s1556_s5] sm:$0xf] (!%p362_p2) }
   0xa   : > { %s1294_s19 = smov (!%p362_p2), 127   ;;  %s1295_s20 = smov (!%p362_p2), 126   ;;  %v604_v17 = vld [vmem:[%s1554_s3] sm:$0xf] (!%p362_p2)  ;;  %v1432_v33 = vadd.s32 (!%p362_p2), 4294967293, %v1429_v30  ;;  %v496_v34 = vadd.s32 (!%p362_p2), 4294967292, %v1429_v30 }
   0xb   : > { %s1296_s23 = smov (!%p362_p2), 125   ;;  %s1297_s26 = smov (!%p362_p2), 124   ;;  %v884_v18 = vld [vmem:[%s1560_s9] sm:$0xf] (!%p362_p2)  ;;  %v1436_v35 = vadd.s32 (!%p362_p2), 4294967294, %v1429_v30  ;;  %v1440_v38 = vadd.s32 (!%p362_p2), 4294967295, %v1429_v30 }
   0xc   : > { %1255 = vset.pattern.permute.xlu0 (!%p362_p2), %v1283_v6  ;;  %1251 = vset.pattern.permute.xlu1 (!%p362_p2), %v1284_v7  ;;  %vm510_vm3 = vcmp.ge.s32.totalorder (!%p362_p2), %v1432_v33, 0  ;;  %vm497_vm4 = vcmp.ge.s32.totalorder (!%p362_p2), %v496_v34, 0  ;;  %v1451_v49 = vadd.s32 (!%p362_p2), 2, %v1429_v30  ;;  %v1454_v50 = vadd.s32 (!%p362_p2), 1, %v1429_v30  ;;  %s1298_s13 = smov (!%p362_p2), 123   ;;  %s1299_s14 = smov (!%p362_p2), 5  }
   0xd   : > { %s1565_s22 = smov (!%p402_p3, %s1150_s22), 1  ;;  %586 = vperm.xlu0 %1255, %v491_v1   ;;  %541 = vperm.xlu1 %1251, %v491_v1   ;;  %vm523_vm5 = vcmp.ge.s32.totalorder %v1436_v35, 0  ;;  %vm536_vm6 = vcmp.ge.s32.totalorder %v1440_v38, 0  ;;  %v593_v54 = vadd.s32 4, %v1429_v30  ;;  %v1458_v55 = vadd.s32 3, %v1429_v30  ;;  %v910_v35 = vld [vmem:[%s1561_s10 + $0x8] sm:$0xff] }
   0xe   : > { %s1155_s25 = sshll.u32 %s1565_s22, 2  ;;  %vm569_vm7 = vcmp.lt.s32.totalorder %v1451_v49, 128  ;;  %vm556_vm8 = vcmp.lt.s32.totalorder %v1454_v50, 128  ;;  %v1005_v49 = vld [vmem:[%s1562_s11] sm:$0xff] }
   0xf   : > { %s405_s28 = scalar_lea.vmem %s1551_s0, %s1155_s25  ;;  %vm595_vm9 = vcmp.lt.s32.totalorder %v593_v54, 128  ;;  %vm582_vm10 = vcmp.lt.s32.totalorder %v1458_v55, 128  ;;  %v1006_v55 = vld [vmem:[%s1562_s11 + $0x8] sm:$0xff] }
  0x10   : > { %v1387_v5 = vld [vmem:[%s405_s28] sm:$0xf] }
  0x11   : > { %1190 = vmatpush3.msk.msra.mxu0 %vm417_vm1, %v1387_v5  ;;  %1256 = vset.pattern.permute.xlu0 %v1285_v8 }
  0x12   : > { %1192 = vmatmul.mubr.msk.f32.vlgmr.msra.gmra.mrb[0].mxu0 %vm413_vm2, %v412_v4  ;;  %515 = vperm.xlu0 %1256, %v491_v1  }
  0x13   : > { %1252 = vset.pattern.permute.xlu1 %v1286_v9 }
  0x14   : > { %547 = vperm.xlu1 %1252, %v491_v1  }
  0x16   : > { %873 = vperm.xlu0 %1256, %v865_v10  }
  0x18   : > { %1253 = vset.pattern.permute.xlu1 %v1287_v11 }
  0x19   : > { %560 = vperm.xlu1 %1253, %v491_v1  }
  0x1d   : > { %1254 = vset.pattern.permute.xlu1 %v1288_v12 }
  0x1e   : > { %573 = vperm.xlu1 %1254, %v491_v1  }
  0x22   : > { %1257 = vset.pattern.permute.xlu1 %v1289_v13 }
  0x23   : > { %599 = vperm.xlu1 %1257, %v491_v1  }
  0x27   : > { %1258 = vset.pattern.permute.xlu1 %v1281_v2 }
  0x28   : > { %868 = vperm.xlu1 %1258, %v865_v10  }
  0x2c   : > { %1259 = vset.pattern.permute.xlu1 %v1282_v3 }
  0x87   : > { %v529_v19 = vpop.permute.xlu1 %528  ;;  %v504_v22 = vpop.permute.xlu0 %503 }
  0x8c   : > { %v542_v20 = vpop.permute.xlu1 %541  ;;  %v587_v24 = vpop.permute.xlu0 %586 }
  0x91   : > { %v516_v26 = vpop.permute.xlu0 %515 }
  0x93   : > { %v548_v21 = vpop.permute.xlu1 %547 }
  0x95   : > { %v874_v29 = vpop.permute.xlu0 %873 }
  0x98   : > { %v561_v23 = vpop.permute.xlu1 %560 }
  0x9d   : > { %v574_v25 = vpop.permute.xlu1 %573 }
  0xa2   : > { %v600_v27 = vpop.permute.xlu1 %599 }
  0xa7   : > { %v869_v31 = vpop.permute.xlu1 %868 }
  0xe5   : > { %v1397_v14 = vpop.f32.mrb[0].mxu0 }
  0xe6   : > { %507 = vrot.lane.b32.xlu0 %v1397_v14, %s1290_s15  ;;  %494 = vrot.lane.b32.xlu1 %v1397_v14, %s1291_s16  ;;  %v1193_v15 = vpop.f32.mrb[1].mxu0  ;;  %v876_v58 = vmul.f32 %v874_v29, %v1397_v14  ;;  %v550_v60 = vmul.f32 %v548_v21, %v1397_v14 }
  0xea   : > { %520 = vrot.lane.b32.xlu0 %v1397_v14, %s1292_s17  ;;  %879 = vperm.xlu1 %1259, %v865_v10  }
  0xee   : > { %533 = vrot.lane.b32.xlu0 %v1397_v14, %s1293_s18  ;;  %552 = vrot.lane.b32.xlu1 %v1397_v14, %s1294_s19 }
  0xef   : > { %1260 = vset.pattern.permute.xlu1 %v1281_v2 }
  0xf2   : > { %565 = vrot.lane.b32.xlu0 %v1397_v14, %s1295_s20  ;;  %578 = vrot.lane.b32.xlu1 %v1397_v14, %s1296_s23 }
  0xf6   : > { %591 = vrot.lane.b32.xlu0 %v1397_v14, %s1297_s26  ;;  %642 = vperm.xlu1 %1260, %v639_v16  }
  0xfa   : > { %647 = vperm.xlu0 %1256, %v639_v16   ;;  %1261 = vset.pattern.permute.xlu1 %v1282_v3 }
  0xfb   : > { %653 = vperm.xlu1 %1261, %v639_v16  }
  0xfe   : > { %1262 = vset.pattern.permute.xlu0 %v1284_v7 }
  0xff   : > { %659 = vperm.xlu0 %1262, %v639_v16   ;;  %1263 = vset.pattern.permute.xlu1 %v1286_v9 }
 0x100   : > { %665 = vperm.xlu1 %1263, %v639_v16  }
 0x103   : > { %1265 = vset.pattern.permute.xlu0 %v1285_v8 }
 0x104   : > { %619 = vperm.xlu0 %1265, %v604_v17   ;;  %1264 = vset.pattern.permute.xlu1 %v1281_v2 }
 0x105   : > { %614 = vperm.xlu1 %1264, %v604_v17  }
 0x108   : > { %895 = vperm.xlu0 %1265, %v884_v18  }
 0x109   : > { %1266 = vset.pattern.permute.xlu1 %v1282_v3 }
 0x10a   : > { %632 = vperm.xlu1 %1266, %v604_v17  }
 0x10e   : > { %1267 = vset.pattern.permute.xlu1 %v1281_v2 }
 0x10f   : > { %890 = vperm.xlu1 %1267, %v884_v18  }
 0x113   : > { %1268 = vset.pattern.permute.xlu1 %v1282_v3 }
 0x114   : > { %904 = vperm.xlu1 %1268, %v884_v18  }
 0x118   : > { %1269 = vset.pattern.permute.xlu1 %v1281_v2 }
 0x158   : > { %v508_v32 = vpop.permute.xlu0 %507  ;;  %v495_v37 = vpop.permute.xlu1 %494 }
 0x159   : > { %v513_v39 = vsel %vm510_vm3, %v508_v32, 0.0  ;;  %v500_v40 = vsel %vm497_vm4, %v495_v37, 0.0  ;;  %v637_v32 = vld [vmem:[%s1555_s4] sm:$0xff] }
 0x15a   : > { %v518_v43 = vmul.f32 %v516_v26, %v513_v39  ;;  %v506_v44 = vmul.f32 %v504_v22, %v500_v40  ;;  %1201 = vmatprep.mubr.msk.f32.mxu1 %vm413_vm2, %v637_v32 }
 0x15c   : > { %v521_v36 = vpop.permute.xlu0 %520  ;;  %v519_v47 = vadd.f32 %v518_v43, %v506_v44  ;;  %v626_v43 = vadd.s32 5, %v1429_v30  ;;  %v607_v44 = vadd.s32 4294967291, %v1429_v30  ;;  %v909_v30 = vld [vmem:[%s1561_s10] sm:$0xff] }
 0x15d   : > { %v526_v42 = vsel %vm523_vm5, %v521_v36, 0.0  ;;  %v695_v36 = vld [vmem:[%s1558_s7] sm:$0xff] }
 0x15e   : > { %v531_v46 = vmul.f32 %v529_v19, %v526_v42  ;;  %1196 = vmatprep.mubr.msk.f32.mxu0 %vm413_vm2, %v695_v36  ;;  %vm628_vm11 = vcmp.lt.s32.totalorder %v626_v43, 128  ;;  %vm608_vm12 = vcmp.ge.s32.totalorder %v607_v44, 0 }
 0x160   : > { %v534_v41 = vpop.permute.xlu0 %533  ;;  %v532_v51 = vadd.f32 %v531_v46, %v519_v47 }
 0x161   : > { %v539_v45 = vsel %vm536_vm6, %v534_v41, 0.0 }
 0x162   : > { %v544_v48 = vmul.f32 %v542_v20, %v539_v45  ;;  %v871_v57 = vmul.f32 %v869_v31, %v539_v45 }
 0x164   : > { %v566_v52 = vpop.permute.xlu0 %565  ;;  %v545_v56 = vadd.f32 %v544_v48, %v532_v51  ;;  %v877_v63 = vadd.f32 %v876_v58, %v871_v57  ;;  %v638_v58 = vld [vmem:[%s1555_s4 + $0x8] sm:$0xff] }
 0x165   : > { %v571_v61 = vsel %vm569_vm7, %v566_v52, 0.0 }
 0x166   : > { %v551_v1 = vadd.f32 %v550_v60, %v545_v56  ;;  %v576_v6 = vmul.f32 %v574_v25, %v571_v61 }
 0x168   : > { %v592_v0 = vpop.permute.xlu0 %591 }
 0x169   : > { %v880_v53 = vpop.permute.xlu1 %879  ;;  %v597_v10 = vsel %vm595_vm9, %v592_v0, 0.0 }
 0x16a   : > { %v602_v15 = vmul.f32 %v600_v27, %v597_v10 }
 0x16d   : > { %v553_v59 = vpop.permute.xlu1 %552 }
 0x16e   : > { %v558_v62 = vsel %vm556_vm8, %v553_v59, 0.0 }
 0x16f   : > { %v563_v2 = vmul.f32 %v561_v23, %v558_v62  ;;  %v882_v4 = vmul.f32 %v880_v53, %v558_v62  ;;  %v670_v23 = vld [vmem:[%s1557_s6] sm:$0xf] }
 0x171   : > { %v564_v7 = vadd.f32 %v563_v2, %v551_v1  ;;  %v579_v8 = vpop.permute.xlu1 %578  ;;  %v1469_v9 = vadd.f32 %v882_v4, %v877_v63 }
 0x172   : > { %v584_v11 = vsel %vm582_vm10, %v579_v8, 0.0 }
 0x173   : > { %v577_v12 = vadd.f32 %v576_v6, %v564_v7  ;;  %v589_v13 = vmul.f32 %v587_v24, %v584_v11  ;;  %885 = vrot.lane.b32.xlu0 %v1469_v9, %s1292_s17  ;;  %s1174_s17 = sshll.u32 %s1565_s22, 4 }
 0x174   : > { %s410_s27 = scalar_lea.vmem %s1563_s12, %s1174_s17 }
 0x175   : > { %v590_v16 = vadd.f32 %v589_v13, %v577_v12  ;;  %v643_v17 = vpop.permute.xlu1 %642 }
 0x176   : > { %v645_v20 = vmul.f32 %v643_v17, %v526_v42 }
 0x177   : > { %v603_v18 = vadd.f32 %v602_v15, %v590_v16 }
 0x179   : > { %v648_v19 = vpop.permute.xlu0 %647  ;;  %624 = vrot.lane.b32.xlu0 %v603_v18, %s1298_s13  ;;  %605 = vrot.lane.b32.xlu1 %v603_v18, %s1299_s14 }
 0x17a   : > { %v650_v21 = vmul.f32 %v648_v19, %v539_v45  ;;  %v654_v22 = vpop.permute.xlu1 %653 }
 0x17b   : > { %v656_v24 = vmul.f32 %v654_v22, %v1397_v14 }
 0x17c   : > { %v651_v25 = vadd.f32 %v650_v21, %v645_v20  ;;  %v696_v21 = vld [vmem:[%s1558_s7 + $0x8] sm:$0xff] }
 0x17d   : > { %681 = vperm.xlu0 %1265, %v670_v23   ;;  %676 = vperm.xlu1 %1269, %v670_v23  }
 0x17e   : > { %v657_v26 = vadd.f32 %v656_v24, %v651_v25  ;;  %v660_v27 = vpop.permute.xlu0 %659 }
 0x17f   : > { %v662_v28 = vmul.f32 %v660_v27, %v558_v62  ;;  %v666_v29 = vpop.permute.xlu1 %665 }
 0x180   : > { %v668_v31 = vmul.f32 %v666_v29, %v571_v61 }
 0x181   : > { %v663_v34 = vadd.f32 %v662_v28, %v657_v26  ;;  %900 = vrot.lane.b32.xlu1 %v1469_v9, %s1295_s20  ;;  %1270 = vset.pattern.permute.xlu0 %v1282_v3 }
 0x182   : > { %690 = vperm.xlu0 %1270, %v670_v23  }
 0x183   : > { %v669_v14 = vadd.f32 %v668_v31, %v663_v34  ;;  %v620_v39 = vpop.permute.xlu0 %619 }
 0x184   : > { %v615_v3 = vpop.permute.xlu1 %614  ;;  %v622_v52 = vmul.f32 %v620_v39, %v603_v18 }
 0x185   : > { %671 = vrot.lane.b32.xlu1 %v669_v14, %s1290_s15 }
 0x186   : > { %997 = vrot.lane.b32.xlu0 %v1387_v5, %s1293_s18 }
 0x187   : > { %v896_v41 = vpop.permute.xlu0 %895 }
 0x188   : > { %v898_v63 = vmul.f32 %v896_v41, %v1469_v9 }
 0x189   : > { %686 = vrot.lane.b32.xlu1 %v669_v14, %s1296_s23  ;;  %v633_v37 = vpop.permute.xlu1 %632 }
 0x18d   : > { %1001 = vrot.lane.b32.xlu1 %v1387_v5, %s1294_s19 }
 0x18e   : > { %v891_v40 = vpop.permute.xlu1 %890 }
 0x193   : > { %v905_v42 = vpop.permute.xlu1 %904 }
 0x1e5   : > { %v886_v45 = vpop.permute.xlu0 %885 }
 0x1e6   : > { %v887_v59 = vsel %vm523_vm5, %v886_v45, 0.0 }
 0x1e7   : > { %v893_v62 = vmul.f32 %v891_v40, %v887_v59 }
 0x1e9   : > { %v899_v4 = vadd.f32 %v898_v63, %v893_v62 }
 0x1eb   : > { %v625_v46 = vpop.permute.xlu0 %624  ;;  %v606_v47 = vpop.permute.xlu1 %605 }
 0x1ec   : > { %v630_v48 = vsel %vm628_vm11, %v625_v46, 0.0  ;;  %v611_v51 = vsel %vm608_vm12, %v606_v47, 0.0 }
 0x1ed   : > { %v617_v53 = vmul.f32 %v615_v3, %v611_v51  ;;  %v635_v54 = vmul.f32 %v633_v37, %v630_v48 }
 0x1ef   : > { %v623_v56 = vadd.f32 %v622_v52, %v617_v53 }
 0x1f1   : > { %v636_v57 = vadd.f32 %v635_v54, %v623_v56 }
 0x1f3   : > { %1199 = vmatprep.subr.msk.mxu1 %vm417_vm1, %v636_v57 }
 0x1f4   : > { %1200 = vmatpush3.msk.msra.mxu1 %vm417_vm1, %v636_v57 }
 0x1f5   : > { %1202 = vmatmul.mubr.msk.f32.vlgmr.msra.gmra.mrb[0].mxu1 %vm413_vm2, %v638_v58 }
 0x1f6   : > { %1206 = vmatprep.mubr.msk.f32.mxu1 %vm413_vm2, %v909_v30 }
 0x1fc   : > { %v677_v60 = vpop.permute.xlu1 %676  ;;  %v682_v61 = vpop.permute.xlu0 %681 }
 0x1fd   : > { %v684_v13 = vmul.f32 %v682_v61, %v669_v14 }
 0x200   : > { %v901_v0 = vpop.permute.xlu1 %900 }
 0x201   : > { %v902_v1 = vsel %vm569_vm7, %v901_v0, 0.0  ;;  %v691_v2 = vpop.permute.xlu0 %690 }
 0x202   : > { %v907_v6 = vmul.f32 %v905_v42, %v902_v1 }
 0x204   : > { %v908_v7 = vadd.f32 %v907_v6, %v899_v4  ;;  %v672_v8 = vpop.permute.xlu1 %671 }
 0x205   : > { %v673_v10 = vsel %vm510_vm3, %v672_v8, 0.0  ;;  %v998_v11 = vpop.permute.xlu0 %997 }
 0x206   : > { %v679_v12 = vmul.f32 %v677_v60, %v673_v10  ;;  %1204 = vmatprep.subr.msk.mxu1 %vm417_vm1, %v908_v7  ;;  %v999_v9 = vsel %vm536_vm6, %v998_v11, -inf }
 0x207   : > { %1205 = vmatpush3.msk.msra.mxu1 %vm417_vm1, %v908_v7  ;;  %v1000_v18 = vmax.f32 %v999_v9, %v1387_v5 }
 0x208   : > { %v687_v33 = vpop.permute.xlu1 %686  ;;  %1207 = vmatmul.mubr.msk.f32.vlgmr.msra.gmra.mrb[0].mxu1 %vm413_vm2, %v910_v35  ;;  %v685_v16 = vadd.f32 %v684_v13, %v679_v12 }
 0x209   : > { %v688_v15 = vsel %vm582_vm10, %v687_v33, 0.0  ;;  %1211 = vmatprep.mubr.msk.f32.mxu1 %vm413_vm2, %v1005_v49 }
 0x20a   : > { %v693_v17 = vmul.f32 %v691_v2, %v688_v15 }
 0x20c   : > { %v694_v19 = vadd.f32 %v693_v17, %v685_v16  ;;  %v1002_v20 = vpop.permute.xlu1 %1001 }
 0x20d   : > { %v1003_v38 = vsel %vm556_vm8, %v1002_v20, -inf }
 0x20e   : > { %v1004_v22 = vmax.f32 %v1000_v18, %v1003_v38  ;;  %1194 = vmatprep.subr.msk.mxu0 %vm417_vm1, %v694_v19 }
 0x20f   : > { %1195 = vmatpush3.msk.msra.mxu0 %vm417_vm1, %v694_v19 }
 0x210   : > { %1209 = vmatprep.subr.msk.mxu1 %vm417_vm1, %v1004_v22  ;;  %1197 = vmatmul.mubr.msk.f32.vlgmr.msra.gmra.mrb[2].mxu0 %vm413_vm2, %v696_v21 }
 0x211   : > { %1210 = vmatpush3.msk.msra.mxu1 %vm417_vm1, %v1004_v22 }
 0x212   : > { %1212 = vmatmul.mubr.msk.f32.vlgmr.msra.gmra.mrb[0].mxu1 %vm413_vm2, %v1006_v55 }
 0x2e3   : > { %v1198_v5 = vpop.f32.mrb[2].mxu0 }
 0x2e4   : > { %v772_v50 = vpop.f32.mrb[3].mxu0 }
 0x2e5   : > { %v1213_v23 = vpop.f32.mrb[0].mxu1 }
 0x2e6   : > { %v1214_v24 = vadd.f32 %v1213_v23, %v1198_v5  ;;  %v1082_v25 = vpop.f32.mrb[1].mxu1 }
 0x2e7   : > { %v1215_v26 = vadd.f32 %v1082_v25, %v772_v50 }
 0x2e8   : > { %1094 = vst [vmem:[%s410_s27 + $0x8] sm:$0xff] %v1214_v24 }
 0x2e9   : > { %1093 = vst [vmem:[%s410_s27] sm:$0xff] %v1215_v26 }
 0x2ea PF: > { %s22_s21 = sadd.s32 1, %s1277_s21  }
 0x2eb   : > { %p19_p4 = scmp.ge.s32.totalorder %s22_s21, 4  }
 0x2ed   :  { %21 = sbr.rel (!%p19_p4) target bundleno = 1 (0x1), region = 98 }

// kernel: _lambda_.9
= control target key start
LH: loop header
LB: loop body
LE: loop exit
PB: predicated region body
PF: predicated region fallthrough
CT: control target
= control target key end

     0   :  { %s2017_s21 = smov 0   ;;  %s2583_s0 = inlined_call_operand.vmem [shape: f32[2,32,128], index: 0, kind: input, shape index: {}]   ;;  %s2584_s1 = inlined_call_operand.vmem [shape: f32[16,32], index: 1, kind: input, shape index: {}]   ;;  %s2585_s2 = inlined_call_operand.vmem [shape: f32[16,9], index: 2, kind: input, shape index: {}]   ;;  %s2586_s3 = inlined_call_operand.vmem [shape: f32[16,3], index: 3, kind: input, shape index: {}]   ;;  %s2587_s4 = inlined_call_operand.vmem [shape: f32[64,16], index: 4, kind: input, shape index: {}]   ;;  %s2588_s5 = inlined_call_operand.vmem [shape: f32[16,5], index: 5, kind: input, shape index: {}]   ;;  %s2589_s6 = inlined_call_operand.vmem [shape: f32[16,3], index: 6, kind: input, shape index: {}]   ;;  %s2590_s7 = inlined_call_operand.vmem [shape: f32[64,16], index: 7, kind: input, shape index: {}]   ;;  %s2591_s8 = inlined_call_operand.vmem [shape: f32[16,3], index: 8, kind: input, shape index: {}]   ;;  %s2592_s9 = inlined_call_operand.vmem [shape: f32[16,3], index: 9, kind: input, shape index: {}]   ;;  %s2593_s10 = inlined_call_operand.vmem [shape: f32[64,16], index: 10, kind: input, shape index: {}]   ;;  %s2594_s11 = inlined_call_operand.vmem [shape: f32[64,32], index: 11, kind: input, shape index: {}]   ;;  %s2595_s12 = inlined_call_operand.vmem [shape: f32[2,64,128], index: 12, kind: output, shape index: {}]  }
   0x1 LB: > { %s1612_s22 = sadd.s32 4294967295, %s1931_s21   ;;  %p1616_p0 = scmp.ge.s32.totalorder %s1931_s21, 1  ;;  %s1931_s21 = sphi %s2017_s21, %s22_s21  }
   0x2   : > { %p362_p1 = scmp.lt.s32.totalorder %s1931_s21, 3 }
   0x4   : > { %p363_p2 = pnand %p1616_p0, %p362_p1 }
   0x5   : > { %p404_p3 = scmp.lt.s32.totalorder (!%p363_p2), %s1612_s22, 1  ;;  %v418_v0 = vld [vmem:[%s2584_s1] sm:$0xff] (!%p363_p2)  ;;  %vm420_vm0 = vcmask (!%p363_p2), 261120   ;;  %v1933_v2 = vmov (!%p363_p2), 1   ;;  %v1934_v3 = vmov (!%p363_p2), 4   ;;  %v2042_v4 = vld [vmem:[%s2585_s2 + $0x8] sm:$0xff] (!%p363_p2)  ;;  %v504_v62 = vlaneseq (!%p363_p2) }
   0x6   : > { %366 = sbr.rel (%p363_p2) target bundleno = 801 (0x321), region = 68  ;;  %v2031_v1 = vld [vmem:[%s2585_s2] sm:$0xff] (!%p363_p2)  ;;  %1715 = vmatprep.mubr.msk.f32.mxu0 (!%p363_p2), %vm420_vm0, %v418_v0  ;;  %1867 = vset.pattern.permute.xlu1 (!%p363_p2), %v1933_v2  ;;  %v1935_v10 = vmov (!%p363_p2), 5   ;;  %v1936_v12 = vmov (!%p363_p2), 2   ;;  %v1937_v13 = vmov (!%p363_p2), 6   ;;  %v419_v14 = vld [vmem:[%s2584_s1 + $0x8] sm:$0xff] (!%p363_p2) }
   0x7   : > { %539 = vperm.xlu1 (!%p363_p2), %1867, %v2031_v1   ;;  %1870 = vset.pattern.permute.xlu0 (!%p363_p2), %v1934_v3  ;;  %v1938_v15 = vmov (!%p363_p2), 3   ;;  %v1939_v16 = vmov (!%p363_p2), 7   ;;  %v1940_v17 = vmov (!%p363_p2), 8   ;;  %v1941_v18 = vmov (!%p363_p2), 0   ;;  %v2083_v19 = vld [vmem:[%s2588_s5 + $0x8] sm:$0xff] (!%p363_p2)  ;;  %v1139_v20 = vld [vmem:[%s2591_s8] sm:$0xff] (!%p363_p2) }
   0x8   : > { %595 = vperm.xlu0 (!%p363_p2), %1870, %v2031_v1   ;;  %v2094_v21 = vld [vmem:[%s2588_s5] sm:$0xff] (!%p363_p2)  ;;  %v1140_v22 = vld [vmem:[%s2591_s8 + $0x8] sm:$0xff] (!%p363_p2)  ;;  %s1942_s27 = smov (!%p363_p2), 2   ;;  %s1943_s28 = smov (!%p363_p2), 4   ;;  %v2241_v63 = vand.u32 (!%p363_p2), 127, %v504_v62  ;;  %vm880_vm9 = vcmask (!%p363_p2), 130048  }
   0x9   : > { %s1945_s30 = smov (!%p363_p2), 3   ;;  %s1946_s13 = smov (!%p363_p2), 125   ;;  %v695_v55 = vld [vmem:[%s2586_s3 + $0x8] sm:$0xff] (!%p363_p2)  ;;  %v822_v57 = vld [vmem:[%s2589_s6] sm:$0xff] (!%p363_p2) }
   0xa   : > { %s1948_s15 = smov (!%p363_p2), 127   ;;  %s1949_s16 = smov (!%p363_p2), 124   ;;  %v1178_v56 = vld [vmem:[%s2592_s9 + $0x8] sm:$0xff] (!%p363_p2)  ;;  %v694_v58 = vld [vmem:[%s2586_s3] sm:$0xff] (!%p363_p2) }
   0xb   : > { %543 = vperm.xlu1 (!%p363_p2), %1867, %v2042_v4   ;;  %v1177_v59 = vld [vmem:[%s2592_s9] sm:$0xff] (!%p363_p2)  ;;  %v823_v60 = vld [vmem:[%s2589_s6 + $0x8] sm:$0xff] (!%p363_p2)  ;;  %s1950_s19 = smov (!%p363_p2), 123  }
   0xc   : > { %1873 = vset.pattern.permute.xlu0 (!%p363_p2), %v1935_v10 }
   0xd   : > { %s2597_s22 = smov (!%p404_p3, %s1612_s22), 1  ;;  %621 = vperm.xlu0 %1873, %v2042_v4  }
   0xe   : > { %s1657_s29 = sshll.u32 %s2597_s22, 5  ;;  %s1658_s20 = sshll.u32 %s2597_s22, 6 }
   0xf   : > { %s408_s14 = scalar_lea.vmem %s2583_s0, %s1657_s29  ;;  %1868 = vset.pattern.permute.xlu1 %v1936_v12  ;;  %s1944_s29 = smov 126  }
  0x10   : > { %v2049_v5 = vld [vmem:[%s408_s14] sm:$0xff]  ;;  %v2051_v6 = vld [vmem:[%s408_s14 + $0x8] sm:$0xff]  ;;  %v2053_v7 = vld [vmem:[%s408_s14 + $0x10] sm:$0xff]  ;;  %565 = vperm.xlu1 %1868, %v2042_v4   ;;  %s413_s24 = scalar_lea.vmem %s2595_s12, %s1658_s20 }
  0x11   : > { %v1786_v8 = vpack.c.bf16 %v2051_v6, %v2049_v5  ;;  %v2058_v9 = vld [vmem:[%s408_s14 + $0x18] sm:$0xff]  ;;  %1874 = vset.pattern.permute.xlu0 %v1937_v13  ;;  %s1947_s14 = smov 1  }
  0x12   : > { %v1790_v11 = vpack.c.bf16 %v2058_v9, %v2053_v7  ;;  %639 = vperm.xlu0 %1874, %v2031_v1  }
  0x13   : > { %1787 = vmatprep.subr.bf16.mxu0 %v1786_v8 }
  0x14   : > { %1789 = vmatpush3.bf16.msra.mxu0 %v1786_v8  ;;  %1869 = vset.pattern.permute.xlu1 %v1938_v15  ;;  %v2248_v8 = vadd.s32 4294967293, %v2241_v63 }
  0x15   : > { %1791 = vmatprep.subr.bf16.mxu0 %v1790_v11  ;;  %583 = vperm.xlu1 %1869, %v2031_v1  }
  0x16   : > { %1877 = vset.pattern.permute.xlu0 %v1939_v16  ;;  %vm533_vm3 = vcmp.ge.s32.totalorder %v2248_v8, 0 }
  0x17   : > { %665 = vperm.xlu0 %1877, %v2042_v4  }
  0x18   : > { %1793 = vmatpush3.bf16.msra.mxu0 %v1790_v11  ;;  %v2253_v11 = vadd.s32 4294967295, %v2241_v63 }
  0x19   : > { %1871 = vset.pattern.permute.xlu1 %v1934_v3 }
  0x1a   : > { %599 = vperm.xlu1 %1871, %v2042_v4   ;;  %vm577_vm4 = vcmp.ge.s32.totalorder %v2253_v11, 0 }
  0x1b   : > { %1716 = vmatmul.mubr.msk.f32.vlgmr.msra.gmra.mrb[0].mxu0 %vm420_vm0, %v419_v14  ;;  %1878 = vset.pattern.permute.xlu0 %v1940_v17 }
  0x1c   : > { %683 = vperm.xlu0 %1878, %v2031_v1  }
  0x1e   : > { %1872 = vset.pattern.permute.xlu1 %v1935_v10 }
  0x1f   : > { %617 = vperm.xlu1 %1872, %v2031_v1  }
  0x20   : > { %1879 = vset.pattern.permute.xlu0 %v1941_v18 }
  0x21   : > { %518 = vperm.xlu0 %1879, %v2031_v1  }
  0x23   : > { %1875 = vset.pattern.permute.xlu1 %v1937_v13 }
  0x24   : > { %643 = vperm.xlu1 %1875, %v2042_v4  }
  0x25   : > { %523 = vperm.xlu0 %1879, %v2042_v4  }
  0x28   : > { %1876 = vset.pattern.permute.xlu1 %v1939_v16 }
  0x29   : > { %661 = vperm.xlu1 %1876, %v2031_v1   ;;  %769 = vperm.xlu0 %1879, %v2083_v19  }
  0x2d   : > { %1880 = vset.pattern.permute.xlu1 %v1940_v17  ;;  %1143 = vperm.xlu0 %1879, %v1139_v20  }
  0x2e   : > { %687 = vperm.xlu1 %1880, %v2042_v4  }
  0x31   : > { %1884 = vset.pattern.permute.xlu0 %v1933_v2 }
  0x32   : > { %1881 = vset.pattern.permute.xlu1 %v1941_v18  ;;  %1154 = vperm.xlu0 %1884, %v1139_v20  }
  0x33   : > { %764 = vperm.xlu1 %1881, %v2094_v21  }
  0x36   : > { %1885 = vset.pattern.permute.xlu0 %v1936_v12 }
  0x37   : > { %1882 = vset.pattern.permute.xlu1 %v1933_v2  ;;  %561 = vperm.xlu0 %1885, %v2031_v1  }
  0x38   : > { %775 = vperm.xlu1 %1882, %v2094_v21  }
  0x3b   : > { %791 = vperm.xlu0 %1885, %v2083_v19  }
  0x3c   : > { %779 = vperm.xlu1 %1882, %v2083_v19  }
  0x3f   : > { %1888 = vset.pattern.permute.xlu0 %v1938_v15 }
  0x40   : > { %1883 = vset.pattern.permute.xlu1 %v1941_v18  ;;  %587 = vperm.xlu0 %1888, %v2042_v4   ;;  %v2245_v4 = vadd.s32 4294967294, %v2241_v63 }
  0x41   : > { %1148 = vperm.xlu1 %1883, %v1140_v22  }
  0x42   : > { %vm555_vm2 = vcmp.ge.s32.totalorder %v2245_v4, 0 }
  0x45   : > { %1886 = vset.pattern.permute.xlu1 %v1933_v2 }
  0x46   : > { %1158 = vperm.xlu1 %1886, %v1140_v22  }
  0x4a   : > { %1887 = vset.pattern.permute.xlu1 %v1936_v12 }
  0x4b   : > { %787 = vperm.xlu1 %1887, %v2094_v21  }
  0x4f   : > { %1166 = vperm.xlu1 %1887, %v1139_v20   ;;  %v2269_v20 = vadd.s32 1, %v2241_v63 }
  0x51   : > { %vm612_vm6 = vcmp.lt.s32.totalorder %v2269_v20, 128  ;;  %v875_v20 = vld [vmem:[%s2590_s7 + $0x18] sm:$0xff] }
  0x53   : > { %1170 = vperm.xlu1 %1887, %v1140_v22  }
  0x57   : > { %1889 = vset.pattern.permute.xlu1 %v1938_v15  ;;  %v2261_v15 = vadd.s32 2, %v2241_v63 }
  0x59   : > { %vm634_vm5 = vcmp.lt.s32.totalorder %v2261_v15, 128 }
  0x86   : > { %v2113_v23 = vpop.permute.xlu1 %539 }
  0x87   : > { %v2119_v26 = vpop.permute.xlu0 %595 }
  0x8a   : > { %v2115_v24 = vpop.permute.xlu1 %543 }
  0x8c   : > { %v2123_v28 = vpop.permute.xlu0 %621 }
  0x8f   : > { %v2117_v25 = vpop.permute.xlu1 %565 }
  0x91   : > { %v2125_v30 = vpop.permute.xlu0 %639 }
  0x94   : > { %v2121_v27 = vpop.permute.xlu1 %583 }
  0x96   : > { %v2129_v32 = vpop.permute.xlu0 %665 }
  0x99   : > { %v600_v29 = vpop.permute.xlu1 %599 }
  0x9b   : > { %v2133_v34 = vpop.permute.xlu0 %683 }
  0x9e   : > { %v2127_v31 = vpop.permute.xlu1 %617 }
  0xa0   : > { %v2137_v36 = vpop.permute.xlu0 %518 }
  0xa3   : > { %v2131_v33 = vpop.permute.xlu1 %643 }
  0xa4   : > { %v2141_v38 = vpop.permute.xlu0 %523 }
  0xa8   : > { %v2135_v35 = vpop.permute.xlu1 %661  ;;  %v2145_v40 = vpop.permute.xlu0 %769 }
  0xac   : > { %v2149_v42 = vpop.permute.xlu0 %1143 }
  0xad   : > { %v2139_v37 = vpop.permute.xlu1 %687 }
  0xb1   : > { %v2153_v44 = vpop.permute.xlu0 %1154 }
  0xb2   : > { %v2143_v39 = vpop.permute.xlu1 %764 }
  0xb6   : > { %v2157_v46 = vpop.permute.xlu0 %561 }
  0xb7   : > { %v2147_v41 = vpop.permute.xlu1 %775 }
  0xba   : > { %v792_v48 = vpop.permute.xlu0 %791 }
  0xbb   : > { %v2151_v43 = vpop.permute.xlu1 %779 }
  0xbf   : > { %v588_v0 = vpop.permute.xlu0 %587 }
  0xc0   : > { %v2155_v45 = vpop.permute.xlu1 %1148 }
  0xc5   : > { %v2159_v47 = vpop.permute.xlu1 %1158 }
  0xca   : > { %v788_v49 = vpop.permute.xlu1 %787 }
  0xce   : > { %v2239_v61 = vpop.permute.xlu1 %1166 }
  0xd2   : > { %v1171_v1 = vpop.permute.xlu1 %1170 }
  0xee   : > { %v2161_v50 = vpop.f32.mrb[0].mxu0 }
  0xef   : > { %552 = vrot.lane.b32.xlu0 %v2161_v50, %s1942_s27  ;;  %508 = vrot.lane.b32.xlu1 %v2161_v50, %s1943_s28  ;;  %v2166_v51 = vpop.f32.mrb[1].mxu0  ;;  %v2169_v52 = vmul.f32 %v2161_v50, %v600_v29  ;;  %v2172_v53 = vmul.f32 %v2161_v50, %v792_v48  ;;  %v2274_v29 = vadd.s32 3, %v2241_v63 }
  0xf0   : > { %v2175_v54 = vmul.f32 %v788_v49, %v2166_v51 }
  0xf1   : > { %vm656_vm7 = vcmp.lt.s32.totalorder %v2274_v29, 128  ;;  %v1227_v29 = vld [vmem:[%s2593_s10] sm:$0xff] }
  0xf3   : > { %630 = vrot.lane.b32.xlu0 %v2161_v50, %s1944_s29  ;;  %530 = vrot.lane.b32.xlu1 %v2161_v50, %s1945_s30 }
  0xf7   : > { %652 = vrot.lane.b32.xlu0 %v2161_v50, %s1946_s13  ;;  %574 = vrot.lane.b32.xlu1 %v2161_v50, %s1947_s14 }
  0xfb   : > { %608 = vrot.lane.b32.xlu1 %v2161_v50, %s1948_s15  ;;  %528 = vrot.lane.b32.xlu0 %v2166_v51, %s1945_s30 }
  0xff   : > { %674 = vrot.lane.b32.xlu1 %v2161_v50, %s1949_s16  ;;  %799 = vperm.xlu0 %1888, %v2094_v21  }
 0x103   : > { %672 = vrot.lane.b32.xlu0 %v2166_v51, %s1949_s16  ;;  %506 = vrot.lane.b32.xlu1 %v2166_v51, %s1943_s28 }
 0x104   : > { %1891 = vset.pattern.permute.xlu0 %v1934_v3 }
 0x107   : > { %815 = vperm.xlu0 %1891, %v2083_v19   ;;  %803 = vperm.xlu1 %1889, %v2083_v19  }
 0x10b   : > { %1895 = vset.pattern.permute.xlu0 %v1936_v12  ;;  %1890 = vset.pattern.permute.xlu1 %v1934_v3  ;;  %v510_v3 = vadd.s32 4294967292, %v2241_v63 }
 0x10c   : > { %745 = vperm.xlu0 %1895, %v695_v55   ;;  %811 = vperm.xlu1 %1890, %v2094_v21  }
 0x10d   : > { %vm511_vm1 = vcmp.ge.s32.totalorder %v510_v3, 0 }
 0x110   : > { %1220 = vperm.xlu0 %1895, %v1178_v56   ;;  %550 = vrot.lane.b32.xlu1 %v2166_v51, %s1942_s27 }
 0x111   : > { %1892 = vset.pattern.permute.xlu1 %v1941_v18 }
 0x114   : > { %1899 = vset.pattern.permute.xlu0 %v1941_v18  ;;  %572 = vrot.lane.b32.xlu1 %v2166_v51, %s1947_s14 }
 0x115   : > { %832 = vperm.xlu0 %1899, %v822_v57  }
 0x118   : > { %606 = vrot.lane.b32.xlu1 %v2166_v51, %s1948_s15 }
 0x119   : > { %1900 = vset.pattern.permute.xlu0 %v1933_v2 }
 0x11a   : > { %719 = vperm.xlu0 %1900, %v694_v58  }
 0x11c   : > { %628 = vrot.lane.b32.xlu1 %v2166_v51, %s1944_s29 }
 0x11e   : > { %1198 = vperm.xlu0 %1900, %v1177_v59  }
 0x120   : > { %650 = vrot.lane.b32.xlu1 %v2166_v51, %s1946_s13 }
 0x122   : > { %847 = vperm.xlu0 %1900, %v823_v60  }
 0x124   : > { %708 = vperm.xlu1 %1892, %v694_v58  }
 0x126   : > { %1924 = vset.pattern.permute.xlu0 %v1936_v12 }
 0x128   : > { %713 = vperm.xlu1 %1892, %v695_v55  }
 0x12c   : > { %1893 = vset.pattern.permute.xlu1 %v1933_v2 }
 0x12d   : > { %723 = vperm.xlu1 %1893, %v695_v55  }
 0x131   : > { %1894 = vset.pattern.permute.xlu1 %v1936_v12 }
 0x132   : > { %741 = vperm.xlu1 %1894, %v694_v58  }
 0x136   : > { %1896 = vset.pattern.permute.xlu1 %v1941_v18 }
 0x137   : > { %1187 = vperm.xlu1 %1896, %v1177_v59  }
 0x13b   : > { %1192 = vperm.xlu1 %1896, %v1178_v56  }
 0x13f   : > { %1897 = vset.pattern.permute.xlu1 %v1933_v2 }
 0x140   : > { %1202 = vperm.xlu1 %1897, %v1178_v56  }
 0x144   : > { %1898 = vset.pattern.permute.xlu1 %v1936_v12 }
 0x145   : > { %1216 = vperm.xlu1 %1898, %v1177_v59   ;;  %v2289_v59 = vadd.s32 4, %v2241_v63 }
 0x147   : > { %vm678_vm8 = vcmp.lt.s32.totalorder %v2289_v59, 128 }
 0x149   : > { %1901 = vset.pattern.permute.xlu1 %v1941_v18 }
 0x14a   : > { %837 = vperm.xlu1 %1901, %v823_v60  }
 0x14e   : > { %1902 = vset.pattern.permute.xlu1 %v1933_v2 }
 0x14f   : > { %843 = vperm.xlu1 %1902, %v822_v57  }
 0x153   : > { %1903 = vset.pattern.permute.xlu1 %v1936_v12 }
 0x154   : > { %861 = vperm.xlu1 %1903, %v822_v57   ;;  %v1162_v57 = vmul.f32 %v2161_v50, %v2159_v47 }
 0x158   : > { %865 = vperm.xlu1 %1903, %v823_v60  }
 0x161   : > { %v553_v2 = vpop.permute.xlu0 %552  ;;  %v509_v10 = vpop.permute.xlu1 %508 }
 0x162   : > { %v515_v12 = vsel %vm511_vm1, %v509_v10, 0.0  ;;  %v2258_v14 = vsel %vm555_vm2, %v553_v2, 0.0 }
 0x163   : > { %v527_v17 = vmul.f32 %v2141_v38, %v515_v12  ;;  %v569_v21 = vmul.f32 %v2117_v25, %v2258_v14 }
 0x165   : > { %v531_v13 = vpop.permute.xlu1 %530  ;;  %v631_v18 = vpop.permute.xlu0 %630 }
 0x166   : > { %v537_v16 = vsel %vm533_vm3, %v531_v13, 0.0  ;;  %v2293_v60 = vsel %vm634_vm5, %v631_v18, 0.0 }
 0x167   : > { %v547_v19 = vmul.f32 %v2115_v24, %v537_v16  ;;  %v647_v10 = vmul.f32 %v2131_v33, %v2293_v60 }
 0x169   : > { %v549_v22 = vadd.f32 %v547_v19, %v527_v17  ;;  %v575_v48 = vpop.permute.xlu1 %574  ;;  %v653_v25 = vpop.permute.xlu0 %652 }
 0x16a   : > { %v2278_v49 = vsel %vm577_vm4, %v575_v48, 0.0  ;;  %v659_v50 = vsel %vm656_vm7, %v653_v25, 0.0 }
 0x16b   : > { %v571_v24 = vadd.f32 %v569_v21, %v549_v22  ;;  %v591_v38 = vmul.f32 %v588_v0, %v2278_v49  ;;  %v1152_v55 = vmul.f32 %v2155_v45, %v2278_v49  ;;  %v669_v17 = vmul.f32 %v2129_v32, %v659_v50 }
 0x16d   : > { %v593_v56 = vadd.f32 %v591_v38, %v571_v24  ;;  %v609_v58 = vpop.permute.xlu1 %608  ;;  %v1164_v45 = vadd.f32 %v1162_v57, %v1152_v55  ;;  %v529_v21 = vpop.permute.xlu0 %528 }
 0x16e   : > { %v2297_v62 = vsel %vm612_vm6, %v609_v58, 0.0  ;;  %v536_v24 = vsel %vm533_vm3, %v529_v21, 0.0 }
 0x16f   : > { %v605_v0 = vadd.f32 %v2169_v52, %v593_v56  ;;  %v625_v2 = vmul.f32 %v2123_v28, %v2297_v62  ;;  %v1174_v47 = vmul.f32 %v1171_v1, %v2297_v62  ;;  %v546_v25 = vmul.f32 %v2113_v23, %v536_v24 }
 0x171   : > { %v627_v12 = vadd.f32 %v625_v2, %v605_v0  ;;  %v675_v13 = vpop.permute.xlu1 %674  ;;  %v2308_v16 = vadd.f32 %v1174_v47, %v1164_v45 }
 0x172   : > { %v681_v28 = vsel %vm678_vm8, %v675_v13, 0.0 }
 0x173   : > { %v649_v52 = vadd.f32 %v647_v10, %v627_v12  ;;  %1181 = vrot.lane.b32.xlu1 %v2308_v16, %s1942_s27  ;;  %v691_v18 = vmul.f32 %v2139_v37, %v681_v28 }
 0x175   : > { %v671_v1 = vadd.f32 %v669_v17, %v649_v52  ;;  %v507_v32 = vpop.permute.xlu1 %506 }
 0x176   : > { %v514_v48 = vsel %vm511_vm1, %v507_v32, 0.0 }
 0x177   : > { %1211 = vrot.lane.b32.xlu1 %v2308_v16, %s1944_s29  ;;  %v2318_v33 = vadd.f32 %v691_v18, %v671_v1  ;;  %v526_v37 = vmul.f32 %v2137_v36, %v514_v48  ;;  %v1161_v36 = vmul.f32 %v2153_v44, %v2166_v51 }
 0x179   : > { %v548_v57 = vadd.f32 %v546_v25, %v526_v37 }
 0x17b   : > { %732 = vrot.lane.b32.xlu1 %v2318_v33, %s1950_s19 }
 0x17e   : > { %v800_v47 = vpop.permute.xlu0 %799 }
 0x182   : > { %v673_v18 = vpop.permute.xlu0 %672 }
 0x186   : > { %v804_v19 = vpop.permute.xlu1 %803 }
 0x18b   : > { %v812_v22 = vpop.permute.xlu1 %811 }
 0x18f   : > { %v551_v38 = vpop.permute.xlu1 %550 }
 0x190   : > { %v558_v55 = vsel %vm555_vm2, %v551_v38, 0.0 }
 0x191   : > { %v568_v56 = vmul.f32 %v2157_v46, %v558_v55  ;;  %v602_v46 = vmul.f32 %v2119_v26, %v2166_v51  ;;  %v772_v44 = vmul.f32 %v2143_v39, %v558_v55  ;;  %v783_v26 = vmul.f32 %v2151_v43, %v2278_v49 }
 0x192   : > { %v680_v39 = vsel %vm678_vm8, %v673_v18, 0.0  ;;  %v807_v55 = vmul.f32 %v804_v19, %v2297_v62  ;;  %v1904_v19 = vpack.i.bf16 %v2051_v6, %v2049_v5  ;;  %v700_v18 = vadd.s32 4294967291, %v2241_v63 }
 0x193   : > { %v573_v58 = vpop.permute.xlu1 %572  ;;  %v570_v3 = vadd.f32 %v568_v56, %v548_v57  ;;  %v690_v49 = vmul.f32 %v2133_v34, %v680_v39  ;;  %v758_v34 = vld [vmem:[%s2587_s4 + $0x30] sm:$0xff] }
 0x194   : > { %v580_v45 = vsel %vm577_vm4, %v573_v58, 0.0  ;;  %1747 = vmatprep.mubr.msk.f32.mxu1 %vm880_vm9, %v758_v34  ;;  %vm701_vm10 = vcmp.ge.s32.totalorder %v700_v18, 0 }
 0x195   : > { %v590_v0 = vmul.f32 %v2121_v27, %v580_v45  ;;  %v1151_v2 = vmul.f32 %v2149_v42, %v580_v45  ;;  %v782_v13 = vmul.f32 %v2147_v41, %v580_v45 }
 0x197   : > { %v592_v50 = vadd.f32 %v590_v0, %v570_v3  ;;  %v1163_v10 = vadd.f32 %v1161_v36, %v1151_v2  ;;  %v607_v12 = vpop.permute.xlu1 %606  ;;  %v784_v21 = vadd.f32 %v782_v13, %v772_v44 }
 0x198   : > { %v614_v23 = vsel %vm612_vm6, %v607_v12, 0.0 }
 0x199   : > { %v1173_v17 = vmul.f32 %v2239_v61, %v614_v23  ;;  %v604_v27 = vadd.f32 %v602_v46, %v592_v50  ;;  %v624_v42 = vmul.f32 %v2127_v31, %v614_v23  ;;  %v773_v61 = vmul.f32 %v2145_v40, %v2258_v14  ;;  %v816_v40 = vpop.permute.xlu0 %815 }
 0x19a   : > { %v796_v24 = vadd.f32 %v2175_v54, %v784_v21  ;;  %v806_v37 = vmul.f32 %v800_v47, %v614_v23  ;;  %v819_v62 = vmul.f32 %v816_v40, %v2293_v60  ;;  %v1914_v60 = vpack.i.bf16 %v2058_v9, %v2053_v7 }
 0x19b   : > { %v629_v52 = vpop.permute.xlu1 %628  ;;  %v2344_v28 = vadd.f32 %v1173_v17, %v1163_v10  ;;  %v626_v41 = vadd.f32 %v624_v42, %v604_v27  ;;  %v785_v43 = vadd.f32 %v783_v26, %v773_v61  ;;  %v734_v21 = vadd.s32 5, %v2241_v63 }
 0x19c   : > { %v636_v1 = vsel %vm634_vm5, %v629_v52, 0.0  ;;  %v808_v56 = vadd.f32 %v806_v37, %v796_v24 }
 0x19d   : > { %v646_v32 = vmul.f32 %v2125_v30, %v636_v1  ;;  %1179 = vrot.lane.b32.xlu0 %v2344_v28, %s1942_s27  ;;  %s1951_s27 = smov 5   ;;  %v818_v38 = vmul.f32 %v812_v22, %v636_v1  ;;  %v872_v22 = vld [vmem:[%s2590_s7] sm:$0xff]  ;;  %v746_v50 = vpop.permute.xlu0 %745  ;;  %vm736_vm11 = vcmp.lt.s32.totalorder %v734_v21, 128 }
 0x19e   : > { %1722 = vmatprep.mubr.msk.f32.mxu0 %vm880_vm9, %v872_v22 }
 0x19f   : > { %v651_v31 = vpop.permute.xlu1 %650  ;;  %v648_v48 = vadd.f32 %v646_v32, %v626_v41  ;;  %v2370_v54 = vadd.f32 %v818_v38, %v808_v56 }
 0x1a0   : > { %v658_v51 = vsel %vm656_vm7, %v651_v31, 0.0 }
 0x1a1   : > { %v668_v30 = vmul.f32 %v2135_v35, %v658_v51  ;;  %698 = vrot.lane.b32.xlu0 %v2318_v33, %s1951_s27  ;;  %v797_v35 = vadd.f32 %v2172_v53, %v785_v43  ;;  %v1221_v12 = vpop.permute.xlu0 %1220 }
 0x1a3   : > { %v670_v59 = vadd.f32 %v668_v30, %v648_v48  ;;  %v809_v14 = vadd.f32 %v807_v55, %v797_v35  ;;  %v709_v57 = vpop.permute.xlu1 %708 }
 0x1a5   : > { %v2364_v25 = vadd.f32 %v690_v49, %v670_v59  ;;  %1209 = vrot.lane.b32.xlu0 %v2344_v28, %s1944_s29  ;;  %v2381_v53 = vadd.f32 %v819_v62, %v809_v14  ;;  %v833_v46 = vpop.permute.xlu0 %832 }
 0x1a7   : > { %696 = vrot.lane.b32.xlu1 %v2364_v25, %s1951_s27  ;;  %v714_v58 = vpop.permute.xlu1 %713 }
 0x1a9   : > { %824 = vrot.lane.b32.xlu0 %v2370_v54, %s1945_s30  ;;  %v720_v17 = vpop.permute.xlu0 %719 }
 0x1aa   : > { %v726_v34 = vmul.f32 %v720_v17, %v2364_v25 }
 0x1ab   : > { %730 = vrot.lane.b32.xlu1 %v2364_v25, %s1950_s19 }
 0x1ac   : > { %v724_v45 = vpop.permute.xlu1 %723 }
 0x1ad   : > { %854 = vrot.lane.b32.xlu0 %v2370_v54, %s1946_s13  ;;  %v1199_v42 = vpop.permute.xlu0 %1198  ;;  %v727_v24 = vmul.f32 %v724_v45, %v2318_v33 }
 0x1ae   : > { %v1205_v4 = vmul.f32 %v1199_v42, %v2344_v28 }
 0x1af   : > { %826 = vrot.lane.b32.xlu1 %v2381_v53, %s1945_s30 }
 0x1b1   : > { %1905 = vrot.lane.b32.xlu0 %v1904_v19, %s1947_s14  ;;  %v742_v3 = vpop.permute.xlu1 %741  ;;  %v848_v44 = vpop.permute.xlu0 %847 }
 0x1b2   : > { %v851_v18 = vmul.f32 %v848_v44, %v2381_v53 }
 0x1b3   : > { %856 = vrot.lane.b32.xlu1 %v2381_v53, %s1946_s13 }
 0x1b5   : > { %1915 = vrot.lane.b32.xlu0 %v1914_v60, %s1947_s14 }
 0x1b6   : > { %v1188_v0 = vpop.permute.xlu1 %1187 }
 0x1b7   : > { %1910 = vrot.lane.b32.xlu1 %v1904_v19, %s1948_s15 }
 0x1ba   : > { %v1193_v2 = vpop.permute.xlu1 %1192 }
 0x1bb   : > { %1920 = vrot.lane.b32.xlu1 %v1914_v60, %s1948_s15 }
 0x1bf   : > { %v1203_v36 = vpop.permute.xlu1 %1202 }
 0x1c0   : > { %v1206_v14 = vmul.f32 %v1203_v36, %v2308_v16 }
 0x1c4   : > { %v1217_v47 = vpop.permute.xlu1 %1216 }
 0x1c9   : > { %v838_v10 = vpop.permute.xlu1 %837 }
 0x1ce   : > { %v844_v23 = vpop.permute.xlu1 %843 }
 0x1d3   : > { %v862_v13 = vpop.permute.xlu1 %861 }
 0x1d7   : > { %v2401_v27 = vpop.permute.xlu1 %865 }
 0x1e5   : > { %v1182_v52 = vpop.permute.xlu1 %1181 }
 0x1e6   : > { %v1184_v61 = vsel %vm555_vm2, %v1182_v52, 0.0  ;;  %v850_v52 = vmul.f32 %v844_v23, %v2370_v54  ;;  %v759_v54 = vld [vmem:[%s2587_s4 + $0x38] sm:$0xff] }
 0x1e7   : > { %v1196_v55 = vmul.f32 %v1193_v2, %v1184_v61 }
 0x1e9   : > { %v1212_v1 = vpop.permute.xlu1 %1211  ;;  %v1208_v45 = vadd.f32 %v1206_v14, %v1196_v55 }
 0x1ea   : > { %v1214_v63 = vsel %vm634_vm5, %v1212_v1, 0.0 }
 0x1eb   : > { %v1224_v62 = vmul.f32 %v1221_v12, %v1214_v63 }
 0x1ed   : > { %v733_v41 = vpop.permute.xlu1 %732 }
 0x1ee   : > { %v739_v49 = vsel %vm736_vm11, %v733_v41, 0.0 }
 0x1ef   : > { %v749_v19 = vmul.f32 %v746_v50, %v739_v49  ;;  %v1226_v50 = vadd.f32 %v1224_v62, %v1208_v45  ;;  %v1229_v49 = vld [vmem:[%s2593_s10 + $0x10] sm:$0xff] }
 0x1f0   : > { %v1233_v45 = vld [vmem:[%s2593_s10 + $0x30] sm:$0xff] }
 0x20f   : > { %v1180_v32 = vpop.permute.xlu0 %1179 }
 0x210   : > { %v1183_v39 = vsel %vm555_vm2, %v1180_v32, 0.0 }
 0x211   : > { %v1195_v59 = vmul.f32 %v1188_v0, %v1183_v39 }
 0x213   : > { %v699_v26 = vpop.permute.xlu0 %698  ;;  %v1207_v22 = vadd.f32 %v1205_v4, %v1195_v59 }
 0x214   : > { %v705_v31 = vsel %vm701_vm10, %v699_v26, 0.0 }
 0x215   : > { %v717_v48 = vmul.f32 %v714_v58, %v705_v31 }
 0x217   : > { %v1210_v51 = vpop.permute.xlu0 %1209  ;;  %v729_v35 = vadd.f32 %v727_v24, %v717_v48 }
 0x218   : > { %v1213_v37 = vsel %vm634_vm5, %v1210_v51, 0.0 }
 0x219   : > { %v697_v30 = vpop.permute.xlu1 %696  ;;  %v1223_v40 = vmul.f32 %v1217_v47, %v1213_v37  ;;  %v751_v28 = vadd.f32 %v749_v19, %v729_v35  ;;  %v874_v19 = vld [vmem:[%s2590_s7 + $0x10] sm:$0xff] }
 0x21a   : > { %v704_v43 = vsel %vm701_vm10, %v697_v30, 0.0 }
 0x21b   : > { %v716_v38 = vmul.f32 %v709_v57, %v704_v43  ;;  %v825_v56 = vpop.permute.xlu0 %824  ;;  %v1225_v2 = vadd.f32 %v1223_v40, %v1207_v22  ;;  %v1228_v43 = vld [vmem:[%s2593_s10 + $0x8] sm:$0xff] }
 0x21c   : > { %v828_v57 = vsel %vm533_vm3, %v825_v56, 0.0 }
 0x21d   : > { %v731_v33 = vpop.permute.xlu1 %730  ;;  %v728_v60 = vadd.f32 %v726_v34, %v716_v38  ;;  %v840_v16 = vmul.f32 %v833_v46, %v828_v57  ;;  %v1802_v41 = vpack.c.bf16 %v1226_v50, %v1225_v2  ;;  %v1232_v57 = vld [vmem:[%s2593_s10 + $0x28] sm:$0xff]  ;;  %v1234_v2 = vld [vmem:[%s2593_s10 + $0x38] sm:$0xff]  ;;  %v1406_v50 = vld [vmem:[%s2594_s11 + $0x10] sm:$0xff] }
 0x21e   : > { %v738_v15 = vsel %vm736_vm11, %v731_v33, 0.0  ;;  %v873_v33 = vld [vmem:[%s2590_s7 + $0x8] sm:$0xff] }
 0x21f   : > { %v748_v58 = vmul.f32 %v742_v3, %v738_v15  ;;  %v855_v0 = vpop.permute.xlu0 %854  ;;  %v852_v46 = vadd.f32 %v850_v52, %v840_v16  ;;  %v1405_v16 = vld [vmem:[%s2594_s11 + $0x8] sm:$0xff]  ;;  %v754_v52 = vld [vmem:[%s2587_s4 + $0x10] sm:$0xff] }
 0x220   : > { %v858_v25 = vsel %vm656_vm7, %v855_v0, 0.0 }
 0x221   : > { %v750_v47 = vadd.f32 %v748_v58, %v728_v60  ;;  %v827_v17 = vpop.permute.xlu1 %826  ;;  %v868_v3 = vmul.f32 %v862_v13, %v858_v25  ;;  %v1231_v60 = vld [vmem:[%s2593_s10 + $0x20] sm:$0xff] }
 0x222   : > { %v829_v36 = vsel %vm533_vm3, %v827_v17, 0.0  ;;  %v876_v58 = vld [vmem:[%s2590_s7 + $0x20] sm:$0xff]  ;;  %v879_v17 = vld [vmem:[%s2590_s7 + $0x38] sm:$0xff] }
 0x223   : > { %v2425_v12 = vpack.c.bf16 %v751_v28, %v750_v47  ;;  %v841_v42 = vmul.f32 %v838_v10, %v829_v36  ;;  %v1906_v1 = vpop.permute.xlu0 %1905  ;;  %v870_v44 = vadd.f32 %v868_v3, %v852_v46  ;;  %v877_v28 = vld [vmem:[%s2590_s7 + $0x28] sm:$0xff]  ;;  %v878_v47 = vld [vmem:[%s2590_s7 + $0x30] sm:$0xff]  ;;  %v1404_v25 = vld [vmem:[%s2594_s11] sm:$0xff] }
 0x224   : > { %v1908_v21 = vunpack.i.h.bf16 %v1906_v1  ;;  %v1907_v26 = vunpack.i.l.bf16 %v1906_v1  ;;  %v752_v36 = vld [vmem:[%s2587_s4] sm:$0xff]  ;;  %v755_v1 = vld [vmem:[%s2587_s4 + $0x18] sm:$0xff] }
 0x225   : > { %v857_v32 = vpop.permute.xlu1 %856  ;;  %1814 = vmatprep.subr.bf16.mxu1 %v2425_v12  ;;  %v853_v10 = vadd.f32 %v851_v18, %v841_v42  ;;  %v1407_v42 = vld [vmem:[%s2594_s11 + $0x18] sm:$0xff]  ;;  %v1408_v3 = vld [vmem:[%s2594_s11 + $0x20] sm:$0xff]  ;;  %v1409_v18 = vld [vmem:[%s2594_s11 + $0x28] sm:$0xff] }
 0x226   : > { %v859_v8 = vsel %vm656_vm7, %v857_v32, 0.0  ;;  %1815 = vmatpush3.bf16.msra.mxu1 %v2425_v12  ;;  %v1381_v53 = vsel %vm577_vm4, %v1908_v21, -inf  ;;  %v1380_v13 = vsel %vm577_vm4, %v1907_v26, -inf  ;;  %v756_v32 = vld [vmem:[%s2587_s4 + $0x20] sm:$0xff]  ;;  %v1410_v21 = vld [vmem:[%s2594_s11 + $0x30] sm:$0xff]  ;;  %v757_v26 = vld [vmem:[%s2587_s4 + $0x28] sm:$0xff] }
 0x227   : > { %v869_v23 = vmul.f32 %v2401_v27, %v859_v8  ;;  %1803 = vmatprep.subr.bf16.mxu1 %v1802_v41  ;;  %v1385_v31 = vmax.f32 %v1381_v53, %v2051_v6  ;;  %v1916_v39 = vpop.permute.xlu0 %1915  ;;  %v1384_v61 = vmax.f32 %v1380_v13, %v2049_v5 }
 0x228   : > { %v1918_v27 = vunpack.i.h.bf16 %v1916_v39  ;;  %v1917_v30 = vunpack.i.l.bf16 %v1916_v39 }
 0x229   : > { %v871_v51 = vadd.f32 %v869_v23, %v853_v10  ;;  %v1911_v48 = vpop.permute.xlu1 %1910  ;;  %1748 = vmatmul.mubr.msk.f32.vlgmr.msra.gmra.mrb[0].mxu1 %vm880_vm9, %v759_v54 }
 0x22a   : > { %v1913_v24 = vunpack.i.h.bf16 %v1911_v48  ;;  %v1912_v37 = vunpack.i.l.bf16 %v1911_v48  ;;  %1805 = vmatpush3.bf16.msra.mxu1 %v1802_v41  ;;  %1754 = vmatprep.mubr.msk.f32.mxu1 %vm880_vm9, %v1227_v29  ;;  %v1383_v6 = vsel %vm577_vm4, %v1918_v27, -inf  ;;  %v1382_v5 = vsel %vm577_vm4, %v1917_v30, -inf  ;;  %v1411_v41 = vld [vmem:[%s2594_s11 + $0x38] sm:$0xff] }
 0x22b   : > { %v1794_v63 = vpack.c.bf16 %v871_v51, %v870_v44  ;;  %v1387_v55 = vmax.f32 %v1383_v6, %v2058_v9  ;;  %v1386_v11 = vmax.f32 %v1382_v5, %v2053_v7  ;;  %v1230_v9 = vld [vmem:[%s2593_s10 + $0x18] sm:$0xff] }
 0x22c   : > { %v1397_v59 = vsel %vm612_vm6, %v1913_v24, -inf  ;;  %v1396_v38 = vsel %vm612_vm6, %v1912_v37, -inf }
 0x22d   : > { %v1401_v56 = vmax.f32 %v1385_v31, %v1397_v59  ;;  %v1400_v4 = vmax.f32 %v1384_v61, %v1396_v38  ;;  %1795 = vmatprep.subr.bf16.mxu0 %v1794_v63  ;;  %1755 = vmatmul.mubr.msk.f32.vlgmr.msra.gmra.mrb[2].mxu1 %vm880_vm9, %v1228_v43  ;;  %v1921_v35 = vpop.permute.xlu1 %1920 }
 0x22e   : > { %1797 = vmatpush3.bf16.msra.mxu0 %v1794_v63  ;;  %v1923_v40 = vunpack.i.h.bf16 %v1921_v35  ;;  %v1922_v34 = vunpack.i.l.bf16 %v1921_v35  ;;  %1757 = vmatprep.mubr.msk.f32.mxu1 %vm880_vm9, %v1229_v49 }
 0x22f   : > { %1799 = vmatprep.subr.bf16.mxu0 %v2425_v12  ;;  %v1806_v14 = vpack.c.bf16 %v1401_v56, %v1400_v4 }
 0x230   : > { %v1399_v7 = vsel %vm612_vm6, %v1923_v40, -inf  ;;  %v1398_v62 = vsel %vm612_vm6, %v1922_v34, -inf }
 0x231   : > { %v1403_v15 = vmax.f32 %v1387_v55, %v1399_v7  ;;  %v1402_v22 = vmax.f32 %v1386_v11, %v1398_v62  ;;  %1723 = vmatmul.mubr.msk.f32.vlgmr.msra.gmra.mrb[2].mxu0 %vm880_vm9, %v873_v33  ;;  %1758 = vmatmul.mubr.msk.f32.gmra.mrb[4].mxu1 %vm880_vm9, %v1230_v9 }
 0x232   : > { %1807 = vmatprep.subr.bf16.mxu1 %v1806_v14  ;;  %1801 = vmatpush3.bf16.msra.mxu0 %v2425_v12  ;;  %v753_v12 = vld [vmem:[%s2587_s4 + $0x8] sm:$0xff] }
 0x233   : > { %1809 = vmatpush3.bf16.msra.mxu1 %v1806_v14  ;;  %1725 = vmatprep.mubr.msk.f32.mxu0 %vm880_vm9, %v874_v19  ;;  %v1810_v0 = vpack.c.bf16 %v1403_v15, %v1402_v22 }
 0x234   : > { %1760 = vmatprep.mubr.msk.f32.mxu1 %vm880_vm9, %v1231_v60 }
 0x235   : > { %1726 = vmatmul.mubr.msk.f32.gmra.mrb[4].mxu0 %vm880_vm9, %v875_v20  ;;  %1761 = vmatmul.mubr.msk.f32.gmra.mrb[6].mxu1 %vm880_vm9, %v1232_v57 }
 0x236   : > { %1728 = vmatprep.mubr.msk.f32.mxu0 %vm880_vm9, %v876_v58  ;;  %1763 = vmatprep.mubr.msk.f32.mxu1 %vm880_vm9, %v1233_v45 }
 0x237   : > { %1811 = vmatprep.subr.bf16.mxu1 %v1810_v0 }
 0x238   : > { %1813 = vmatpush3.bf16.msra.mxu1 %v1810_v0 }
 0x239   : > { %1729 = vmatmul.mubr.msk.f32.gmra.mrb[6].mxu0 %vm880_vm9, %v877_v28  ;;  %1764 = vmatmul.mubr.msk.f32.gmra.mrb[0].mxu1 %vm880_vm9, %v1234_v2 }
 0x23a   : > { %1731 = vmatprep.mubr.msk.f32.mxu0 %vm880_vm9, %v878_v47  ;;  %1774 = vmatprep.mubr.msk.f32.mxu1 %vm420_vm0, %v1404_v25 }
 0x23d   : > { %1732 = vmatmul.mubr.msk.f32.gmra.mrb[8].mxu0 %vm880_vm9, %v879_v17  ;;  %1775 = vmatmul.mubr.msk.f32.vlgmr.msra.gmra.mrb[2].mxu1 %vm420_vm0, %v1405_v16 }
 0x23e   : > { %1738 = vmatprep.mubr.msk.f32.mxu0 %vm880_vm9, %v752_v36  ;;  %1777 = vmatprep.mubr.msk.f32.mxu1 %vm420_vm0, %v1406_v50 }
 0x241   : > { %1739 = vmatmul.mubr.msk.f32.vlgmr.msra.gmra.mrb[2].mxu0 %vm880_vm9, %v753_v12  ;;  %1778 = vmatmul.mubr.msk.f32.gmra.mrb[4].mxu1 %vm420_vm0, %v1407_v42 }
 0x242   : > { %1741 = vmatprep.mubr.msk.f32.mxu0 %vm880_vm9, %v754_v52  ;;  %1780 = vmatprep.mubr.msk.f32.mxu1 %vm420_vm0, %v1408_v3 }
 0x245   : > { %1742 = vmatmul.mubr.msk.f32.gmra.mrb[4].mxu0 %vm880_vm9, %v755_v1  ;;  %1781 = vmatmul.mubr.msk.f32.gmra.mrb[6].mxu1 %vm420_vm0, %v1409_v18 }
 0x246   : > { %1744 = vmatprep.mubr.msk.f32.mxu0 %vm880_vm9, %v756_v32  ;;  %1783 = vmatprep.mubr.msk.f32.mxu1 %vm420_vm0, %v1410_v21 }
 0x249   : > { %1745 = vmatmul.mubr.msk.f32.gmra.mrb[6].mxu0 %vm880_vm9, %v757_v26  ;;  %1784 = vmatmul.mubr.msk.f32.gmra.mrb[0].mxu1 %vm420_vm0, %v1411_v41 }
 0x310   : > { %v1776_v46 = vpop.f32.mrb[2].mxu1  ;;  %v1733_v8 = vpop.f32.mrb[8].mxu0 }
 0x311   : > { %v1502_v54 = vpop.f32.mrb[3].mxu1  ;;  %v1001_v10 = vpop.f32.mrb[9].mxu0 }
 0x314   : > { %v1740_v23 = vpop.f32.mrb[2].mxu0  ;;  %v1779_v53 = vpop.f32.mrb[4].mxu1 }
 0x315   : > { %v1816_v13 = vadd.f32 %v1776_v46, %v1740_v23  ;;  %v1100_v29 = vpop.f32.mrb[3].mxu0  ;;  %v1512_v44 = vpop.f32.mrb[5].mxu1 }
 0x316   : > { %v1817_v31 = vadd.f32 %v1502_v54, %v1100_v29 }
 0x317   : > { %1550 = vst [vmem:[%s413_s24 + $0x8] sm:$0xff] %v1816_v13 }
 0x318   : > { %1549 = vst [vmem:[%s413_s24] sm:$0xff] %v1817_v31  ;;  %v1743_v39 = vpop.f32.mrb[4].mxu0  ;;  %v1782_v51 = vpop.f32.mrb[6].mxu1 }
 0x319   : > { %v1818_v61 = vadd.f32 %v1779_v53, %v1743_v39  ;;  %v1110_v48 = vpop.f32.mrb[5].mxu0  ;;  %v1522_v27 = vpop.f32.mrb[7].mxu1 }
 0x31a   : > { %v1819_v30 = vadd.f32 %v1512_v44, %v1110_v48 }
 0x31b   : > { %1552 = vst [vmem:[%s413_s24 + $0x18] sm:$0xff] %v1818_v61 }
 0x31c   : > { %1551 = vst [vmem:[%s413_s24 + $0x10] sm:$0xff] %v1819_v30  ;;  %v1746_v24 = vpop.f32.mrb[6].mxu0  ;;  %v1785_v37 = vpop.f32.mrb[0].mxu1 }
 0x31d   : > { %v1820_v43 = vadd.f32 %v1782_v51, %v1746_v24  ;;  %v1822_v63 = vadd.f32 %v1785_v37, %v1733_v8  ;;  %v1120_v6 = vpop.f32.mrb[7].mxu0  ;;  %v1532_v5 = vpop.f32.mrb[1].mxu1 }
 0x31e   : > { %v1821_v49 = vadd.f32 %v1522_v27, %v1120_v6  ;;  %v1823_v59 = vadd.f32 %v1532_v5, %v1001_v10 }
 0x31f   : > { %1554 = vst [vmem:[%s413_s24 + $0x28] sm:$0xff] %v1820_v43  ;;  %1556 = vst [vmem:[%s413_s24 + $0x38] sm:$0xff] %v1822_v63 }
 0x320   : > { %1553 = vst [vmem:[%s413_s24 + $0x20] sm:$0xff] %v1821_v49  ;;  %1555 = vst [vmem:[%s413_s24 + $0x30] sm:$0xff] %v1823_v59 }
 0x321 PF: > { %s22_s21 = sadd.s32 1, %s1931_s21  }
 0x322   : > { %p19_p4 = scmp.ge.s32.totalorder %s22_s21, 4  }
 0x324   :  { %21 = sbr.rel (!%p19_p4) target bundleno = 1 (0x1), region = 98 }

// kernel: _lambda_.11
= control target key start
LH: loop header
LB: loop body
LE: loop exit
PB: predicated region body
PF: predicated region fallthrough
CT: control target
= control target key end

     0   :  { %9 = vsyncpa [#allocation3], 0  ;;  %s1047_s0 = inlined_call_operand.vmem [shape: f32[2,128,128], index: 0, kind: input, shape index: {}]   ;;  %s1048_s1 = inlined_call_operand.vmem [shape: f32[2,128,128], index: 1, kind: input, shape index: {}]   ;;  %s1049_s2 = inlined_call_operand.vmem [shape: f32[128,1], index: 2, kind: input, shape index: {}]   ;;  %s1050_s3 = inlined_call_operand.vmem [shape: f32[128,1], index: 3, kind: input, shape index: {}]   ;;  %s1051_s4 = inlined_call_operand.hbm [shape: f32[2,128,128], index: 4, kind: output, shape index: {}]  }
   0x1   :  { %11 = vsyncpa [#allocation3 + $0x1], 0  ;;  %s762_s15 = smov 0   ;;  %s764_s16 = smov 0  }
   0x2   :  { %s766_s17 = smov 0   ;;  %s768_s18 = smov 0  }
   0x3 LB: > { %s783_s19 = sadd.s32 4294967295, %s731_s18   ;;  %s608_s20 = sadd.s32 4294967294, %s731_s18   ;;  %s731_s18 = sphi %s768_s18, %s1057_s18   ;;  %s727_s17 = sphi %s766_s17, %s1056_s17   ;;  %s723_s16 = sphi %s764_s16, %s1055_s16   ;;  %s719_s15 = sphi %s762_s15, %s1054_s15  }
   0x4   : > { %s787_s21 = sadd.s32 1, %s731_s18   ;;  %s118_s22 = sadd.s32 1, %s727_s17 }
   0x5   : > { %s115_s23 = ssub.s32 %s731_s18, %s787_s21  ;;  %p128_p0 = scmp.ne.s32.totalorder %s727_s17, %s723_s16 }
   0x6   : > { %p116_p1 = scmp.eq.s32.totalorder %s115_s23, 0  ;;  %p129_p2 = scmp.eq.s32.totalorder %s783_s19, 1 }
   0x7   : > { %p134_p3 = scmp.ne.s32.totalorder %s723_s16, %s719_s15  ;;  %p135_p4 = scmp.eq.s32.totalorder %s608_s20, 1 }
   0x8   : > { %s798_s24 = scalar_select %p116_p1, %s727_s17, %s118_s22  }
   0x9   : > { %p800_p5 = por %p129_p2, %p128_p0  ;;  %p804_p6 = por %p135_p4, %p134_p3 }
   0xa   : > { %p611_p7 = scmp.ge.s32.totalorder %s731_s18, 1  ;;  %p175_p8 = scmp.lt.s32.totalorder %s731_s18, 3 }
   0xc   : > { %p176_p9 = pnand %p611_p7, %p175_p8 }
   0xd   : > { %v250_v0 = vld [vmem:[%s1049_s2 + $0x10] sm:$0xff] (!%p176_p9)  ;;  %v248_v1 = vld [vmem:[%s1049_s2] sm:$0xff] (!%p176_p9)  ;;  %v733_v2 = vmov (!%p176_p9), 0   ;;  %v251_v3 = vld [vmem:[%s1049_s2 + $0x18] sm:$0xff] (!%p176_p9)  ;;  %p206_p10 = scmp.lt.s32.totalorder (!%p176_p9), %s783_s19, 1  ;;  %s203_s5 = sand.u32 (!%p176_p9), 1, %s723_s16  }
   0xe   : > { %179 = sbr.rel (%p176_p9) target bundleno = 222 (0xde), region = 36  ;;  %668 = vset.pattern.permute.xlu1 (!%p176_p9), %v733_v2  ;;  %667 = vset.pattern.permute.xlu0 (!%p176_p9), %v733_v2  ;;  %v249_v4 = vld [vmem:[%s1049_s2 + $0x8] sm:$0xff] (!%p176_p9)  ;;  %v252_v6 = vld [vmem:[%s1049_s2 + $0x20] sm:$0xff] (!%p176_p9)  ;;  %v255_v7 = vld [vmem:[%s1049_s2 + $0x38] sm:$0xff] (!%p176_p9)  ;;  %s612_s6 = sshll.u32 (!%p176_p9), %s203_s5, 7 }
   0xf   : > { %276 = vperm.xlu1 (!%p176_p9), %668, %v250_v0   ;;  %266 = vperm.xlu0 (!%p176_p9), %667, %v248_v1   ;;  %v253_v5 = vld [vmem:[%s1049_s2 + $0x28] sm:$0xff] (!%p176_p9)  ;;  %v254_v8 = vld [vmem:[%s1049_s2 + $0x30] sm:$0xff] (!%p176_p9)  ;;  %v256_v10 = vld [vmem:[%s1049_s2 + $0x40] sm:$0xff] (!%p176_p9)  ;;  %s951_s7 = scalar_lea.vmem (!%p176_p9), [#allocation2], %s612_s6  ;;  %s624_s8 = sshll.u32 (!%p176_p9), %s783_s19, 11 }
  0x10   : > { %v257_v9 = vld [vmem:[%s1049_s2 + $0x48] sm:$0xff] (!%p176_p9)  ;;  %v259_v11 = vld [vmem:[%s1049_s2 + $0x58] sm:$0xff] (!%p176_p9)  ;;  %v258_v12 = vld [vmem:[%s1049_s2 + $0x50] sm:$0xff] (!%p176_p9)  ;;  %s534_s9 = sshll.u32 (!%p176_p9), %s951_s7, 4  ;;  %s998_s12 = scalar_lea.hbm (!%p176_p9), %s1051_s4, %s624_s8  ;;  %s1000_s9 = int_to_ptr.vmem [resolvable:$true] %s534_s9 }
  0x11   : > { %v261_v13 = vld [vmem:[%s1049_s2 + $0x68] sm:$0xff] (!%p176_p9)  ;;  %v260_v14 = vld [vmem:[%s1049_s2 + $0x60] sm:$0xff] (!%p176_p9)  ;;  %v263_v15 = vld [vmem:[%s1049_s2 + $0x78] sm:$0xff] (!%p176_p9)  ;;  %s669_s13 = scalar_lea.vmem (!%p176_p9), %s1000_s9, 2048 }
  0x12   : > { %v262_v16 = vld [vmem:[%s1049_s2 + $0x70] sm:$0xff] (!%p176_p9)  ;;  %v377_v17 = vld [vmem:[%s1050_s3 + $0x8] sm:$0xff] (!%p176_p9)  ;;  %v376_v18 = vld [vmem:[%s1050_s3] sm:$0xff] (!%p176_p9)  ;;  %p670_p11 = scmp.ne.s32.totalorder (!%p176_p9), %s1000_s9, %s669_s13 }
  0x13   : > { %281 = vperm.xlu1 (!%p176_p9), %668, %v251_v3   ;;  %271 = vperm.xlu0 (!%p176_p9), %667, %v249_v4   ;;  %v379_v19 = vld [vmem:[%s1050_s3 + $0x18] sm:$0xff] (!%p176_p9)  ;;  %v378_v20 = vld [vmem:[%s1050_s3 + $0x10] sm:$0xff] (!%p176_p9)  ;;  %v381_v21 = vld [vmem:[%s1050_s3 + $0x28] sm:$0xff] (!%p176_p9) }
  0x14   : > { %v380_v22 = vld [vmem:[%s1050_s3 + $0x20] sm:$0xff] (!%p176_p9)  ;;  %v383_v23 = vld [vmem:[%s1050_s3 + $0x38] sm:$0xff] (!%p176_p9)  ;;  %v382_v24 = vld [vmem:[%s1050_s3 + $0x30] sm:$0xff] (!%p176_p9)  ;;  %p671_p12 = pnand (!%p176_p9), %p670_p11, %p800_p5 }
  0x15   : > { %v385_v25 = vld [vmem:[%s1050_s3 + $0x48] sm:$0xff]  ;;  %v384_v26 = vld [vmem:[%s1050_s3 + $0x40] sm:$0xff]  ;;  %v387_v27 = vld [vmem:[%s1050_s3 + $0x58] sm:$0xff]  ;;  %s207_s14 = scalar_select %p206_p10, %s783_s19, 1 }
  0x16   : > { %v386_v28 = vld [vmem:[%s1050_s3 + $0x50] sm:$0xff]  ;;  %v389_v29 = vld [vmem:[%s1050_s3 + $0x68] sm:$0xff]  ;;  %v388_v30 = vld [vmem:[%s1050_s3 + $0x60] sm:$0xff]  ;;  %s1006_s19 = scalar_lea.sflag [#allocation3], %s203_s5  ;;  %p672_p13 = pneg %p671_p12 }
  0x17   : > { %291 = vperm.xlu1 %668, %v253_v5   ;;  %286 = vperm.xlu0 %667, %v252_v6   ;;  %v391_v31 = vld [vmem:[%s1050_s3 + $0x78] sm:$0xff]  ;;  %v390_v32 = vld [vmem:[%s1050_s3 + $0x70] sm:$0xff]  ;;  %s622_s20 = sshll.u32 %s207_s14, 7  ;;  %s734_s14 = smov [#allocation2]  }
  0x18   : > { %s919_s27 = scalar_lea.vmem %s1048_s1, %s622_s20  ;;  %s930_s30 = scalar_lea.vmem %s1047_s0, %s622_s20 }
  0x19   : > { %v232_v45 = vld [vmem:[%s919_s27] sm:$0xff]  ;;  %v233_v46 = vld [vmem:[%s919_s27 + $0x8] sm:$0xff]  ;;  %v234_v49 = vld [vmem:[%s919_s27 + $0x10] sm:$0xff]  ;;  %s673_s20 = sshll.u32 %s734_s14, 4  ;;  %s674_s20 = int_to_ptr.vmem [resolvable:$false] %s673_s20 }
  0x1a   : > { %v235_v52 = vld [vmem:[%s919_s27 + $0x18] sm:$0xff]  ;;  %v217_v55 = vld [vmem:[%s930_s30 + $0x8] sm:$0xff]  ;;  %v216_v56 = vld [vmem:[%s930_s30] sm:$0xff]  ;;  %s675_s22 = scalar_lea.vmem %s674_s20, 4096  ;;  %p676_p0 = scmp.lt.s32.totalorder %s1000_s9, %s674_s20 }
  0x1b   : > { %301 = vperm.xlu1 %668, %v255_v7   ;;  %296 = vperm.xlu0 %667, %v254_v8   ;;  %v237_v59 = vld [vmem:[%s919_s27 + $0x28] sm:$0xff]  ;;  %v236_v60 = vld [vmem:[%s919_s27 + $0x20] sm:$0xff]  ;;  %v219_v1 = vld [vmem:[%s930_s30 + $0x18] sm:$0xff]  ;;  %p677_p1 = scmp.lt.s32.totalorder %s675_s22, %s669_s13 }
  0x1c   : > { %v218_v2 = vld [vmem:[%s930_s30 + $0x10] sm:$0xff] }
  0x1d   : > { %p678_p2 = por %p677_p1, %p676_p0 }
  0x1f   : > { %311 = vperm.xlu1 %668, %v257_v9   ;;  %306 = vperm.xlu0 %667, %v256_v10   ;;  %p679_p3 = pnand %p678_p2, %p672_p13 }
  0x23   : > { %321 = vperm.xlu1 %668, %v259_v11   ;;  %316 = vperm.xlu0 %667, %v258_v12   ;;  %v221_v11 = vld [vmem:[%s930_s30 + $0x28] sm:$0xff]  ;;  %v220_v12 = vld [vmem:[%s930_s30 + $0x20] sm:$0xff] }
  0x27   : > { %331 = vperm.xlu1 %668, %v261_v13   ;;  %326 = vperm.xlu0 %667, %v260_v14   ;;  %v239_v13 = vld [vmem:[%s919_s27 + $0x38] sm:$0xff]  ;;  %v238_v14 = vld [vmem:[%s919_s27 + $0x30] sm:$0xff] }
  0x2b   : > { %341 = vperm.xlu1 %668, %v263_v15   ;;  %336 = vperm.xlu0 %667, %v262_v16  }
  0x2f   : > { %399 = vperm.xlu1 %668, %v377_v17   ;;  %394 = vperm.xlu0 %667, %v376_v18  }
  0x33   : > { %409 = vperm.xlu1 %668, %v379_v19   ;;  %404 = vperm.xlu0 %667, %v378_v20  }
  0x37   : > { %419 = vperm.xlu1 %668, %v381_v21   ;;  %414 = vperm.xlu0 %667, %v380_v22  }
  0x3b   : > { %429 = vperm.xlu1 %668, %v383_v23   ;;  %424 = vperm.xlu0 %667, %v382_v24   ;;  %v241_v23 = vld [vmem:[%s919_s27 + $0x48] sm:$0xff]  ;;  %v240_v24 = vld [vmem:[%s919_s27 + $0x40] sm:$0xff] }
  0x3f   : > { %439 = vperm.xlu1 %668, %v385_v25   ;;  %434 = vperm.xlu0 %667, %v384_v26  }
  0x43   : > { %449 = vperm.xlu1 %668, %v387_v27   ;;  %444 = vperm.xlu0 %667, %v386_v28  }
  0x47   : > { %459 = vperm.xlu1 %668, %v389_v29   ;;  %454 = vperm.xlu0 %667, %v388_v30   ;;  %v223_v29 = vld [vmem:[%s930_s30 + $0x38] sm:$0xff]  ;;  %v222_v30 = vld [vmem:[%s930_s30 + $0x30] sm:$0xff] }
  0x4b   : > { %469 = vperm.xlu1 %668, %v391_v31   ;;  %464 = vperm.xlu0 %667, %v390_v32  }
  0x8e   : > { %v277_v33 = vpop.permute.xlu1 %276  ;;  %v267_v34 = vpop.permute.xlu0 %266 }
  0x8f   : > { %v344_v50 = vmul.f32 %v267_v34, %v232_v45  ;;  %v346_v57 = vmul.f32 %v277_v33, %v234_v49  ;;  %v243_v45 = vld [vmem:[%s919_s27 + $0x58] sm:$0xff] }
  0x91   : > { %v360_v62 = vadd.f32 %v344_v50, %v216_v56  ;;  %v362_v10 = vadd.f32 %v346_v57, %v218_v2  ;;  %v245_v57 = vld [vmem:[%s919_s27 + $0x68] sm:$0xff] }
  0x92   : > { %v282_v35 = vpop.permute.xlu1 %281  ;;  %v272_v36 = vpop.permute.xlu0 %271 }
  0x93   : > { %v345_v51 = vmul.f32 %v272_v36, %v233_v46  ;;  %v347_v58 = vmul.f32 %v282_v35, %v235_v52  ;;  %v242_v46 = vld [vmem:[%s919_s27 + $0x50] sm:$0xff] }
  0x95   : > { %v361_v61 = vadd.f32 %v345_v51, %v217_v55  ;;  %v363_v9 = vadd.f32 %v347_v58, %v219_v1  ;;  %v244_v58 = vld [vmem:[%s919_s27 + $0x60] sm:$0xff] }
  0x96   : > { %v292_v37 = vpop.permute.xlu1 %291  ;;  %v287_v38 = vpop.permute.xlu0 %286 }
  0x97   : > { %v349_v5 = vmul.f32 %v292_v37, %v237_v59  ;;  %v348_v6 = vmul.f32 %v287_v38, %v236_v60 }
  0x99   : > { %v365_v19 = vadd.f32 %v349_v5, %v221_v11  ;;  %v364_v20 = vadd.f32 %v348_v6, %v220_v12 }
  0x9a   : > { %v302_v39 = vpop.permute.xlu1 %301  ;;  %v297_v40 = vpop.permute.xlu0 %296 }
  0x9b   : > { %v351_v21 = vmul.f32 %v302_v39, %v239_v13  ;;  %v350_v22 = vmul.f32 %v297_v40, %v238_v14  ;;  %v225_v39 = vld [vmem:[%s930_s30 + $0x48] sm:$0xff]  ;;  %v224_v40 = vld [vmem:[%s930_s30 + $0x40] sm:$0xff] }
  0x9d   : > { %v367_v37 = vadd.f32 %v351_v21, %v223_v29  ;;  %v366_v38 = vadd.f32 %v350_v22, %v222_v30  ;;  %v231_v21 = vld [vmem:[%s930_s30 + $0x78] sm:$0xff]  ;;  %v230_v22 = vld [vmem:[%s930_s30 + $0x70] sm:$0xff] }
  0x9e   : > { %v908_v41 = vpop.permute.xlu1 %311  ;;  %v910_v42 = vpop.permute.xlu0 %306 }
  0x9f   : > { %v353_v33 = vmul.f32 %v908_v41, %v241_v23  ;;  %v352_v34 = vmul.f32 %v910_v42, %v240_v24 }
  0xa1   : > { %v369_v51 = vadd.f32 %v353_v33, %v225_v39  ;;  %v368_v52 = vadd.f32 %v352_v34, %v224_v40 }
  0xa2   : > { %v912_v43 = vpop.permute.xlu1 %321  ;;  %v914_v44 = vpop.permute.xlu0 %316 }
  0xa3   : > { %v355_v55 = vmul.f32 %v912_v43, %v243_v45  ;;  %v354_v56 = vmul.f32 %v914_v44, %v242_v46 }
  0xa6   : > { %v923_v47 = vpop.permute.xlu1 %331  ;;  %v925_v48 = vpop.permute.xlu0 %326 }
  0xa7   : > { %v357_v44 = vmul.f32 %v923_v47, %v245_v57  ;;  %v356_v2 = vmul.f32 %v925_v48, %v244_v58 }
  0xaa   : > { %v934_v53 = vpop.permute.xlu1 %341  ;;  %v936_v54 = vpop.permute.xlu0 %336 }
  0xae   : > { %v400_v63 = vpop.permute.xlu1 %399  ;;  %v395_v0 = vpop.permute.xlu0 %394 }
  0xaf   : > { %v473_v3 = vadd.f32 %v400_v63, %v361_v61  ;;  %v472_v4 = vadd.f32 %v395_v0, %v360_v62  ;;  %v227_v63 = vld [vmem:[%s930_s30 + $0x58] sm:$0xff]  ;;  %v226_v0 = vld [vmem:[%s930_s30 + $0x50] sm:$0xff] }
  0xb0   : > { %v371_v5 = vadd.f32 %v355_v55, %v227_v63  ;;  %v370_v6 = vadd.f32 %v354_v56, %v226_v0 }
  0xb1   : > { %v489_v7 = vmax.f32 %v473_v3, 0.0  ;;  %v488_v8 = vmax.f32 %v472_v4, 0.0 }
  0xb2   : > { %v410_v15 = vpop.permute.xlu1 %409  ;;  %v405_v16 = vpop.permute.xlu0 %404 }
  0xb3   : > { %505 = vst [vmem:[%s951_s7 + $0x8] sm:$0xff] %v489_v7  ;;  %504 = vst [vmem:[%s951_s7] sm:$0xff] %v488_v8  ;;  %v475_v17 = vadd.f32 %v410_v15, %v363_v9  ;;  %v474_v18 = vadd.f32 %v405_v16, %v362_v10  ;;  %v229_v7 = vld [vmem:[%s930_s30 + $0x68] sm:$0xff]  ;;  %v228_v8 = vld [vmem:[%s930_s30 + $0x60] sm:$0xff] }
  0xb4   : > { %v247_v9 = vld [vmem:[%s919_s27 + $0x78] sm:$0xff]  ;;  %v246_v10 = vld [vmem:[%s919_s27 + $0x70] sm:$0xff]  ;;  %v373_v14 = vadd.f32 %v357_v44, %v229_v7  ;;  %v372_v48 = vadd.f32 %v356_v2, %v228_v8 }
  0xb5   : > { %v491_v25 = vmax.f32 %v475_v17, 0.0  ;;  %v490_v26 = vmax.f32 %v474_v18, 0.0  ;;  %v359_v15 = vmul.f32 %v934_v53, %v247_v9  ;;  %v358_v16 = vmul.f32 %v936_v54, %v246_v10 }
  0xb6   : > { %v420_v27 = vpop.permute.xlu1 %419  ;;  %v415_v28 = vpop.permute.xlu0 %414 }
  0xb7   : > { %507 = vst [vmem:[%s951_s7 + $0x18] sm:$0xff] %v491_v25  ;;  %506 = vst [vmem:[%s951_s7 + $0x10] sm:$0xff] %v490_v26  ;;  %v477_v31 = vadd.f32 %v420_v27, %v365_v19  ;;  %v476_v32 = vadd.f32 %v415_v28, %v364_v20  ;;  %v375_v53 = vadd.f32 %v359_v15, %v231_v21 }
  0xb8   : > { %v374_v54 = vadd.f32 %v358_v16, %v230_v22 }
  0xb9   : > { %v493_v35 = vmax.f32 %v477_v31, 0.0  ;;  %v492_v36 = vmax.f32 %v476_v32, 0.0 }
  0xba   : > { %v430_v49 = vpop.permute.xlu1 %429  ;;  %v425_v50 = vpop.permute.xlu0 %424 }
  0xbb   : > { %509 = vst [vmem:[%s951_s7 + $0x28] sm:$0xff] %v493_v35  ;;  %508 = vst [vmem:[%s951_s7 + $0x20] sm:$0xff] %v492_v36  ;;  %v479_v41 = vadd.f32 %v430_v49, %v367_v37  ;;  %v478_v42 = vadd.f32 %v425_v50, %v366_v38 }
  0xbd   : > { %v495_v59 = vmax.f32 %v479_v41, 0.0  ;;  %v494_v60 = vmax.f32 %v478_v42, 0.0 }
  0xbe   : > { %v440_v61 = vpop.permute.xlu1 %439  ;;  %v435_v62 = vpop.permute.xlu0 %434 }
  0xbf   : > { %511 = vst [vmem:[%s951_s7 + $0x38] sm:$0xff] %v495_v59  ;;  %510 = vst [vmem:[%s951_s7 + $0x30] sm:$0xff] %v494_v60  ;;  %v481_v1 = vadd.f32 %v440_v61, %v369_v51  ;;  %v480_v43 = vadd.f32 %v435_v62, %v368_v52 }
  0xc1   : > { %v497_v3 = vmax.f32 %v481_v1, 0.0  ;;  %v496_v4 = vmax.f32 %v480_v43, 0.0 }
  0xc2   : > { %v450_v11 = vpop.permute.xlu1 %449  ;;  %v445_v12 = vpop.permute.xlu0 %444 }
  0xc3   : > { %513 = vst [vmem:[%s951_s7 + $0x48] sm:$0xff] %v497_v3  ;;  %512 = vst [vmem:[%s951_s7 + $0x40] sm:$0xff] %v496_v4  ;;  %v483_v13 = vadd.f32 %v450_v11, %v371_v5  ;;  %v482_v47 = vadd.f32 %v445_v12, %v370_v6 }
  0xc5   : > { %v499_v17 = vmax.f32 %v483_v13, 0.0  ;;  %v498_v18 = vmax.f32 %v482_v47, 0.0 }
  0xc6   : > { %v460_v19 = vpop.permute.xlu1 %459  ;;  %v455_v20 = vpop.permute.xlu0 %454 }
  0xc7   : > { %515 = vst [vmem:[%s951_s7 + $0x58] sm:$0xff] %v499_v17  ;;  %514 = vst [vmem:[%s951_s7 + $0x50] sm:$0xff] %v498_v18  ;;  %v485_v23 = vadd.f32 %v460_v19, %v373_v14  ;;  %v484_v24 = vadd.f32 %v455_v20, %v372_v48 }
  0xc9   : > { %v501_v25 = vmax.f32 %v485_v23, 0.0  ;;  %v500_v26 = vmax.f32 %v484_v24, 0.0 }
  0xca   : > { %v470_v27 = vpop.permute.xlu1 %469  ;;  %v465_v28 = vpop.permute.xlu0 %464 }
  0xcb   : > { %517 = vst [vmem:[%s951_s7 + $0x68] sm:$0xff] %v501_v25  ;;  %516 = vst [vmem:[%s951_s7 + $0x60] sm:$0xff] %v500_v26  ;;  %v487_v29 = vadd.f32 %v470_v27, %v375_v53  ;;  %v486_v30 = vadd.f32 %v465_v28, %v374_v54 }
  0xcd   : > { %v503_v31 = vmax.f32 %v487_v29, 0.0  ;;  %v502_v32 = vmax.f32 %v486_v30, 0.0 }
  0xcf   : > { %519 = vst [vmem:[%s951_s7 + $0x78] sm:$0xff] %v503_v31  ;;  %518 = vst [vmem:[%s951_s7 + $0x70] sm:$0xff] %v502_v32 }
  0xd0   : > { %682 = shalt.err (!%p679_p3)
}
  0xd1   : > { %s683_s23 = scalar_lea.hbm %s998_s12, 2048  ;;  %s687_s29 = scalar_lea.hbm %s1051_s4, 4096 }
  0xd2   : > { %p684_p4 = scmp.ne.s32.totalorder %s998_s12, %s683_s23  ;;  %p688_p9 = scmp.lt.u32.totalorder %s998_s12, %s1051_s4 }
  0xd3   : > { %p689_p10 = scmp.lt.u32.totalorder %s687_s29, %s683_s23  ;;  %p691_p12 = scmp.lt.u32.totalorder %s683_s23, %s998_s12 }
  0xd4   : > { %p685_p7 = pnand %p684_p4, %p800_p5 }
  0xd5   : > { %p690_p11 = por %p689_p10, %p688_p9 }
  0xd6   : > { %p686_p8 = pneg %p685_p7 }
  0xd7   : > { %p692_p13 = por %p691_p12, %p690_p11 }
  0xd9   : > { %p693_p0 = pnand %p692_p13, %p686_p8 }
  0xdb   : > { %696 = shalt.err (!%p693_p0)
}
  0xdc   : > { %s735_s6 = smov 128   ;;  %s736_s7 = smov 8  }
  0xdd   : > { %625 = dma.vmem_to_hbm [thread:$0]  (%p800_p5), %s1000_s9, 2048, %s998_s12, %s1006_s19, %s735_s6, %s735_s6, %s736_s7  }
  0xde PF: > { %p631_p1 = scmp.ge.s32.totalorder %s731_s18, 2  ;;  %s549_s8 = sand.u32 1, %s719_s15  }
  0xdf   : > { %s550_s10 = scalar_lea.sflag [#allocation3], %s549_s8 }
  0xe0   : > { %p628_p2 = pnand %p631_p1, %p804_p6 }
  0xe2   : > { %714 = dma.done.wait (!%p628_p2), %s550_s10, 2048  }
  0xe3   : > { %716 = vsyncadd (!%p628_p2), %s550_s10, 4294965248  ;;  %p14_p3 = scmp.ge.s32.totalorder %s787_s21, 4   ;;  %s1054_s15 = smov %s723_s16 }
  0xe4   : > { %s1055_s16 = smov %s727_s17  ;;  %s1056_s17 = smov %s798_s24 }
  0xe5   : > { %s1057_s18 = smov %s787_s21  ;;  %16 = sbr.rel (!%p14_p3) target bundleno = 3 (0x3), region = 74 }
  0xec   :  { %555 = vsyncpa [#allocation3], 1 }
  0xed   :  { %557 = vsyncpa [#allocation3 + $0x1], 1 }

// kernel: _lambda_.10
= control target key start
LH: loop header
LB: loop body
LE: loop exit
PB: predicated region body
PF: predicated region fallthrough
CT: control target
= control target key end

     0   :  { %s3538_s18 = smov 0   ;;  %s4931_s0 = inlined_call_operand.vmem [shape: f32[2,64,128], index: 0, kind: input, shape index: {}]   ;;  %s4932_s1 = inlined_call_operand.vmem [shape: f32[2,32,128], index: 1, kind: input, shape index: {}]   ;;  %s4933_s2 = inlined_call_operand.vmem [shape: f32[32,64], index: 2, kind: input, shape index: {}]   ;;  %s4934_s3 = inlined_call_operand.vmem [shape: f32[32,9], index: 3, kind: input, shape index: {}]   ;;  %s4935_s4 = inlined_call_operand.vmem [shape: f32[32,3], index: 4, kind: input, shape index: {}]   ;;  %s4936_s5 = inlined_call_operand.vmem [shape: f32[128,32], index: 5, kind: input, shape index: {}]   ;;  %s4937_s6 = inlined_call_operand.vmem [shape: f32[32,5], index: 6, kind: input, shape index: {}]   ;;  %s4938_s7 = inlined_call_operand.vmem [shape: f32[32,3], index: 7, kind: input, shape index: {}]   ;;  %s4939_s8 = inlined_call_operand.vmem [shape: f32[128,32], index: 8, kind: input, shape index: {}]   ;;  %s4940_s9 = inlined_call_operand.vmem [shape: f32[32,3], index: 9, kind: input, shape index: {}]   ;;  %s4941_s10 = inlined_call_operand.vmem [shape: f32[32,3], index: 10, kind: input, shape index: {}]   ;;  %s4942_s11 = inlined_call_operand.vmem [shape: f32[128,32], index: 11, kind: input, shape index: {}]   ;;  %s4943_s12 = inlined_call_operand.vmem [shape: f32[128,64], index: 12, kind: input, shape index: {}]   ;;  %s4944_s13 = inlined_call_operand.vmem [shape: f32[128,32], index: 13, kind: input, shape index: {}]   ;;  %s4945_s14 = inlined_call_operand.vmem [shape: f32[2,128,128], index: 14, kind: output, shape index: {0}]   ;;  %s4946_s15 = inlined_call_operand.vmem [shape: f32[2,128,128], index: 15, kind: output, shape index: {1}]  }
   0x1 LB: > { %s2774_s19 = sadd.s32 4294967295, %s3437_s18   ;;  %p2778_p0 = scmp.ge.s32.totalorder %s3437_s18, 1  ;;  %s3437_s18 = sphi %s3538_s18, %s26_s18  }
   0x2   : > { %p450_p1 = scmp.lt.s32.totalorder %s3437_s18, 3 }
   0x4   : > { %p451_p2 = pnand %p2778_p0, %p450_p1 }
   0x6   : > { %454 = sbr.rel (%p451_p2) target bundleno = 919 (0x397), region = 76 }
   0xd   : > { %v3549_v0 = vld [vmem:[%s4934_s3 + $0x8] sm:$0xff]  ;;  %p508_p3 = scmp.lt.s32.totalorder %s2774_s19, 1  ;;  %v4949_v1 = vmov 0   ;;  %v536_v2 = vld [vmem:[%s4933_s2] sm:$0xff]  ;;  %vm540_vm0 = vcmask 523264   ;;  %v3562_v3 = vld [vmem:[%s4934_s3 + $0x10] sm:$0xff] }
   0xe   : > { %3326 = vset.pattern.permute.xlu1 %v4949_v1  ;;  %3009 = vmatprep.mubr.msk.f32.mxu0 %vm540_vm0, %v536_v2  ;;  %v3440_v4 = vmov 3   ;;  %v3580_v10 = vld [vmem:[%s4934_s3] sm:$0xff]  ;;  %v3441_v14 = vmov 5   ;;  %v4947_v15 = vmov 1   ;;  %v3595_v20 = vld [vmem:[%s4934_s3 + $0x18] sm:$0xff]  ;;  %v3443_v21 = vmov 6  }
   0xf   : > { %667 = vperm.xlu1 %3326, %v3549_v0   ;;  %s5030_s19 = smov (!%p508_p3, %s2774_s19), 1  ;;  %3330 = vset.pattern.permute.xlu0 %v3440_v4  ;;  %v537_v22 = vld [vmem:[%s4933_s2 + $0x8] sm:$0xff]  ;;  %v3444_v23 = vmov 7   ;;  %v4951_v24 = vmov 2   ;;  %v538_v25 = vld [vmem:[%s4933_s2 + $0x10] sm:$0xff]  ;;  %v539_v26 = vld [vmem:[%s4933_s2 + $0x18] sm:$0xff] }
  0x10   : > { %s2873_s26 = sshll.u32 %s5030_s19, 6  ;;  %785 = vperm.xlu0 %3330, %v3549_v0   ;;  %v3446_v27 = vmov 8   ;;  %v3627_v28 = vld [vmem:[%s4937_s6 + $0x10] sm:$0xff]  ;;  %v3447_v29 = vmov 4   ;;  %v1113_v30 = vld [vmem:[%s4937_s6 + $0x8] sm:$0xff]  ;;  %v1115_v31 = vld [vmem:[%s4937_s6 + $0x18] sm:$0xff] }
  0x11   : > { %s3570_s29 = scalar_lea.vmem %s4931_s0, %s2873_s26  ;;  %v1740_v32 = vld [vmem:[%s4940_s9 + $0x8] sm:$0xff]  ;;  %v3659_v33 = vld [vmem:[%s4940_s9 + $0x18] sm:$0xff]  ;;  %v3670_v34 = vld [vmem:[%s4937_s6] sm:$0xff]  ;;  %s3448_s21 = smov 2   ;;  %vm1352_vm9 = vcmask 261120  }
  0x12   : > { %v528_v5 = vld [vmem:[%s3570_s29] sm:$0xff]  ;;  %v529_v6 = vld [vmem:[%s3570_s29 + $0x8] sm:$0xff]  ;;  %v530_v7 = vld [vmem:[%s3570_s29 + $0x10] sm:$0xff]  ;;  %s3449_s22 = smov 4   ;;  %s3450_s23 = smov 126  }
  0x13   : > { %672 = vperm.xlu1 %3326, %v3562_v3   ;;  %v3183_v8 = vpack.c.bf16 %v529_v6, %v528_v5  ;;  %v531_v9 = vld [vmem:[%s3570_s29 + $0x18] sm:$0xff]  ;;  %v532_v12 = vld [vmem:[%s3570_s29 + $0x20] sm:$0xff]  ;;  %v533_v13 = vld [vmem:[%s3570_s29 + $0x28] sm:$0xff]  ;;  %s3451_s24 = smov 3   ;;  %s3452_s25 = smov 124  }
  0x14   : > { %v3187_v11 = vpack.c.bf16 %v531_v9, %v530_v7  ;;  %3333 = vset.pattern.permute.xlu0 %v3441_v14  ;;  %v3191_v16 = vpack.c.bf16 %v533_v13, %v532_v12  ;;  %v534_v17 = vld [vmem:[%s3570_s29 + $0x30] sm:$0xff]  ;;  %v535_v18 = vld [vmem:[%s3570_s29 + $0x38] sm:$0xff]  ;;  %v3709_v44 = vld [vmem:[%s4940_s9] sm:$0xff]  ;;  %s3453_s26 = smov 1   ;;  %s3454_s27 = smov 127  }
  0x15   : > { %3184 = vmatprep.subr.bf16.mxu0 %v3183_v8  ;;  %849 = vperm.xlu0 %3333, %v3549_v0   ;;  %v3195_v19 = vpack.c.bf16 %v535_v18, %v534_v17  ;;  %v3728_v49 = vld [vmem:[%s4940_s9 + $0x10] sm:$0xff]  ;;  %v3744_v53 = vld [vmem:[%s4935_s4 + $0x8] sm:$0xff]  ;;  %s3455_s28 = smov 125   ;;  %s3457_s30 = smov 123  }
  0x16   : > { %3186 = vmatpush3.bf16.msra.mxu0 %v3183_v8 }
  0x17   : > { %3327 = vset.pattern.permute.xlu1 %v4947_v15  ;;  %3188 = vmatprep.subr.bf16.mxu0 %v3187_v11 }
  0x18   : > { %701 = vperm.xlu1 %3327, %v3580_v10  }
  0x19   : > { %853 = vperm.xlu0 %3333, %v3562_v3  }
  0x1a   : > { %3190 = vmatpush3.bf16.msra.mxu0 %v3187_v11 }
  0x1b   : > { %3192 = vmatprep.subr.bf16.mxu0 %v3191_v16 }
  0x1c   : > { %709 = vperm.xlu1 %3327, %v3562_v3  }
  0x1d   : > { %3338 = vset.pattern.permute.xlu0 %v3443_v21 }
  0x1e   : > { %3194 = vmatpush3.bf16.msra.mxu0 %v3191_v16  ;;  %897 = vperm.xlu0 %3338, %v3595_v20  }
  0x1f   : > { %3196 = vmatprep.subr.bf16.mxu0 %v3195_v19 }
  0x20   : > { %713 = vperm.xlu1 %3327, %v3595_v20  }
  0x22   : > { %3198 = vmatpush3.bf16.msra.mxu0 %v3195_v19  ;;  %3339 = vset.pattern.permute.xlu0 %v3444_v23 }
  0x23   : > { %925 = vperm.xlu0 %3339, %v3580_v10  }
  0x24   : > { %3328 = vset.pattern.permute.xlu1 %v4951_v24 }
  0x25   : > { %745 = vperm.xlu1 %3328, %v3549_v0   ;;  %3010 = vmatmul.mubr.msk.f32.vlgmr.msra.gmra.mrb[0].mxu0 %vm540_vm0, %v537_v22 }
  0x26   : > { %3012 = vmatprep.mubr.msk.f32.mxu0 %vm540_vm0, %v538_v25 }
  0x27   : > { %933 = vperm.xlu0 %3339, %v3562_v3  }
  0x29   : > { %749 = vperm.xlu1 %3328, %v3562_v3   ;;  %3013 = vmatmul.mubr.msk.f32.gmra.mrb[2].mxu0 %vm540_vm0, %v539_v26  ;;  %v991_v26 = vld [vmem:[%s4935_s4 + $0x18] sm:$0xff] }
  0x2b   : > { %3343 = vset.pattern.permute.xlu0 %v3446_v27 }
  0x2c   : > { %977 = vperm.xlu0 %3343, %v3595_v20  }
  0x2d   : > { %3329 = vset.pattern.permute.xlu1 %v3440_v4 }
  0x2e   : > { %781 = vperm.xlu1 %3329, %v3580_v10  }
  0x30   : > { %3344 = vset.pattern.permute.xlu0 %v4951_v24 }
  0x31   : > { %741 = vperm.xlu0 %3344, %v3580_v10  }
  0x32   : > { %789 = vperm.xlu1 %3329, %v3562_v3  }
  0x35   : > { %753 = vperm.xlu0 %3344, %v3595_v20  }
  0x36   : > { %793 = vperm.xlu1 %3329, %v3595_v20  }
  0x39   : > { %1173 = vperm.xlu0 %3344, %v3627_v28  }
  0x3a   : > { %3331 = vset.pattern.permute.xlu1 %v3447_v29 }
  0x3b   : > { %809 = vperm.xlu1 %3331, %v3549_v0  }
  0x3d   : > { %3351 = vset.pattern.permute.xlu0 %v3447_v29 }
  0x3e   : > { %805 = vperm.xlu0 %3351, %v3580_v10  }
  0x3f   : > { %813 = vperm.xlu1 %3331, %v3562_v3  }
  0x42   : > { %817 = vperm.xlu0 %3351, %v3595_v20  }
  0x43   : > { %3332 = vset.pattern.permute.xlu1 %v3441_v14 }
  0x44   : > { %845 = vperm.xlu1 %3332, %v3580_v10  }
  0x46   : > { %1217 = vperm.xlu0 %3351, %v1113_v30  }
  0x48   : > { %3334 = vset.pattern.permute.xlu1 %v3443_v21 }
  0x49   : > { %885 = vperm.xlu1 %3334, %v3580_v10  }
  0x4a   : > { %1221 = vperm.xlu0 %3351, %v3627_v28  }
  0x4d   : > { %889 = vperm.xlu1 %3334, %v3549_v0  }
  0x4e   : > { %3355 = vset.pattern.permute.xlu0 %v4947_v15 }
  0x4f   : > { %705 = vperm.xlu0 %3355, %v3549_v0  }
  0x51   : > { %3335 = vset.pattern.permute.xlu1 %v3441_v14 }
  0x52   : > { %857 = vperm.xlu1 %3335, %v3595_v20  }
  0x53   : > { %1145 = vperm.xlu0 %3355, %v1113_v30  }
  0x56   : > { %3336 = vset.pattern.permute.xlu1 %v3444_v23 }
  0x57   : > { %929 = vperm.xlu1 %3336, %v3549_v0   ;;  %1153 = vperm.xlu0 %3355, %v1115_v31  }
  0x5b   : > { %3337 = vset.pattern.permute.xlu1 %v3443_v21  ;;  %1772 = vperm.xlu0 %3355, %v1740_v32  }
  0x5c   : > { %893 = vperm.xlu1 %3337, %v3562_v3  }
  0x5f   : > { %1780 = vperm.xlu0 %3355, %v3659_v33  }
  0x60   : > { %3340 = vset.pattern.permute.xlu1 %v3446_v27 }
  0x61   : > { %965 = vperm.xlu1 %3340, %v3580_v10  }
  0x65   : > { %969 = vperm.xlu1 %3340, %v3549_v0  }
  0x69   : > { %3341 = vset.pattern.permute.xlu1 %v3444_v23 }
  0x6a   : > { %937 = vperm.xlu1 %3341, %v3595_v20  }
  0x6e   : > { %3342 = vset.pattern.permute.xlu1 %v3446_v27 }
  0x6f   : > { %973 = vperm.xlu1 %3342, %v3562_v3  }
  0x73   : > { %3345 = vset.pattern.permute.xlu1 %v4949_v1 }
  0x74   : > { %1123 = vperm.xlu1 %3345, %v1113_v30  }
  0x78   : > { %3346 = vset.pattern.permute.xlu1 %v4947_v15 }
  0x79   : > { %1141 = vperm.xlu1 %3346, %v3670_v34  }
  0x7d   : > { %3347 = vset.pattern.permute.xlu1 %v4951_v24 }
  0x7e   : > { %1165 = vperm.xlu1 %3347, %v3670_v34  }
  0x82   : > { %1169 = vperm.xlu1 %3347, %v1113_v30  }
  0x86   : > { %3348 = vset.pattern.permute.xlu1 %v4949_v1 }
  0x87   : > { %1133 = vperm.xlu1 %3348, %v1115_v31  }
  0x8b   : > { %3349 = vset.pattern.permute.xlu1 %v4947_v15 }
  0x8c   : > { %1149 = vperm.xlu1 %3349, %v3627_v28  }
  0x8e   : > { %v3679_v35 = vpop.permute.xlu1 %667 }
  0x8f   : > { %v3777_v3 = vpop.permute.xlu0 %785 }
  0x90   : > { %3350 = vset.pattern.permute.xlu1 %v3440_v4 }
  0x91   : > { %1189 = vperm.xlu1 %3350, %v3670_v34  }
  0x92   : > { %v3683_v36 = vpop.permute.xlu1 %672 }
  0x94   : > { %v3791_v6 = vpop.permute.xlu0 %849 }
  0x95   : > { %1193 = vperm.xlu1 %3350, %v1113_v30  }
  0x97   : > { %v3685_v37 = vpop.permute.xlu1 %701 }
  0x98   : > { %v3799_v8 = vpop.permute.xlu0 %853 }
  0x99   : > { %3352 = vset.pattern.permute.xlu1 %v4951_v24  ;;  %4969 = vst [vmem:[#allocation11_spill] sm:$0xff] %v3799_v8 }
  0x9a   : > { %1177 = vperm.xlu1 %3352, %v1115_v31  }
  0x9b   : > { %v3688_v38 = vpop.permute.xlu1 %709 }
  0x9d   : > { %v3811_v11 = vpop.permute.xlu0 %897 }
  0x9e   : > { %3353 = vset.pattern.permute.xlu1 %v3447_v29  ;;  %4971 = vst [vmem:[#allocation13_spill] sm:$0xff] %v3811_v11 }
  0x9f   : > { %1213 = vperm.xlu1 %3353, %v3670_v34   ;;  %v3692_v39 = vpop.permute.xlu1 %713 }
  0xa2   : > { %v3819_v13 = vpop.permute.xlu0 %925 }
  0xa3   : > { %3354 = vset.pattern.permute.xlu1 %v3440_v4 }
  0xa4   : > { %1197 = vperm.xlu1 %3354, %v3627_v28   ;;  %v3696_v40 = vpop.permute.xlu1 %745 }
  0xa6   : > { %v3831_v16 = vpop.permute.xlu0 %933 }
  0xa7   : > { %4972 = vst [vmem:[#allocation14_spill] sm:$0xff] %v3831_v16  ;;  %v3946_v16 = vld [vmem:[%s4941_s10 + $0x8] sm:$0xff] }
  0xa8   : > { %1201 = vperm.xlu1 %3354, %v1115_v31   ;;  %v3698_v41 = vpop.permute.xlu1 %749 }
  0xab   : > { %v3839_v18 = vpop.permute.xlu0 %977 }
  0xac   : > { %3356 = vset.pattern.permute.xlu1 %v3447_v29  ;;  %4973 = vst [vmem:[#allocation15_spill] sm:$0xff] %v3839_v18 }
  0xad   : > { %1225 = vperm.xlu1 %3356, %v1115_v31   ;;  %v3701_v42 = vpop.permute.xlu1 %781 }
  0xb0   : > { %v3851_v21 = vpop.permute.xlu0 %741 }
  0xb1   : > { %3357 = vset.pattern.permute.xlu1 %v4949_v1  ;;  %v3704_v43 = vpop.permute.xlu1 %789 }
  0xb2   : > { %4960 = vst [vmem:[#allocation2_spill] sm:$0xff] %v3704_v43  ;;  %1750 = vperm.xlu1 %3357, %v1740_v32  }
  0xb4   : > { %v3859_v23 = vpop.permute.xlu0 %753 }
  0xb5   : > { %v3711_v45 = vpop.permute.xlu1 %793  ;;  %4976 = vst [vmem:[#allocation18_spill] sm:$0xff] %v3859_v23 }
  0xb6   : > { %4961 = vst [vmem:[#allocation3_spill] sm:$0xff] %v3711_v45  ;;  %3358 = vset.pattern.permute.xlu1 %v4947_v15 }
  0xb7   : > { %1768 = vperm.xlu1 %3358, %v3709_v44  }
  0xb8   : > { %v3871_v27 = vpop.permute.xlu0 %1173 }
  0xba   : > { %v3715_v46 = vpop.permute.xlu1 %809 }
  0xbb   : > { %3359 = vset.pattern.permute.xlu1 %v4951_v24 }
  0xbc   : > { %1792 = vperm.xlu1 %3359, %v3709_v44  }
  0xbd   : > { %v3879_v30 = vpop.permute.xlu0 %805 }
  0xbe   : > { %v3719_v47 = vpop.permute.xlu1 %813 }
  0xc0   : > { %1796 = vperm.xlu1 %3359, %v1740_v32   ;;  %v988_v32 = vld [vmem:[%s4935_s4] sm:$0xff] }
  0xc3   : > { %v3721_v48 = vpop.permute.xlu1 %845 }
  0xc4   : > { %3360 = vset.pattern.permute.xlu1 %v4949_v1 }
  0xc5   : > { %1760 = vperm.xlu1 %3360, %v3659_v33  }
  0xc8   : > { %v3730_v50 = vpop.permute.xlu1 %885 }
  0xc9   : > { %4962 = vst [vmem:[#allocation4_spill] sm:$0xff] %v3730_v50  ;;  %3361 = vset.pattern.permute.xlu1 %v4947_v15 }
  0xca   : > { %1776 = vperm.xlu1 %3361, %v3728_v49  }
  0xcc   : > { %v3734_v51 = vpop.permute.xlu1 %889 }
  0xce   : > { %3362 = vset.pattern.permute.xlu1 %v4951_v24 }
  0xcf   : > { %1800 = vperm.xlu1 %3362, %v3728_v49  }
  0xd1   : > { %v3738_v52 = vpop.permute.xlu1 %857 }
  0xd2   : > { %4963 = vst [vmem:[#allocation5_spill] sm:$0xff] %v3738_v52 }
  0xd3   : > { %1804 = vperm.xlu1 %3362, %v3659_v33   ;;  %v3890_v33 = vpop.permute.xlu0 %817 }
  0xd6   : > { %v3746_v54 = vpop.permute.xlu1 %929 }
  0xd7   : > { %3363 = vset.pattern.permute.xlu1 %v4949_v1 }
  0xd8   : > { %1015 = vperm.xlu1 %3363, %v3744_v53  }
  0xdb   : > { %v3750_v55 = vpop.permute.xlu1 %893 }
  0xdc   : > { %4964 = vst [vmem:[#allocation6_spill] sm:$0xff] %v3750_v55  ;;  %3364 = vset.pattern.permute.xlu1 %v4947_v15 }
  0xe0   : > { %v3753_v56 = vpop.permute.xlu1 %965 }
  0xe1   : > { %4965 = vst [vmem:[#allocation7_spill] sm:$0xff] %v3753_v56 }
  0xe4   : > { %v3755_v57 = vpop.permute.xlu1 %969 }
  0xe9   : > { %v3757_v58 = vpop.permute.xlu1 %937 }
  0xea   : > { %4966 = vst [vmem:[#allocation8_spill] sm:$0xff] %v3757_v58 }
  0xee   : > { %v3759_v59 = vpop.permute.xlu1 %973 }
  0xef   : > { %4967 = vst [vmem:[#allocation9_spill] sm:$0xff] %v3759_v59 }
  0xf3   : > { %v3761_v60 = vpop.permute.xlu1 %1123 }
  0xf8   : > { %v3763_v61 = vpop.permute.xlu1 %1141  ;;  %v3765_v62 = vpop.f32.mrb[0].mxu0 }
  0xf9   : > { %726 = vrot.lane.b32.xlu1 %v3765_v62, %s3448_s21  ;;  %646 = vrot.lane.b32.xlu0 %v3765_v62, %s3449_s22  ;;  %v3771_v63 = vpop.f32.mrb[1].mxu0 }
  0xfc   : > { %v3775_v2 = vpop.f32.mrb[2].mxu0 }
  0xfd   : > { %v3773_v0 = vpop.permute.xlu1 %1165  ;;  %870 = vrot.lane.b32.xlu1 %v3765_v62, %s3450_s23  ;;  %686 = vrot.lane.b32.xlu0 %v3765_v62, %s3451_s24  ;;  %v3783_v4 = vpop.f32.mrb[3].mxu0 }
 0x101   : > { %v3785_v5 = vpop.permute.xlu1 %1169  ;;  %950 = vrot.lane.b32.xlu1 %v3765_v62, %s3452_s25  ;;  %766 = vrot.lane.b32.xlu0 %v3765_v62, %s3453_s26 }
 0x105   : > { %830 = vrot.lane.b32.xlu0 %v3765_v62, %s3454_s27  ;;  %684 = vrot.lane.b32.xlu1 %v3771_v63, %s3451_s24 }
 0x106   : > { %v3797_v7 = vpop.permute.xlu1 %1133 }
 0x107   : > { %4968 = vst [vmem:[#allocation10_spill] sm:$0xff] %v3797_v7 }
 0x109   : > { %910 = vrot.lane.b32.xlu0 %v3765_v62, %s3455_s28  ;;  %764 = vrot.lane.b32.xlu1 %v3771_v63, %s3453_s26 }
 0x10b   : > { %v3805_v9 = vpop.permute.xlu1 %1149 }
 0x10c   : > { %4970 = vst [vmem:[#allocation12_spill] sm:$0xff] %v3805_v9 }
 0x10d   : > { %828 = vrot.lane.b32.xlu1 %v3771_v63, %s3454_s27  ;;  %644 = vrot.lane.b32.xlu0 %v3771_v63, %s3449_s22 }
 0x110   : > { %v3813_v12 = vpop.permute.xlu1 %1189 }
 0x111   : > { %908 = vrot.lane.b32.xlu1 %v3771_v63, %s3455_s28  ;;  %724 = vrot.lane.b32.xlu0 %v3771_v63, %s3448_s21 }
 0x114   : > { %v3825_v14 = vpop.permute.xlu1 %1193 }
 0x115   : > { %868 = vrot.lane.b32.xlu0 %v3771_v63, %s3450_s23  ;;  %650 = vrot.lane.b32.xlu1 %v3775_v2, %s3449_s22 }
 0x119   : > { %948 = vrot.lane.b32.xlu0 %v3771_v63, %s3452_s25  ;;  %730 = vrot.lane.b32.xlu1 %v3775_v2, %s3448_s21  ;;  %v3833_v17 = vpop.permute.xlu1 %1177 }
 0x11d   : > { %690 = vrot.lane.b32.xlu0 %v3775_v2, %s3451_s24  ;;  %874 = vrot.lane.b32.xlu1 %v3775_v2, %s3450_s23 }
 0x11e   : > { %v3841_v19 = vpop.permute.xlu1 %1213 }
 0x11f   : > { %4974 = vst [vmem:[#allocation16_spill] sm:$0xff] %v3841_v19 }
 0x121   : > { %770 = vrot.lane.b32.xlu0 %v3775_v2, %s3453_s26  ;;  %914 = vrot.lane.b32.xlu1 %v3775_v2, %s3455_s28 }
 0x123   : > { %v3853_v22 = vpop.permute.xlu1 %1197 }
 0x124   : > { %4975 = vst [vmem:[#allocation17_spill] sm:$0xff] %v3853_v22 }
 0x125   : > { %834 = vrot.lane.b32.xlu0 %v3775_v2, %s3454_s27  ;;  %954 = vrot.lane.b32.xlu1 %v3775_v2, %s3452_s25 }
 0x127   : > { %v3861_v25 = vpop.permute.xlu1 %1201 }
 0x128   : > { %4977 = vst [vmem:[#allocation19_spill] sm:$0xff] %v3861_v25 }
 0x129   : > { %728 = vrot.lane.b32.xlu0 %v3783_v4, %s3448_s21  ;;  %648 = vrot.lane.b32.xlu1 %v3783_v4, %s3449_s22  ;;  %s3456_s22 = smov 5  }
 0x12c   : > { %v3873_v29 = vpop.permute.xlu1 %1225 }
 0x12d   : > { %1037 = vperm.xlu0 %3355, %v3744_v53   ;;  %688 = vrot.lane.b32.xlu1 %v3783_v4, %s3451_s24  ;;  %4978 = vst [vmem:[#allocation20_spill] sm:$0xff] %v3873_v29  ;;  %v4985_v29 = vmov 2  }
 0x131   : > { %1045 = vperm.xlu0 %3355, %v991_v26   ;;  %768 = vrot.lane.b32.xlu1 %v3783_v4, %s3453_s26  ;;  %v3881_v31 = vpop.permute.xlu1 %1750 }
 0x135   : > { %3368 = vset.pattern.permute.xlu0 %v4949_v1  ;;  %832 = vrot.lane.b32.xlu1 %v3783_v4, %s3454_s27  ;;  %v3898_v1 = vpop.permute.xlu0 %1217 }
 0x136   : > { %662 = vperm.xlu0 %3368, %v3580_v10   ;;  %v3892_v15 = vpop.permute.xlu1 %1768 }
 0x137   : > { %4979 = vst [vmem:[#allocation21_spill] sm:$0xff] %v3892_v15  ;;  %v4984_v15 = vmov 1  }
 0x139   : > { %872 = vrot.lane.b32.xlu1 %v3783_v4, %s3450_s23 }
 0x13a   : > { %677 = vperm.xlu0 %3368, %v3595_v20  }
 0x13b   : > { %v3896_v10 = vpop.permute.xlu1 %1792 }
 0x13c   : > { %4980 = vst [vmem:[#allocation22_spill] sm:$0xff] %v3896_v10 }
 0x13d   : > { %1033 = vperm.xlu1 %3364, %v988_v32  }
 0x13e   : > { %1118 = vperm.xlu0 %3368, %v3670_v34   ;;  %v4981_v34 = vmov 0  }
 0x13f   : > { %v3903_v20 = vpop.permute.xlu1 %1796 }
 0x141   : > { %3365 = vset.pattern.permute.xlu1 %v4951_v24  ;;  %v3908_v24 = vpop.permute.xlu0 %1221 }
 0x142   : > { %1128 = vperm.xlu0 %3368, %v3627_v28   ;;  %1073 = vperm.xlu1 %3365, %v988_v32   ;;  %4982 = vst [vmem:[#allocation23_spill] sm:$0xff] %v3908_v24  ;;  %v990_v28 = vld [vmem:[%s4935_s4 + $0x10] sm:$0xff] }
 0x144   : > { %v3914_v10 = vpop.permute.xlu1 %1760 }
 0x145   : > { %4983 = vst [vmem:[#allocation24_spill] sm:$0xff] %v3914_v10 }
 0x146   : > { %912 = vrot.lane.b32.xlu0 %v3783_v4, %s3455_s28  ;;  %1077 = vperm.xlu1 %3365, %v3744_v53   ;;  %v706_v53 = vpop.permute.xlu0 %705 }
 0x149   : > { %v3919_v59 = vpop.permute.xlu1 %1776 }
 0x14a   : > { %952 = vrot.lane.b32.xlu0 %v3783_v4, %s3452_s25  ;;  %3366 = vset.pattern.permute.xlu1 %v4981_v34  ;;  %4986 = vst [vmem:[#allocation25_spill] sm:$0xff] %v3919_v59  ;;  %v3921_v18 = vpop.permute.xlu0 %1145 }
 0x14b   : > { %1025 = vperm.xlu1 %3366, %v991_v26  }
 0x14e   : > { %1745 = vperm.xlu0 %3368, %v3709_v44   ;;  %v1236_v44 = vld [vmem:[%s4938_s7] sm:$0xff]  ;;  %v3927_v10 = vpop.permute.xlu1 %1800  ;;  %v3932_v24 = vpop.permute.xlu0 %1153 }
 0x14f   : > { %3367 = vset.pattern.permute.xlu1 %v4984_v15  ;;  %4987 = vst [vmem:[#allocation26_spill] sm:$0xff] %v3927_v10  ;;  %4988 = vst [vmem:[#allocation27_spill] sm:$0xff] %v3932_v24  ;;  %v642_v10 = vlaneseq }
 0x150   : > { %1041 = vperm.xlu1 %3367, %v990_v28  }
 0x151   : > { %v3948_v58 = vand.u32 127, %v642_v10 }
 0x152   : > { %1755 = vperm.xlu0 %3368, %v3728_v49   ;;  %v1237_v49 = vld [vmem:[%s4938_s7 + $0x8] sm:$0xff]  ;;  %v1773_v59 = vpop.permute.xlu0 %1772 }
 0x153   : > { %4990 = vst [vmem:[#allocation29_spill] sm:$0xff] %v3948_v58  ;;  %v3962_v25 = vadd.s32 4294967292, %v3948_v58  ;;  %v3965_v10 = vadd.s32 4294967294, %v3948_v58 }
 0x154   : > { %3369 = vset.pattern.permute.xlu1 %v4985_v29 }
 0x155   : > { %1085 = vperm.xlu1 %3369, %v991_v26   ;;  %v3938_v26 = vld [vmem:[%s4938_s7 + $0x18] sm:$0xff]  ;;  %4993 = vst [vmem:[#allocation32_spill] sm:$0xff] %v3965_v10  ;;  %vm653_vm1 = vcmp.ge.s32.totalorder %v3962_v25, 0  ;;  %vm733_vm2 = vcmp.ge.s32.totalorder %v3965_v10, 0 }
 0x156   : > { %1010 = vperm.xlu0 %3368, %v988_v32   ;;  %v3940_v32 = vpop.permute.xlu1 %1804  ;;  %v3953_v22 = vpop.permute.xlu0 %1780 }
 0x157   : > { %4989 = vst [vmem:[#allocation28_spill] sm:$0xff] %v3940_v32  ;;  %4992 = vst [vmem:[#allocation31_spill] sm:$0xff] %v3953_v22  ;;  %v3959_v32 = vld [vmem:[%s4941_s10 + $0x18] sm:$0xff]  ;;  %v1238_v22 = vld [vmem:[%s4938_s7 + $0x10] sm:$0xff] }
 0x159   : > { %3370 = vset.pattern.permute.xlu1 %v4981_v34 }
 0x15a   : > { %1020 = vperm.xlu0 %3368, %v990_v28   ;;  %1254 = vperm.xlu1 %3370, %v1236_v44   ;;  %v3950_v55 = vpop.permute.xlu1 %1015 }
 0x15b   : > { %4991 = vst [vmem:[#allocation30_spill] sm:$0xff] %v3950_v55  ;;  %v3968_v55 = vadd.s32 4294967293, %v3948_v58 }
 0x15d   : > { %vm693_vm3 = vcmp.ge.s32.totalorder %v3968_v55, 0 }
 0x15e   : > { %1259 = vperm.xlu0 %3368, %v1237_v49   ;;  %3371 = vset.pattern.permute.xlu1 %v4984_v15 }
 0x15f   : > { %1277 = vperm.xlu1 %3371, %v1236_v44  }
 0x162   : > { %1269 = vperm.xlu0 %3368, %v3938_v26  }
 0x163   : > { %1281 = vperm.xlu1 %3371, %v1237_v49  }
 0x166   : > { %1838 = vperm.xlu0 %3368, %v3946_v16  }
 0x167   : > { %3372 = vset.pattern.permute.xlu1 %v4985_v29 }
 0x168   : > { %1317 = vperm.xlu1 %3372, %v1237_v49   ;;  %v3979_v49 = vadd.s32 4294967295, %v3948_v58 }
 0x16a   : > { %1848 = vperm.xlu0 %3368, %v3959_v32   ;;  %4994 = vst [vmem:[#allocation33_spill] sm:$0xff] %v3979_v49  ;;  %vm773_vm4 = vcmp.ge.s32.totalorder %v3979_v49, 0 }
 0x16b   : > { %v727_v8 = vpop.permute.xlu1 %726  ;;  %v647_v9 = vpop.permute.xlu0 %646 }
 0x16c   : > { %3373 = vset.pattern.permute.xlu1 %v4981_v34  ;;  %v657_v52 = vsel %vm653_vm1, %v647_v9, 0.0  ;;  %v737_v56 = vsel %vm733_vm2, %v727_v8, 0.0  ;;  %v3994_v9 = vadd.s32 1, %v3948_v58 }
 0x16d   : > { %1264 = vperm.xlu1 %3373, %v1238_v22   ;;  %v681_v45 = vmul.f32 %v3679_v35, %v657_v52  ;;  %v757_v50 = vmul.f32 %v3696_v40, %v737_v56 }
 0x16e   : > { %3380 = vset.pattern.permute.xlu0 %v4985_v29  ;;  %vm838_vm5 = vcmp.lt.s32.totalorder %v3994_v9, 128  ;;  %v2448_v9 = vld [vmem:[%s4944_s13 + $0x18] sm:$0xff] }
 0x16f   : > { %v3984_v11 = vpop.permute.xlu1 %870  ;;  %v687_v7 = vpop.permute.xlu0 %686  ;;  %1081 = vperm.xlu0 %3380, %v990_v28  }
 0x170   : > { %v697_v24 = vsel %vm693_vm3, %v687_v7, 0.0 }
 0x171   : > { %v717_v19 = vmul.f32 %v706_v53, %v697_v24  ;;  %3374 = vset.pattern.permute.xlu1 %v4984_v15  ;;  %v1784_v53 = vmul.f32 %v3765_v62, %v1773_v59  ;;  %v1815_v59 = vld [vmem:[%s4941_s10] sm:$0xff] }
 0x172   : > { %1285 = vperm.xlu1 %3374, %v1238_v22  }
 0x173   : > { %v721_v28 = vadd.f32 %v717_v19, %v681_v45  ;;  %v3997_v23 = vpop.permute.xlu1 %950  ;;  %v767_v8 = vpop.permute.xlu0 %766  ;;  %1313 = vperm.xlu0 %3380, %v1236_v44   ;;  %v821_v19 = vmul.f32 %v3765_v62, %v3715_v46 }
 0x174   : > { %v777_v7 = vsel %vm773_vm4, %v767_v8, 0.0 }
 0x175   : > { %v761_v35 = vadd.f32 %v757_v50, %v721_v28  ;;  %v797_v24 = vmul.f32 %v3777_v3, %v777_v7  ;;  %v1764_v52 = vmul.f32 %v3881_v31, %v777_v7 }
 0x176   : > { %1289 = vperm.xlu1 %3374, %v3938_v26  }
 0x177   : > { %v801_v40 = vadd.f32 %v797_v24, %v761_v35  ;;  %v831_v45 = vpop.permute.xlu0 %830  ;;  %v4008_v44 = vpop.permute.xlu1 %684  ;;  %1321 = vperm.xlu0 %3380, %v1238_v22   ;;  %v1788_v8 = vadd.f32 %v1784_v53, %v1764_v52 }
 0x178   : > { %v841_v50 = vsel %vm838_vm5, %v831_v45, 0.0  ;;  %v1157_v45 = vmul.f32 %v3921_v18, %v777_v7 }
 0x179   : > { %v825_v3 = vadd.f32 %v821_v19, %v801_v40  ;;  %v1808_v28 = vmul.f32 %v3903_v20, %v841_v50 }
 0x17a   : > { %3375 = vset.pattern.permute.xlu1 %v4985_v29 }
 0x17b   : > { %v911_v31 = vpop.permute.xlu0 %910  ;;  %v4017_v35 = vpop.permute.xlu1 %764  ;;  %1325 = vperm.xlu1 %3375, %v3938_v26   ;;  %1892 = vperm.xlu0 %3380, %v1815_v59   ;;  %v4020_v46 = vadd.f32 %v1808_v28, %v1788_v8  ;;  %v1137_v8 = vmul.f32 %v3761_v60, %v737_v56  ;;  %v1205_v60 = vmul.f32 %v3825_v14, %v841_v50 }
 0x17d   : > { %4995 = vst [vmem:[#allocation34_spill] sm:$0xff] %v4020_v46  ;;  %v4053_v46 = vadd.s32 2, %v3948_v58  ;;  %v1161_v43 = vadd.f32 %v1157_v45, %v1137_v8  ;;  %v4069_v45 = vadd.s32 3, %v3948_v58  ;;  %v861_v8 = vmul.f32 %v3791_v6, %v841_v50 }
 0x17f   : > { %v4022_v22 = vpop.permute.xlu1 %828  ;;  %v4024_v24 = vpop.permute.xlu0 %644  ;;  %3376 = vset.pattern.permute.xlu1 %v4981_v34  ;;  %vm878_vm6 = vcmp.lt.s32.totalorder %v4053_v46, 128  ;;  %vm918_vm7 = vcmp.lt.s32.totalorder %v4069_v45, 128  ;;  %v1102_v45 = vld [vmem:[%s4936_s5 + $0x30] sm:$0xff] }
 0x180   : > { %1833 = vperm.xlu1 %3376, %v1815_v59  }
 0x183   : > { %v4027_v20 = vpop.permute.xlu1 %908  ;;  %v4029_v52 = vpop.permute.xlu0 %724 }
 0x184   : > { %3377 = vset.pattern.permute.xlu1 %v4984_v15 }
 0x185   : > { %1856 = vperm.xlu1 %3377, %v1815_v59   ;;  %v4050_v59 = vld [vmem:[%s4941_s10 + $0x10] sm:$0xff] }
 0x187   : > { %v4032_v53 = vpop.permute.xlu1 %650  ;;  %v4035_v26 = vpop.permute.xlu0 %868 }
 0x189   : > { %1860 = vperm.xlu1 %3377, %v3946_v16  }
 0x18b   : > { %v4037_v40 = vpop.permute.xlu1 %730  ;;  %v4045_v28 = vpop.permute.xlu0 %948 }
 0x18d   : > { %3378 = vset.pattern.permute.xlu1 %v4985_v29 }
 0x18e   : > { %1896 = vperm.xlu1 %3378, %v3946_v16   ;;  %v1181_v16 = vmul.f32 %v3765_v62, %v3785_v5 }
 0x18f   : > { %v4042_v19 = vpop.permute.xlu1 %874  ;;  %v691_v7 = vpop.permute.xlu0 %690 }
 0x190   : > { %v1185_v56 = vadd.f32 %v1181_v16, %v1161_v43  ;;  %v865_v16 = vadd.f32 %v861_v8, %v825_v3 }
 0x192   : > { %3379 = vset.pattern.permute.xlu1 %v4981_v34  ;;  %v881_v34 = vsel %vm878_vm6, %v3984_v11, 0.0  ;;  %v1209_v62 = vadd.f32 %v1205_v60, %v1185_v56  ;;  %v4082_v11 = vadd.s32 4, %v3948_v58  ;;  %v921_v56 = vsel %vm918_vm7, %v911_v31, 0.0 }
 0x193   : > { %1843 = vperm.xlu1 %3379, %v4050_v59   ;;  %v4059_v18 = vpop.permute.xlu1 %914  ;;  %v1229_v43 = vmul.f32 %v3898_v1, %v881_v34  ;;  %v4075_v14 = vpop.permute.xlu0 %770  ;;  %v901_v1 = vmul.f32 %v3734_v51, %v881_v34 }
 0x194   : > { %vm958_vm8 = vcmp.lt.s32.totalorder %v4082_v11, 128 }
 0x195   : > { %v905_v50 = vadd.f32 %v901_v1, %v865_v16  ;;  %v961_v3 = vsel %vm958_vm8, %v3997_v23, 0.0  ;;  %v696_v23 = vsel %vm693_vm3, %v4008_v44, 0.0  ;;  %v4128_v44 = vmul.f32 %v3775_v2, %v3890_v33 }
 0x196   : > { %v981_v51 = vmul.f32 %v3755_v57, %v961_v3  ;;  %v716_v33 = vmul.f32 %v3685_v37, %v696_v23  ;;  %v960_v25 = vsel %vm958_vm8, %v4045_v28, 0.0  ;;  %v5000_v28 = vld [vmem:[#allocation3_spill] sm:$0xff] }
 0x197   : > { %3381 = vset.pattern.permute.xlu1 %v4984_v15  ;;  %v4071_v5 = vpop.permute.xlu1 %954  ;;  %v4079_v15 = vadd.f32 %v1229_v43, %v1209_v62  ;;  %v4090_v6 = vpop.permute.xlu0 %834  ;;  %v941_v62 = vmul.f32 %v3746_v54, %v921_v56 }
 0x198   : > { %1864 = vperm.xlu1 %3381, %v4050_v59  }
 0x199   : > { %v945_v8 = vadd.f32 %v941_v62, %v905_v50  ;;  %v820_v50 = vmul.f32 %v3879_v30, %v3771_v63  ;;  %v4123_v62 = vsel %vm773_vm4, %v4017_v35, 0.0  ;;  %v4141_v30 = vmul.f32 %v3719_v47, %v3783_v4 }
 0x19a   : > { %v736_v35 = vsel %vm733_vm2, %v4029_v52, 0.0  ;;  %v796_v47 = vmul.f32 %v3701_v42, %v4123_v62  ;;  %v920_v42 = vsel %vm918_vm7, %v4027_v20, 0.0  ;;  %v739_v20 = vsel %vm733_vm2, %v4037_v40, 0.0  ;;  %v4996_v40 = vld [vmem:[#allocation2_spill] sm:$0xff] }
 0x19b   : > { %v649_v60 = vpop.permute.xlu1 %648  ;;  %v729_v43 = vpop.permute.xlu0 %728 }
 0x19c   : > { %1868 = vperm.xlu1 %3381, %v3959_v32   ;;  %v658_v1 = vsel %vm653_vm1, %v649_v60, 0.0  ;;  %v4132_v60 = vmul.f32 %v3775_v2, %v3833_v17  ;;  %v656_v17 = vsel %vm653_vm1, %v4024_v24, 0.0  ;;  %v738_v37 = vsel %vm733_vm2, %v729_v43, 0.0 }
 0x19f   : > { %v689_v31 = vpop.permute.xlu1 %688 }
 0x1a0   : > { %1242 = vrot.lane.b32.xlu1 %v4079_v15, %s3451_s24  ;;  %v698_v54 = vsel %vm693_vm3, %v689_v31, 0.0 }
 0x1a1   : > { %3382 = vset.pattern.permute.xlu1 %v4985_v29  ;;  %v4100_v29 = vadd.f32 %v981_v51, %v945_v8  ;;  %v718_v3 = vmul.f32 %v3688_v38, %v698_v54  ;;  %v4145_v38 = vmul.f32 %v3871_v27, %v3783_v4  ;;  %v1156_v27 = vmul.f32 %v3763_v61, %v4123_v62 }
 0x1a2   : > { %v756_v61 = vmul.f32 %v3851_v21, %v736_v35  ;;  %v758_v21 = vmul.f32 %v3698_v41, %v738_v37 }
 0x1a3   : > { %v769_v34 = vpop.permute.xlu1 %768 }
 0x1a4   : > { %1302 = vrot.lane.b32.xlu1 %v4079_v15, %s3455_s28  ;;  %v4173_v43 = vsel %vm773_vm4, %v769_v34, 0.0 }
 0x1a5   : > { %v798_v41 = vmul.f32 %v4996_v40, %v4173_v43  ;;  %v5003_v40 = vld [vmem:[#allocation10_spill] sm:$0xff] }
 0x1a7   : > { %v833_v57 = vpop.permute.xlu1 %832 }
 0x1ab   : > { %v873_v54 = vpop.permute.xlu1 %872 }
 0x1ac   : > { %v1038_v58 = vpop.permute.xlu0 %1037 }
 0x1ad   : > { %v4103_v16 = vmul.f32 %v1038_v58, %v4100_v29  ;;  %v4118_v58 = vmul.f32 %v3773_v0, %v3771_v63  ;;  %v4137_v0 = vsel %vm838_vm5, %v4022_v22, 0.0  ;;  %v682_v22 = vmul.f32 %v3683_v36, %v658_v1 }
 0x1ae   : > { %v860_v24 = vmul.f32 %v3721_v48, %v4137_v0  ;;  %v1204_v51 = vmul.f32 %v3813_v12, %v4137_v0  ;;  %v699_v36 = vsel %vm693_vm3, %v691_v7, 0.0  ;;  %v880_v48 = vsel %vm878_vm6, %v4035_v26, 0.0 }
 0x1af   : > { %v722_v52 = vadd.f32 %v718_v3, %v682_v22  ;;  %v659_v12 = vsel %vm653_vm1, %v4032_v53, 0.0  ;;  %v719_v34 = vmul.f32 %v3692_v39, %v699_v36  ;;  %v4189_v1 = vsel %vm773_vm4, %v4075_v14, 0.0  ;;  %v4998_v36 = vld [vmem:[#allocation4_spill] sm:$0xff] }
 0x1b0   : > { %v4107_v56 = vpop.permute.xlu0 %1045  ;;  %v4201_v39 = vsel %vm878_vm6, %v4042_v19, 0.0 }
 0x1b1   : > { %v762_v53 = vadd.f32 %v758_v21, %v722_v52  ;;  %v799_v52 = vmul.f32 %v5000_v28, %v4189_v1  ;;  %v4220_v28 = vsel %vm838_vm5, %v833_v57, 0.0 }
 0x1b5   : > { %v663_v31 = vpop.permute.xlu0 %662 }
 0x1b6   : > { %v680_v8 = vmul.f32 %v663_v31, %v656_v17  ;;  %v4997_v17 = vld [vmem:[#allocation18_spill] sm:$0xff] }
 0x1b7   : > { %v759_v22 = vmul.f32 %v4997_v17, %v739_v20  ;;  %v1139_v17 = vmul.f32 %v5003_v40, %v739_v20  ;;  %v882_v20 = vsel %vm878_vm6, %v873_v54, 0.0  ;;  %v5007_v54 = vld [vmem:[#allocation11_spill] sm:$0xff] }
 0x1b8   : > { %v720_v23 = vadd.f32 %v716_v33, %v680_v8  ;;  %v940_v33 = vmul.f32 %v3819_v13, %v920_v42  ;;  %v900_v13 = vmul.f32 %v4998_v36, %v880_v48  ;;  %v4999_v42 = vld [vmem:[#allocation16_spill] sm:$0xff] }
 0x1b9   : > { %v678_v7 = vpop.permute.xlu0 %677 }
 0x1ba   : > { %v760_v3 = vadd.f32 %v756_v61, %v720_v23  ;;  %v683_v26 = vmul.f32 %v678_v7, %v659_v12  ;;  %v1228_v61 = vmul.f32 %v4999_v42, %v880_v48  ;;  %v5001_v23 = vld [vmem:[#allocation27_spill] sm:$0xff]  ;;  %v4212_v7 = vsel %vm838_vm5, %v4090_v6, 0.0  ;;  %v5004_v48 = vld [vmem:[#allocation13_spill] sm:$0xff] }
 0x1bb   : > { %v1159_v12 = vmul.f32 %v5001_v23, %v4189_v1  ;;  %v903_v36 = vmul.f32 %v5004_v48, %v4201_v39  ;;  %v802_v42 = vadd.f32 %v798_v41, %v762_v53 }
 0x1bc   : > { %v800_v14 = vadd.f32 %v796_v47, %v760_v3  ;;  %v723_v31 = vadd.f32 %v719_v34, %v683_v26  ;;  %v1034_v8 = vpop.permute.xlu1 %1033  ;;  %v5002_v3 = vld [vmem:[#allocation7_spill] sm:$0xff] }
 0x1bd   : > { %v1119_v21 = vpop.permute.xlu0 %1118  ;;  %v980_v26 = vmul.f32 %v5002_v3, %v960_v25  ;;  %v1163_v6 = vadd.f32 %v1159_v12, %v1139_v17  ;;  %v826_v12 = vadd.f32 %v4141_v30, %v802_v42 }
 0x1be   : > { %v824_v19 = vadd.f32 %v820_v50, %v800_v14  ;;  %v763_v47 = vadd.f32 %v759_v22, %v723_v31  ;;  %v1136_v34 = vmul.f32 %v1119_v21, %v736_v35  ;;  %v5005_v50 = vld [vmem:[#allocation5_spill] sm:$0xff]  ;;  %v5006_v35 = vld [vmem:[#allocation12_spill] sm:$0xff]  ;;  %v862_v21 = vmul.f32 %v5007_v54, %v4220_v28 }
 0x1bf   : > { %v863_v22 = vmul.f32 %v5005_v50, %v4212_v7  ;;  %v1158_v25 = vmul.f32 %v5006_v35, %v4173_v43 }
 0x1c0   : > { %v864_v23 = vadd.f32 %v860_v24, %v824_v19  ;;  %v803_v49 = vadd.f32 %v799_v52, %v763_v47  ;;  %v1160_v10 = vadd.f32 %v1156_v27, %v1136_v34  ;;  %v923_v27 = vsel %vm918_vm7, %v4059_v18, 0.0  ;;  %v5009_v18 = vld [vmem:[#allocation17_spill] sm:$0xff]  ;;  %v5010_v34 = vld [vmem:[#allocation6_spill] sm:$0xff] }
 0x1c1   : > { %v1129_v14 = vpop.permute.xlu0 %1128  ;;  %v4228_v31 = vpop.permute.xlu1 %1073  ;;  %v963_v52 = vsel %vm958_vm8, %v4071_v5, 0.0  ;;  %v902_v3 = vmul.f32 %v5010_v34, %v882_v20  ;;  %v866_v42 = vadd.f32 %v862_v21, %v826_v12  ;;  %v5016_v21 = vld [vmem:[#allocation20_spill] sm:$0xff] }
 0x1c2   : > { %v827_v53 = vadd.f32 %v4128_v44, %v803_v49  ;;  %v1184_v57 = vadd.f32 %v4118_v58, %v1160_v10  ;;  %v904_v24 = vadd.f32 %v900_v13, %v864_v23  ;;  %v1138_v41 = vmul.f32 %v1129_v14, %v738_v37  ;;  %v5008_v58 = vld [vmem:[#allocation19_spill] sm:$0xff]  ;;  %v5012_v23 = vld [vmem:[#allocation14_spill] sm:$0xff] }
 0x1c3   : > { %v1187_v10 = vadd.f32 %v4132_v60, %v1163_v6  ;;  %v1207_v37 = vmul.f32 %v5008_v58, %v4212_v7  ;;  %v1206_v13 = vmul.f32 %v5009_v18, %v4220_v28  ;;  %v5011_v60 = vld [vmem:[#allocation8_spill] sm:$0xff] }
 0x1c4   : > { %v867_v19 = vadd.f32 %v863_v22, %v827_v53  ;;  %v1208_v47 = vadd.f32 %v1204_v51, %v1184_v57  ;;  %v944_v49 = vadd.f32 %v940_v33, %v904_v24  ;;  %v1162_v44 = vadd.f32 %v1158_v25, %v1138_v41  ;;  %v5013_v22 = vld [vmem:[#allocation23_spill] sm:$0xff] }
 0x1c5   : > { %v913_v5 = vpop.permute.xlu0 %912  ;;  %v4247_v40 = vpop.permute.xlu1 %1077  ;;  %v943_v48 = vmul.f32 %v5011_v60, %v923_v27  ;;  %v1230_v35 = vmul.f32 %v5013_v22, %v882_v20  ;;  %v906_v53 = vadd.f32 %v902_v3, %v866_v42  ;;  %v1211_v24 = vadd.f32 %v1207_v37, %v1187_v10  ;;  %v5015_v20 = vld [vmem:[#allocation9_spill] sm:$0xff]  ;;  %v5018_v3 = vld [vmem:[#allocation22_spill] sm:$0xff]  ;;  %v5021_v42 = vld [vmem:[#allocation31_spill] sm:$0xff] }
 0x1c6   : > { %v984_v30 = vadd.f32 %v980_v26, %v944_v49  ;;  %v1186_v17 = vadd.f32 %v4145_v38, %v1162_v44  ;;  %v922_v51 = vsel %vm918_vm7, %v913_v5, 0.0  ;;  %v4252_v33 = vadd.f32 %v1228_v61, %v1208_v47  ;;  %v5014_v38 = vld [vmem:[#allocation15_spill] sm:$0xff]  ;;  %v5017_v37 = vld [vmem:[#allocation21_spill] sm:$0xff] }
 0x1c7   : > { %v942_v6 = vmul.f32 %v5012_v23, %v922_v51  ;;  %v907_v50 = vadd.f32 %v903_v36, %v867_v19  ;;  %v983_v26 = vmul.f32 %v5014_v38, %v963_v52  ;;  %v1231_v19 = vmul.f32 %v5016_v21, %v4201_v39  ;;  %v5019_v51 = vld [vmem:[#allocation24_spill] sm:$0xff] }
 0x1c8   : > { %v4257_v25 = vmul.f32 %v1034_v8, %v984_v30  ;;  %v1210_v14 = vadd.f32 %v1206_v13, %v1186_v17  ;;  %1240 = vrot.lane.b32.xlu0 %v4252_v33, %s3451_s24  ;;  %v1783_v18 = vmul.f32 %v5017_v37, %v3771_v63  ;;  %v1807_v5 = vmul.f32 %v5018_v3, %v4137_v0  ;;  %v1100_v0 = vld [vmem:[%s4936_s5 + $0x20] sm:$0xff] }
 0x1c9   : > { %v953_v57 = vpop.permute.xlu0 %952  ;;  %v947_v61 = vadd.f32 %v943_v48, %v907_v50  ;;  %v946_v12 = vadd.f32 %v942_v6, %v906_v53  ;;  %v1235_v11 = vadd.f32 %v1231_v19, %v1211_v24  ;;  %v1766_v60 = vmul.f32 %v5019_v51, %v4189_v1  ;;  %v5020_v48 = vld [vmem:[#allocation34_spill] sm:$0xff]  ;;  %3061 = vmatprep.mubr.msk.f32.mxu1 %vm1352_vm9, %v1100_v0  ;;  %v5022_v6 = vld [vmem:[#allocation28_spill] sm:$0xff] }
 0x1ca   : > { %v962_v41 = vsel %vm958_vm8, %v953_v57, 0.0  ;;  %v4264_v27 = vpop.permute.xlu1 %1025  ;;  %v1234_v36 = vadd.f32 %v1230_v35, %v1210_v14  ;;  %v1786_v23 = vmul.f32 %v3775_v2, %v5021_v42  ;;  %v1810_v50 = vmul.f32 %v5022_v6, %v4212_v7  ;;  %v5023_v35 = vld [vmem:[#allocation25_spill] sm:$0xff]  ;;  %v4335_v57 = vld [vmem:[%s3570_s29 + $0x8] sm:$0xff] }
 0x1cb   : > { %v982_v8 = vmul.f32 %v5015_v20, %v962_v41  ;;  %v987_v54 = vadd.f32 %v983_v26, %v947_v61  ;;  %v1785_v14 = vmul.f32 %v5023_v35, %v3783_v4  ;;  %v5024_v26 = vld [vmem:[#allocation26_spill] sm:$0xff]  ;;  %v4344_v41 = vld [vmem:[%s3570_s29 + $0x10] sm:$0xff] }
 0x1cc   : > { %1300 = vrot.lane.b32.xlu0 %v4252_v33, %s3455_s28  ;;  %1244 = vrot.lane.b32.xlu1 %v1234_v36, %s3451_s24  ;;  %v1790_v1 = vadd.f32 %v1786_v23, %v1766_v60  ;;  %v1809_v7 = vmul.f32 %v5024_v26, %v4220_v28 }
 0x1cd   : > { %v986_v52 = vadd.f32 %v982_v8, %v946_v12  ;;  %v4273_v47 = vmul.f32 %v4107_v56, %v987_v54  ;;  %v1746_v10 = vpop.permute.xlu0 %1745  ;;  %v4356_v8 = vld [vmem:[%s3570_s29 + $0x20] sm:$0xff] }
 0x1ce   : > { %v1763_v58 = vmul.f32 %v1746_v10, %v4123_v62  ;;  %v1814_v38 = vadd.f32 %v1810_v50, %v1790_v1 }
 0x1cf   : > { %v1042_v49 = vpop.permute.xlu1 %1041 }
 0x1d0   : > { %v4275_v44 = vmul.f32 %v1042_v49, %v986_v52  ;;  %1246 = vrot.lane.b32.xlu0 %v1235_v11, %s3451_s24  ;;  %994 = vrot.lane.b32.xlu1 %v4100_v29, %s3456_s22  ;;  %v1787_v13 = vadd.f32 %v1783_v18, %v1763_v58  ;;  %v4371_v49 = vld [vmem:[%s3570_s29 + $0x38] sm:$0xff] }
 0x1d1   : > { %v1756_v63 = vpop.permute.xlu0 %1755 }
 0x1d2   : > { %v1811_v62 = vadd.f32 %v1807_v5, %v1787_v13  ;;  %v1765_v22 = vmul.f32 %v1756_v63, %v4173_v43 }
 0x1d4   : > { %1304 = vrot.lane.b32.xlu0 %v1234_v36, %s3455_s28  ;;  %992 = vrot.lane.b32.xlu1 %v984_v30, %s3456_s22  ;;  %v4280_v39 = vpop.permute.xlu1 %1085  ;;  %v1789_v2 = vadd.f32 %v1785_v14, %v1765_v22 }
 0x1d6   : > { %v1813_v43 = vadd.f32 %v1809_v7, %v1789_v2 }
 0x1d8   : > { %1058 = vrot.lane.b32.xlu0 %v4100_v29, %s3457_s30  ;;  %1056 = vrot.lane.b32.xlu1 %v984_v30, %s3457_s30  ;;  %v1336_v29 = vld [vmem:[%s4939_s8] sm:$0xff] }
 0x1d9   : > { %v4283_v56 = vpop.permute.xlu1 %1254  ;;  %3023 = vmatprep.mubr.msk.f32.mxu0 %vm1352_vm9, %v1336_v29 }
 0x1dc   : > { %998 = vrot.lane.b32.xlu0 %v987_v54, %s3456_s22  ;;  %996 = vrot.lane.b32.xlu1 %v986_v52, %s3456_s22 }
 0x1de   : > { %v4288_v34 = vpop.permute.xlu1 %1277 }
 0x1e0   : > { %1062 = vrot.lane.b32.xlu0 %v987_v54, %s3457_s30  ;;  %1060 = vrot.lane.b32.xlu1 %v986_v52, %s3457_s30  ;;  %v4359_v54 = vld [vmem:[%s3570_s29 + $0x28] sm:$0xff]  ;;  %v1011_v52 = vpop.permute.xlu0 %1010  ;;  %s2875_s30 = sshll.u32 %s5030_s19, 7 }
 0x1e1   : > { %v3408_v21 = vpack.i.bf16 %v4359_v54, %v4356_v8  ;;  %s4877_s16 = scalar_lea.vmem %s4946_s15, %s2875_s30 }
 0x1e2   : > { %v4296_v30 = vpop.permute.xlu1 %1281 }
 0x1e4   : > { %1819 = vrot.lane.b32.xlu0 %v1811_v62, %s3448_s21  ;;  %1306 = vrot.lane.b32.xlu1 %v1235_v11, %s3455_s28  ;;  %v4379_v18 = vpop.permute.xlu0 %1020 }
 0x1e7   : > { %v4300_v17 = vpop.permute.xlu1 %1317 }
 0x1e8   : > { %1900 = vperm.xlu0 %3380, %v4050_v59   ;;  %1821 = vrot.lane.b32.xlu1 %v5020_v48, %s3448_s21  ;;  %v1260_v5 = vpop.permute.xlu0 %1259 }
 0x1ec   : > { %1881 = vrot.lane.b32.xlu0 %v5020_v48, %s3450_s23  ;;  %1904 = vperm.xlu1 %3382, %v3959_v32   ;;  %v4321_v59 = vpop.permute.xlu1 %1264  ;;  %v4332_v32 = vld [vmem:[%s3570_s29] sm:$0xff]  ;;  %v4387_v63 = vpop.permute.xlu0 %1269 }
 0x1ed   : > { %v3388_v28 = vpack.i.bf16 %v4335_v57, %v4332_v32 }
 0x1f0   : > { %1825 = vrot.lane.b32.xlu0 %v1814_v38, %s3448_s21  ;;  %1879 = vrot.lane.b32.xlu1 %v1811_v62, %s3450_s23  ;;  %v4391_v60 = vpop.permute.xlu0 %1838 }
 0x1f1   : > { %v1286_v4 = vpop.permute.xlu1 %1285 }
 0x1f2   : > { %v4327_v53 = vmul.f32 %v1286_v4, %v1234_v36  ;;  %v4347_v36 = vld [vmem:[%s3570_s29 + $0x18] sm:$0xff]  ;;  %v1292_v4 = vmul.f32 %v4288_v34, %v4252_v33 }
 0x1f3   : > { %v3398_v12 = vpack.i.bf16 %v4347_v36, %v4344_v41 }
 0x1f4   : > { %1885 = vrot.lane.b32.xlu0 %v1814_v38, %s3450_s23  ;;  %1823 = vrot.lane.b32.xlu1 %v1813_v43, %s3448_s21  ;;  %v4397_v6 = vpop.permute.xlu0 %1848 }
 0x1f5   : > { %v1290_v61 = vpop.permute.xlu1 %1289 }
 0x1f6   : > { %v4339_v24 = vmul.f32 %v1290_v61, %v1235_v11  ;;  %v4368_v11 = vld [vmem:[%s3570_s29 + $0x30] sm:$0xff]  ;;  %v1293_v61 = vmul.f32 %v4296_v30, %v4079_v15  ;;  %s4894_s29 = scalar_lea.vmem %s4945_s14, %s2875_s30 }
 0x1f7   : > { %v3418_v10 = vpack.i.bf16 %v4371_v49, %v4368_v11 }
 0x1f8   : > { %1883 = vrot.lane.b32.xlu1 %v1813_v43, %s3450_s23  ;;  %3389 = vrot.lane.b32.xlu0 %v3388_v28, %s3454_s27  ;;  %v4399_v50 = vpop.permute.xlu0 %1081  ;;  %s2874_s23 = sshll.u32 %s5030_s19, 5 }
 0x1f9   : > { %s4465_s22 = scalar_lea.vmem %s4932_s1, %s2874_s23 }
 0x1fa   : > { %v4351_v20 = vpop.permute.xlu1 %1325 }
 0x1fc   : > { %3384 = vrot.lane.b32.xlu1 %v3388_v28, %s3453_s26  ;;  %3399 = vrot.lane.b32.xlu0 %v3398_v12, %s3454_s27 }
 0x1ff   : > { %v4363_v19 = vpop.permute.xlu1 %1833 }
 0x200   : > { %3394 = vrot.lane.b32.xlu1 %v3398_v12, %s3453_s26  ;;  %3409 = vrot.lane.b32.xlu0 %v3408_v21, %s3454_s27 }
 0x204   : > { %v1857_v58 = vpop.permute.xlu1 %1856  ;;  %3404 = vrot.lane.b32.xlu1 %v3408_v21, %s3453_s26  ;;  %3419 = vrot.lane.b32.xlu0 %v3418_v10, %s3454_s27 }
 0x205   : > { %v4377_v37 = vmul.f32 %v1857_v58, %v1811_v62 }
 0x208   : > { %v1861_v13 = vpop.permute.xlu1 %1860  ;;  %3414 = vrot.lane.b32.xlu1 %v3418_v10, %s3453_s26 }
 0x209   : > { %v4383_v3 = vmul.f32 %v1861_v13, %v5020_v48  ;;  %v1314_v48 = vpop.permute.xlu0 %1313  ;;  %v5025_v13 = vld [vmem:[#allocation29_spill] sm:$0xff] }
 0x20a   : > { %v1064_v15 = vadd.s32 5, %v5025_v13 }
 0x20c   : > { %vm1066_vm11 = vcmp.lt.s32.totalorder %v1064_v15, 128 }
 0x20d   : > { %v4385_v29 = vpop.permute.xlu1 %1896  ;;  %v4401_v22 = vpop.permute.xlu0 %1321 }
 0x211   : > { %v4403_v14 = vpop.permute.xlu0 %1892 }
 0x212   : > { %v4389_v0 = vpop.permute.xlu1 %1843 }
 0x217   : > { %v1865_v51 = vpop.permute.xlu1 %1864 }
 0x218   : > { %v4393_v62 = vmul.f32 %v1865_v51, %v1813_v43  ;;  %v1000_v51 = vadd.s32 4294967291, %v5025_v13 }
 0x21a   : > { %vm1001_vm10 = vcmp.ge.s32.totalorder %v1000_v51, 0 }
 0x21b   : > { %v1869_v42 = vpop.permute.xlu1 %1868 }
 0x21c   : > { %v4395_v23 = vmul.f32 %v1869_v42, %v1814_v38 }
 0x21f   : > { %v1243_v35 = vpop.permute.xlu1 %1242 }
 0x220   : > { %v1249_v2 = vsel %vm693_vm3, %v1243_v35, 0.0 }
 0x221   : > { %v1273_v43 = vmul.f32 %v1260_v5, %v1249_v2 }
 0x223   : > { %v1303_v1 = vpop.permute.xlu1 %1302  ;;  %v1297_v35 = vadd.f32 %v1293_v61, %v1273_v43 }
 0x224   : > { %v1309_v7 = vsel %vm918_vm7, %v1303_v1, 0.0 }
 0x225   : > { %v1329_v12 = vmul.f32 %v4300_v17, %v1309_v7 }
 0x23a   : > { %v1241_v26 = vpop.permute.xlu0 %1240 }
 0x23b   : > { %v1248_v38 = vsel %vm693_vm3, %v1241_v26, 0.0  ;;  %v1333_v26 = vadd.f32 %v1329_v12, %v1297_v35 }
 0x23c   : > { %v1272_v28 = vmul.f32 %v4283_v56, %v1248_v38  ;;  %v5026_v38 = vld [vmem:[#allocation30_spill] sm:$0xff] }
 0x23e   : > { %v1296_v21 = vadd.f32 %v1292_v4, %v1272_v28  ;;  %v1301_v10 = vpop.permute.xlu0 %1300  ;;  %v1245_v58 = vpop.permute.xlu1 %1244 }
 0x23f   : > { %v1308_v42 = vsel %vm918_vm7, %v1301_v10, 0.0 }
 0x240   : > { %v1328_v1 = vmul.f32 %v1314_v48, %v1308_v42 }
 0x242   : > { %v1332_v33 = vadd.f32 %v1328_v1, %v1296_v21  ;;  %v1247_v34 = vpop.permute.xlu0 %1246  ;;  %v995_v56 = vpop.permute.xlu1 %994 }
 0x243   : > { %v1005_v30 = vsel %vm1001_vm10, %v995_v56, 0.0 }
 0x244   : > { %v3199_v5 = vpack.c.bf16 %v1333_v26, %v1332_v33  ;;  %v1029_v4 = vmul.f32 %v5026_v38, %v1005_v30 }
 0x246   : > { %3200 = vmatprep.subr.bf16.mxu0 %v3199_v5  ;;  %v1305_v17 = vpop.permute.xlu0 %1304  ;;  %v993_v2 = vpop.permute.xlu1 %992  ;;  %v1053_v21 = vadd.f32 %v4103_v16, %v1029_v4  ;;  %v1251_v16 = vsel %vm693_vm3, %v1247_v34, 0.0 }
 0x247   : > { %v1004_v7 = vsel %vm1001_vm10, %v993_v2, 0.0  ;;  %3202 = vmatpush3.bf16.msra.mxu0 %v3199_v5  ;;  %v1275_v38 = vmul.f32 %v4387_v63, %v1251_v16  ;;  %v1107_v16 = vld [vmem:[%s4936_s5 + $0x58] sm:$0xff] }
 0x248   : > { %v1028_v43 = vmul.f32 %v1011_v52, %v1004_v7  ;;  %v1250_v52 = vsel %vm693_vm3, %v1245_v58, 0.0  ;;  %v1310_v58 = vsel %vm918_vm7, %v1305_v17, 0.0 }
 0x249   : > { %v1330_v4 = vmul.f32 %v4401_v22, %v1310_v58  ;;  %v1343_v58 = vld [vmem:[%s4939_s8 + $0x38] sm:$0xff] }
 0x24a   : > { %v1059_v48 = vpop.permute.xlu0 %1058  ;;  %v1057_v28 = vpop.permute.xlu1 %1056  ;;  %v1052_v10 = vadd.f32 %v4257_v25, %v1028_v43 }
 0x24b   : > { %v1069_v61 = vsel %vm1066_vm11, %v1059_v48, 0.0  ;;  %v1068_v12 = vsel %vm1066_vm11, %v1057_v28, 0.0  ;;  %v1299_v28 = vadd.f32 %v4339_v24, %v1275_v38  ;;  %v1103_v24 = vld [vmem:[%s4936_s5 + $0x38] sm:$0xff] }
 0x24c   : > { %v1089_v13 = vmul.f32 %v4247_v40, %v1069_v61  ;;  %v1088_v42 = vmul.f32 %v4228_v31, %v1068_v12  ;;  %v1274_v31 = vmul.f32 %v4321_v59, %v1250_v52  ;;  %v1104_v12 = vld [vmem:[%s4936_s5 + $0x40] sm:$0xff] }
 0x24e   : > { %v1093_v35 = vadd.f32 %v1089_v13, %v1053_v21  ;;  %v1092_v1 = vadd.f32 %v1088_v42, %v1052_v10  ;;  %v999_v26 = vpop.permute.xlu0 %998  ;;  %v997_v33 = vpop.permute.xlu1 %996  ;;  %v1298_v15 = vadd.f32 %v4327_v53, %v1274_v31  ;;  %v1337_v53 = vld [vmem:[%s4939_s8 + $0x8] sm:$0xff]  ;;  %v2461_v21 = vld [vmem:[%s4465_s22] sm:$0xff]  ;;  %v1339_v42 = vld [vmem:[%s4939_s8 + $0x18] sm:$0xff] }
 0x24f   : > { %v1007_v56 = vsel %vm1001_vm10, %v999_v26, 0.0  ;;  %v1006_v5 = vsel %vm1001_vm10, %v997_v33, 0.0  ;;  %v2462_v10 = vld [vmem:[%s4465_s22 + $0x8] sm:$0xff]  ;;  %v1106_v33 = vld [vmem:[%s4936_s5 + $0x50] sm:$0xff] }
 0x250   : > { %v3207_v30 = vpack.c.bf16 %v1093_v35, %v1092_v1  ;;  %v1031_v25 = vmul.f32 %v4264_v27, %v1007_v56  ;;  %v1030_v40 = vmul.f32 %v4379_v18, %v1006_v5  ;;  %v1334_v61 = vadd.f32 %v1330_v4, %v1298_v15  ;;  %v1105_v35 = vld [vmem:[%s4936_s5 + $0x48] sm:$0xff]  ;;  %v1340_v1 = vld [vmem:[%s4939_s8 + $0x20] sm:$0xff] }
 0x251   : > { %v4495_v26 = vpack.c.bf16 %v2462_v10, %v2461_v21  ;;  %v1341_v5 = vld [vmem:[%s4939_s8 + $0x28] sm:$0xff] }
 0x252   : > { %v1063_v2 = vpop.permute.xlu0 %1062  ;;  %3247 = vmatprep.subr.bf16.mxu1 %v3207_v30  ;;  %v1061_v7 = vpop.permute.xlu1 %1060  ;;  %v1055_v34 = vadd.f32 %v4273_v47, %v1031_v25  ;;  %v1054_v27 = vadd.f32 %v4275_v44, %v1030_v40  ;;  %v1108_v25 = vld [vmem:[%s4936_s5 + $0x60] sm:$0xff] }
 0x253   : > { %v1071_v51 = vsel %vm1066_vm11, %v1063_v2, 0.0  ;;  %v1070_v55 = vsel %vm1066_vm11, %v1061_v7, 0.0  ;;  %3249 = vmatpush3.bf16.msra.mxu1 %v3207_v30 }
 0x254   : > { %v1091_v18 = vmul.f32 %v4280_v39, %v1071_v51  ;;  %v1090_v59 = vmul.f32 %v4399_v50, %v1070_v55  ;;  %v1101_v50 = vld [vmem:[%s4936_s5 + $0x28] sm:$0xff] }
 0x255   : > { %v1109_v51 = vld [vmem:[%s4936_s5 + $0x68] sm:$0xff] }
 0x256   : > { %v1095_v63 = vadd.f32 %v1091_v18, %v1055_v34  ;;  %v1094_v43 = vadd.f32 %v1090_v59, %v1054_v27  ;;  %v1307_v48 = vpop.permute.xlu1 %1306  ;;  %v1820_v13 = vpop.permute.xlu0 %1819  ;;  %v1344_v34 = vld [vmem:[%s4939_s8 + $0x40] sm:$0xff]  ;;  %v1110_v27 = vld [vmem:[%s4936_s5 + $0x70] sm:$0xff] }
 0x257   : > { %v1311_v17 = vsel %vm918_vm7, %v1307_v48, 0.0  ;;  %v1827_v31 = vsel %vm733_vm2, %v1820_v13, 0.0  ;;  %v1345_v48 = vld [vmem:[%s4939_s8 + $0x48] sm:$0xff] }
 0x258   : > { %v3211_v47 = vpack.c.bf16 %v1095_v63, %v1094_v43  ;;  %v1331_v44 = vmul.f32 %v4351_v20, %v1311_v17  ;;  %v1338_v20 = vld [vmem:[%s4939_s8 + $0x10] sm:$0xff]  ;;  %v1851_v18 = vmul.f32 %v4363_v19, %v1827_v31  ;;  %v1111_v19 = vld [vmem:[%s4936_s5 + $0x78] sm:$0xff]  ;;  %v1915_v17 = vld [vmem:[%s4942_s11] sm:$0xff] }
 0x25a   : > { %v1335_v39 = vadd.f32 %v1331_v44, %v1299_v28  ;;  %3248 = vmatprep.subr.bf16.mxu1 %v3211_v47  ;;  %v1822_v52 = vpop.permute.xlu1 %1821  ;;  %v1875_v15 = vadd.f32 %v4377_v37, %v1851_v18  ;;  %v1347_v37 = vld [vmem:[%s4939_s8 + $0x58] sm:$0xff] }
 0x25b   : > { %3250 = vmatpush3.bf16.msra.mxu1 %v3211_v47  ;;  %v1828_v2 = vsel %vm733_vm2, %v1822_v52, 0.0 }
 0x25c   : > { %v3203_v22 = vpack.c.bf16 %v1335_v39, %v1334_v61  ;;  %v1852_v59 = vmul.f32 %v4391_v60, %v1828_v2 }
 0x25e   : > { %3204 = vmatprep.subr.bf16.mxu0 %v3203_v22  ;;  %3062 = vmatmul.mubr.msk.f32.vlgmr.msra.gmra.mrb[0].mxu1 %vm1352_vm9, %v1101_v50  ;;  %v1876_v28 = vadd.f32 %v4383_v3, %v1852_v59 }
 0x25f   : > { %3206 = vmatpush3.bf16.msra.mxu0 %v3203_v22  ;;  %3064 = vmatprep.mubr.msk.f32.mxu1 %vm1352_vm9, %v1102_v45 }
 0x260   : > { %3208 = vmatprep.subr.bf16.mxu0 %v3207_v30 }
 0x262   : > { %3024 = vmatmul.mubr.msk.f32.vlgmr.msra.gmra.mrb[4].mxu0 %vm1352_vm9, %v1337_v53  ;;  %3065 = vmatmul.mubr.msk.f32.gmra.mrb[2].mxu1 %vm1352_vm9, %v1103_v24  ;;  %v1348_v53 = vld [vmem:[%s4939_s8 + $0x60] sm:$0xff] }
 0x263   : > { %3210 = vmatpush3.bf16.msra.mxu0 %v3207_v30  ;;  %3026 = vmatprep.mubr.msk.f32.mxu0 %vm1352_vm9, %v1338_v20  ;;  %v1342_v30 = vld [vmem:[%s4939_s8 + $0x30] sm:$0xff] }
 0x264   : > { %3212 = vmatprep.subr.bf16.mxu0 %v3211_v47  ;;  %3067 = vmatprep.mubr.msk.f32.mxu1 %vm1352_vm9, %v1104_v12 }
 0x266   : > { %3027 = vmatmul.mubr.msk.f32.gmra.mrb[6].mxu0 %vm1352_vm9, %v1339_v42  ;;  %3068 = vmatmul.mubr.msk.f32.gmra.mrb[4].mxu1 %vm1352_vm9, %v1105_v35 }
 0x267   : > { %v4502_v56 = vpop.permute.xlu0 %1900  ;;  %3214 = vmatpush3.bf16.msra.mxu0 %v3211_v47  ;;  %3029 = vmatprep.mubr.msk.f32.mxu0 %vm1352_vm9, %v1340_v1 }
 0x268   : > { %3070 = vmatprep.mubr.msk.f32.mxu1 %vm1352_vm9, %v1106_v33  ;;  %3240 = vmatprep.subr.bf16.mxu0 %v4495_v26 }
 0x26a   : > { %3030 = vmatmul.mubr.msk.f32.gmra.mrb[8].mxu0 %vm1352_vm9, %v1341_v5  ;;  %3071 = vmatmul.mubr.msk.f32.gmra.mrb[6].mxu1 %vm1352_vm9, %v1107_v16  ;;  %v1351_v16 = vld [vmem:[%s4939_s8 + $0x78] sm:$0xff] }
 0x26b   : > { %v1882_v7 = vpop.permute.xlu0 %1881  ;;  %v1905_v38 = vpop.permute.xlu1 %1904  ;;  %3032 = vmatprep.mubr.msk.f32.mxu0 %vm1352_vm9, %v1342_v30  ;;  %3073 = vmatprep.mubr.msk.f32.mxu1 %vm1352_vm9, %v1108_v25 }
 0x26c   : > { %v1888_v55 = vsel %vm878_vm6, %v1882_v7, 0.0  ;;  %v2463_v7 = vld [vmem:[%s4465_s22 + $0x10] sm:$0xff] }
 0x26d   : > { %v1908_v4 = vmul.f32 %v4385_v29, %v1888_v55  ;;  %v1346_v29 = vld [vmem:[%s4939_s8 + $0x50] sm:$0xff] }
 0x26e   : > { %3033 = vmatmul.mubr.msk.f32.gmra.mrb[10].mxu0 %vm1352_vm9, %v1343_v58  ;;  %3074 = vmatmul.mubr.msk.f32.gmra.mrb[8].mxu1 %vm1352_vm9, %v1109_v51  ;;  %v1922_v58 = vld [vmem:[%s4942_s11 + $0x38] sm:$0xff] }
 0x26f   : > { %v1826_v63 = vpop.permute.xlu0 %1825  ;;  %v1880_v43 = vpop.permute.xlu1 %1879  ;;  %3035 = vmatprep.mubr.msk.f32.mxu0 %vm1352_vm9, %v1344_v34  ;;  %3076 = vmatprep.mubr.msk.f32.mxu1 %vm1352_vm9, %v1110_v27  ;;  %v1912_v61 = vadd.f32 %v1908_v4, %v1876_v28  ;;  %v1097_v4 = vld [vmem:[%s4936_s5 + $0x8] sm:$0xff] }
 0x270   : > { %v1887_v60 = vsel %vm878_vm6, %v1880_v43, 0.0  ;;  %v1830_v47 = vsel %vm733_vm2, %v1826_v63, 0.0 }
 0x271   : > { %v1907_v44 = vmul.f32 %v4403_v14, %v1887_v60  ;;  %v1854_v3 = vmul.f32 %v4397_v6, %v1830_v47  ;;  %v1349_v6 = vld [vmem:[%s4939_s8 + $0x68] sm:$0xff] }
 0x272   : > { %3036 = vmatmul.mubr.msk.f32.gmra.mrb[12].mxu0 %vm1352_vm9, %v1345_v48  ;;  %3077 = vmatmul.mubr.msk.f32.gmra.mrb[10].mxu1 %vm1352_vm9, %v1111_v19  ;;  %v1916_v48 = vld [vmem:[%s4942_s11 + $0x8] sm:$0xff] }
 0x273   : > { %v1911_v39 = vadd.f32 %v1907_v44, %v1875_v15  ;;  %v1886_v50 = vpop.permute.xlu0 %1885  ;;  %v1824_v22 = vpop.permute.xlu1 %1823  ;;  %3038 = vmatprep.mubr.msk.f32.mxu0 %vm1352_vm9, %v1346_v29  ;;  %3087 = vmatprep.mubr.msk.f32.mxu1 %vm1352_vm9, %v1915_v17  ;;  %v1878_v13 = vadd.f32 %v4395_v23, %v1854_v3  ;;  %v1917_v15 = vld [vmem:[%s4942_s11 + $0x10] sm:$0xff]  ;;  %v1099_v3 = vld [vmem:[%s4936_s5 + $0x18] sm:$0xff] }
 0x274   : > { %v1890_v14 = vsel %vm878_vm6, %v1886_v50, 0.0  ;;  %v1829_v45 = vsel %vm733_vm2, %v1824_v22, 0.0 }
 0x275   : > { %v1853_v24 = vmul.f32 %v4389_v0, %v1829_v45  ;;  %v3215_v20 = vpack.c.bf16 %v1912_v61, %v1911_v39  ;;  %v1910_v12 = vmul.f32 %v1905_v38, %v1890_v14  ;;  %v1350_v0 = vld [vmem:[%s4939_s8 + $0x70] sm:$0xff]  ;;  %v2464_v38 = vld [vmem:[%s4465_s22 + $0x18] sm:$0xff] }
 0x276   : > { %3039 = vmatmul.mubr.msk.f32.gmra.mrb[14].mxu0 %vm1352_vm9, %v1347_v37 }
 0x277   : > { %v1884_v21 = vpop.permute.xlu1 %1883  ;;  %3216 = vmatprep.subr.bf16.mxu1 %v3215_v20  ;;  %3041 = vmatprep.mubr.msk.f32.mxu0 %vm1352_vm9, %v1348_v53  ;;  %v3390_v10 = vpop.permute.xlu0 %3389  ;;  %v1877_v35 = vadd.f32 %v4393_v62, %v1853_v24  ;;  %v1914_v5 = vadd.f32 %v1910_v12, %v1878_v13  ;;  %v1918_v24 = vld [vmem:[%s4942_s11 + $0x18] sm:$0xff] }
 0x278   : > { %v1889_v42 = vsel %vm878_vm6, %v1884_v21, 0.0  ;;  %3218 = vmatpush3.bf16.msra.mxu1 %v3215_v20  ;;  %v3392_v33 = vunpack.i.h.bf16 %v3390_v10  ;;  %v3391_v52 = vunpack.i.l.bf16 %v3390_v10 }
 0x279   : > { %v1909_v1 = vmul.f32 %v4502_v56, %v1889_v42  ;;  %v1096_v56 = vld [vmem:[%s4936_s5] sm:$0xff] }
 0x27a   : > { %3042 = vmatmul.mubr.msk.f32.gmra.mrb[16].mxu0 %vm1352_vm9, %v1349_v6  ;;  %v2189_v31 = vsel %vm838_vm5, %v3392_v33, -inf  ;;  %v2188_v2 = vsel %vm838_vm5, %v3391_v52, -inf }
 0x27b   : > { %v1913_v23 = vadd.f32 %v1909_v1, %v1877_v35  ;;  %3044 = vmatprep.mubr.msk.f32.mxu0 %vm1352_vm9, %v1350_v0  ;;  %v3385_v46 = vpop.permute.xlu1 %3384  ;;  %v3400_v30 = vpop.permute.xlu0 %3399 }
 0x27c   : > { %v3387_v25 = vunpack.i.h.bf16 %v3385_v46  ;;  %v3386_v62 = vunpack.i.l.bf16 %v3385_v46  ;;  %v3402_v34 = vunpack.i.h.bf16 %v3400_v30  ;;  %v3401_v27 = vunpack.i.l.bf16 %v3400_v30  ;;  %v2446_v30 = vld [vmem:[%s4944_s13 + $0x8] sm:$0xff] }
 0x27d   : > { %v3219_v40 = vpack.c.bf16 %v1914_v5, %v1913_v23  ;;  %v1920_v23 = vld [vmem:[%s4942_s11 + $0x28] sm:$0xff] }
 0x27e   : > { %v2157_v51 = vsel %vm773_vm4, %v3387_v25, -inf  ;;  %v2156_v55 = vsel %vm773_vm4, %v3386_v62, -inf  ;;  %3045 = vmatmul.mubr.msk.f32.gmra.mrb[18].mxu0 %vm1352_vm9, %v1351_v16  ;;  %v2191_v39 = vsel %vm838_vm5, %v3402_v34, -inf  ;;  %v2190_v50 = vsel %vm838_vm5, %v3401_v27, -inf  ;;  %v2447_v62 = vld [vmem:[%s4944_s13 + $0x10] sm:$0xff]  ;;  %v2449_v34 = vld [vmem:[%s4944_s13 + $0x20] sm:$0xff] }
 0x27f   : > { %3220 = vmatprep.subr.bf16.mxu1 %v3219_v40  ;;  %v2165_v18 = vmax.f32 %v2157_v51, %v4335_v57  ;;  %v2164_v59 = vmax.f32 %v2156_v55, %v4332_v32  ;;  %3055 = vmatprep.mubr.msk.f32.mxu0 %vm1352_vm9, %v1096_v56  ;;  %v3395_v63 = vpop.permute.xlu1 %3394  ;;  %v3410_v43 = vpop.permute.xlu0 %3409  ;;  %v1098_v57 = vld [vmem:[%s4936_s5 + $0x10] sm:$0xff]  ;;  %v3243_v32 = vpack.c.bf16 %v2464_v38, %v2463_v7 }
 0x280   : > { %3222 = vmatpush3.bf16.msra.mxu1 %v3219_v40  ;;  %v3397_v19 = vunpack.i.h.bf16 %v3395_v63  ;;  %v3396_v60 = vunpack.i.l.bf16 %v3395_v63  ;;  %v3412_v28 = vunpack.i.h.bf16 %v3410_v43  ;;  %v3411_v47 = vunpack.i.l.bf16 %v3410_v43  ;;  %v2451_v63 = vld [vmem:[%s4944_s13 + $0x30] sm:$0xff]  ;;  %v1926_v43 = vld [vmem:[%s4942_s11 + $0x58] sm:$0xff] }
 0x281   : > { %v2196_v29 = vmax.f32 %v2164_v59, %v2188_v2  ;;  %v2197_v17 = vmax.f32 %v2165_v18, %v2189_v31  ;;  %v1924_v18 = vld [vmem:[%s4942_s11 + $0x48] sm:$0xff] }
 0x282   : > { %3056 = vmatmul.mubr.msk.f32.vlgmr.msra.gmra.mrb[4].mxu0 %vm1352_vm9, %v1097_v4  ;;  %v2159_v44 = vsel %vm773_vm4, %v3397_v19, -inf  ;;  %v2158_v61 = vsel %vm773_vm4, %v3396_v60, -inf  ;;  %v2193_v10 = vsel %vm838_vm5, %v3412_v28, -inf  ;;  %v2192_v13 = vsel %vm838_vm5, %v3411_v47, -inf  ;;  %v2450_v59 = vld [vmem:[%s4944_s13 + $0x28] sm:$0xff]  ;;  %v1925_v4 = vld [vmem:[%s4942_s11 + $0x50] sm:$0xff] }
 0x283   : > { %3088 = vmatmul.mubr.msk.f32.vlgmr.msra.gmra.mrb[12].mxu1 %vm1352_vm9, %v1916_v48  ;;  %v2167_v22 = vmax.f32 %v2159_v44, %v4347_v36  ;;  %v2166_v37 = vmax.f32 %v2158_v61, %v4344_v41  ;;  %3058 = vmatprep.mubr.msk.f32.mxu0 %vm1352_vm9, %v1098_v57  ;;  %v3223_v14 = vpack.c.bf16 %v2197_v17, %v2196_v29  ;;  %v3405_v45 = vpop.permute.xlu1 %3404  ;;  %v3420_v53 = vpop.permute.xlu0 %3419  ;;  %v2445_v41 = vld [vmem:[%s4944_s13] sm:$0xff]  ;;  %v2452_v48 = vld [vmem:[%s4944_s13 + $0x38] sm:$0xff]  ;;  %v1928_v57 = vld [vmem:[%s4942_s11 + $0x68] sm:$0xff] }
 0x284   : > { %3090 = vmatprep.mubr.msk.f32.mxu1 %vm1352_vm9, %v1917_v15  ;;  %v3407_v20 = vunpack.i.h.bf16 %v3405_v45  ;;  %v3406_v12 = vunpack.i.l.bf16 %v3405_v45  ;;  %3242 = vmatpush3.bf16.msra.mxu0 %v4495_v26  ;;  %v1919_v36 = vld [vmem:[%s4942_s11 + $0x20] sm:$0xff]  ;;  %v3422_v0 = vunpack.i.h.bf16 %v3420_v53  ;;  %v3421_v35 = vunpack.i.l.bf16 %v3420_v53  ;;  %v1929_v29 = vld [vmem:[%s4942_s11 + $0x70] sm:$0xff]  ;;  %v1930_v15 = vld [vmem:[%s4942_s11 + $0x78] sm:$0xff] }
 0x285   : > { %v2198_v21 = vmax.f32 %v2166_v37, %v2190_v50  ;;  %v2199_v6 = vmax.f32 %v2167_v22, %v2191_v39  ;;  %3224 = vmatprep.subr.bf16.mxu1 %v3223_v14  ;;  %3244 = vmatprep.subr.bf16.mxu0 %v3243_v32  ;;  %v1927_v19 = vld [vmem:[%s4942_s11 + $0x60] sm:$0xff]  ;;  %v2455_v17 = vld [vmem:[%s4944_s13 + $0x50] sm:$0xff]  ;;  %v2456_v28 = vld [vmem:[%s4944_s13 + $0x58] sm:$0xff] }
 0x286   : > { %3059 = vmatmul.mubr.msk.f32.gmra.mrb[6].mxu0 %vm1352_vm9, %v1099_v3  ;;  %3226 = vmatpush3.bf16.msra.mxu1 %v3223_v14  ;;  %v2161_v26 = vsel %vm773_vm4, %v3407_v20, -inf  ;;  %v2160_v42 = vsel %vm773_vm4, %v3406_v12, -inf  ;;  %v2195_v31 = vsel %vm838_vm5, %v3422_v0, -inf  ;;  %v2194_v2 = vsel %vm838_vm5, %v3421_v35, -inf  ;;  %v2453_v60 = vld [vmem:[%s4944_s13 + $0x40] sm:$0xff]  ;;  %v2205_v61 = vld [vmem:[%s4943_s12 + $0x8] sm:$0xff] }
 0x287   : > { %3091 = vmatmul.mubr.msk.f32.gmra.mrb[14].mxu1 %vm1352_vm9, %v1918_v24  ;;  %v2169_v1 = vmax.f32 %v2161_v26, %v4359_v54  ;;  %v2168_v33 = vmax.f32 %v2160_v42, %v4356_v8  ;;  %v3415_v52 = vpop.permute.xlu1 %3414  ;;  %v3227_v5 = vpack.c.bf16 %v2199_v6, %v2198_v21  ;;  %3159 = vmatprep.mubr.msk.f32.mxu0 %vm1352_vm9, %v2445_v41  ;;  %v1921_v8 = vld [vmem:[%s4942_s11 + $0x30] sm:$0xff]  ;;  %v2204_v47 = vld [vmem:[%s4943_s12] sm:$0xff]  ;;  %v2458_v39 = vld [vmem:[%s4944_s13 + $0x68] sm:$0xff] }
 0x288   : > { %3093 = vmatprep.mubr.msk.f32.mxu1 %vm1352_vm9, %v1919_v36  ;;  %v3417_v46 = vunpack.i.h.bf16 %v3415_v52  ;;  %v3416_v16 = vunpack.i.l.bf16 %v3415_v52  ;;  %3246 = vmatpush3.bf16.msra.mxu0 %v3243_v32  ;;  %v2454_v32 = vld [vmem:[%s4944_s13 + $0x48] sm:$0xff]  ;;  %v2457_v44 = vld [vmem:[%s4944_s13 + $0x60] sm:$0xff]  ;;  %v2206_v50 = vld [vmem:[%s4943_s12 + $0x10] sm:$0xff] }
 0x289   : > { %v2200_v54 = vmax.f32 %v2168_v33, %v2192_v13  ;;  %v2201_v25 = vmax.f32 %v2169_v1, %v2193_v10  ;;  %3228 = vmatprep.subr.bf16.mxu1 %v3227_v5  ;;  %v2459_v22 = vld [vmem:[%s4944_s13 + $0x70] sm:$0xff]  ;;  %v2207_v37 = vld [vmem:[%s4943_s12 + $0x18] sm:$0xff]  ;;  %v2208_v14 = vld [vmem:[%s4943_s12 + $0x20] sm:$0xff] }
 0x28a   : > { %v2163_v56 = vsel %vm773_vm4, %v3417_v46, -inf  ;;  %v2162_v40 = vsel %vm773_vm4, %v3416_v16, -inf  ;;  %3230 = vmatpush3.bf16.msra.mxu1 %v3227_v5  ;;  %v2460_v3 = vld [vmem:[%s4944_s13 + $0x78] sm:$0xff]  ;;  %v2209_v45 = vld [vmem:[%s4943_s12 + $0x28] sm:$0xff]  ;;  %v2210_v53 = vld [vmem:[%s4943_s12 + $0x30] sm:$0xff] }
 0x28b   : > { %3094 = vmatmul.mubr.msk.f32.gmra.mrb[0].mxu1 %vm1352_vm9, %v1920_v23  ;;  %v2171_v7 = vmax.f32 %v2163_v56, %v4371_v49  ;;  %v2170_v38 = vmax.f32 %v2162_v40, %v4368_v11  ;;  %v3231_v51 = vpack.c.bf16 %v2201_v25, %v2200_v54  ;;  %3160 = vmatmul.mubr.msk.f32.vlgmr.msra.gmra.mrb[20].mxu0 %vm1352_vm9, %v2446_v30  ;;  %v1923_v49 = vld [vmem:[%s4942_s11 + $0x40] sm:$0xff]  ;;  %v2211_v24 = vld [vmem:[%s4943_s12 + $0x38] sm:$0xff]  ;;  %v2213_v12 = vld [vmem:[%s4943_s12 + $0x48] sm:$0xff] }
 0x28c   : > { %3096 = vmatprep.mubr.msk.f32.mxu1 %vm1352_vm9, %v1921_v8  ;;  %3162 = vmatprep.mubr.msk.f32.mxu0 %vm1352_vm9, %v2447_v62  ;;  %v2212_v20 = vld [vmem:[%s4943_s12 + $0x40] sm:$0xff]  ;;  %v2214_v41 = vld [vmem:[%s4943_s12 + $0x50] sm:$0xff]  ;;  %v2215_v36 = vld [vmem:[%s4943_s12 + $0x58] sm:$0xff] }
 0x28d   : > { %v2202_v11 = vmax.f32 %v2170_v38, %v2194_v2  ;;  %v2203_v55 = vmax.f32 %v2171_v7, %v2195_v31  ;;  %3232 = vmatprep.subr.bf16.mxu1 %v3231_v51  ;;  %v2216_v21 = vld [vmem:[%s4943_s12 + $0x60] sm:$0xff]  ;;  %v2217_v6 = vld [vmem:[%s4943_s12 + $0x68] sm:$0xff]  ;;  %v2218_v10 = vld [vmem:[%s4943_s12 + $0x70] sm:$0xff] }
 0x28e   : > { %3234 = vmatpush3.bf16.msra.mxu1 %v3231_v51  ;;  %v2219_v13 = vld [vmem:[%s4943_s12 + $0x78] sm:$0xff] }
 0x28f   : > { %3097 = vmatmul.mubr.msk.f32.gmra.mrb[2].mxu1 %vm1352_vm9, %v1922_v58  ;;  %v3235_v27 = vpack.c.bf16 %v2203_v55, %v2202_v11  ;;  %3163 = vmatmul.mubr.msk.f32.gmra.mrb[22].mxu0 %vm1352_vm9, %v2448_v9 }
 0x290   : > { %3099 = vmatprep.mubr.msk.f32.mxu1 %vm1352_vm9, %v1923_v49  ;;  %3165 = vmatprep.mubr.msk.f32.mxu0 %vm1352_vm9, %v2449_v34 }
 0x291   : > { %3236 = vmatprep.subr.bf16.mxu1 %v3235_v27 }
 0x292   : > { %3238 = vmatpush3.bf16.msra.mxu1 %v3235_v27 }
 0x293   : > { %3100 = vmatmul.mubr.msk.f32.gmra.mrb[4].mxu1 %vm1352_vm9, %v1924_v18  ;;  %3166 = vmatmul.mubr.msk.f32.gmra.mrb[24].mxu0 %vm1352_vm9, %v2450_v59 }
 0x294   : > { %3102 = vmatprep.mubr.msk.f32.mxu1 %vm1352_vm9, %v1925_v4  ;;  %3168 = vmatprep.mubr.msk.f32.mxu0 %vm1352_vm9, %v2451_v63 }
 0x297   : > { %3103 = vmatmul.mubr.msk.f32.gmra.mrb[6].mxu1 %vm1352_vm9, %v1926_v43  ;;  %3169 = vmatmul.mubr.msk.f32.gmra.mrb[26].mxu0 %vm1352_vm9, %v2452_v48 }
 0x298   : > { %3105 = vmatprep.mubr.msk.f32.mxu1 %vm1352_vm9, %v1927_v19  ;;  %3171 = vmatprep.mubr.msk.f32.mxu0 %vm1352_vm9, %v2453_v60 }
 0x29b   : > { %3106 = vmatmul.mubr.msk.f32.gmra.mrb[8].mxu1 %vm1352_vm9, %v1928_v57  ;;  %3172 = vmatmul.mubr.msk.f32.gmra.mrb[28].mxu0 %vm1352_vm9, %v2454_v32 }
 0x29c   : > { %3108 = vmatprep.mubr.msk.f32.mxu1 %vm1352_vm9, %v1929_v29  ;;  %3174 = vmatprep.mubr.msk.f32.mxu0 %vm1352_vm9, %v2455_v17 }
 0x29f   : > { %3109 = vmatmul.mubr.msk.f32.gmra.mrb[10].mxu1 %vm1352_vm9, %v1930_v15  ;;  %3175 = vmatmul.mubr.msk.f32.gmra.mrb[30].mxu0 %vm1352_vm9, %v2456_v28 }
 0x2a0   : > { %3127 = vmatprep.mubr.msk.f32.mxu1 %vm540_vm0, %v2204_v47  ;;  %3177 = vmatprep.mubr.msk.f32.mxu0 %vm1352_vm9, %v2457_v44 }
 0x2a3   : > { %3128 = vmatmul.mubr.msk.f32.vlgmr.msra.gmra.mrb[12].mxu1 %vm540_vm0, %v2205_v61  ;;  %3178 = vmatmul.mubr.msk.f32.gmra.mrb[32].mxu0 %vm1352_vm9, %v2458_v39 }
 0x2a4   : > { %3130 = vmatprep.mubr.msk.f32.mxu1 %vm540_vm0, %v2206_v50  ;;  %3180 = vmatprep.mubr.msk.f32.mxu0 %vm1352_vm9, %v2459_v22 }
 0x2a7   : > { %3131 = vmatmul.mubr.msk.f32.gmra.mrb[14].mxu1 %vm540_vm0, %v2207_v37  ;;  %3181 = vmatmul.mubr.msk.f32.gmra.mrb[34].mxu0 %vm1352_vm9, %v2460_v3 }
 0x2a8   : > { %3133 = vmatprep.mubr.msk.f32.mxu1 %vm540_vm0, %v2208_v14 }
 0x2ab   : > { %3134 = vmatmul.mubr.msk.f32.gmra.mrb[0].mxu1 %vm540_vm0, %v2209_v45 }
 0x2ac   : > { %3136 = vmatprep.mubr.msk.f32.mxu1 %vm540_vm0, %v2210_v53 }
 0x2af   : > { %3137 = vmatmul.mubr.msk.f32.gmra.mrb[2].mxu1 %vm540_vm0, %v2211_v24 }
 0x2b0   : > { %3139 = vmatprep.mubr.msk.f32.mxu1 %vm540_vm0, %v2212_v20 }
 0x2b3   : > { %3140 = vmatmul.mubr.msk.f32.gmra.mrb[4].mxu1 %vm540_vm0, %v2213_v12 }
 0x2b4   : > { %3142 = vmatprep.mubr.msk.f32.mxu1 %vm540_vm0, %v2214_v41 }
 0x2b7   : > { %3143 = vmatmul.mubr.msk.f32.gmra.mrb[6].mxu1 %vm540_vm0, %v2215_v36 }
 0x2b8   : > { %3145 = vmatprep.mubr.msk.f32.mxu1 %vm540_vm0, %v2216_v21 }
 0x2bb   : > { %3146 = vmatmul.mubr.msk.f32.gmra.mrb[8].mxu1 %vm540_vm0, %v2217_v6 }
 0x2bc   : > { %3148 = vmatprep.mubr.msk.f32.mxu1 %vm540_vm0, %v2218_v10 }
 0x2bf   : > { %3149 = vmatmul.mubr.msk.f32.gmra.mrb[10].mxu1 %vm540_vm0, %v2219_v13 }
 0x33d   : > { %v4849_v26 = vpop.f32.mrb[8].mxu0 }
 0x33e   : > { %v4851_v42 = vpop.f32.mrb[9].mxu0 }
 0x341   : > { %v4853_v0 = vpop.f32.mrb[10].mxu0 }
 0x342   : > { %v4855_v35 = vpop.f32.mrb[11].mxu0 }
 0x345   : > { %v4857_v1 = vpop.f32.mrb[12].mxu0 }
 0x346   : > { %v4859_v33 = vpop.f32.mrb[13].mxu0 }
 0x349   : > { %v4861_v52 = vpop.f32.mrb[14].mxu0 }
 0x34a   : > { %v4863_v5 = vpop.f32.mrb[15].mxu0 }
 0x34d   : > { %v4865_v23 = vpop.f32.mrb[16].mxu0 }
 0x34e   : > { %v4867_v46 = vpop.f32.mrb[17].mxu0 }
 0x351   : > { %v4869_v16 = vpop.f32.mrb[18].mxu0 }
 0x352   : > { %v4871_v30 = vpop.f32.mrb[19].mxu0 }
 0x355   : > { %v3057_v8 = vpop.f32.mrb[4].mxu0 }
 0x356   : > { %v1660_v54 = vpop.f32.mrb[5].mxu0 }
 0x359   : > { %v3060_v25 = vpop.f32.mrb[6].mxu0 }
 0x35a   : > { %v1670_v62 = vpop.f32.mrb[7].mxu0 }
 0x35e   : > { %v3161_v56 = vpop.f32.mrb[20].mxu0 }
 0x35f   : > { %2659 = vst [vmem:[%s4877_s16 + $0x8] sm:$0xff] %v3161_v56  ;;  %v2579_v40 = vpop.f32.mrb[21].mxu0 }
 0x360   : > { %2658 = vst [vmem:[%s4877_s16] sm:$0xff] %v2579_v40 }
 0x362   : > { %v3164_v31 = vpop.f32.mrb[22].mxu0 }
 0x363   : > { %2661 = vst [vmem:[%s4877_s16 + $0x18] sm:$0xff] %v3164_v31  ;;  %v2589_v2 = vpop.f32.mrb[23].mxu0 }
 0x364   : > { %2660 = vst [vmem:[%s4877_s16 + $0x10] sm:$0xff] %v2589_v2 }
 0x366   : > { %v3167_v7 = vpop.f32.mrb[24].mxu0 }
 0x367   : > { %2663 = vst [vmem:[%s4877_s16 + $0x28] sm:$0xff] %v3167_v7  ;;  %v2599_v38 = vpop.f32.mrb[25].mxu0 }
 0x368   : > { %2662 = vst [vmem:[%s4877_s16 + $0x20] sm:$0xff] %v2599_v38 }
 0x36a   : > { %v3170_v51 = vpop.f32.mrb[26].mxu0 }
 0x36b   : > { %2665 = vst [vmem:[%s4877_s16 + $0x38] sm:$0xff] %v3170_v51  ;;  %v2609_v58 = vpop.f32.mrb[27].mxu0 }
 0x36c   : > { %2664 = vst [vmem:[%s4877_s16 + $0x30] sm:$0xff] %v2609_v58 }
 0x36e   : > { %v3173_v9 = vpop.f32.mrb[28].mxu0 }
 0x36f   : > { %2667 = vst [vmem:[%s4877_s16 + $0x48] sm:$0xff] %v3173_v9  ;;  %v2619_v49 = vpop.f32.mrb[29].mxu0 }
 0x370   : > { %2666 = vst [vmem:[%s4877_s16 + $0x40] sm:$0xff] %v2619_v49 }
 0x372   : > { %v3176_v11 = vpop.f32.mrb[30].mxu0 }
 0x373   : > { %2669 = vst [vmem:[%s4877_s16 + $0x58] sm:$0xff] %v3176_v11  ;;  %v2629_v55 = vpop.f32.mrb[31].mxu0 }
 0x374   : > { %2668 = vst [vmem:[%s4877_s16 + $0x50] sm:$0xff] %v2629_v55 }
 0x376   : > { %v3129_v34 = vpop.f32.mrb[12].mxu1  ;;  %v3179_v27 = vpop.f32.mrb[32].mxu0 }
 0x377   : > { %v3251_v18 = vadd.f32 %v3129_v34, %v3057_v8  ;;  %v2334_v59 = vpop.f32.mrb[13].mxu1  ;;  %2671 = vst [vmem:[%s4877_s16 + $0x68] sm:$0xff] %v3179_v27  ;;  %v2639_v4 = vpop.f32.mrb[33].mxu0 }
 0x378   : > { %v3252_v63 = vadd.f32 %v2334_v59, %v1660_v54  ;;  %2670 = vst [vmem:[%s4877_s16 + $0x60] sm:$0xff] %v2639_v4 }
 0x379   : > { %2430 = vst [vmem:[%s4894_s29 + $0x8] sm:$0xff] %v3251_v18 }
 0x37a   : > { %2429 = vst [vmem:[%s4894_s29] sm:$0xff] %v3252_v63  ;;  %v3132_v43 = vpop.f32.mrb[14].mxu1  ;;  %v3182_v48 = vpop.f32.mrb[34].mxu0 }
 0x37b   : > { %v3253_v19 = vadd.f32 %v3132_v43, %v3060_v25  ;;  %v2344_v60 = vpop.f32.mrb[15].mxu1  ;;  %2673 = vst [vmem:[%s4877_s16 + $0x78] sm:$0xff] %v3182_v48  ;;  %v2649_v57 = vpop.f32.mrb[35].mxu0 }
 0x37c   : > { %v3254_v32 = vadd.f32 %v2344_v60, %v1670_v62  ;;  %2672 = vst [vmem:[%s4877_s16 + $0x70] sm:$0xff] %v2649_v57 }
 0x37d   : > { %2432 = vst [vmem:[%s4894_s29 + $0x18] sm:$0xff] %v3253_v19 }
 0x37e   : > { %2431 = vst [vmem:[%s4894_s29 + $0x10] sm:$0xff] %v3254_v32  ;;  %v3135_v29 = vpop.f32.mrb[0].mxu1 }
 0x37f   : > { %v3255_v17 = vadd.f32 %v3135_v29, %v4849_v26  ;;  %v2354_v15 = vpop.f32.mrb[1].mxu1 }
 0x380   : > { %v3256_v28 = vadd.f32 %v2354_v15, %v4851_v42 }
 0x381   : > { %2434 = vst [vmem:[%s4894_s29 + $0x28] sm:$0xff] %v3255_v17 }
 0x382   : > { %2433 = vst [vmem:[%s4894_s29 + $0x20] sm:$0xff] %v3256_v28  ;;  %v3138_v47 = vpop.f32.mrb[2].mxu1 }
 0x383   : > { %v3257_v44 = vadd.f32 %v3138_v47, %v4853_v0  ;;  %v2364_v61 = vpop.f32.mrb[3].mxu1 }
 0x384   : > { %v3258_v39 = vadd.f32 %v2364_v61, %v4855_v35 }
 0x385   : > { %2436 = vst [vmem:[%s4894_s29 + $0x38] sm:$0xff] %v3257_v44 }
 0x386   : > { %2435 = vst [vmem:[%s4894_s29 + $0x30] sm:$0xff] %v3258_v39  ;;  %v3141_v50 = vpop.f32.mrb[4].mxu1 }
 0x387   : > { %v3259_v22 = vadd.f32 %v3141_v50, %v4857_v1  ;;  %v2374_v37 = vpop.f32.mrb[5].mxu1 }
 0x388   : > { %v3260_v3 = vadd.f32 %v2374_v37, %v4859_v33 }
 0x389   : > { %2438 = vst [vmem:[%s4894_s29 + $0x48] sm:$0xff] %v3259_v22 }
 0x38a   : > { %2437 = vst [vmem:[%s4894_s29 + $0x40] sm:$0xff] %v3260_v3  ;;  %v3144_v14 = vpop.f32.mrb[6].mxu1 }
 0x38b   : > { %v3261_v45 = vadd.f32 %v3144_v14, %v4861_v52  ;;  %v2384_v53 = vpop.f32.mrb[7].mxu1 }
 0x38c   : > { %v3262_v24 = vadd.f32 %v2384_v53, %v4863_v5 }
 0x38d   : > { %2440 = vst [vmem:[%s4894_s29 + $0x58] sm:$0xff] %v3261_v45 }
 0x38e   : > { %2439 = vst [vmem:[%s4894_s29 + $0x50] sm:$0xff] %v3262_v24  ;;  %v3147_v20 = vpop.f32.mrb[8].mxu1 }
 0x38f   : > { %v3263_v12 = vadd.f32 %v3147_v20, %v4865_v23  ;;  %v2394_v41 = vpop.f32.mrb[9].mxu1 }
 0x390   : > { %v3264_v36 = vadd.f32 %v2394_v41, %v4867_v46 }
 0x391   : > { %2442 = vst [vmem:[%s4894_s29 + $0x68] sm:$0xff] %v3263_v12 }
 0x392   : > { %2441 = vst [vmem:[%s4894_s29 + $0x60] sm:$0xff] %v3264_v36  ;;  %v3150_v21 = vpop.f32.mrb[10].mxu1 }
 0x393   : > { %v3265_v6 = vadd.f32 %v3150_v21, %v4869_v16  ;;  %v2404_v10 = vpop.f32.mrb[11].mxu1 }
 0x394   : > { %v3266_v13 = vadd.f32 %v2404_v10, %v4871_v30 }
 0x395   : > { %2444 = vst [vmem:[%s4894_s29 + $0x78] sm:$0xff] %v3265_v6 }
 0x396   : > { %2443 = vst [vmem:[%s4894_s29 + $0x70] sm:$0xff] %v3266_v13 }
 0x397 PF: > { %s26_s18 = sadd.s32 1, %s3437_s18  }
 0x398   : > { %p23_p4 = scmp.ge.s32.totalorder %s26_s18, 4  }
 0x39a   :  { %25 = sbr.rel (!%p23_p4) target bundleno = 1 (0x1), region = 121 }

</bundles_post_ra>
